<compile_context>
chip_gen: v7x
topology: tpu7x:2x2x1
jax: 0.10.0
libtpu: 0.0.40
codegen_flags: <defaults>
</compile_context>

<pallas_src>
import jax
import jax.numpy as jnp
import numpy as np
from jax.experimental import pallas as pl
from jax.experimental.pallas import tpu as pltpu

FEATURE_MAPS = 14
KERNEL_SIZE = 6
IN_CH = 1                 # Discriminator input channels (= Generator out_channels)
STRIDE_DEF = 2
LRELU_SLOPE = 0.2
BN_EPS = 1e-5

# Example spatial size (32x32 single-channel images).
H0 = W0 = 32
OH1 = H0 - KERNEL_SIZE + 1                      # 27
OH2 = (OH1 - KERNEL_SIZE) // STRIDE_DEF + 1     # 11
OH3 = (OH2 - KERNEL_SIZE) // STRIDE_DEF + 1     # 3
OW1, OW2, OW3 = OH1, OH2, OH3

C_PAD = 16            # feature_maps 14 -> 16 (one channel group per 16 lanes)
P1W, P2W, P3W = 32, 16, 8      # padded conv output widths (>= 27 / 11 / 3)
N1 = P1W * C_PAD      # 512: conv1 GEMM N  == a1 lane width
N2 = P2W * C_PAD      # 256: conv2 GEMM N  == a2 lane width
N3 = P3W * C_PAD      # 128: conv3 GEMM N  == lane-dense HBM store
XW = 40               # padded input width  (>= 31 + 6)
XROWS = 16            # rows per mod-4 input group (10 real, padded)
A1ROWS = 16           # rows per mod-4 a1 group (8 written, row 8 is zero margin)
A2ROWS = 16           # rows per parity a2 group (8 written, rows 8-9 zero margin)
Q1 = Q2 = Q3 = 8      # output rows produced per row group / per batch element


def _leaky(v):
    return jnp.where(v > 0, v, LRELU_SLOPE * v)


# ------------------------------ fused kernel -------------------------------

def _discriminator_kernel(x_ref, w1_ref, b1_ref, w2_ref, b2_ref, gam_ref, bt_ref,
                          w3_ref, b3_ref, abn_ref, o_ref, a1_ref, a2_ref):
    B = x_ref.shape[1]
    f32 = jnp.float32

    # Margin-only zeroing (review #3): only pad rows that a shifted row window of
    # a later layer can read are cleared; they feed discarded outputs only.
    a1_ref[:, :, Q1:A1ROWS, :] = jnp.zeros((4, B, A1ROWS - Q1, N1), f32)
    a2_ref[:, :, Q2:A2ROWS, :] = jnp.zeros((2, B, A2ROWS - Q2, N2), f32)

    # ---------------- conv1 (stride 1) + LeakyReLU ----------------
    # Rows are produced in mod-4 order (g, b, q) with oh1 = 4q + g so the two
    # stride-2 layers downstream slice their row windows with unit stride.
    # Width taps + channels live in the banded weights -> one GEMM per row tap.
    for g in range(4):
        acc = None
        for i in range(KERNEL_SIZE):
            t = g + i
            lhs = x_ref[t & 3, :, (t >> 2):(t >> 2) + Q1, :].reshape(B * Q1, XW)
            part = jnp.dot(lhs, w1_ref[i], preferred_element_type=f32)
            acc = part if acc is None else acc + part
        y = _leaky(acc + b1_ref[...])                         # (B*Q1, 512) lane-dense
        a1_ref[g, :, 0:Q1, :] = y.reshape(B, Q1, N1)

    # ------- conv2 (stride 2) + BatchNorm(batch stats) + LeakyReLU -------
    # TODO(synk): the PyTorch module declares BatchNorm2d(feature_maps*2)=28 on a
    # 14-channel tensor (would raise at runtime); we use the first 14 affine
    # params with training-mode (biased) batch statistics.
    accs = []
    for p in range(2):                                        # output row parity
        acc = None
        for i in range(KERNEL_SIZE):
            t = 2 * p + i
            lhs = a1_ref[t & 3, :, (t >> 2):(t >> 2) + Q2, :].reshape(B * Q2, N1)
            part = jnp.dot(lhs, w2_ref[i], preferred_element_type=f32)
            acc = part if acc is None else acc + part
        accs.append((acc + b2_ref[...]).reshape(B, Q2, N2))
    acc_e, acc_o = accs                                       # oh2 = 2q / 2q+1

    # Row validity from a plain iota compare; the valid-ow selection and the
    # per-channel reduce + broadcast are folded into the constant matrix `abn`
    # (review #7: no per-element div/mod).
    q_idx = jax.lax.broadcasted_iota(jnp.int32, (B, Q2, N2), 1)
    mask_e = q_idx < (OH2 + 1) // 2                           # even rows: 2q   < 11
    mask_o = q_idx < OH2 // 2                                 # odd  rows: 2q+1 < 11
    tot = jnp.where(mask_e, acc_e, 0.0) + jnp.where(mask_o, acc_o, 0.0)
    s_col = tot.sum(axis=0).sum(axis=0, keepdims=True)        # (1, 256)
    mean = jnp.dot(jnp.broadcast_to(s_col, (Q2, N2)), abn_ref[...],
                   preferred_element_type=f32)                # per-channel mean, bcast
    d_e = jnp.where(mask_e, acc_e - mean, 0.0)
    d_o = jnp.where(mask_o, acc_o - mean, 0.0)
    sq_col = (d_e * d_e + d_o * d_o).sum(axis=0).sum(axis=0, keepdims=True)
    var = jnp.dot(jnp.broadcast_to(sq_col, (Q2, N2)), abn_ref[...],
                  preferred_element_type=f32)
    inv = jax.lax.rsqrt(var + BN_EPS)
    y_e = _leaky((acc_e - mean) * inv * gam_ref[...] + bt_ref[...])
    y_o = _leaky((acc_o - mean) * inv * gam_ref[...] + bt_ref[...])
    a2_ref[0, :, 0:Q2, :] = y_e                               # row-parity storage
    a2_ref[1, :, 0:Q2, :] = y_o

    # ---------------- conv3 (stride 2) + Sigmoid ----------------
    acc = None
    for i in range(KERNEL_SIZE):
        lhs = a2_ref[i & 1, :, (i // 2):(i // 2) + Q3, :].reshape(B * Q3, N2)
        part = jnp.dot(lhs, w3_ref[i], preferred_element_type=f32)
        acc = part if acc is None else acc + part
    o_ref[...] = jax.nn.sigmoid(acc + b3_ref[...])            # (B*Q3, 128) lane-dense


# ------------------------------ glue (JAX) ---------------------------------

def _pack_banded_w1(w1):
    """(14,1,6,6) -> (6, XW, P1W*C_PAD): per row tap, a banded matrix folding the
    6 width taps over the padded input width into K and (ow, c_out) into N."""
    sel = np.zeros((KERNEL_SIZE, XW, P1W), np.float32)
    for j in range(KERNEL_SIZE):
        for ow in range(P1W):
            sel[j, ow + j, ow] = 1.0
    wb = jnp.einsum("jwp,oij->iwpo", jnp.asarray(sel), w1[:, 0])
    wb = jnp.pad(wb, ((0, 0), (0, 0), (0, 0), (0, C_PAD - FEATURE_MAPS)))
    return wb.reshape(KERNEL_SIZE, XW, N1)


def _pack_banded_w(w, in_w, out_w, stride):
    """(Co,Ci,6,6) -> (6, in_w*C_PAD, out_w*C_PAD) banded matrices (stride folded
    into the band), K = (in_width, c_in), N = (out_width, c_out)."""
    sel = np.zeros((KERNEL_SIZE, in_w, out_w), np.float32)
    for j in range(KERNEL_SIZE):
        for ow in range(out_w):
            src = stride * ow + j
            if src < in_w:
                sel[j, src, ow] = 1.0
    wp = jnp.pad(w, ((0, C_PAD - w.shape[0]), (0, C_PAD - w.shape[1]),
                     (0, 0), (0, 0)))
    wb = jnp.einsum("jwp,ocij->iwcpo", jnp.asarray(sel), wp)
    return wb.reshape(KERNEL_SIZE, in_w * C_PAD, out_w * C_PAD)


def _col_vec(v, reps):
    """Per-channel vector -> (1, reps*C_PAD) lane vector tiled over out-width."""
    return jnp.tile(jnp.pad(v, (0, C_PAD - v.shape[0])), reps).reshape(1, reps * C_PAD)


def _bn_combine_matrix(count):
    """(N2, N2) constant: masked (ow < OW2) per-channel mean-reduce + broadcast."""
    a = np.zeros((P2W, C_PAD, P2W, C_PAD), np.float32)
    for ow in range(OW2):
        for c in range(C_PAD):
            a[ow, c, :, c] = 1.0 / count
    return jnp.asarray(a.reshape(N2, N2))


@jax.jit
def discriminator_forward(x, params):
    B, C, H, W = x.shape
    assert C == IN_CH and H == H0 and W == W0, "kernel is sized for 1x32x32 inputs"

    # Boundary layout work only: zero-pad the single-channel image to 40x40 and
    # split its rows by residue mod 4 (review #4: unit-stride row windows).
    xp = jnp.pad(x[:, 0], ((0, 0), (0, XW - H), (0, XW - W)))        # (B, 40, 40)
    x_m4 = xp.reshape(B, XW // 4, 4, XW).transpose(2, 0, 1, 3)       # (4, B, 10, 40)
    x_m4 = jnp.pad(x_m4, ((0, 0), (0, 0), (0, XROWS - XW // 4), (0, 0)))

    w1 = _pack_banded_w1(params["w1"])
    w2 = _pack_banded_w(params["w2"], P1W, P2W, STRIDE_DEF)
    w3 = _pack_banded_w(params["w3"], P2W, P3W, STRIDE_DEF)
    b1 = _col_vec(params["b1"], P1W)
    b2 = _col_vec(params["b2"], P2W)
    gam = _col_vec(params["gamma"], P2W)
    bet = _col_vec(params["beta"], P2W)
    b3 = _col_vec(params["b3"], P3W)
    abn = _bn_combine_matrix(B * OH2 * OW2)

    out = pl.pallas_call(
        _discriminator_kernel,
        out_shape=jax.ShapeDtypeStruct((B * Q3, N3), jnp.float32),
        in_specs=[
            pl.BlockSpec(x_m4.shape, lambda: (0, 0, 0, 0)),
            pl.BlockSpec(w1.shape, lambda: (0, 0, 0)),
            pl.BlockSpec(b1.shape, lambda: (0, 0)),
            pl.BlockSpec(w2.shape, lambda: (0, 0, 0)),
            pl.BlockSpec(b2.shape, lambda: (0, 0)),
            pl.BlockSpec(gam.shape, lambda: (0, 0)),
            pl.BlockSpec(bet.shape, lambda: (0, 0)),
            pl.BlockSpec(w3.shape, lambda: (0, 0, 0)),
            pl.BlockSpec(b3.shape, lambda: (0, 0)),
            pl.BlockSpec(abn.shape, lambda: (0, 0)),
        ],
        out_specs=pl.BlockSpec((B * Q3, N3), lambda: (0, 0)),
        scratch_shapes=[
            pltpu.VMEM((4, B, A1ROWS, N1), jnp.float32),   # a1, mod-4 row groups
            pltpu.VMEM((2, B, A2ROWS, N2), jnp.float32),   # a2, row-parity groups
        ],
        compiler_params=pltpu.CompilerParams(vmem_limit_bytes=32 * 1024 * 1024),
    )(x_m4, w1, b1, w2, b2, gam, bet, w3, b3, abn)

    # Module-boundary layout only: (B*8, 8*16) -> NCHW (B, 14, 3, 3).
    y = out.reshape(B, Q3, P3W, C_PAD)[:, :OH3, :OW3, :FEATURE_MAPS]
    return jnp.transpose(y, (0, 3, 1, 2))


# --------------------------- pure-JAX reference -----------------------------

def _ref_forward(x, p):
    def conv(x, w, b, s):
        y = jax.lax.conv_general_dilated(
            x, w, (s, s), "VALID", dimension_numbers=("NCHW", "OIHW", "NCHW"))
        return y + b.reshape(1, -1, 1, 1)

    def lrelu(v):
        return jnp.where(v > 0, v, LRELU_SLOPE * v)

    y = lrelu(conv(x, p["w1"], p["b1"], 1))
    y = conv(y, p["w2"], p["b2"], STRIDE_DEF)
    mean = jnp.mean(y, axis=(0, 2, 3), keepdims=True)
    var = jnp.mean((y - mean) ** 2, axis=(0, 2, 3), keepdims=True)
    y = (y - mean) * jax.lax.rsqrt(var + BN_EPS) * p["gamma"].reshape(1, -1, 1, 1) \
        + p["beta"].reshape(1, -1, 1, 1)
    y = lrelu(y)
    y = conv(y, p["w3"], p["b3"], STRIDE_DEF)
    return jax.nn.sigmoid(y)


# --------------------------------- main -------------------------------------

if __name__ == "__main__":
    key = jax.random.PRNGKey(0)
    kx, k1, k2, k3, k4, k5, k6, k7, k8 = jax.random.split(key, 9)

    B = 2
    x = jax.random.uniform(kx, (B, IN_CH, H0, W0), dtype=jnp.float32)

    def u(k, shape, lo=-0.1, hi=0.1):
        return jax.random.uniform(k, shape, jnp.float32, lo, hi)

    params = {
        "w1": u(k1, (FEATURE_MAPS, IN_CH, KERNEL_SIZE, KERNEL_SIZE)),
        "b1": u(k2, (FEATURE_MAPS,)),
        "w2": u(k3, (FEATURE_MAPS, FEATURE_MAPS, KERNEL_SIZE, KERNEL_SIZE)),
        "b2": u(k4, (FEATURE_MAPS,)),
        "w3": u(k5, (FEATURE_MAPS, FEATURE_MAPS, KERNEL_SIZE, KERNEL_SIZE)),
        "b3": u(k6, (FEATURE_MAPS,)),
        # BatchNorm2d(28) affine params; only the first 14 channels are usable:
        "gamma": jax.random.uniform(k7, (FEATURE_MAPS * 2,), jnp.float32, 0.5, 1.5)[:FEATURE_MAPS],
        "beta": u(k8, (FEATURE_MAPS * 2,))[:FEATURE_MAPS],
    }

    out = jax.block_until_ready(discriminator_forward(x, params))
    ref = jax.block_until_ready(_ref_forward(x, params))

    assert out.shape == ref.shape, (out.shape, ref.shape)
    np.testing.assert_allclose(np.asarray(out), np.asarray(ref), rtol=1e-4, atol=1e-4)

    print("KERNEL_OK")
</pallas_src>

<mosaic_0001>
module attributes {stable_mosaic.version = 11 : i64} {
  func.func @_discriminator_kernel(%arg0: memref<4x2x16x40xf32, #tpu.memory_space<vmem>>, %arg1: memref<6x40x512xf32, #tpu.memory_space<vmem>>, %arg2: memref<1x512xf32, #tpu.memory_space<vmem>>, %arg3: memref<6x512x256xf32, #tpu.memory_space<vmem>>, %arg4: memref<1x256xf32, #tpu.memory_space<vmem>>, %arg5: memref<1x256xf32, #tpu.memory_space<vmem>>, %arg6: memref<1x256xf32, #tpu.memory_space<vmem>>, %arg7: memref<6x256x128xf32, #tpu.memory_space<vmem>>, %arg8: memref<1x128xf32, #tpu.memory_space<vmem>>, %arg9: memref<256x256xf32, #tpu.memory_space<vmem>>, %arg10: memref<16x128xf32, #tpu.memory_space<vmem>>, %arg11: memref<4x2x16x512xf32, #tpu.memory_space<vmem>>, %arg12: memref<2x2x16x256xf32, #tpu.memory_space<vmem>>) attributes {dimension_semantics = [], scalar_prefetch = 0 : i64, scratch_operands = 2 : i64, tpu.core_type = #tpu.core_type<tc>} {
    %cst = arith.constant 0.000000e+00 : f32
    %0 = vector.broadcast %cst : f32 to vector<4x2x8x512xf32>
    %c0 = arith.constant 0 : index
    %c0_0 = arith.constant 0 : index
    %c8 = arith.constant 8 : index
    %c0_1 = arith.constant 0 : index
    %1 = vector.load %arg11[%c0, %c0_0, %c8, %c0_1] : memref<4x2x16x512xf32, #tpu.memory_space<vmem>>, vector<4x2x8x512xf32>
    tpu.vector_store %arg11[%c0, %c0_0, %c8, %c0_1], %0 {strides = array<i32>} : memref<4x2x16x512xf32, #tpu.memory_space<vmem>>, vector<4x2x8x512xf32>,
    %cst_2 = arith.constant 0.000000e+00 : f32
    %2 = vector.broadcast %cst_2 : f32 to vector<2x2x8x256xf32>
    %c0_3 = arith.constant 0 : index
    %c0_4 = arith.constant 0 : index
    %c8_5 = arith.constant 8 : index
    %c0_6 = arith.constant 0 : index
    %3 = vector.load %arg12[%c0_3, %c0_4, %c8_5, %c0_6] : memref<2x2x16x256xf32, #tpu.memory_space<vmem>>, vector<2x2x8x256xf32>
    tpu.vector_store %arg12[%c0_3, %c0_4, %c8_5, %c0_6], %2 {strides = array<i32>} : memref<2x2x16x256xf32, #tpu.memory_space<vmem>>, vector<2x2x8x256xf32>,
    %c0_7 = arith.constant 0 : index
    %c0_8 = arith.constant 0 : index
    %c0_9 = arith.constant 0 : index
    %c0_10 = arith.constant 0 : index
    %4 = vector.load %arg0[%c0_7, %c0_8, %c0_9, %c0_10] : memref<4x2x16x40xf32, #tpu.memory_space<vmem>>, vector<1x2x8x40xf32>
    %5 = vector.shape_cast %4 : vector<1x2x8x40xf32> to vector<2x8x40xf32>
    %6 = vector.shape_cast %5 : vector<2x8x40xf32> to vector<16x40xf32>
    %c0_11 = arith.constant 0 : index
    %c0_12 = arith.constant 0 : index
    %c0_13 = arith.constant 0 : index
    %7 = vector.load %arg1[%c0_11, %c0_12, %c0_13] : memref<6x40x512xf32, #tpu.memory_space<vmem>>, vector<1x40x512xf32>
    %8 = vector.shape_cast %7 : vector<1x40x512xf32> to vector<40x512xf32>
    %cst_14 = arith.constant dense<0.000000e+00> : vector<16x512xf32>
    %9 = tpu.matmul %6, %8, %cst_14 {dimension_numbers = #tpu.dot_dimension_numbers<[1], [0], [0], [1], [0, 0, 1, 1], [], []>} : vector<16x40xf32>, vector<40x512xf32>, vector<16x512xf32> -> vector<16x512xf32>
    %c1 = arith.constant 1 : index
    %c0_15 = arith.constant 0 : index
    %c0_16 = arith.constant 0 : index
    %c0_17 = arith.constant 0 : index
    %10 = vector.load %arg0[%c1, %c0_15, %c0_16, %c0_17] : memref<4x2x16x40xf32, #tpu.memory_space<vmem>>, vector<1x2x8x40xf32>
    %11 = vector.shape_cast %10 : vector<1x2x8x40xf32> to vector<2x8x40xf32>
    %12 = vector.shape_cast %11 : vector<2x8x40xf32> to vector<16x40xf32>
    %c1_18 = arith.constant 1 : index
    %c0_19 = arith.constant 0 : index
    %c0_20 = arith.constant 0 : index
    %13 = vector.load %arg1[%c1_18, %c0_19, %c0_20] : memref<6x40x512xf32, #tpu.memory_space<vmem>>, vector<1x40x512xf32>
    %14 = vector.shape_cast %13 : vector<1x40x512xf32> to vector<40x512xf32>
    %cst_21 = arith.constant dense<0.000000e+00> : vector<16x512xf32>
    %15 = tpu.matmul %12, %14, %cst_21 {dimension_numbers = #tpu.dot_dimension_numbers<[1], [0], [0], [1], [0, 0, 1, 1], [], []>} : vector<16x40xf32>, vector<40x512xf32>, vector<16x512xf32> -> vector<16x512xf32>
    %16 = arith.addf %9, %15 : vector<16x512xf32>
    %c2 = arith.constant 2 : index
    %c0_22 = arith.constant 0 : index
    %c0_23 = arith.constant 0 : index
    %c0_24 = arith.constant 0 : index
    %17 = vector.load %arg0[%c2, %c0_22, %c0_23, %c0_24] : memref<4x2x16x40xf32, #tpu.memory_space<vmem>>, vector<1x2x8x40xf32>
    %18 = vector.shape_cast %17 : vector<1x2x8x40xf32> to vector<2x8x40xf32>
    %19 = vector.shape_cast %18 : vector<2x8x40xf32> to vector<16x40xf32>
    %c2_25 = arith.constant 2 : index
    %c0_26 = arith.constant 0 : index
    %c0_27 = arith.constant 0 : index
    %20 = vector.load %arg1[%c2_25, %c0_26, %c0_27] : memref<6x40x512xf32, #tpu.memory_space<vmem>>, vector<1x40x512xf32>
    %21 = vector.shape_cast %20 : vector<1x40x512xf32> to vector<40x512xf32>
    %cst_28 = arith.constant dense<0.000000e+00> : vector<16x512xf32>
    %22 = tpu.matmul %19, %21, %cst_28 {dimension_numbers = #tpu.dot_dimension_numbers<[1], [0], [0], [1], [0, 0, 1, 1], [], []>} : vector<16x40xf32>, vector<40x512xf32>, vector<16x512xf32> -> vector<16x512xf32>
    %23 = arith.addf %16, %22 : vector<16x512xf32>
    %c3 = arith.constant 3 : index
    %c0_29 = arith.constant 0 : index
    %c0_30 = arith.constant 0 : index
    %c0_31 = arith.constant 0 : index
    %24 = vector.load %arg0[%c3, %c0_29, %c0_30, %c0_31] : memref<4x2x16x40xf32, #tpu.memory_space<vmem>>, vector<1x2x8x40xf32>
    %25 = vector.shape_cast %24 : vector<1x2x8x40xf32> to vector<2x8x40xf32>
    %26 = vector.shape_cast %25 : vector<2x8x40xf32> to vector<16x40xf32>
    %c3_32 = arith.constant 3 : index
    %c0_33 = arith.constant 0 : index
    %c0_34 = arith.constant 0 : index
    %27 = vector.load %arg1[%c3_32, %c0_33, %c0_34] : memref<6x40x512xf32, #tpu.memory_space<vmem>>, vector<1x40x512xf32>
    %28 = vector.shape_cast %27 : vector<1x40x512xf32> to vector<40x512xf32>
    %cst_35 = arith.constant dense<0.000000e+00> : vector<16x512xf32>
    %29 = tpu.matmul %26, %28, %cst_35 {dimension_numbers = #tpu.dot_dimension_numbers<[1], [0], [0], [1], [0, 0, 1, 1], [], []>} : vector<16x40xf32>, vector<40x512xf32>, vector<16x512xf32> -> vector<16x512xf32>
    %30 = arith.addf %23, %29 : vector<16x512xf32>
    %c0_36 = arith.constant 0 : index
    %c0_37 = arith.constant 0 : index
    %c1_38 = arith.constant 1 : index
    %c0_39 = arith.constant 0 : index
    %31 = vector.load %arg0[%c0_36, %c0_37, %c1_38, %c0_39] : memref<4x2x16x40xf32, #tpu.memory_space<vmem>>, vector<1x2x8x40xf32>
    %32 = vector.shape_cast %31 : vector<1x2x8x40xf32> to vector<2x8x40xf32>
    %33 = vector.shape_cast %32 : vector<2x8x40xf32> to vector<16x40xf32>
    %c4 = arith.constant 4 : index
    %c0_40 = arith.constant 0 : index
    %c0_41 = arith.constant 0 : index
    %34 = vector.load %arg1[%c4, %c0_40, %c0_41] : memref<6x40x512xf32, #tpu.memory_space<vmem>>, vector<1x40x512xf32>
    %35 = vector.shape_cast %34 : vector<1x40x512xf32> to vector<40x512xf32>
    %cst_42 = arith.constant dense<0.000000e+00> : vector<16x512xf32>
    %36 = tpu.matmul %33, %35, %cst_42 {dimension_numbers = #tpu.dot_dimension_numbers<[1], [0], [0], [1], [0, 0, 1, 1], [], []>} : vector<16x40xf32>, vector<40x512xf32>, vector<16x512xf32> -> vector<16x512xf32>
    %37 = arith.addf %30, %36 : vector<16x512xf32>
    %c1_43 = arith.constant 1 : index
    %c0_44 = arith.constant 0 : index
    %c1_45 = arith.constant 1 : index
    %c0_46 = arith.constant 0 : index
    %38 = vector.load %arg0[%c1_43, %c0_44, %c1_45, %c0_46] : memref<4x2x16x40xf32, #tpu.memory_space<vmem>>, vector<1x2x8x40xf32>
    %39 = vector.shape_cast %38 : vector<1x2x8x40xf32> to vector<2x8x40xf32>
    %40 = vector.shape_cast %39 : vector<2x8x40xf32> to vector<16x40xf32>
    %c5 = arith.constant 5 : index
    %c0_47 = arith.constant 0 : index
    %c0_48 = arith.constant 0 : index
    %41 = vector.load %arg1[%c5, %c0_47, %c0_48] : memref<6x40x512xf32, #tpu.memory_space<vmem>>, vector<1x40x512xf32>
    %42 = vector.shape_cast %41 : vector<1x40x512xf32> to vector<40x512xf32>
    %cst_49 = arith.constant dense<0.000000e+00> : vector<16x512xf32>
    %43 = tpu.matmul %40, %42, %cst_49 {dimension_numbers = #tpu.dot_dimension_numbers<[1], [0], [0], [1], [0, 0, 1, 1], [], []>} : vector<16x40xf32>, vector<40x512xf32>, vector<16x512xf32> -> vector<16x512xf32>
    %44 = arith.addf %37, %43 : vector<16x512xf32>
    %c0_50 = arith.constant 0 : index
    %c0_51 = arith.constant 0 : index
    %45 = vector.load %arg2[%c0_50, %c0_51] : memref<1x512xf32, #tpu.memory_space<vmem>>, vector<1x512xf32>
    %46 = vector.broadcast %45 : vector<1x512xf32> to vector<16x512xf32>
    %47 = arith.addf %44, %46 : vector<16x512xf32>
    %cst_52 = arith.constant 0.000000e+00 : f32
    %48 = vector.broadcast %cst_52 : f32 to vector<16x512xf32>
    %49 = arith.cmpf ogt, %47, %48 : vector<16x512xf32>
    %cst_53 = arith.constant 2.000000e-01 : f32
    %50 = vector.broadcast %cst_53 : f32 to vector<16x512xf32>
    %51 = arith.mulf %50, %47 : vector<16x512xf32>
    %52 = arith.select %49, %47, %51 : vector<16x512xi1>, vector<16x512xf32>
    %53 = vector.shape_cast %52 : vector<16x512xf32> to vector<2x8x512xf32>
    %c0_54 = arith.constant 0 : index
    %c0_55 = arith.constant 0 : index
    %c0_56 = arith.constant 0 : index
    %c0_57 = arith.constant 0 : index
    %54 = vector.load %arg11[%c0_54, %c0_55, %c0_56, %c0_57] : memref<4x2x16x512xf32, #tpu.memory_space<vmem>>, vector<1x2x8x512xf32>
    %55 = vector.shape_cast %54 : vector<1x2x8x512xf32> to vector<2x8x512xf32>
    %56 = vector.shape_cast %53 : vector<2x8x512xf32> to vector<1x2x8x512xf32>
    tpu.vector_store %arg11[%c0_54, %c0_55, %c0_56, %c0_57], %56 {strides = array<i32>} : memref<4x2x16x512xf32, #tpu.memory_space<vmem>>, vector<1x2x8x512xf32>,
    %c1_58 = arith.constant 1 : index
    %c0_59 = arith.constant 0 : index
    %c0_60 = arith.constant 0 : index
    %c0_61 = arith.constant 0 : index
    %57 = vector.load %arg0[%c1_58, %c0_59, %c0_60, %c0_61] : memref<4x2x16x40xf32, #tpu.memory_space<vmem>>, vector<1x2x8x40xf32>
    %58 = vector.shape_cast %57 : vector<1x2x8x40xf32> to vector<2x8x40xf32>
    %59 = vector.shape_cast %58 : vector<2x8x40xf32> to vector<16x40xf32>
    %c0_62 = arith.constant 0 : index
    %c0_63 = arith.constant 0 : index
    %c0_64 = arith.constant 0 : index
    %60 = vector.load %arg1[%c0_62, %c0_63, %c0_64] : memref<6x40x512xf32, #tpu.memory_space<vmem>>, vector<1x40x512xf32>
    %61 = vector.shape_cast %60 : vector<1x40x512xf32> to vector<40x512xf32>
    %cst_65 = arith.constant dense<0.000000e+00> : vector<16x512xf32>
    %62 = tpu.matmul %59, %61, %cst_65 {dimension_numbers = #tpu.dot_dimension_numbers<[1], [0], [0], [1], [0, 0, 1, 1], [], []>} : vector<16x40xf32>, vector<40x512xf32>, vector<16x512xf32> -> vector<16x512xf32>
    %c2_66 = arith.constant 2 : index
    %c0_67 = arith.constant 0 : index
    %c0_68 = arith.constant 0 : index
    %c0_69 = arith.constant 0 : index
    %63 = vector.load %arg0[%c2_66, %c0_67, %c0_68, %c0_69] : memref<4x2x16x40xf32, #tpu.memory_space<vmem>>, vector<1x2x8x40xf32>
    %64 = vector.shape_cast %63 : vector<1x2x8x40xf32> to vector<2x8x40xf32>
    %65 = vector.shape_cast %64 : vector<2x8x40xf32> to vector<16x40xf32>
    %c1_70 = arith.constant 1 : index
    %c0_71 = arith.constant 0 : index
    %c0_72 = arith.constant 0 : index
    %66 = vector.load %arg1[%c1_70, %c0_71, %c0_72] : memref<6x40x512xf32, #tpu.memory_space<vmem>>, vector<1x40x512xf32>
    %67 = vector.shape_cast %66 : vector<1x40x512xf32> to vector<40x512xf32>
    %cst_73 = arith.constant dense<0.000000e+00> : vector<16x512xf32>
    %68 = tpu.matmul %65, %67, %cst_73 {dimension_numbers = #tpu.dot_dimension_numbers<[1], [0], [0], [1], [0, 0, 1, 1], [], []>} : vector<16x40xf32>, vector<40x512xf32>, vector<16x512xf32> -> vector<16x512xf32>
    %69 = arith.addf %62, %68 : vector<16x512xf32>
    %c3_74 = arith.constant 3 : index
    %c0_75 = arith.constant 0 : index
    %c0_76 = arith.constant 0 : index
    %c0_77 = arith.constant 0 : index
    %70 = vector.load %arg0[%c3_74, %c0_75, %c0_76, %c0_77] : memref<4x2x16x40xf32, #tpu.memory_space<vmem>>, vector<1x2x8x40xf32>
    %71 = vector.shape_cast %70 : vector<1x2x8x40xf32> to vector<2x8x40xf32>
    %72 = vector.shape_cast %71 : vector<2x8x40xf32> to vector<16x40xf32>
    %c2_78 = arith.constant 2 : index
    %c0_79 = arith.constant 0 : index
    %c0_80 = arith.constant 0 : index
    %73 = vector.load %arg1[%c2_78, %c0_79, %c0_80] : memref<6x40x512xf32, #tpu.memory_space<vmem>>, vector<1x40x512xf32>
    %74 = vector.shape_cast %73 : vector<1x40x512xf32> to vector<40x512xf32>
    %cst_81 = arith.constant dense<0.000000e+00> : vector<16x512xf32>
    %75 = tpu.matmul %72, %74, %cst_81 {dimension_numbers = #tpu.dot_dimension_numbers<[1], [0], [0], [1], [0, 0, 1, 1], [], []>} : vector<16x40xf32>, vector<40x512xf32>, vector<16x512xf32> -> vector<16x512xf32>
    %76 = arith.addf %69, %75 : vector<16x512xf32>
    %c0_82 = arith.constant 0 : index
    %c0_83 = arith.constant 0 : index
    %c1_84 = arith.constant 1 : index
    %c0_85 = arith.constant 0 : index
    %77 = vector.load %arg0[%c0_82, %c0_83, %c1_84, %c0_85] : memref<4x2x16x40xf32, #tpu.memory_space<vmem>>, vector<1x2x8x40xf32>
    %78 = vector.shape_cast %77 : vector<1x2x8x40xf32> to vector<2x8x40xf32>
    %79 = vector.shape_cast %78 : vector<2x8x40xf32> to vector<16x40xf32>
    %c3_86 = arith.constant 3 : index
    %c0_87 = arith.constant 0 : index
    %c0_88 = arith.constant 0 : index
    %80 = vector.load %arg1[%c3_86, %c0_87, %c0_88] : memref<6x40x512xf32, #tpu.memory_space<vmem>>, vector<1x40x512xf32>
    %81 = vector.shape_cast %80 : vector<1x40x512xf32> to vector<40x512xf32>
    %cst_89 = arith.constant dense<0.000000e+00> : vector<16x512xf32>
    %82 = tpu.matmul %79, %81, %cst_89 {dimension_numbers = #tpu.dot_dimension_numbers<[1], [0], [0], [1], [0, 0, 1, 1], [], []>} : vector<16x40xf32>, vector<40x512xf32>, vector<16x512xf32> -> vector<16x512xf32>
    %83 = arith.addf %76, %82 : vector<16x512xf32>
    %c1_90 = arith.constant 1 : index
    %c0_91 = arith.constant 0 : index
    %c1_92 = arith.constant 1 : index
    %c0_93 = arith.constant 0 : index
    %84 = vector.load %arg0[%c1_90, %c0_91, %c1_92, %c0_93] : memref<4x2x16x40xf32, #tpu.memory_space<vmem>>, vector<1x2x8x40xf32>
    %85 = vector.shape_cast %84 : vector<1x2x8x40xf32> to vector<2x8x40xf32>
    %86 = vector.shape_cast %85 : vector<2x8x40xf32> to vector<16x40xf32>
    %c4_94 = arith.constant 4 : index
    %c0_95 = arith.constant 0 : index
    %c0_96 = arith.constant 0 : index
    %87 = vector.load %arg1[%c4_94, %c0_95, %c0_96] : memref<6x40x512xf32, #tpu.memory_space<vmem>>, vector<1x40x512xf32>
    %88 = vector.shape_cast %87 : vector<1x40x512xf32> to vector<40x512xf32>
    %cst_97 = arith.constant dense<0.000000e+00> : vector<16x512xf32>
    %89 = tpu.matmul %86, %88, %cst_97 {dimension_numbers = #tpu.dot_dimension_numbers<[1], [0], [0], [1], [0, 0, 1, 1], [], []>} : vector<16x40xf32>, vector<40x512xf32>, vector<16x512xf32> -> vector<16x512xf32>
    %90 = arith.addf %83, %89 : vector<16x512xf32>
    %c2_98 = arith.constant 2 : index
    %c0_99 = arith.constant 0 : index
    %c1_100 = arith.constant 1 : index
    %c0_101 = arith.constant 0 : index
    %91 = vector.load %arg0[%c2_98, %c0_99, %c1_100, %c0_101] : memref<4x2x16x40xf32, #tpu.memory_space<vmem>>, vector<1x2x8x40xf32>
    %92 = vector.shape_cast %91 : vector<1x2x8x40xf32> to vector<2x8x40xf32>
    %93 = vector.shape_cast %92 : vector<2x8x40xf32> to vector<16x40xf32>
    %c5_102 = arith.constant 5 : index
    %c0_103 = arith.constant 0 : index
    %c0_104 = arith.constant 0 : index
    %94 = vector.load %arg1[%c5_102, %c0_103, %c0_104] : memref<6x40x512xf32, #tpu.memory_space<vmem>>, vector<1x40x512xf32>
    %95 = vector.shape_cast %94 : vector<1x40x512xf32> to vector<40x512xf32>
    %cst_105 = arith.constant dense<0.000000e+00> : vector<16x512xf32>
    %96 = tpu.matmul %93, %95, %cst_105 {dimension_numbers = #tpu.dot_dimension_numbers<[1], [0], [0], [1], [0, 0, 1, 1], [], []>} : vector<16x40xf32>, vector<40x512xf32>, vector<16x512xf32> -> vector<16x512xf32>
    %97 = arith.addf %90, %96 : vector<16x512xf32>
    %c0_106 = arith.constant 0 : index
    %c0_107 = arith.constant 0 : index
    %98 = vector.load %arg2[%c0_106, %c0_107] : memref<1x512xf32, #tpu.memory_space<vmem>>, vector<1x512xf32>
    %99 = vector.broadcast %98 : vector<1x512xf32> to vector<16x512xf32>
    %100 = arith.addf %97, %99 : vector<16x512xf32>
    %cst_108 = arith.constant 0.000000e+00 : f32
    %101 = vector.broadcast %cst_108 : f32 to vector<16x512xf32>
    %102 = arith.cmpf ogt, %100, %101 : vector<16x512xf32>
    %cst_109 = arith.constant 2.000000e-01 : f32
    %103 = vector.broadcast %cst_109 : f32 to vector<16x512xf32>
    %104 = arith.mulf %103, %100 : vector<16x512xf32>
    %105 = arith.select %102, %100, %104 : vector<16x512xi1>, vector<16x512xf32>
    %106 = vector.shape_cast %105 : vector<16x512xf32> to vector<2x8x512xf32>
    %c1_110 = arith.constant 1 : index
    %c0_111 = arith.constant 0 : index
    %c0_112 = arith.constant 0 : index
    %c0_113 = arith.constant 0 : index
    %107 = vector.load %arg11[%c1_110, %c0_111, %c0_112, %c0_113] : memref<4x2x16x512xf32, #tpu.memory_space<vmem>>, vector<1x2x8x512xf32>
    %108 = vector.shape_cast %107 : vector<1x2x8x512xf32> to vector<2x8x512xf32>
    %109 = vector.shape_cast %106 : vector<2x8x512xf32> to vector<1x2x8x512xf32>
    tpu.vector_store %arg11[%c1_110, %c0_111, %c0_112, %c0_113], %109 {strides = array<i32>} : memref<4x2x16x512xf32, #tpu.memory_space<vmem>>, vector<1x2x8x512xf32>,
    %c2_114 = arith.constant 2 : index
    %c0_115 = arith.constant 0 : index
    %c0_116 = arith.constant 0 : index
    %c0_117 = arith.constant 0 : index
    %110 = vector.load %arg0[%c2_114, %c0_115, %c0_116, %c0_117] : memref<4x2x16x40xf32, #tpu.memory_space<vmem>>, vector<1x2x8x40xf32>
    %111 = vector.shape_cast %110 : vector<1x2x8x40xf32> to vector<2x8x40xf32>
    %112 = vector.shape_cast %111 : vector<2x8x40xf32> to vector<16x40xf32>
    %c0_118 = arith.constant 0 : index
    %c0_119 = arith.constant 0 : index
    %c0_120 = arith.constant 0 : index
    %113 = vector.load %arg1[%c0_118, %c0_119, %c0_120] : memref<6x40x512xf32, #tpu.memory_space<vmem>>, vector<1x40x512xf32>
    %114 = vector.shape_cast %113 : vector<1x40x512xf32> to vector<40x512xf32>
    %cst_121 = arith.constant dense<0.000000e+00> : vector<16x512xf32>
    %115 = tpu.matmul %112, %114, %cst_121 {dimension_numbers = #tpu.dot_dimension_numbers<[1], [0], [0], [1], [0, 0, 1, 1], [], []>} : vector<16x40xf32>, vector<40x512xf32>, vector<16x512xf32> -> vector<16x512xf32>
    %c3_122 = arith.constant 3 : index
    %c0_123 = arith.constant 0 : index
    %c0_124 = arith.constant 0 : index
    %c0_125 = arith.constant 0 : index
    %116 = vector.load %arg0[%c3_122, %c0_123, %c0_124, %c0_125] : memref<4x2x16x40xf32, #tpu.memory_space<vmem>>, vector<1x2x8x40xf32>
    %117 = vector.shape_cast %116 : vector<1x2x8x40xf32> to vector<2x8x40xf32>
    %118 = vector.shape_cast %117 : vector<2x8x40xf32> to vector<16x40xf32>
    %c1_126 = arith.constant 1 : index
    %c0_127 = arith.constant 0 : index
    %c0_128 = arith.constant 0 : index
    %119 = vector.load %arg1[%c1_126, %c0_127, %c0_128] : memref<6x40x512xf32, #tpu.memory_space<vmem>>, vector<1x40x512xf32>
    %120 = vector.shape_cast %119 : vector<1x40x512xf32> to vector<40x512xf32>
    %cst_129 = arith.constant dense<0.000000e+00> : vector<16x512xf32>
    %121 = tpu.matmul %118, %120, %cst_129 {dimension_numbers = #tpu.dot_dimension_numbers<[1], [0], [0], [1], [0, 0, 1, 1], [], []>} : vector<16x40xf32>, vector<40x512xf32>, vector<16x512xf32> -> vector<16x512xf32>
    %122 = arith.addf %115, %121 : vector<16x512xf32>
    %c0_130 = arith.constant 0 : index
    %c0_131 = arith.constant 0 : index
    %c1_132 = arith.constant 1 : index
    %c0_133 = arith.constant 0 : index
    %123 = vector.load %arg0[%c0_130, %c0_131, %c1_132, %c0_133] : memref<4x2x16x40xf32, #tpu.memory_space<vmem>>, vector<1x2x8x40xf32>
    %124 = vector.shape_cast %123 : vector<1x2x8x40xf32> to vector<2x8x40xf32>
    %125 = vector.shape_cast %124 : vector<2x8x40xf32> to vector<16x40xf32>
    %c2_134 = arith.constant 2 : index
    %c0_135 = arith.constant 0 : index
    %c0_136 = arith.constant 0 : index
    %126 = vector.load %arg1[%c2_134, %c0_135, %c0_136] : memref<6x40x512xf32, #tpu.memory_space<vmem>>, vector<1x40x512xf32>
    %127 = vector.shape_cast %126 : vector<1x40x512xf32> to vector<40x512xf32>
    %cst_137 = arith.constant dense<0.000000e+00> : vector<16x512xf32>
    %128 = tpu.matmul %125, %127, %cst_137 {dimension_numbers = #tpu.dot_dimension_numbers<[1], [0], [0], [1], [0, 0, 1, 1], [], []>} : vector<16x40xf32>, vector<40x512xf32>, vector<16x512xf32> -> vector<16x512xf32>
    %129 = arith.addf %122, %128 : vector<16x512xf32>
    %c1_138 = arith.constant 1 : index
    %c0_139 = arith.constant 0 : index
    %c1_140 = arith.constant 1 : index
    %c0_141 = arith.constant 0 : index
    %130 = vector.load %arg0[%c1_138, %c0_139, %c1_140, %c0_141] : memref<4x2x16x40xf32, #tpu.memory_space<vmem>>, vector<1x2x8x40xf32>
    %131 = vector.shape_cast %130 : vector<1x2x8x40xf32> to vector<2x8x40xf32>
    %132 = vector.shape_cast %131 : vector<2x8x40xf32> to vector<16x40xf32>
    %c3_142 = arith.constant 3 : index
    %c0_143 = arith.constant 0 : index
    %c0_144 = arith.constant 0 : index
    %133 = vector.load %arg1[%c3_142, %c0_143, %c0_144] : memref<6x40x512xf32, #tpu.memory_space<vmem>>, vector<1x40x512xf32>
    %134 = vector.shape_cast %133 : vector<1x40x512xf32> to vector<40x512xf32>
    %cst_145 = arith.constant dense<0.000000e+00> : vector<16x512xf32>
    %135 = tpu.matmul %132, %134, %cst_145 {dimension_numbers = #tpu.dot_dimension_numbers<[1], [0], [0], [1], [0, 0, 1, 1], [], []>} : vector<16x40xf32>, vector<40x512xf32>, vector<16x512xf32> -> vector<16x512xf32>
    %136 = arith.addf %129, %135 : vector<16x512xf32>
    %c2_146 = arith.constant 2 : index
    %c0_147 = arith.constant 0 : index
    %c1_148 = arith.constant 1 : index
    %c0_149 = arith.constant 0 : index
    %137 = vector.load %arg0[%c2_146, %c0_147, %c1_148, %c0_149] : memref<4x2x16x40xf32, #tpu.memory_space<vmem>>, vector<1x2x8x40xf32>
    %138 = vector.shape_cast %137 : vector<1x2x8x40xf32> to vector<2x8x40xf32>
    %139 = vector.shape_cast %138 : vector<2x8x40xf32> to vector<16x40xf32>
    %c4_150 = arith.constant 4 : index
    %c0_151 = arith.constant 0 : index
    %c0_152 = arith.constant 0 : index
    %140 = vector.load %arg1[%c4_150, %c0_151, %c0_152] : memref<6x40x512xf32, #tpu.memory_space<vmem>>, vector<1x40x512xf32>
    %141 = vector.shape_cast %140 : vector<1x40x512xf32> to vector<40x512xf32>
    %cst_153 = arith.constant dense<0.000000e+00> : vector<16x512xf32>
    %142 = tpu.matmul %139, %141, %cst_153 {dimension_numbers = #tpu.dot_dimension_numbers<[1], [0], [0], [1], [0, 0, 1, 1], [], []>} : vector<16x40xf32>, vector<40x512xf32>, vector<16x512xf32> -> vector<16x512xf32>
    %143 = arith.addf %136, %142 : vector<16x512xf32>
    %c3_154 = arith.constant 3 : index
    %c0_155 = arith.constant 0 : index
    %c1_156 = arith.constant 1 : index
    %c0_157 = arith.constant 0 : index
    %144 = vector.load %arg0[%c3_154, %c0_155, %c1_156, %c0_157] : memref<4x2x16x40xf32, #tpu.memory_space<vmem>>, vector<1x2x8x40xf32>
    %145 = vector.shape_cast %144 : vector<1x2x8x40xf32> to vector<2x8x40xf32>
    %146 = vector.shape_cast %145 : vector<2x8x40xf32> to vector<16x40xf32>
    %c5_158 = arith.constant 5 : index
    %c0_159 = arith.constant 0 : index
    %c0_160 = arith.constant 0 : index
    %147 = vector.load %arg1[%c5_158, %c0_159, %c0_160] : memref<6x40x512xf32, #tpu.memory_space<vmem>>, vector<1x40x512xf32>
    %148 = vector.shape_cast %147 : vector<1x40x512xf32> to vector<40x512xf32>
    %cst_161 = arith.constant dense<0.000000e+00> : vector<16x512xf32>
    %149 = tpu.matmul %146, %148, %cst_161 {dimension_numbers = #tpu.dot_dimension_numbers<[1], [0], [0], [1], [0, 0, 1, 1], [], []>} : vector<16x40xf32>, vector<40x512xf32>, vector<16x512xf32> -> vector<16x512xf32>
    %150 = arith.addf %143, %149 : vector<16x512xf32>
    %c0_162 = arith.constant 0 : index
    %c0_163 = arith.constant 0 : index
    %151 = vector.load %arg2[%c0_162, %c0_163] : memref<1x512xf32, #tpu.memory_space<vmem>>, vector<1x512xf32>
    %152 = vector.broadcast %151 : vector<1x512xf32> to vector<16x512xf32>
    %153 = arith.addf %150, %152 : vector<16x512xf32>
    %cst_164 = arith.constant 0.000000e+00 : f32
    %154 = vector.broadcast %cst_164 : f32 to vector<16x512xf32>
    %155 = arith.cmpf ogt, %153, %154 : vector<16x512xf32>
    %cst_165 = arith.constant 2.000000e-01 : f32
    %156 = vector.broadcast %cst_165 : f32 to vector<16x512xf32>
    %157 = arith.mulf %156, %153 : vector<16x512xf32>
    %158 = arith.select %155, %153, %157 : vector<16x512xi1>, vector<16x512xf32>
    %159 = vector.shape_cast %158 : vector<16x512xf32> to vector<2x8x512xf32>
    %c2_166 = arith.constant 2 : index
    %c0_167 = arith.constant 0 : index
    %c0_168 = arith.constant 0 : index
    %c0_169 = arith.constant 0 : index
    %160 = vector.load %arg11[%c2_166, %c0_167, %c0_168, %c0_169] : memref<4x2x16x512xf32, #tpu.memory_space<vmem>>, vector<1x2x8x512xf32>
    %161 = vector.shape_cast %160 : vector<1x2x8x512xf32> to vector<2x8x512xf32>
    %162 = vector.shape_cast %159 : vector<2x8x512xf32> to vector<1x2x8x512xf32>
    tpu.vector_store %arg11[%c2_166, %c0_167, %c0_168, %c0_169], %162 {strides = array<i32>} : memref<4x2x16x512xf32, #tpu.memory_space<vmem>>, vector<1x2x8x512xf32>,
    %c3_170 = arith.constant 3 : index
    %c0_171 = arith.constant 0 : index
    %c0_172 = arith.constant 0 : index
    %c0_173 = arith.constant 0 : index
    %163 = vector.load %arg0[%c3_170, %c0_171, %c0_172, %c0_173] : memref<4x2x16x40xf32, #tpu.memory_space<vmem>>, vector<1x2x8x40xf32>
    %164 = vector.shape_cast %163 : vector<1x2x8x40xf32> to vector<2x8x40xf32>
    %165 = vector.shape_cast %164 : vector<2x8x40xf32> to vector<16x40xf32>
    %c0_174 = arith.constant 0 : index
    %c0_175 = arith.constant 0 : index
    %c0_176 = arith.constant 0 : index
    %166 = vector.load %arg1[%c0_174, %c0_175, %c0_176] : memref<6x40x512xf32, #tpu.memory_space<vmem>>, vector<1x40x512xf32>
    %167 = vector.shape_cast %166 : vector<1x40x512xf32> to vector<40x512xf32>
    %cst_177 = arith.constant dense<0.000000e+00> : vector<16x512xf32>
    %168 = tpu.matmul %165, %167, %cst_177 {dimension_numbers = #tpu.dot_dimension_numbers<[1], [0], [0], [1], [0, 0, 1, 1], [], []>} : vector<16x40xf32>, vector<40x512xf32>, vector<16x512xf32> -> vector<16x512xf32>
    %c0_178 = arith.constant 0 : index
    %c0_179 = arith.constant 0 : index
    %c1_180 = arith.constant 1 : index
    %c0_181 = arith.constant 0 : index
    %169 = vector.load %arg0[%c0_178, %c0_179, %c1_180, %c0_181] : memref<4x2x16x40xf32, #tpu.memory_space<vmem>>, vector<1x2x8x40xf32>
    %170 = vector.shape_cast %169 : vector<1x2x8x40xf32> to vector<2x8x40xf32>
    %171 = vector.shape_cast %170 : vector<2x8x40xf32> to vector<16x40xf32>
    %c1_182 = arith.constant 1 : index
    %c0_183 = arith.constant 0 : index
    %c0_184 = arith.constant 0 : index
    %172 = vector.load %arg1[%c1_182, %c0_183, %c0_184] : memref<6x40x512xf32, #tpu.memory_space<vmem>>, vector<1x40x512xf32>
    %173 = vector.shape_cast %172 : vector<1x40x512xf32> to vector<40x512xf32>
    %cst_185 = arith.constant dense<0.000000e+00> : vector<16x512xf32>
    %174 = tpu.matmul %171, %173, %cst_185 {dimension_numbers = #tpu.dot_dimension_numbers<[1], [0], [0], [1], [0, 0, 1, 1], [], []>} : vector<16x40xf32>, vector<40x512xf32>, vector<16x512xf32> -> vector<16x512xf32>
    %175 = arith.addf %168, %174 : vector<16x512xf32>
    %c1_186 = arith.constant 1 : index
    %c0_187 = arith.constant 0 : index
    %c1_188 = arith.constant 1 : index
    %c0_189 = arith.constant 0 : index
    %176 = vector.load %arg0[%c1_186, %c0_187, %c1_188, %c0_189] : memref<4x2x16x40xf32, #tpu.memory_space<vmem>>, vector<1x2x8x40xf32>
    %177 = vector.shape_cast %176 : vector<1x2x8x40xf32> to vector<2x8x40xf32>
    %178 = vector.shape_cast %177 : vector<2x8x40xf32> to vector<16x40xf32>
    %c2_190 = arith.constant 2 : index
    %c0_191 = arith.constant 0 : index
    %c0_192 = arith.constant 0 : index
    %179 = vector.load %arg1[%c2_190, %c0_191, %c0_192] : memref<6x40x512xf32, #tpu.memory_space<vmem>>, vector<1x40x512xf32>
    %180 = vector.shape_cast %179 : vector<1x40x512xf32> to vector<40x512xf32>
    %cst_193 = arith.constant dense<0.000000e+00> : vector<16x512xf32>
    %181 = tpu.matmul %178, %180, %cst_193 {dimension_numbers = #tpu.dot_dimension_numbers<[1], [0], [0], [1], [0, 0, 1, 1], [], []>} : vector<16x40xf32>, vector<40x512xf32>, vector<16x512xf32> -> vector<16x512xf32>
    %182 = arith.addf %175, %181 : vector<16x512xf32>
    %c2_194 = arith.constant 2 : index
    %c0_195 = arith.constant 0 : index
    %c1_196 = arith.constant 1 : index
    %c0_197 = arith.constant 0 : index
    %183 = vector.load %arg0[%c2_194, %c0_195, %c1_196, %c0_197] : memref<4x2x16x40xf32, #tpu.memory_space<vmem>>, vector<1x2x8x40xf32>
    %184 = vector.shape_cast %183 : vector<1x2x8x40xf32> to vector<2x8x40xf32>
    %185 = vector.shape_cast %184 : vector<2x8x40xf32> to vector<16x40xf32>
    %c3_198 = arith.constant 3 : index
    %c0_199 = arith.constant 0 : index
    %c0_200 = arith.constant 0 : index
    %186 = vector.load %arg1[%c3_198, %c0_199, %c0_200] : memref<6x40x512xf32, #tpu.memory_space<vmem>>, vector<1x40x512xf32>
    %187 = vector.shape_cast %186 : vector<1x40x512xf32> to vector<40x512xf32>
    %cst_201 = arith.constant dense<0.000000e+00> : vector<16x512xf32>
    %188 = tpu.matmul %185, %187, %cst_201 {dimension_numbers = #tpu.dot_dimension_numbers<[1], [0], [0], [1], [0, 0, 1, 1], [], []>} : vector<16x40xf32>, vector<40x512xf32>, vector<16x512xf32> -> vector<16x512xf32>
    %189 = arith.addf %182, %188 : vector<16x512xf32>
    %c3_202 = arith.constant 3 : index
    %c0_203 = arith.constant 0 : index
    %c1_204 = arith.constant 1 : index
    %c0_205 = arith.constant 0 : index
    %190 = vector.load %arg0[%c3_202, %c0_203, %c1_204, %c0_205] : memref<4x2x16x40xf32, #tpu.memory_space<vmem>>, vector<1x2x8x40xf32>
    %191 = vector.shape_cast %190 : vector<1x2x8x40xf32> to vector<2x8x40xf32>
    %192 = vector.shape_cast %191 : vector<2x8x40xf32> to vector<16x40xf32>
    %c4_206 = arith.constant 4 : index
    %c0_207 = arith.constant 0 : index
    %c0_208 = arith.constant 0 : index
    %193 = vector.load %arg1[%c4_206, %c0_207, %c0_208] : memref<6x40x512xf32, #tpu.memory_space<vmem>>, vector<1x40x512xf32>
    %194 = vector.shape_cast %193 : vector<1x40x512xf32> to vector<40x512xf32>
    %cst_209 = arith.constant dense<0.000000e+00> : vector<16x512xf32>
    %195 = tpu.matmul %192, %194, %cst_209 {dimension_numbers = #tpu.dot_dimension_numbers<[1], [0], [0], [1], [0, 0, 1, 1], [], []>} : vector<16x40xf32>, vector<40x512xf32>, vector<16x512xf32> -> vector<16x512xf32>
    %196 = arith.addf %189, %195 : vector<16x512xf32>
    %c0_210 = arith.constant 0 : index
    %c0_211 = arith.constant 0 : index
    %c2_212 = arith.constant 2 : index
    %c0_213 = arith.constant 0 : index
    %197 = vector.load %arg0[%c0_210, %c0_211, %c2_212, %c0_213] : memref<4x2x16x40xf32, #tpu.memory_space<vmem>>, vector<1x2x8x40xf32>
    %198 = vector.shape_cast %197 : vector<1x2x8x40xf32> to vector<2x8x40xf32>
    %199 = vector.shape_cast %198 : vector<2x8x40xf32> to vector<16x40xf32>
    %c5_214 = arith.constant 5 : index
    %c0_215 = arith.constant 0 : index
    %c0_216 = arith.constant 0 : index
    %200 = vector.load %arg1[%c5_214, %c0_215, %c0_216] : memref<6x40x512xf32, #tpu.memory_space<vmem>>, vector<1x40x512xf32>
    %201 = vector.shape_cast %200 : vector<1x40x512xf32> to vector<40x512xf32>
    %cst_217 = arith.constant dense<0.000000e+00> : vector<16x512xf32>
    %202 = tpu.matmul %199, %201, %cst_217 {dimension_numbers = #tpu.dot_dimension_numbers<[1], [0], [0], [1], [0, 0, 1, 1], [], []>} : vector<16x40xf32>, vector<40x512xf32>, vector<16x512xf32> -> vector<16x512xf32>
    %203 = arith.addf %196, %202 : vector<16x512xf32>
    %c0_218 = arith.constant 0 : index
    %c0_219 = arith.constant 0 : index
    %204 = vector.load %arg2[%c0_218, %c0_219] : memref<1x512xf32, #tpu.memory_space<vmem>>, vector<1x512xf32>
    %205 = vector.broadcast %204 : vector<1x512xf32> to vector<16x512xf32>
    %206 = arith.addf %203, %205 : vector<16x512xf32>
    %cst_220 = arith.constant 0.000000e+00 : f32
    %207 = vector.broadcast %cst_220 : f32 to vector<16x512xf32>
    %208 = arith.cmpf ogt, %206, %207 : vector<16x512xf32>
    %cst_221 = arith.constant 2.000000e-01 : f32
    %209 = vector.broadcast %cst_221 : f32 to vector<16x512xf32>
    %210 = arith.mulf %209, %206 : vector<16x512xf32>
    %211 = arith.select %208, %206, %210 : vector<16x512xi1>, vector<16x512xf32>
    %212 = vector.shape_cast %211 : vector<16x512xf32> to vector<2x8x512xf32>
    %c3_222 = arith.constant 3 : index
    %c0_223 = arith.constant 0 : index
    %c0_224 = arith.constant 0 : index
    %c0_225 = arith.constant 0 : index
    %213 = vector.load %arg11[%c3_222, %c0_223, %c0_224, %c0_225] : memref<4x2x16x512xf32, #tpu.memory_space<vmem>>, vector<1x2x8x512xf32>
    %214 = vector.shape_cast %213 : vector<1x2x8x512xf32> to vector<2x8x512xf32>
    %215 = vector.shape_cast %212 : vector<2x8x512xf32> to vector<1x2x8x512xf32>
    tpu.vector_store %arg11[%c3_222, %c0_223, %c0_224, %c0_225], %215 {strides = array<i32>} : memref<4x2x16x512xf32, #tpu.memory_space<vmem>>, vector<1x2x8x512xf32>,
    %c0_226 = arith.constant 0 : index
    %c0_227 = arith.constant 0 : index
    %c0_228 = arith.constant 0 : index
    %c0_229 = arith.constant 0 : index
    %216 = vector.load %arg11[%c0_226, %c0_227, %c0_228, %c0_229] : memref<4x2x16x512xf32, #tpu.memory_space<vmem>>, vector<1x2x8x512xf32>
    %217 = vector.shape_cast %216 : vector<1x2x8x512xf32> to vector<2x8x512xf32>
    %218 = vector.shape_cast %217 : vector<2x8x512xf32> to vector<16x512xf32>
    %c0_230 = arith.constant 0 : index
    %c0_231 = arith.constant 0 : index
    %c0_232 = arith.constant 0 : index
    %219 = vector.load %arg3[%c0_230, %c0_231, %c0_232] : memref<6x512x256xf32, #tpu.memory_space<vmem>>, vector<1x512x256xf32>
    %220 = vector.shape_cast %219 : vector<1x512x256xf32> to vector<512x256xf32>
    %cst_233 = arith.constant dense<0.000000e+00> : vector<16x256xf32>
    %221 = tpu.matmul %218, %220, %cst_233 {dimension_numbers = #tpu.dot_dimension_numbers<[1], [0], [0], [1], [0, 0, 1, 1], [], []>} : vector<16x512xf32>, vector<512x256xf32>, vector<16x256xf32> -> vector<16x256xf32>
    %c1_234 = arith.constant 1 : index
    %c0_235 = arith.constant 0 : index
    %c0_236 = arith.constant 0 : index
    %c0_237 = arith.constant 0 : index
    %222 = vector.load %arg11[%c1_234, %c0_235, %c0_236, %c0_237] : memref<4x2x16x512xf32, #tpu.memory_space<vmem>>, vector<1x2x8x512xf32>
    %223 = vector.shape_cast %222 : vector<1x2x8x512xf32> to vector<2x8x512xf32>
    %224 = vector.shape_cast %223 : vector<2x8x512xf32> to vector<16x512xf32>
    %c1_238 = arith.constant 1 : index
    %c0_239 = arith.constant 0 : index
    %c0_240 = arith.constant 0 : index
    %225 = vector.load %arg3[%c1_238, %c0_239, %c0_240] : memref<6x512x256xf32, #tpu.memory_space<vmem>>, vector<1x512x256xf32>
    %226 = vector.shape_cast %225 : vector<1x512x256xf32> to vector<512x256xf32>
    %cst_241 = arith.constant dense<0.000000e+00> : vector<16x256xf32>
    %227 = tpu.matmul %224, %226, %cst_241 {dimension_numbers = #tpu.dot_dimension_numbers<[1], [0], [0], [1], [0, 0, 1, 1], [], []>} : vector<16x512xf32>, vector<512x256xf32>, vector<16x256xf32> -> vector<16x256xf32>
    %228 = arith.addf %221, %227 : vector<16x256xf32>
    %c2_242 = arith.constant 2 : index
    %c0_243 = arith.constant 0 : index
    %c0_244 = arith.constant 0 : index
    %c0_245 = arith.constant 0 : index
    %229 = vector.load %arg11[%c2_242, %c0_243, %c0_244, %c0_245] : memref<4x2x16x512xf32, #tpu.memory_space<vmem>>, vector<1x2x8x512xf32>
    %230 = vector.shape_cast %229 : vector<1x2x8x512xf32> to vector<2x8x512xf32>
    %231 = vector.shape_cast %230 : vector<2x8x512xf32> to vector<16x512xf32>
    %c2_246 = arith.constant 2 : index
    %c0_247 = arith.constant 0 : index
    %c0_248 = arith.constant 0 : index
    %232 = vector.load %arg3[%c2_246, %c0_247, %c0_248] : memref<6x512x256xf32, #tpu.memory_space<vmem>>, vector<1x512x256xf32>
    %233 = vector.shape_cast %232 : vector<1x512x256xf32> to vector<512x256xf32>
    %cst_249 = arith.constant dense<0.000000e+00> : vector<16x256xf32>
    %234 = tpu.matmul %231, %233, %cst_249 {dimension_numbers = #tpu.dot_dimension_numbers<[1], [0], [0], [1], [0, 0, 1, 1], [], []>} : vector<16x512xf32>, vector<512x256xf32>, vector<16x256xf32> -> vector<16x256xf32>
    %235 = arith.addf %228, %234 : vector<16x256xf32>
    %c3_250 = arith.constant 3 : index
    %c0_251 = arith.constant 0 : index
    %c0_252 = arith.constant 0 : index
    %c0_253 = arith.constant 0 : index
    %236 = vector.load %arg11[%c3_250, %c0_251, %c0_252, %c0_253] : memref<4x2x16x512xf32, #tpu.memory_space<vmem>>, vector<1x2x8x512xf32>
    %237 = vector.shape_cast %236 : vector<1x2x8x512xf32> to vector<2x8x512xf32>
    %238 = vector.shape_cast %237 : vector<2x8x512xf32> to vector<16x512xf32>
    %c3_254 = arith.constant 3 : index
    %c0_255 = arith.constant 0 : index
    %c0_256 = arith.constant 0 : index
    %239 = vector.load %arg3[%c3_254, %c0_255, %c0_256] : memref<6x512x256xf32, #tpu.memory_space<vmem>>, vector<1x512x256xf32>
    %240 = vector.shape_cast %239 : vector<1x512x256xf32> to vector<512x256xf32>
    %cst_257 = arith.constant dense<0.000000e+00> : vector<16x256xf32>
    %241 = tpu.matmul %238, %240, %cst_257 {dimension_numbers = #tpu.dot_dimension_numbers<[1], [0], [0], [1], [0, 0, 1, 1], [], []>} : vector<16x512xf32>, vector<512x256xf32>, vector<16x256xf32> -> vector<16x256xf32>
    %242 = arith.addf %235, %241 : vector<16x256xf32>
    %c0_258 = arith.constant 0 : index
    %c0_259 = arith.constant 0 : index
    %c1_260 = arith.constant 1 : index
    %c0_261 = arith.constant 0 : index
    %243 = vector.load %arg11[%c0_258, %c0_259, %c1_260, %c0_261] : memref<4x2x16x512xf32, #tpu.memory_space<vmem>>, vector<1x2x8x512xf32>
    %244 = vector.shape_cast %243 : vector<1x2x8x512xf32> to vector<2x8x512xf32>
    %245 = vector.shape_cast %244 : vector<2x8x512xf32> to vector<16x512xf32>
    %c4_262 = arith.constant 4 : index
    %c0_263 = arith.constant 0 : index
    %c0_264 = arith.constant 0 : index
    %246 = vector.load %arg3[%c4_262, %c0_263, %c0_264] : memref<6x512x256xf32, #tpu.memory_space<vmem>>, vector<1x512x256xf32>
    %247 = vector.shape_cast %246 : vector<1x512x256xf32> to vector<512x256xf32>
    %cst_265 = arith.constant dense<0.000000e+00> : vector<16x256xf32>
    %248 = tpu.matmul %245, %247, %cst_265 {dimension_numbers = #tpu.dot_dimension_numbers<[1], [0], [0], [1], [0, 0, 1, 1], [], []>} : vector<16x512xf32>, vector<512x256xf32>, vector<16x256xf32> -> vector<16x256xf32>
    %249 = arith.addf %242, %248 : vector<16x256xf32>
    %c1_266 = arith.constant 1 : index
    %c0_267 = arith.constant 0 : index
    %c1_268 = arith.constant 1 : index
    %c0_269 = arith.constant 0 : index
    %250 = vector.load %arg11[%c1_266, %c0_267, %c1_268, %c0_269] : memref<4x2x16x512xf32, #tpu.memory_space<vmem>>, vector<1x2x8x512xf32>
    %251 = vector.shape_cast %250 : vector<1x2x8x512xf32> to vector<2x8x512xf32>
    %252 = vector.shape_cast %251 : vector<2x8x512xf32> to vector<16x512xf32>
    %c5_270 = arith.constant 5 : index
    %c0_271 = arith.constant 0 : index
    %c0_272 = arith.constant 0 : index
    %253 = vector.load %arg3[%c5_270, %c0_271, %c0_272] : memref<6x512x256xf32, #tpu.memory_space<vmem>>, vector<1x512x256xf32>
    %254 = vector.shape_cast %253 : vector<1x512x256xf32> to vector<512x256xf32>
    %cst_273 = arith.constant dense<0.000000e+00> : vector<16x256xf32>
    %255 = tpu.matmul %252, %254, %cst_273 {dimension_numbers = #tpu.dot_dimension_numbers<[1], [0], [0], [1], [0, 0, 1, 1], [], []>} : vector<16x512xf32>, vector<512x256xf32>, vector<16x256xf32> -> vector<16x256xf32>
    %256 = arith.addf %249, %255 : vector<16x256xf32>
    %c0_274 = arith.constant 0 : index
    %c0_275 = arith.constant 0 : index
    %257 = vector.load %arg4[%c0_274, %c0_275] : memref<1x256xf32, #tpu.memory_space<vmem>>, vector<1x256xf32>
    %258 = vector.broadcast %257 : vector<1x256xf32> to vector<16x256xf32>
    %259 = arith.addf %256, %258 : vector<16x256xf32>
    %260 = vector.shape_cast %259 : vector<16x256xf32> to vector<2x8x256xf32>
    %c2_276 = arith.constant 2 : index
    %c0_277 = arith.constant 0 : index
    %c0_278 = arith.constant 0 : index
    %c0_279 = arith.constant 0 : index
    %261 = vector.load %arg11[%c2_276, %c0_277, %c0_278, %c0_279] : memref<4x2x16x512xf32, #tpu.memory_space<vmem>>, vector<1x2x8x512xf32>
    %262 = vector.shape_cast %261 : vector<1x2x8x512xf32> to vector<2x8x512xf32>
    %263 = vector.shape_cast %262 : vector<2x8x512xf32> to vector<16x512xf32>
    %c0_280 = arith.constant 0 : index
    %c0_281 = arith.constant 0 : index
    %c0_282 = arith.constant 0 : index
    %264 = vector.load %arg3[%c0_280, %c0_281, %c0_282] : memref<6x512x256xf32, #tpu.memory_space<vmem>>, vector<1x512x256xf32>
    %265 = vector.shape_cast %264 : vector<1x512x256xf32> to vector<512x256xf32>
    %cst_283 = arith.constant dense<0.000000e+00> : vector<16x256xf32>
    %266 = tpu.matmul %263, %265, %cst_283 {dimension_numbers = #tpu.dot_dimension_numbers<[1], [0], [0], [1], [0, 0, 1, 1], [], []>} : vector<16x512xf32>, vector<512x256xf32>, vector<16x256xf32> -> vector<16x256xf32>
    %c3_284 = arith.constant 3 : index
    %c0_285 = arith.constant 0 : index
    %c0_286 = arith.constant 0 : index
    %c0_287 = arith.constant 0 : index
    %267 = vector.load %arg11[%c3_284, %c0_285, %c0_286, %c0_287] : memref<4x2x16x512xf32, #tpu.memory_space<vmem>>, vector<1x2x8x512xf32>
    %268 = vector.shape_cast %267 : vector<1x2x8x512xf32> to vector<2x8x512xf32>
    %269 = vector.shape_cast %268 : vector<2x8x512xf32> to vector<16x512xf32>
    %c1_288 = arith.constant 1 : index
    %c0_289 = arith.constant 0 : index
    %c0_290 = arith.constant 0 : index
    %270 = vector.load %arg3[%c1_288, %c0_289, %c0_290] : memref<6x512x256xf32, #tpu.memory_space<vmem>>, vector<1x512x256xf32>
    %271 = vector.shape_cast %270 : vector<1x512x256xf32> to vector<512x256xf32>
    %cst_291 = arith.constant dense<0.000000e+00> : vector<16x256xf32>
    %272 = tpu.matmul %269, %271, %cst_291 {dimension_numbers = #tpu.dot_dimension_numbers<[1], [0], [0], [1], [0, 0, 1, 1], [], []>} : vector<16x512xf32>, vector<512x256xf32>, vector<16x256xf32> -> vector<16x256xf32>
    %273 = arith.addf %266, %272 : vector<16x256xf32>
    %c0_292 = arith.constant 0 : index
    %c0_293 = arith.constant 0 : index
    %c1_294 = arith.constant 1 : index
    %c0_295 = arith.constant 0 : index
    %274 = vector.load %arg11[%c0_292, %c0_293, %c1_294, %c0_295] : memref<4x2x16x512xf32, #tpu.memory_space<vmem>>, vector<1x2x8x512xf32>
    %275 = vector.shape_cast %274 : vector<1x2x8x512xf32> to vector<2x8x512xf32>
    %276 = vector.shape_cast %275 : vector<2x8x512xf32> to vector<16x512xf32>
    %c2_296 = arith.constant 2 : index
    %c0_297 = arith.constant 0 : index
    %c0_298 = arith.constant 0 : index
    %277 = vector.load %arg3[%c2_296, %c0_297, %c0_298] : memref<6x512x256xf32, #tpu.memory_space<vmem>>, vector<1x512x256xf32>
    %278 = vector.shape_cast %277 : vector<1x512x256xf32> to vector<512x256xf32>
    %cst_299 = arith.constant dense<0.000000e+00> : vector<16x256xf32>
    %279 = tpu.matmul %276, %278, %cst_299 {dimension_numbers = #tpu.dot_dimension_numbers<[1], [0], [0], [1], [0, 0, 1, 1], [], []>} : vector<16x512xf32>, vector<512x256xf32>, vector<16x256xf32> -> vector<16x256xf32>
    %280 = arith.addf %273, %279 : vector<16x256xf32>
    %c1_300 = arith.constant 1 : index
    %c0_301 = arith.constant 0 : index
    %c1_302 = arith.constant 1 : index
    %c0_303 = arith.constant 0 : index
    %281 = vector.load %arg11[%c1_300, %c0_301, %c1_302, %c0_303] : memref<4x2x16x512xf32, #tpu.memory_space<vmem>>, vector<1x2x8x512xf32>
    %282 = vector.shape_cast %281 : vector<1x2x8x512xf32> to vector<2x8x512xf32>
    %283 = vector.shape_cast %282 : vector<2x8x512xf32> to vector<16x512xf32>
    %c3_304 = arith.constant 3 : index
    %c0_305 = arith.constant 0 : index
    %c0_306 = arith.constant 0 : index
    %284 = vector.load %arg3[%c3_304, %c0_305, %c0_306] : memref<6x512x256xf32, #tpu.memory_space<vmem>>, vector<1x512x256xf32>
    %285 = vector.shape_cast %284 : vector<1x512x256xf32> to vector<512x256xf32>
    %cst_307 = arith.constant dense<0.000000e+00> : vector<16x256xf32>
    %286 = tpu.matmul %283, %285, %cst_307 {dimension_numbers = #tpu.dot_dimension_numbers<[1], [0], [0], [1], [0, 0, 1, 1], [], []>} : vector<16x512xf32>, vector<512x256xf32>, vector<16x256xf32> -> vector<16x256xf32>
    %287 = arith.addf %280, %286 : vector<16x256xf32>
    %c2_308 = arith.constant 2 : index
    %c0_309 = arith.constant 0 : index
    %c1_310 = arith.constant 1 : index
    %c0_311 = arith.constant 0 : index
    %288 = vector.load %arg11[%c2_308, %c0_309, %c1_310, %c0_311] : memref<4x2x16x512xf32, #tpu.memory_space<vmem>>, vector<1x2x8x512xf32>
    %289 = vector.shape_cast %288 : vector<1x2x8x512xf32> to vector<2x8x512xf32>
    %290 = vector.shape_cast %289 : vector<2x8x512xf32> to vector<16x512xf32>
    %c4_312 = arith.constant 4 : index
    %c0_313 = arith.constant 0 : index
    %c0_314 = arith.constant 0 : index
    %291 = vector.load %arg3[%c4_312, %c0_313, %c0_314] : memref<6x512x256xf32, #tpu.memory_space<vmem>>, vector<1x512x256xf32>
    %292 = vector.shape_cast %291 : vector<1x512x256xf32> to vector<512x256xf32>
    %cst_315 = arith.constant dense<0.000000e+00> : vector<16x256xf32>
    %293 = tpu.matmul %290, %292, %cst_315 {dimension_numbers = #tpu.dot_dimension_numbers<[1], [0], [0], [1], [0, 0, 1, 1], [], []>} : vector<16x512xf32>, vector<512x256xf32>, vector<16x256xf32> -> vector<16x256xf32>
    %294 = arith.addf %287, %293 : vector<16x256xf32>
    %c3_316 = arith.constant 3 : index
    %c0_317 = arith.constant 0 : index
    %c1_318 = arith.constant 1 : index
    %c0_319 = arith.constant 0 : index
    %295 = vector.load %arg11[%c3_316, %c0_317, %c1_318, %c0_319] : memref<4x2x16x512xf32, #tpu.memory_space<vmem>>, vector<1x2x8x512xf32>
    %296 = vector.shape_cast %295 : vector<1x2x8x512xf32> to vector<2x8x512xf32>
    %297 = vector.shape_cast %296 : vector<2x8x512xf32> to vector<16x512xf32>
    %c5_320 = arith.constant 5 : index
    %c0_321 = arith.constant 0 : index
    %c0_322 = arith.constant 0 : index
    %298 = vector.load %arg3[%c5_320, %c0_321, %c0_322] : memref<6x512x256xf32, #tpu.memory_space<vmem>>, vector<1x512x256xf32>
    %299 = vector.shape_cast %298 : vector<1x512x256xf32> to vector<512x256xf32>
    %cst_323 = arith.constant dense<0.000000e+00> : vector<16x256xf32>
    %300 = tpu.matmul %297, %299, %cst_323 {dimension_numbers = #tpu.dot_dimension_numbers<[1], [0], [0], [1], [0, 0, 1, 1], [], []>} : vector<16x512xf32>, vector<512x256xf32>, vector<16x256xf32> -> vector<16x256xf32>
    %301 = arith.addf %294, %300 : vector<16x256xf32>
    %c0_324 = arith.constant 0 : index
    %c0_325 = arith.constant 0 : index
    %302 = vector.load %arg4[%c0_324, %c0_325] : memref<1x256xf32, #tpu.memory_space<vmem>>, vector<1x256xf32>
    %303 = vector.broadcast %302 : vector<1x256xf32> to vector<16x256xf32>
    %304 = arith.addf %301, %303 : vector<16x256xf32>
    %305 = vector.shape_cast %304 : vector<16x256xf32> to vector<2x8x256xf32>
    %306 = tpu.iota {dimensions = array<i32: 1>} : vector<2x8x256xi32>
    %c6_i32 = arith.constant 6 : i32
    %307 = vector.broadcast %c6_i32 : i32 to vector<2x8x256xi32>
    %308 = arith.cmpi slt, %306, %307 : vector<2x8x256xi32>
    %c5_i32 = arith.constant 5 : i32
    %309 = vector.broadcast %c5_i32 : i32 to vector<2x8x256xi32>
    %310 = arith.cmpi slt, %306, %309 : vector<2x8x256xi32>
    %cst_326 = arith.constant 0.000000e+00 : f32
    %311 = vector.broadcast %cst_326 : f32 to vector<2x8x256xf32>
    %312 = arith.select %308, %260, %311 : vector<2x8x256xi1>, vector<2x8x256xf32>
    %cst_327 = arith.constant 0.000000e+00 : f32
    %313 = vector.broadcast %cst_327 : f32 to vector<2x8x256xf32>
    %314 = arith.select %310, %305, %313 : vector<2x8x256xi1>, vector<2x8x256xf32>
    %315 = arith.addf %312, %314 : vector<2x8x256xf32>
    %cst_328 = arith.constant dense<0.000000e+00> : vector<8x256xf32>
    %316 = vector.multi_reduction <add>, %315, %cst_328 [0] : vector<2x8x256xf32> to vector<8x256xf32>
    %cst_329 = arith.constant dense<0.000000e+00> : vector<256xf32>
    %317 = vector.multi_reduction <add>, %316, %cst_329 [0] : vector<8x256xf32> to vector<256xf32>
    %318 = vector.shape_cast %317 : vector<256xf32> to vector<1x256xf32>
    %319 = vector.shape_cast %318 : vector<1x256xf32> to vector<1x256xf32>
    %320 = vector.broadcast %319 : vector<1x256xf32> to vector<8x256xf32>
    %c0_330 = arith.constant 0 : index
    %c0_331 = arith.constant 0 : index
    %321 = vector.load %arg9[%c0_330, %c0_331] : memref<256x256xf32, #tpu.memory_space<vmem>>, vector<256x256xf32>
    %cst_332 = arith.constant dense<0.000000e+00> : vector<8x256xf32>
    %322 = tpu.matmul %320, %321, %cst_332 {dimension_numbers = #tpu.dot_dimension_numbers<[1], [0], [0], [1], [0, 0, 1, 1], [], []>} : vector<8x256xf32>, vector<256x256xf32>, vector<8x256xf32> -> vector<8x256xf32>
    %323 = vector.shape_cast %322 : vector<8x256xf32> to vector<1x8x256xf32>
    %324 = vector.broadcast %323 : vector<1x8x256xf32> to vector<2x8x256xf32>
    %325 = arith.subf %260, %324 : vector<2x8x256xf32>
    %cst_333 = arith.constant 0.000000e+00 : f32
    %326 = vector.broadcast %cst_333 : f32 to vector<2x8x256xf32>
    %327 = arith.select %308, %325, %326 : vector<2x8x256xi1>, vector<2x8x256xf32>
    %328 = vector.shape_cast %322 : vector<8x256xf32> to vector<1x8x256xf32>
    %329 = vector.broadcast %328 : vector<1x8x256xf32> to vector<2x8x256xf32>
    %330 = arith.subf %305, %329 : vector<2x8x256xf32>
    %cst_334 = arith.constant 0.000000e+00 : f32
    %331 = vector.broadcast %cst_334 : f32 to vector<2x8x256xf32>
    %332 = arith.select %310, %330, %331 : vector<2x8x256xi1>, vector<2x8x256xf32>
    %333 = arith.mulf %327, %327 : vector<2x8x256xf32>
    %334 = arith.mulf %332, %332 : vector<2x8x256xf32>
    %335 = arith.addf %333, %334 : vector<2x8x256xf32>
    %cst_335 = arith.constant dense<0.000000e+00> : vector<8x256xf32>
    %336 = vector.multi_reduction <add>, %335, %cst_335 [0] : vector<2x8x256xf32> to vector<8x256xf32>
    %cst_336 = arith.constant dense<0.000000e+00> : vector<256xf32>
    %337 = vector.multi_reduction <add>, %336, %cst_336 [0] : vector<8x256xf32> to vector<256xf32>
    %338 = vector.shape_cast %337 : vector<256xf32> to vector<1x256xf32>
    %339 = vector.shape_cast %338 : vector<1x256xf32> to vector<1x256xf32>
    %340 = vector.broadcast %339 : vector<1x256xf32> to vector<8x256xf32>
    %c0_337 = arith.constant 0 : index
    %c0_338 = arith.constant 0 : index
    %341 = vector.load %arg9[%c0_337, %c0_338] : memref<256x256xf32, #tpu.memory_space<vmem>>, vector<256x256xf32>
    %cst_339 = arith.constant dense<0.000000e+00> : vector<8x256xf32>
    %342 = tpu.matmul %340, %341, %cst_339 {dimension_numbers = #tpu.dot_dimension_numbers<[1], [0], [0], [1], [0, 0, 1, 1], [], []>} : vector<8x256xf32>, vector<256x256xf32>, vector<8x256xf32> -> vector<8x256xf32>
    %cst_340 = arith.constant 9.99999974E-6 : f32
    %343 = vector.broadcast %cst_340 : f32 to vector<8x256xf32>
    %344 = arith.addf %342, %343 : vector<8x256xf32>
    %345 = math.rsqrt %344 : vector<8x256xf32>
    %346 = vector.shape_cast %322 : vector<8x256xf32> to vector<1x8x256xf32>
    %347 = vector.broadcast %346 : vector<1x8x256xf32> to vector<2x8x256xf32>
    %348 = arith.subf %260, %347 : vector<2x8x256xf32>
    %349 = vector.shape_cast %345 : vector<8x256xf32> to vector<1x8x256xf32>
    %350 = vector.broadcast %349 : vector<1x8x256xf32> to vector<2x8x256xf32>
    %351 = arith.mulf %348, %350 : vector<2x8x256xf32>
    %c0_341 = arith.constant 0 : index
    %c0_342 = arith.constant 0 : index
    %352 = vector.load %arg5[%c0_341, %c0_342] : memref<1x256xf32, #tpu.memory_space<vmem>>, vector<1x256xf32>
    %353 = vector.shape_cast %352 : vector<1x256xf32> to vector<1x1x256xf32>
    %354 = vector.broadcast %353 : vector<1x1x256xf32> to vector<2x8x256xf32>
    %355 = arith.mulf %351, %354 : vector<2x8x256xf32>
    %c0_343 = arith.constant 0 : index
    %c0_344 = arith.constant 0 : index
    %356 = vector.load %arg6[%c0_343, %c0_344] : memref<1x256xf32, #tpu.memory_space<vmem>>, vector<1x256xf32>
    %357 = vector.shape_cast %356 : vector<1x256xf32> to vector<1x1x256xf32>
    %358 = vector.broadcast %357 : vector<1x1x256xf32> to vector<2x8x256xf32>
    %359 = arith.addf %355, %358 : vector<2x8x256xf32>
    %cst_345 = arith.constant 0.000000e+00 : f32
    %360 = vector.broadcast %cst_345 : f32 to vector<2x8x256xf32>
    %361 = arith.cmpf ogt, %359, %360 : vector<2x8x256xf32>
    %cst_346 = arith.constant 2.000000e-01 : f32
    %362 = vector.broadcast %cst_346 : f32 to vector<2x8x256xf32>
    %363 = arith.mulf %362, %359 : vector<2x8x256xf32>
    %364 = arith.select %361, %359, %363 : vector<2x8x256xi1>, vector<2x8x256xf32>
    %365 = vector.shape_cast %322 : vector<8x256xf32> to vector<1x8x256xf32>
    %366 = vector.broadcast %365 : vector<1x8x256xf32> to vector<2x8x256xf32>
    %367 = arith.subf %305, %366 : vector<2x8x256xf32>
    %368 = vector.shape_cast %345 : vector<8x256xf32> to vector<1x8x256xf32>
    %369 = vector.broadcast %368 : vector<1x8x256xf32> to vector<2x8x256xf32>
    %370 = arith.mulf %367, %369 : vector<2x8x256xf32>
    %c0_347 = arith.constant 0 : index
    %c0_348 = arith.constant 0 : index
    %371 = vector.load %arg5[%c0_347, %c0_348] : memref<1x256xf32, #tpu.memory_space<vmem>>, vector<1x256xf32>
    %372 = vector.shape_cast %371 : vector<1x256xf32> to vector<1x1x256xf32>
    %373 = vector.broadcast %372 : vector<1x1x256xf32> to vector<2x8x256xf32>
    %374 = arith.mulf %370, %373 : vector<2x8x256xf32>
    %c0_349 = arith.constant 0 : index
    %c0_350 = arith.constant 0 : index
    %375 = vector.load %arg6[%c0_349, %c0_350] : memref<1x256xf32, #tpu.memory_space<vmem>>, vector<1x256xf32>
    %376 = vector.shape_cast %375 : vector<1x256xf32> to vector<1x1x256xf32>
    %377 = vector.broadcast %376 : vector<1x1x256xf32> to vector<2x8x256xf32>
    %378 = arith.addf %374, %377 : vector<2x8x256xf32>
    %cst_351 = arith.constant 0.000000e+00 : f32
    %379 = vector.broadcast %cst_351 : f32 to vector<2x8x256xf32>
    %380 = arith.cmpf ogt, %378, %379 : vector<2x8x256xf32>
    %cst_352 = arith.constant 2.000000e-01 : f32
    %381 = vector.broadcast %cst_352 : f32 to vector<2x8x256xf32>
    %382 = arith.mulf %381, %378 : vector<2x8x256xf32>
    %383 = arith.select %380, %378, %382 : vector<2x8x256xi1>, vector<2x8x256xf32>
    %c0_353 = arith.constant 0 : index
    %c0_354 = arith.constant 0 : index
    %c0_355 = arith.constant 0 : index
    %c0_356 = arith.constant 0 : index
    %384 = vector.load %arg12[%c0_353, %c0_354, %c0_355, %c0_356] : memref<2x2x16x256xf32, #tpu.memory_space<vmem>>, vector<1x2x8x256xf32>
    %385 = vector.shape_cast %384 : vector<1x2x8x256xf32> to vector<2x8x256xf32>
    %386 = vector.shape_cast %364 : vector<2x8x256xf32> to vector<1x2x8x256xf32>
    tpu.vector_store %arg12[%c0_353, %c0_354, %c0_355, %c0_356], %386 {strides = array<i32>} : memref<2x2x16x256xf32, #tpu.memory_space<vmem>>, vector<1x2x8x256xf32>,
    %c1_357 = arith.constant 1 : index
    %c0_358 = arith.constant 0 : index
    %c0_359 = arith.constant 0 : index
    %c0_360 = arith.constant 0 : index
    %387 = vector.load %arg12[%c1_357, %c0_358, %c0_359, %c0_360] : memref<2x2x16x256xf32, #tpu.memory_space<vmem>>, vector<1x2x8x256xf32>
    %388 = vector.shape_cast %387 : vector<1x2x8x256xf32> to vector<2x8x256xf32>
    %389 = vector.shape_cast %383 : vector<2x8x256xf32> to vector<1x2x8x256xf32>
    tpu.vector_store %arg12[%c1_357, %c0_358, %c0_359, %c0_360], %389 {strides = array<i32>} : memref<2x2x16x256xf32, #tpu.memory_space<vmem>>, vector<1x2x8x256xf32>,
    %c0_361 = arith.constant 0 : index
    %c0_362 = arith.constant 0 : index
    %c0_363 = arith.constant 0 : index
    %c0_364 = arith.constant 0 : index
    %390 = vector.load %arg12[%c0_361, %c0_362, %c0_363, %c0_364] : memref<2x2x16x256xf32, #tpu.memory_space<vmem>>, vector<1x2x8x256xf32>
    %391 = vector.shape_cast %390 : vector<1x2x8x256xf32> to vector<2x8x256xf32>
    %392 = vector.shape_cast %391 : vector<2x8x256xf32> to vector<16x256xf32>
    %c0_365 = arith.constant 0 : index
    %c0_366 = arith.constant 0 : index
    %c0_367 = arith.constant 0 : index
    %393 = vector.load %arg7[%c0_365, %c0_366, %c0_367] : memref<6x256x128xf32, #tpu.memory_space<vmem>>, vector<1x256x128xf32>
    %394 = vector.shape_cast %393 : vector<1x256x128xf32> to vector<256x128xf32>
    %cst_368 = arith.constant dense<0.000000e+00> : vector<16x128xf32>
    %395 = tpu.matmul %392, %394, %cst_368 {dimension_numbers = #tpu.dot_dimension_numbers<[1], [0], [0], [1], [0, 0, 1, 1], [], []>} : vector<16x256xf32>, vector<256x128xf32>, vector<16x128xf32> -> vector<16x128xf32>
    %c1_369 = arith.constant 1 : index
    %c0_370 = arith.constant 0 : index
    %c0_371 = arith.constant 0 : index
    %c0_372 = arith.constant 0 : index
    %396 = vector.load %arg12[%c1_369, %c0_370, %c0_371, %c0_372] : memref<2x2x16x256xf32, #tpu.memory_space<vmem>>, vector<1x2x8x256xf32>
    %397 = vector.shape_cast %396 : vector<1x2x8x256xf32> to vector<2x8x256xf32>
    %398 = vector.shape_cast %397 : vector<2x8x256xf32> to vector<16x256xf32>
    %c1_373 = arith.constant 1 : index
    %c0_374 = arith.constant 0 : index
    %c0_375 = arith.constant 0 : index
    %399 = vector.load %arg7[%c1_373, %c0_374, %c0_375] : memref<6x256x128xf32, #tpu.memory_space<vmem>>, vector<1x256x128xf32>
    %400 = vector.shape_cast %399 : vector<1x256x128xf32> to vector<256x128xf32>
    %cst_376 = arith.constant dense<0.000000e+00> : vector<16x128xf32>
    %401 = tpu.matmul %398, %400, %cst_376 {dimension_numbers = #tpu.dot_dimension_numbers<[1], [0], [0], [1], [0, 0, 1, 1], [], []>} : vector<16x256xf32>, vector<256x128xf32>, vector<16x128xf32> -> vector<16x128xf32>
    %402 = arith.addf %395, %401 : vector<16x128xf32>
    %c0_377 = arith.constant 0 : index
    %c0_378 = arith.constant 0 : index
    %c1_379 = arith.constant 1 : index
    %c0_380 = arith.constant 0 : index
    %403 = vector.load %arg12[%c0_377, %c0_378, %c1_379, %c0_380] : memref<2x2x16x256xf32, #tpu.memory_space<vmem>>, vector<1x2x8x256xf32>
    %404 = vector.shape_cast %403 : vector<1x2x8x256xf32> to vector<2x8x256xf32>
    %405 = vector.shape_cast %404 : vector<2x8x256xf32> to vector<16x256xf32>
    %c2_381 = arith.constant 2 : index
    %c0_382 = arith.constant 0 : index
    %c0_383 = arith.constant 0 : index
    %406 = vector.load %arg7[%c2_381, %c0_382, %c0_383] : memref<6x256x128xf32, #tpu.memory_space<vmem>>, vector<1x256x128xf32>
    %407 = vector.shape_cast %406 : vector<1x256x128xf32> to vector<256x128xf32>
    %cst_384 = arith.constant dense<0.000000e+00> : vector<16x128xf32>
    %408 = tpu.matmul %405, %407, %cst_384 {dimension_numbers = #tpu.dot_dimension_numbers<[1], [0], [0], [1], [0, 0, 1, 1], [], []>} : vector<16x256xf32>, vector<256x128xf32>, vector<16x128xf32> -> vector<16x128xf32>
    %409 = arith.addf %402, %408 : vector<16x128xf32>
    %c1_385 = arith.constant 1 : index
    %c0_386 = arith.constant 0 : index
    %c1_387 = arith.constant 1 : index
    %c0_388 = arith.constant 0 : index
    %410 = vector.load %arg12[%c1_385, %c0_386, %c1_387, %c0_388] : memref<2x2x16x256xf32, #tpu.memory_space<vmem>>, vector<1x2x8x256xf32>
    %411 = vector.shape_cast %410 : vector<1x2x8x256xf32> to vector<2x8x256xf32>
    %412 = vector.shape_cast %411 : vector<2x8x256xf32> to vector<16x256xf32>
    %c3_389 = arith.constant 3 : index
    %c0_390 = arith.constant 0 : index
    %c0_391 = arith.constant 0 : index
    %413 = vector.load %arg7[%c3_389, %c0_390, %c0_391] : memref<6x256x128xf32, #tpu.memory_space<vmem>>, vector<1x256x128xf32>
    %414 = vector.shape_cast %413 : vector<1x256x128xf32> to vector<256x128xf32>
    %cst_392 = arith.constant dense<0.000000e+00> : vector<16x128xf32>
    %415 = tpu.matmul %412, %414, %cst_392 {dimension_numbers = #tpu.dot_dimension_numbers<[1], [0], [0], [1], [0, 0, 1, 1], [], []>} : vector<16x256xf32>, vector<256x128xf32>, vector<16x128xf32> -> vector<16x128xf32>
    %416 = arith.addf %409, %415 : vector<16x128xf32>
    %c0_393 = arith.constant 0 : index
    %c0_394 = arith.constant 0 : index
    %c2_395 = arith.constant 2 : index
    %c0_396 = arith.constant 0 : index
    %417 = vector.load %arg12[%c0_393, %c0_394, %c2_395, %c0_396] : memref<2x2x16x256xf32, #tpu.memory_space<vmem>>, vector<1x2x8x256xf32>
    %418 = vector.shape_cast %417 : vector<1x2x8x256xf32> to vector<2x8x256xf32>
    %419 = vector.shape_cast %418 : vector<2x8x256xf32> to vector<16x256xf32>
    %c4_397 = arith.constant 4 : index
    %c0_398 = arith.constant 0 : index
    %c0_399 = arith.constant 0 : index
    %420 = vector.load %arg7[%c4_397, %c0_398, %c0_399] : memref<6x256x128xf32, #tpu.memory_space<vmem>>, vector<1x256x128xf32>
    %421 = vector.shape_cast %420 : vector<1x256x128xf32> to vector<256x128xf32>
    %cst_400 = arith.constant dense<0.000000e+00> : vector<16x128xf32>
    %422 = tpu.matmul %419, %421, %cst_400 {dimension_numbers = #tpu.dot_dimension_numbers<[1], [0], [0], [1], [0, 0, 1, 1], [], []>} : vector<16x256xf32>, vector<256x128xf32>, vector<16x128xf32> -> vector<16x128xf32>
    %423 = arith.addf %416, %422 : vector<16x128xf32>
    %c1_401 = arith.constant 1 : index
    %c0_402 = arith.constant 0 : index
    %c2_403 = arith.constant 2 : index
    %c0_404 = arith.constant 0 : index
    %424 = vector.load %arg12[%c1_401, %c0_402, %c2_403, %c0_404] : memref<2x2x16x256xf32, #tpu.memory_space<vmem>>, vector<1x2x8x256xf32>
    %425 = vector.shape_cast %424 : vector<1x2x8x256xf32> to vector<2x8x256xf32>
    %426 = vector.shape_cast %425 : vector<2x8x256xf32> to vector<16x256xf32>
    %c5_405 = arith.constant 5 : index
    %c0_406 = arith.constant 0 : index
    %c0_407 = arith.constant 0 : index
    %427 = vector.load %arg7[%c5_405, %c0_406, %c0_407] : memref<6x256x128xf32, #tpu.memory_space<vmem>>, vector<1x256x128xf32>
    %428 = vector.shape_cast %427 : vector<1x256x128xf32> to vector<256x128xf32>
    %cst_408 = arith.constant dense<0.000000e+00> : vector<16x128xf32>
    %429 = tpu.matmul %426, %428, %cst_408 {dimension_numbers = #tpu.dot_dimension_numbers<[1], [0], [0], [1], [0, 0, 1, 1], [], []>} : vector<16x256xf32>, vector<256x128xf32>, vector<16x128xf32> -> vector<16x128xf32>
    %430 = arith.addf %423, %429 : vector<16x128xf32>
    %c0_409 = arith.constant 0 : index
    %c0_410 = arith.constant 0 : index
    %431 = vector.load %arg8[%c0_409, %c0_410] : memref<1x128xf32, #tpu.memory_space<vmem>>, vector<1x128xf32>
    %432 = vector.broadcast %431 : vector<1x128xf32> to vector<16x128xf32>
    %433 = arith.addf %430, %432 : vector<16x128xf32>
    %434 = arith.negf %433 : vector<16x128xf32>
    %435 = math.exp %434 : vector<16x128xf32>
    %cst_411 = arith.constant 1.000000e+00 : f32
    %436 = vector.broadcast %cst_411 : f32 to vector<16x128xf32>
    %437 = arith.addf %436, %435 : vector<16x128xf32>
    %438 = arith.divf %436, %437 : vector<16x128xf32>
    %c0_412 = arith.constant 0 : index
    %c0_413 = arith.constant 0 : index
    %439 = vector.load %arg10[%c0_412, %c0_413] : memref<16x128xf32, #tpu.memory_space<vmem>>, vector<16x128xf32>
    tpu.vector_store %arg10[%c0_412, %c0_413], %438 {strides = array<i32>} : memref<16x128xf32, #tpu.memory_space<vmem>>, vector<16x128xf32>,
    return
  }
}

</mosaic_0001>

<bundles_post_ra>
// kernel: tile.28
= control target key start
LH: loop header
LB: loop body
LE: loop exit
PB: predicated region body
PF: predicated region fallthrough
CT: control target
= control target key end

     0   :  { %s40_s0 = inlined_call_operand.vmem [shape: f32[16], index: 0, kind: input, shape index: {}]   ;;  %s41_s1 = inlined_call_operand.vmem [shape: f32[32,16], index: 1, kind: output, shape index: {}]  }
   0x1   :  { %v4_v0 = vld [vmem:[%s40_s0] ss:$0 sm:$0xff] }
   0x2   :  { %5 = vst [vmem:[%s41_s1] sm:$0xff] %v4_v0  ;;  %12 = vst [vmem:[%s41_s1 + $0x8] sm:$0xff] %v4_v0 }
   0x3   :  { %13 = vst [vmem:[%s41_s1 + $0x10] sm:$0xff] %v4_v0  ;;  %14 = vst [vmem:[%s41_s1 + $0x18] sm:$0xff] %v4_v0 }

// kernel: tile.29
= control target key start
LH: loop header
LB: loop body
LE: loop exit
PB: predicated region body
PF: predicated region fallthrough
CT: control target
= control target key end

     0   :  { %s89_s8 = smov 112   ;;  %s90_s11 = smov 80   ;;  %vm3_vm0 = vcmask 130048   ;;  %vm9_vm1 = vcmask 1048448   ;;  %vm15_vm2 = vcmask 917248   ;;  %vm21_vm3 = vcmask 786048   ;;  %s142_s0 = inlined_call_operand.vmem [shape: f32[32,16], index: 0, kind: input, shape index: {}]   ;;  %s143_s1 = inlined_call_operand.vmem [shape: f32[1,512], index: 1, kind: output, shape index: {}]  }
   0x1   :  { %v72_v0 = vld [vmem:[%s142_s0 + $0x7] ss:$8 sm:$0xf]   ;;  %v74_v1 = vld [vmem:[%s142_s0 + $0x5] ss:$8 sm:$0xf]  }
   0x2   :  { %7 = vrot.lane.b32.xlu0 %v72_v0, %s89_s8  ;;  %19 = vrot.lane.b32.xlu1 %v74_v1, %s90_s11  ;;  %v73_v2 = vld [vmem:[%s142_s0 + $0x6] ss:$8 sm:$0xf]   ;;  %v75_v3 = vld [vmem:[%s142_s0 + $0x4] ss:$8 sm:$0xf]  }
   0x3   :  { %s91_s16 = smov 96   ;;  %v2_v4 = vld [vmem:[%s142_s0] ss:$8 sm:$0xf]   ;;  %s92_s19 = smov 64   ;;  %vm27_vm4 = vcmask 654848  }
   0x4   :  { %v76_v5 = vld [vmem:[%s142_s0 + $0x3] ss:$8 sm:$0xf]   ;;  %4 = vst.msk [vmem:[#allocation0] ss:$8 sm:$0xf] %vm3_vm0, %v2_v4  }
   0x5   :  { %v77_v6 = vld [vmem:[%s142_s0 + $0x2] ss:$8 sm:$0xf]   ;;  %s93_s24 = smov 48   ;;  %s94_s25 = smov 32   ;;  %vm33_vm5 = vcmask 523648  }
   0x6   :  { %13 = vrot.lane.b32.xlu0 %v73_v2, %s91_s16  ;;  %25 = vrot.lane.b32.xlu1 %v75_v3, %s92_s19  ;;  %v78_v7 = vld [vmem:[%s142_s0 + $0x1] ss:$8 sm:$0xf]   ;;  %s95_s0 = smov 16   ;;  %vm39_vm6 = vcmask 392448   ;;  %vm45_vm7 = vcmask 261248  }
   0xa   :  { %31 = vrot.lane.b32.xlu0 %v76_v5, %s93_s24  ;;  %37 = vrot.lane.b32.xlu1 %v77_v6, %s94_s25 }
   0xe   :  { %43 = vrot.lane.b32.xlu0 %v78_v7, %s95_s0 }
  0x74   :  { %v8_v8 = vpop.permute.xlu0 %7   ;;  %v20_v9 = vpop.permute.xlu1 %19  }
  0x75   :  { %10 = vst.msk [vmem:[#allocation0] ss:$8 sm:$0xf] %vm9_vm1, %v8_v8  }
  0x78   :  { %v14_v10 = vpop.permute.xlu0 %13   ;;  %v26_v11 = vpop.permute.xlu1 %25  }
  0x79   :  { %16 = vst.msk [vmem:[#allocation0] ss:$8 sm:$0xf] %vm15_vm2, %v14_v10  }
  0x7a   :  { %22 = vst.msk [vmem:[#allocation0] ss:$8 sm:$0xf] %vm21_vm3, %v20_v9  }
  0x7b   :  { %28 = vst.msk [vmem:[#allocation0] ss:$8 sm:$0xf] %vm27_vm4, %v26_v11  }
  0x7c   :  { %v32_v12 = vpop.permute.xlu0 %31   ;;  %v38_v13 = vpop.permute.xlu1 %37  }
  0x7d   :  { %34 = vst.msk [vmem:[#allocation0] ss:$8 sm:$0xf] %vm33_vm5, %v32_v12  }
  0x7e   :  { %40 = vst.msk [vmem:[#allocation0] ss:$8 sm:$0xf] %vm39_vm6, %v38_v13  }
  0x80   :  { %v44_v14 = vpop.permute.xlu0 %43  }
  0x81   :  { %46 = vst.msk [vmem:[#allocation0] ss:$8 sm:$0xf] %vm45_vm7, %v44_v14  }
  0x88   :  { %v50_v15 = vld [vmem:[#allocation0] sm:$0x1]  ;;  %v54_v16 = vld [vmem:[#allocation0 + $0x8] sm:$0x1]  ;;  %v59_v17 = vld [vmem:[#allocation0 + $0x10] sm:$0x1] }
  0x89   :  { %52 = vst [vmem:[%s143_s1] sm:$0x1] %v50_v15  ;;  %79 = vst [vmem:[%s143_s1 + $0x1] sm:$0x1] %v54_v16  ;;  %v65_v18 = vld [vmem:[#allocation0 + $0x18] sm:$0x1] }
  0x8a   :  { %80 = vst [vmem:[%s143_s1 + $0x2] sm:$0x1] %v59_v17  ;;  %81 = vst [vmem:[%s143_s1 + $0x3] sm:$0x1] %v65_v18 }

// kernel: tile.33
= control target key start
LH: loop header
LB: loop body
LE: loop exit
PB: predicated region body
PF: predicated region fallthrough
CT: control target
= control target key end

     0   :  { %s28_s0 = inlined_call_operand.vmem [shape: f32[16], index: 0, kind: input, shape index: {}]   ;;  %s29_s1 = inlined_call_operand.vmem [shape: f32[16,16], index: 1, kind: output, shape index: {}]  }
   0x1   :  { %v4_v0 = vld [vmem:[%s28_s0] ss:$0 sm:$0xff] }
   0x2   :  { %5 = vst [vmem:[%s29_s1] sm:$0xff] %v4_v0  ;;  %8 = vst [vmem:[%s29_s1 + $0x8] sm:$0xff] %v4_v0 }

// kernel: tile.34
= control target key start
LH: loop header
LB: loop body
LE: loop exit
PB: predicated region body
PF: predicated region fallthrough
CT: control target
= control target key end

     0   :  { %s7_s6 = smov 3  ;;  %s21_s9 = smov 3  ;;  %vm4_vm0 = vcmask 130048   ;;  %vm11_vm1 = vcmask 1048448   ;;  %vm18_vm2 = vcmask 917248   ;;  %vm25_vm3 = vcmask 786048   ;;  %s128_s0 = inlined_call_operand.vmem [shape: f32[16,16], index: 0, kind: input, shape index: {}]   ;;  %s129_s1 = inlined_call_operand.vmem [shape: f32[1,256], index: 1, kind: output, shape index: {}]  }
   0x1   :  { %v66_v0 = vld [vmem:[%s128_s0 + $0x7] ss:$8 sm:%s7_s6]   ;;  %s81_s10 = smov 112   ;;  %v68_v1 = vld [vmem:[%s128_s0 + $0x5] ss:$8 sm:%s21_s9]   ;;  %s14_s13 = smov 3 }
   0x2   :  { %9 = vrot.lane.b32.xlu0 %v66_v0, %s81_s10  ;;  %s82_s14 = smov 80   ;;  %v67_v2 = vld [vmem:[%s128_s0 + $0x6] ss:$8 sm:%s14_s13]   ;;  %s28_s17 = smov 3  ;;  %vm32_vm4 = vcmask 654848   ;;  %vm39_vm5 = vcmask 523648  }
   0x3   :  { %23 = vrot.lane.b32.xlu1 %v68_v1, %s82_s14  ;;  %v69_v3 = vld [vmem:[%s128_s0 + $0x4] ss:$8 sm:%s28_s17]   ;;  %s35_s20 = smov 3  ;;  %s42_s21 = smov 3  ;;  %vm46_vm6 = vcmask 392448   ;;  %vm53_vm7 = vcmask 261248  }
   0x4   :  { %s83_s22 = smov 96   ;;  %s84_s23 = smov 64   ;;  %v70_v4 = vld [vmem:[%s128_s0 + $0x3] ss:$8 sm:%s35_s20]   ;;  %v71_v5 = vld [vmem:[%s128_s0 + $0x2] ss:$8 sm:%s42_s21]  }
   0x5   :  { %s2_s26 = smov 3  ;;  %s49_s29 = smov 3 }
   0x6   :  { %16 = vrot.lane.b32.xlu0 %v67_v2, %s83_s22  ;;  %v3_v6 = vld [vmem:[%s128_s0] ss:$8 sm:%s2_s26]   ;;  %s85_s3 = smov 48   ;;  %s86_s4 = smov 32  }
   0x7   :  { %30 = vrot.lane.b32.xlu1 %v69_v3, %s84_s23  ;;  %5 = vst.msk [vmem:[#allocation0] ss:$8 sm:$0x3] %vm4_vm0, %v3_v6   ;;  %v72_v7 = vld [vmem:[%s128_s0 + $0x1] ss:$8 sm:%s49_s29]   ;;  %s87_s0 = smov 16  }
   0xa   :  { %37 = vrot.lane.b32.xlu0 %v70_v4, %s85_s3 }
   0xb   :  { %44 = vrot.lane.b32.xlu1 %v71_v5, %s86_s4 }
   0xe   :  { %51 = vrot.lane.b32.xlu0 %v72_v7, %s87_s0 }
  0x74   :  { %v10_v8 = vpop.permute.xlu0 %9  }
  0x75   :  { %12 = vst.msk [vmem:[#allocation0] ss:$8 sm:$0x3] %vm11_vm1, %v10_v8   ;;  %v24_v9 = vpop.permute.xlu1 %23  }
  0x78   :  { %v17_v10 = vpop.permute.xlu0 %16  }
  0x79   :  { %19 = vst.msk [vmem:[#allocation0] ss:$8 sm:$0x3] %vm18_vm2, %v17_v10   ;;  %v31_v11 = vpop.permute.xlu1 %30  }
  0x7a   :  { %26 = vst.msk [vmem:[#allocation0] ss:$8 sm:$0x3] %vm25_vm3, %v24_v9  }
  0x7b   :  { %33 = vst.msk [vmem:[#allocation0] ss:$8 sm:$0x3] %vm32_vm4, %v31_v11  }
  0x7c   :  { %v38_v12 = vpop.permute.xlu0 %37  }
  0x7d   :  { %40 = vst.msk [vmem:[#allocation0] ss:$8 sm:$0x3] %vm39_vm5, %v38_v12   ;;  %v45_v13 = vpop.permute.xlu1 %44  }
  0x7e   :  { %47 = vst.msk [vmem:[#allocation0] ss:$8 sm:$0x3] %vm46_vm6, %v45_v13  }
  0x80   :  { %v52_v14 = vpop.permute.xlu0 %51  }
  0x81   :  { %54 = vst.msk [vmem:[#allocation0] ss:$8 sm:$0x3] %vm53_vm7, %v52_v14  }
  0x88   :  { %v58_v15 = vld [vmem:[#allocation0] sm:$0x1]  ;;  %v62_v16 = vld [vmem:[#allocation0 + $0x8] sm:$0x1] }
  0x89   :  { %60 = vst [vmem:[%s129_s1] sm:$0x1] %v58_v15  ;;  %73 = vst [vmem:[%s129_s1 + $0x1] sm:$0x1] %v62_v16 }

// kernel: tile.48
= control target key start
LH: loop header
LB: loop body
LE: loop exit
PB: predicated region body
PF: predicated region fallthrough
CT: control target
= control target key end

     0   :  { %s22_s0 = inlined_call_operand.vmem [shape: f32[16], index: 0, kind: input, shape index: {}]   ;;  %s23_s1 = inlined_call_operand.vmem [shape: f32[8,16], index: 1, kind: output, shape index: {}]  }
   0x1   :  { %v4_v0 = vld [vmem:[%s22_s0] ss:$0 sm:$0xff] }
   0x2   :  { %5 = vst [vmem:[%s23_s1] sm:$0xff] %v4_v0 }

// kernel: tile.49
= control target key start
LH: loop header
LB: loop body
LE: loop exit
PB: predicated region body
PF: predicated region fallthrough
CT: control target
= control target key end

     0   :  { %s67_s10 = smov 112   ;;  %s68_s11 = smov 80   ;;  %vm3_vm0 = vcmask 130048   ;;  %vm9_vm1 = vcmask 1048448   ;;  %vm15_vm2 = vcmask 917248   ;;  %vm21_vm3 = vcmask 786048   ;;  %s111_s0 = inlined_call_operand.vmem [shape: f32[8,16], index: 0, kind: input, shape index: {}]   ;;  %s112_s1 = inlined_call_operand.vmem [shape: f32[1,128], index: 1, kind: output, shape index: {}]  }
   0x1   :  { %v53_v0 = vld [vmem:[%s111_s0 + $0x7] sm:$0x1]   ;;  %v55_v1 = vld [vmem:[%s111_s0 + $0x5] sm:$0x1]   ;;  %v54_v2 = vld [vmem:[%s111_s0 + $0x6] sm:$0x1]  }
   0x2   :  { %7 = vrot.lane.b32.xlu0 %v53_v0, %s67_s10  ;;  %19 = vrot.lane.b32.xlu1 %v55_v1, %s68_s11  ;;  %v56_v3 = vld [vmem:[%s111_s0 + $0x4] sm:$0x1]   ;;  %v2_v4 = vld [vmem:[%s111_s0] sm:$0x1]   ;;  %s69_s18 = smov 96   ;;  %s70_s19 = smov 64  }
   0x3   :  { %4 = vst.msk [vmem:[#allocation0] sm:$0x1] %vm3_vm0, %v2_v4   ;;  %v57_v5 = vld [vmem:[%s111_s0 + $0x3] sm:$0x1]   ;;  %v58_v6 = vld [vmem:[%s111_s0 + $0x2] sm:$0x1]  }
   0x4   :  { %s71_s24 = smov 48   ;;  %s72_s25 = smov 32   ;;  %v59_v7 = vld [vmem:[%s111_s0 + $0x1] sm:$0x1]   ;;  %vm27_vm4 = vcmask 654848   ;;  %vm33_vm5 = vcmask 523648  }
   0x5   :  { %s73_s0 = smov 16   ;;  %vm39_vm6 = vcmask 392448   ;;  %vm45_vm7 = vcmask 261248  }
   0x6   :  { %13 = vrot.lane.b32.xlu0 %v54_v2, %s69_s18  ;;  %25 = vrot.lane.b32.xlu1 %v56_v3, %s70_s19 }
   0xa   :  { %31 = vrot.lane.b32.xlu0 %v57_v5, %s71_s24  ;;  %37 = vrot.lane.b32.xlu1 %v58_v6, %s72_s25 }
   0xe   :  { %43 = vrot.lane.b32.xlu0 %v59_v7, %s73_s0 }
  0x74   :  { %v8_v8 = vpop.permute.xlu0 %7   ;;  %v20_v9 = vpop.permute.xlu1 %19  }
  0x75   :  { %10 = vst.msk [vmem:[#allocation0] sm:$0x1] %vm9_vm1, %v8_v8  }
  0x78   :  { %v14_v10 = vpop.permute.xlu0 %13   ;;  %v26_v11 = vpop.permute.xlu1 %25  }
  0x79   :  { %16 = vst.msk [vmem:[#allocation0] sm:$0x1] %vm15_vm2, %v14_v10  }
  0x7a   :  { %22 = vst.msk [vmem:[#allocation0] sm:$0x1] %vm21_vm3, %v20_v9  }
  0x7b   :  { %28 = vst.msk [vmem:[#allocation0] sm:$0x1] %vm27_vm4, %v26_v11  }
  0x7c   :  { %v32_v12 = vpop.permute.xlu0 %31   ;;  %v38_v13 = vpop.permute.xlu1 %37  }
  0x7d   :  { %34 = vst.msk [vmem:[#allocation0] sm:$0x1] %vm33_vm5, %v32_v12  }
  0x7e   :  { %40 = vst.msk [vmem:[#allocation0] sm:$0x1] %vm39_vm6, %v38_v13  }
  0x80   :  { %v44_v14 = vpop.permute.xlu0 %43  }
  0x81   :  { %46 = vst.msk [vmem:[#allocation0] sm:$0x1] %vm45_vm7, %v44_v14  }
  0x88   :  { %v50_v15 = vld [vmem:[#allocation0] sm:$0x1] }
  0x89   :  { %52 = vst [vmem:[%s112_s1] sm:$0x1] %v50_v15 }

// kernel: discriminator_forward.1
= control target key start
LH: loop header
LB: loop body
LE: loop exit
PB: predicated region body
PF: predicated region fallthrough
CT: control target
= control target key end

     0   :  { %v19685_v3 = vmov 0.0   ;;  %vm121_vm0 = vcmask 326656   ;;  %s19674_s1 = inlined_call_operand.vmem [shape: f32[6,40,512], index: 1, kind: input, shape index: {}]   ;;  %s19675_s0 = inlined_call_operand.vmem [shape: f32[4,2,16,40], index: 0, kind: input, shape index: {}]   ;;  %s19676_s3 = inlined_call_operand.vmem [shape: f32[6,512,256], index: 3, kind: input, shape index: {}]   ;;  %s19677_s2 = inlined_call_operand.vmem [shape: f32[1,512], index: 2, kind: input, shape index: {}]   ;;  %s19678_s9 = inlined_call_operand.vmem [shape: f32[256,256], index: 9, kind: input, shape index: {}]   ;;  %s19679_s4 = inlined_call_operand.vmem [shape: f32[1,256], index: 4, kind: input, shape index: {}]   ;;  %s19680_s7 = inlined_call_operand.vmem [shape: f32[6,256,128], index: 7, kind: input, shape index: {}]   ;;  %s19681_s5 = inlined_call_operand.vmem [shape: f32[1,256], index: 5, kind: input, shape index: {}]   ;;  %s19682_s6 = inlined_call_operand.vmem [shape: f32[1,256], index: 6, kind: input, shape index: {}]   ;;  %s19683_s8 = inlined_call_operand.vmem [shape: f32[1,128], index: 8, kind: input, shape index: {}]   ;;  %s19684_s10 = inlined_call_operand.vmem [shape: f32[16,128], index: 10, kind: output, shape index: {}]  }
   0x1   :  { %v8976_v0 = vld [vmem:[%s19674_s1 + $0xa8] sm:$0xff]  ;;  %v8975_v2 = vld [vmem:[%s19674_s1 + $0xa0] sm:$0xff]  ;;  %192 = vmatprep.mubr.f32.mxu0 %v19685_v3  ;;  %35 = vst [vmem:[#allocation2 + $0x20] sm:$0xff] %v19685_v3  ;;  %36 = vst [vmem:[#allocation2 + $0x28] sm:$0xff] %v19685_v3  ;;  %269 = vmatprep.mubr.f32.mxu1 %v19685_v3 }
   0x2   :  { %v8980_v1 = vld [vmem:[%s19674_s1 + $0xc8] sm:$0xff]  ;;  %37 = vst [vmem:[#allocation2 + $0x30] sm:$0xff] %v19685_v3  ;;  %38 = vst [vmem:[#allocation2 + $0x38] sm:$0xff] %v19685_v3  ;;  %v8979_v5 = vld [vmem:[%s19674_s1 + $0xc0] sm:$0xff] }
   0x3   :  { %39 = vst [vmem:[#allocation2 + $0x60] sm:$0xff] %v19685_v3  ;;  %40 = vst [vmem:[#allocation2 + $0x68] sm:$0xff] %v19685_v3  ;;  %v13153_v4 = vpack.c.bf16 %v8980_v1, %v8976_v0  ;;  %v8984_v6 = vld [vmem:[%s19674_s1 + $0xe8] sm:$0xff]  ;;  %v13164_v8 = vpack.c.bf16 %v8979_v5, %v8975_v2  ;;  %v8983_v10 = vld [vmem:[%s19674_s1 + $0xe0] sm:$0xff] }
   0x4   :  { %41 = vst [vmem:[#allocation2 + $0x70] sm:$0xff] %v19685_v3  ;;  %42 = vst [vmem:[#allocation2 + $0x78] sm:$0xff] %v19685_v3  ;;  %v8988_v7 = vld [vmem:[%s19674_s1 + $0x108] sm:$0xff]  ;;  %v8987_v11 = vld [vmem:[%s19674_s1 + $0x100] sm:$0xff] }
   0x5   :  { %43 = vst [vmem:[#allocation2 + $0xa0] sm:$0xff] %v19685_v3  ;;  %44 = vst [vmem:[#allocation2 + $0xa8] sm:$0xff] %v19685_v3  ;;  %v13166_v9 = vpack.c.bf16 %v8988_v7, %v8984_v6  ;;  %10537 = vmatprep.subr.bf16.mxu0 %v13153_v4  ;;  %v13176_v12 = vpack.c.bf16 %v8987_v11, %v8983_v10  ;;  %v13181_v13 = vld [vmem:[%s19674_s1 + $0x128] sm:$0xff]  ;;  %v8978_v15 = vld [vmem:[%s19674_s1 + $0xb8] sm:$0xff] }
   0x6   :  { %45 = vst [vmem:[#allocation2 + $0xb0] sm:$0xff] %v19685_v3  ;;  %46 = vst [vmem:[#allocation2 + $0xb8] sm:$0xff] %v19685_v3  ;;  %10539 = vmatpush1.bf16.msra.mxu0 %v13164_v8  ;;  %v78_v14 = vld [vmem:[%s19674_s1 + $0x8] sm:$0xff]  ;;  %v8982_v16 = vld [vmem:[%s19674_s1 + $0xd8] sm:$0xff] }
   0x7   :  { %47 = vst [vmem:[#allocation2 + $0xe0] sm:$0xff] %v19685_v3  ;;  %48 = vst [vmem:[#allocation2 + $0xe8] sm:$0xff] %v19685_v3  ;;  %10541 = vmatprep.subr.bf16.mxu0 %v13166_v9  ;;  %v8977_v17 = vld [vmem:[%s19674_s1 + $0xb0] sm:$0xff]  ;;  %v82_v18 = vld [vmem:[%s19674_s1 + $0x28] sm:$0xff]  ;;  %v13202_v20 = vpack.c.bf16 %v8982_v16, %v8978_v15 }
   0x8   :  { %49 = vst [vmem:[#allocation2 + $0xf0] sm:$0xff] %v19685_v3  ;;  %50 = vst [vmem:[#allocation2 + $0xf8] sm:$0xff] %v19685_v3  ;;  %v77_v19 = vld [vmem:[%s19674_s1] sm:$0xff]  ;;  %v8981_v21 = vld [vmem:[%s19674_s1 + $0xd0] sm:$0xff]  ;;  %v13235_v30 = vpack.c.bf16 %v82_v18, %v78_v14 }
   0x9   :  { %51 = vst [vmem:[#allocation2 + $0x120] sm:$0xff] %v19685_v3  ;;  %52 = vst [vmem:[#allocation2 + $0x128] sm:$0xff] %v19685_v3  ;;  %v81_v22 = vld [vmem:[%s19674_s1 + $0x20] sm:$0xff]  ;;  %v13210_v23 = vpack.c.bf16 %v8981_v21, %v8977_v17  ;;  %v86_v24 = vld [vmem:[%s19674_s1 + $0x48] sm:$0xff]  ;;  %10545 = vmatprep.subr.bf16.mxu1 %v13202_v20 }
   0xa   :  { %53 = vst [vmem:[#allocation2 + $0x130] sm:$0xff] %v19685_v3  ;;  %54 = vst [vmem:[#allocation2 + $0x138] sm:$0xff] %v19685_v3  ;;  %v8986_v25 = vld [vmem:[%s19674_s1 + $0xf8] sm:$0xff]  ;;  %10543 = vmatpush1.bf16.msra.mxu0 %v13176_v12  ;;  %v90_v26 = vld [vmem:[%s19674_s1 + $0x68] sm:$0xff]  ;;  %v13248_v34 = vpack.c.bf16 %v81_v22, %v77_v19 }
   0xb   :  { %55 = vst [vmem:[#allocation2 + $0x160] sm:$0xff] %v19685_v3  ;;  %56 = vst [vmem:[#allocation2 + $0x168] sm:$0xff] %v19685_v3  ;;  %v8990_v27 = vld [vmem:[%s19674_s1 + $0x118] sm:$0xff]  ;;  %v8985_v28 = vld [vmem:[%s19674_s1 + $0xf0] sm:$0xff]  ;;  %136 = vmatprep.subr.mxu0 %v13181_v13  ;;  %10547 = vmatpush1.bf16.msra.mxu1 %v13210_v23  ;;  %v13250_v35 = vpack.c.bf16 %v90_v26, %v86_v24 }
   0xc   :  { %57 = vst [vmem:[#allocation2 + $0x170] sm:$0xff] %v19685_v3  ;;  %58 = vst [vmem:[#allocation2 + $0x178] sm:$0xff] %v19685_v3  ;;  %v13233_v29 = vld [vmem:[%s19674_s1 + $0x120] sm:$0xff]  ;;  %v13238_v31 = vpack.c.bf16 %v8990_v27, %v8986_v25  ;;  %v8989_v32 = vld [vmem:[%s19674_s1 + $0x110] sm:$0xff] }
   0xd   :  { %59 = vst [vmem:[#allocation2 + $0x1a0] sm:$0xff] %v19685_v3  ;;  %60 = vst [vmem:[#allocation2 + $0x1a8] sm:$0xff] %v19685_v3  ;;  %v13246_v33 = vld [vmem:[%s19675_s0 + $0x20] sm:$0xff]  ;;  %v13259_v38 = vpack.c.bf16 %v8989_v32, %v8985_v28  ;;  %v13268_v39 = vld [vmem:[%s19674_s1 + $0x138] sm:$0xff] }
   0xe   :  { %61 = vst [vmem:[#allocation2 + $0x1b0] sm:$0xff] %v19685_v3  ;;  %62 = vst [vmem:[#allocation2 + $0x1b8] sm:$0xff] %v19685_v3  ;;  %v85_v36 = vld [vmem:[%s19674_s1 + $0x40] sm:$0xff]  ;;  %10549 = vmatprep.subr.bf16.mxu1 %v13238_v31  ;;  %137 = vmatpush1.msra.mxu0 %v13233_v29  ;;  %v80_v40 = vld [vmem:[%s19674_s1 + $0x18] sm:$0xff] }
   0xf   :  { %63 = vst [vmem:[#allocation2 + $0x1e0] sm:$0xff] %v19685_v3  ;;  %64 = vst [vmem:[#allocation2 + $0x1e8] sm:$0xff] %v19685_v3  ;;  %v89_v37 = vld [vmem:[%s19674_s1 + $0x60] sm:$0xff]  ;;  %10553 = vmatprep.subr.bf16.mxu0 %v13235_v30  ;;  %8995 = vmatmul.mubr.msk.f32.vlgmr.msra.gmra.mrb[0].mxu0 %vm121_vm0, %v13246_v33  ;;  %v84_v41 = vld [vmem:[%s19674_s1 + $0x38] sm:$0xff] }
  0x10   :  { %65 = vst [vmem:[#allocation2 + $0x1f0] sm:$0xff] %v19685_v3  ;;  %66 = vst [vmem:[#allocation2 + $0x1f8] sm:$0xff] %v19685_v3  ;;  %10555 = vmatpush1.bf16.msra.mxu0 %v13248_v34  ;;  %v13277_v42 = vpack.c.bf16 %v89_v37, %v85_v36  ;;  %198 = vmatprep.mubr.f32.mxu0 %v19685_v3  ;;  %v13283_v43 = vld [vmem:[%s19675_s0 + $0x30] sm:$0xff]  ;;  %v13296_v46 = vld [vmem:[%s19674_s1 + $0x88] sm:$0xff]  ;;  %v13316_v52 = vpack.c.bf16 %v84_v41, %v80_v40 }
  0x11   :  { %67 = vst [vmem:[#allocation3 + $0x10] sm:$0xff] %v19685_v3  ;;  %68 = vst [vmem:[#allocation3 + $0x18] sm:$0xff] %v19685_v3  ;;  %v79_v44 = vld [vmem:[%s19674_s1 + $0x10] sm:$0xff]  ;;  %10557 = vmatprep.subr.bf16.mxu0 %v13250_v35  ;;  %10551 = vmatpush1.bf16.msra.mxu1 %v13259_v38  ;;  %v88_v47 = vld [vmem:[%s19674_s1 + $0x58] sm:$0xff] }
  0x12   :  { %69 = vst [vmem:[#allocation3 + $0x30] sm:$0xff] %v19685_v3  ;;  %70 = vst [vmem:[#allocation3 + $0x38] sm:$0xff] %v19685_v3  ;;  %v83_v45 = vld [vmem:[%s19674_s1 + $0x30] sm:$0xff]  ;;  %v92_v48 = vld [vmem:[%s19674_s1 + $0x78] sm:$0xff]  ;;  %213 = vmatprep.subr.mxu1 %v13268_v39 }
  0x13   :  { %71 = vst [vmem:[#allocation3 + $0x50] sm:$0xff] %v19685_v3  ;;  %72 = vst [vmem:[#allocation3 + $0x58] sm:$0xff] %v19685_v3  ;;  %v9006_v49 = vld [vmem:[%s19674_s1 + $0x148] sm:$0xff]  ;;  %v13314_v51 = vld [vmem:[%s19674_s1 + $0x130] sm:$0xff]  ;;  %8996 = vmatmul.mubr.msk.f32.gmra.mrb[2].mxu0 %vm121_vm0, %v13283_v43  ;;  %v13326_v55 = vpack.c.bf16 %v83_v45, %v79_v44  ;;  %v13336_v58 = vpack.c.bf16 %v92_v48, %v88_v47 }
  0x14   :  { %73 = vst [vmem:[#allocation3 + $0x70] sm:$0xff] %v19685_v3  ;;  %74 = vst [vmem:[#allocation3 + $0x78] sm:$0xff] %v19685_v3  ;;  %v9010_v50 = vld [vmem:[%s19674_s1 + $0x168] sm:$0xff]  ;;  %v9005_v53 = vld [vmem:[%s19674_s1 + $0x140] sm:$0xff]  ;;  %10559 = vmatpush1.bf16.msra.mxu0 %v13277_v42  ;;  %352 = vmatprep.mubr.f32.mxu0 %v19685_v3 }
  0x15   :  { %v9009_v54 = vld [vmem:[%s19674_s1 + $0x160] sm:$0xff]  ;;  %v9014_v56 = vld [vmem:[%s19674_s1 + $0x188] sm:$0xff]  ;;  %v87_v59 = vld [vmem:[%s19674_s1 + $0x50] sm:$0xff]  ;;  %296 = vmatprep.subr.mxu0 %v13296_v46  ;;  %v13350_v62 = vpack.c.bf16 %v9010_v50, %v9006_v49  ;;  %214 = vmatpush1.msra.mxu1 %v13314_v51 }
  0x16   :  { %v9018_v57 = vld [vmem:[%s19674_s1 + $0x1a8] sm:$0xff]  ;;  %v91_v60 = vld [vmem:[%s19674_s1 + $0x70] sm:$0xff]  ;;  %v13348_v61 = vld [vmem:[%s19674_s1 + $0x80] sm:$0xff]  ;;  %v13356_v0 = vpack.c.bf16 %v9009_v54, %v9005_v53  ;;  %10561 = vmatprep.subr.bf16.mxu1 %v13316_v52  ;;  %8997 = vmatmul.mubr.msk.f32.vlgmr.msra.gmra.mrb[0].mxu1 %vm121_vm0, %v13246_v33 }
  0x17   :  { %v75_v63 = vld [vmem:[%s19675_s0] sm:$0xff]  ;;  %10563 = vmatpush1.bf16.msra.mxu1 %v13326_v55  ;;  %v13362_v1 = vpack.c.bf16 %v9018_v57, %v9014_v56  ;;  %v13370_v6 = vpack.c.bf16 %v91_v60, %v87_v59  ;;  %275 = vmatprep.mubr.f32.mxu1 %v19685_v3  ;;  %v13380_v7 = vld [vmem:[%s19674_s1 + $0x98] sm:$0xff]  ;;  %v76_v15 = vld [vmem:[%s19675_s0 + $0x10] sm:$0xff] }
  0x18   :  { %v9013_v2 = vld [vmem:[%s19674_s1 + $0x180] sm:$0xff]  ;;  %297 = vmatpush1.msra.mxu0 %v13348_v61  ;;  %10565 = vmatprep.subr.bf16.mxu1 %v13336_v58  ;;  %v9008_v10 = vld [vmem:[%s19674_s1 + $0x158] sm:$0xff]  ;;  %v9007_v16 = vld [vmem:[%s19674_s1 + $0x150] sm:$0xff] }
  0x19   :  { %v9017_v5 = vld [vmem:[%s19674_s1 + $0x1a0] sm:$0xff]  ;;  %10569 = vmatprep.subr.bf16.mxu0 %v13350_v62  ;;  %8999 = vmatmul.mubr.msk.f32.vlgmr.msra.gmra.mrb[0].mxu0 %vm121_vm0, %v75_v63  ;;  %v9012_v11 = vld [vmem:[%s19674_s1 + $0x178] sm:$0xff]  ;;  %v9011_v17 = vld [vmem:[%s19674_s1 + $0x170] sm:$0xff] }
  0x1a   :  { %10571 = vmatpush1.bf16.msra.mxu0 %v13356_v0  ;;  %v13389_v14 = vpack.c.bf16 %v9017_v5, %v9013_v2  ;;  %358 = vmatprep.mubr.f32.mxu0 %v19685_v3  ;;  %v13406_v18 = vld [vmem:[%s19674_s1 + $0x1c8] sm:$0xff]  ;;  %v9016_v19 = vld [vmem:[%s19674_s1 + $0x198] sm:$0xff]  ;;  %v13426_v25 = vld [vmem:[%s19674_s1 + $0x90] sm:$0xff]  ;;  %v13428_v26 = vpack.c.bf16 %v9012_v11, %v9008_v10  ;;  %v13438_v32 = vpack.c.bf16 %v9011_v17, %v9007_v16 }
  0x1b   :  { %10573 = vmatprep.subr.bf16.mxu0 %v13362_v1  ;;  %10567 = vmatpush1.bf16.msra.mxu1 %v13370_v6  ;;  %v9020_v21 = vld [vmem:[%s19674_s1 + $0x1b8] sm:$0xff]  ;;  %v9032_v22 = vld [vmem:[%s19674_s1 + $0x1e8] sm:$0xff]  ;;  %v9031_v27 = vld [vmem:[%s19674_s1 + $0x1e0] sm:$0xff] }
  0x1c   :  { %8998 = vmatmul.mubr.msk.f32.gmra.mrb[2].mxu1 %vm121_vm0, %v13283_v43  ;;  %373 = vmatprep.subr.mxu1 %v13380_v7  ;;  %v9036_v24 = vld [vmem:[%s19674_s1 + $0x208] sm:$0xff]  ;;  %v9035_v28 = vld [vmem:[%s19674_s1 + $0x200] sm:$0xff]  ;;  %v13448_v40 = vpack.c.bf16 %v9020_v21, %v9016_v19  ;;  %v9015_v41 = vld [vmem:[%s19674_s1 + $0x190] sm:$0xff] }
  0x1d   :  { %9000 = vmatmul.mubr.msk.f32.gmra.mrb[2].mxu0 %vm121_vm0, %v76_v15  ;;  %429 = vmatprep.mubr.f32.mxu1 %v19685_v3  ;;  %v9040_v36 = vld [vmem:[%s19674_s1 + $0x228] sm:$0xff]  ;;  %v9019_v44 = vld [vmem:[%s19674_s1 + $0x1b0] sm:$0xff]  ;;  %v13460_v45 = vld [vmem:[%s19674_s1 + $0x1c0] sm:$0xff]  ;;  %v13462_v47 = vpack.c.bf16 %v9036_v24, %v9032_v22  ;;  %v13470_v49 = vpack.c.bf16 %v9035_v28, %v9031_v27 }
  0x1e   :  { %10575 = vmatpush1.bf16.msra.mxu0 %v13389_v14  ;;  %536 = vmatprep.mubr.f32.mxu0 %v19685_v3  ;;  %v9044_v37 = vld [vmem:[%s19674_s1 + $0x248] sm:$0xff]  ;;  %v13468_v48 = vld [vmem:[%s19675_s0 + $0x40] sm:$0xff]  ;;  %v13483_v56 = vpack.c.bf16 %v9019_v44, %v9015_v41  ;;  %v13494_v57 = vld [vmem:[%s19674_s1 + $0x1d8] sm:$0xff] }
  0x1f   :  { %480 = vmatprep.subr.mxu0 %v13406_v18  ;;  %374 = vmatpush1.msra.mxu1 %v13426_v25  ;;  %v13475_v50 = vpack.c.bf16 %v9044_v37, %v9040_v36  ;;  %v9039_v53 = vld [vmem:[%s19674_s1 + $0x220] sm:$0xff]  ;;  %v9034_v59 = vld [vmem:[%s19674_s1 + $0x1f8] sm:$0xff]  ;;  %v13509_v2 = vld [vmem:[%s19675_s0 + $0x50] sm:$0xff] }
  0x20   :  { %10577 = vmatprep.subr.bf16.mxu1 %v13428_v26  ;;  %9001 = vmatmul.mubr.msk.f32.vlgmr.msra.gmra.mrb[0].mxu1 %vm121_vm0, %v75_v63  ;;  %v9043_v54 = vld [vmem:[%s19674_s1 + $0x240] sm:$0xff]  ;;  %v9038_v60 = vld [vmem:[%s19674_s1 + $0x218] sm:$0xff]  ;;  %v9033_v5 = vld [vmem:[%s19674_s1 + $0x1f0] sm:$0xff] }
  0x21   :  { %10579 = vmatpush1.bf16.msra.mxu1 %v13438_v32  ;;  %435 = vmatprep.mubr.f32.mxu1 %v19685_v3  ;;  %v13503_v63 = vpack.c.bf16 %v9043_v54, %v9039_v53  ;;  %v9037_v10 = vld [vmem:[%s19674_s1 + $0x210] sm:$0xff]  ;;  %v13522_v11 = vld [vmem:[%s19674_s1 + $0x268] sm:$0xff]  ;;  %v9042_v16 = vld [vmem:[%s19674_s1 + $0x238] sm:$0xff]  ;;  %v13543_v24 = vpack.c.bf16 %v9038_v60, %v9034_v59 }
  0x22   :  { %481 = vmatpush1.msra.mxu0 %v13460_v45  ;;  %10581 = vmatprep.subr.bf16.mxu1 %v13448_v40  ;;  %v9046_v17 = vld [vmem:[%s19674_s1 + $0x258] sm:$0xff]  ;;  %v9056_v19 = vld [vmem:[%s19674_s1 + $0x288] sm:$0xff]  ;;  %v13541_v22 = vld [vmem:[%s19674_s1 + $0x1d0] sm:$0xff]  ;;  %v13554_v28 = vpack.c.bf16 %v9037_v10, %v9033_v5 }
  0x23   :  { %10585 = vmatprep.subr.bf16.mxu0 %v13462_v47  ;;  %9025 = vmatmul.mubr.msk.f32.vlgmr.msra.gmra.mrb[0].mxu0 %vm121_vm0, %v13468_v48  ;;  %v9060_v21 = vld [vmem:[%s19674_s1 + $0x2a8] sm:$0xff]  ;;  %19825 = vst [vmem:[#allocation4_spill] sm:$0xff] %v13541_v22  ;;  %19826 = vst [vmem:[#allocation5_spill] sm:$0xff] %v13543_v24  ;;  %v9059_v27 = vld [vmem:[%s19674_s1 + $0x2a0] sm:$0xff]  ;;  %v13564_v41 = vpack.c.bf16 %v9046_v17, %v9042_v16 }
  0x24   :  { %10587 = vmatpush1.bf16.msra.mxu0 %v13470_v49  ;;  %542 = vmatprep.mubr.f32.mxu0 %v19685_v3  ;;  %19827 = vst [vmem:[#allocation6_spill] sm:$0xff] %v13554_v28  ;;  %v9064_v36 = vld [vmem:[%s19674_s1 + $0x2c8] sm:$0xff]  ;;  %v9041_v44 = vld [vmem:[%s19674_s1 + $0x230] sm:$0xff]  ;;  %v13576_v54 = vld [vmem:[%s19674_s1 + $0x260] sm:$0xff]  ;;  %v13578_v59 = vpack.c.bf16 %v9060_v21, %v9056_v19 }
  0x25   :  { %10589 = vmatprep.subr.bf16.mxu0 %v13475_v50  ;;  %10583 = vmatpush1.bf16.msra.mxu1 %v13483_v56  ;;  %v9068_v37 = vld [vmem:[%s19674_s1 + $0x2e8] sm:$0xff]  ;;  %19828 = vst [vmem:[#allocation7_spill] sm:$0xff] %v13564_v41  ;;  %v9045_v53 = vld [vmem:[%s19674_s1 + $0x250] sm:$0xff]  ;;  %19829 = vst [vmem:[#allocation8_spill] sm:$0xff] %v13576_v54 }
  0x26   :  { %9002 = vmatmul.mubr.msk.f32.gmra.mrb[2].mxu1 %vm121_vm0, %v76_v15  ;;  %557 = vmatprep.subr.mxu1 %v13494_v57  ;;  %v9055_v15 = vld [vmem:[%s19674_s1 + $0x280] sm:$0xff]  ;;  %19830 = vst [vmem:[#allocation9_spill] sm:$0xff] %v13578_v59  ;;  %v13592_v10 = vpack.c.bf16 %v9068_v37, %v9064_v36  ;;  %v13600_v19 = vpack.c.bf16 %v9045_v53, %v9041_v44  ;;  %v13611_v21 = vld [vmem:[%s19674_s1 + $0x278] sm:$0xff]  ;;  %v13626_v37 = vld [vmem:[%s19675_s0 + $0x70] sm:$0xff] }
  0x27   :  { %9026 = vmatmul.mubr.msk.f32.gmra.mrb[2].mxu0 %vm121_vm0, %v13509_v2  ;;  %613 = vmatprep.mubr.f32.mxu1 %v19685_v3  ;;  %v13584_v60 = vld [vmem:[%s19675_s0 + $0x60] sm:$0xff]  ;;  %v13586_v5 = vpack.c.bf16 %v9059_v27, %v9055_v15  ;;  %19834 = vst [vmem:[#allocation13_spill] sm:$0xff] %v13611_v21  ;;  %v9058_v15 = vld [vmem:[%s19674_s1 + $0x298] sm:$0xff]  ;;  %v9057_v44 = vld [vmem:[%s19674_s1 + $0x290] sm:$0xff] }
  0x28   :  { %10591 = vmatpush1.bf16.msra.mxu0 %v13503_v63  ;;  %728 = vmatprep.mubr.f32.mxu0 %v19685_v3  ;;  %19832 = vst [vmem:[#allocation11_spill] sm:$0xff] %v13592_v10  ;;  %v9063_v16 = vld [vmem:[%s19674_s1 + $0x2c0] sm:$0xff]  ;;  %19833 = vst [vmem:[#allocation12_spill] sm:$0xff] %v13600_v19  ;;  %v9062_v27 = vld [vmem:[%s19674_s1 + $0x2b8] sm:$0xff] }
  0x29   :  { %672 = vmatprep.subr.mxu0 %v13522_v11  ;;  %558 = vmatpush1.msra.mxu1 %v13541_v22  ;;  %19831 = vst [vmem:[#allocation10_spill] sm:$0xff] %v13586_v5  ;;  %v9067_v17 = vld [vmem:[%s19674_s1 + $0x2e0] sm:$0xff]  ;;  %v9061_v53 = vld [vmem:[%s19674_s1 + $0x2b0] sm:$0xff] }
  0x2a   :  { %10593 = vmatprep.subr.bf16.mxu1 %v13543_v24  ;;  %9027 = vmatmul.mubr.msk.f32.vlgmr.msra.gmra.mrb[0].mxu1 %vm121_vm0, %v13468_v48  ;;  %v13620_v36 = vpack.c.bf16 %v9067_v17, %v9063_v16  ;;  %v13639_v16 = vld [vmem:[%s19674_s1 + $0x308] sm:$0xff]  ;;  %v9066_v17 = vld [vmem:[%s19674_s1 + $0x2d8] sm:$0xff]  ;;  %v9065_v22 = vld [vmem:[%s19674_s1 + $0x2d0] sm:$0xff] }
  0x2b   :  { %10595 = vmatpush1.bf16.msra.mxu1 %v13554_v28  ;;  %619 = vmatprep.mubr.f32.mxu1 %v19685_v3  ;;  %19836 = vst [vmem:[#allocation15_spill] sm:$0xff] %v13639_v16  ;;  %v13672_v28 = vpack.c.bf16 %v9061_v53, %v9057_v44  ;;  %v9069_v44 = vld [vmem:[%s19674_s1 + $0x2f0] sm:$0xff]  ;;  %v13694_v53 = vld [vmem:[%s19674_s1 + $0x300] sm:$0xff] }
  0x2c   :  { %673 = vmatpush1.msra.mxu0 %v13576_v54  ;;  %10597 = vmatprep.subr.bf16.mxu1 %v13564_v41  ;;  %19835 = vst [vmem:[#allocation14_spill] sm:$0xff] %v13620_v36  ;;  %v9085_v41 = vld [vmem:[%s19674_s1 + $0x340] sm:$0xff]  ;;  %v19838_v54 = vmov 0.0   ;;  %19840 = vst [vmem:[#allocation18_spill] sm:$0xff] %v13694_v53 }
  0x2d   :  { %10601 = vmatprep.subr.bf16.mxu0 %v13578_v59  ;;  %9051 = vmatmul.mubr.msk.f32.vlgmr.msra.gmra.mrb[0].mxu0 %vm121_vm0, %v13584_v60  ;;  %v13661_v59 = vpack.c.bf16 %v9062_v27, %v9058_v15  ;;  %v9090_v15 = vld [vmem:[%s19674_s1 + $0x368] sm:$0xff] }
  0x2e   :  { %10603 = vmatpush1.bf16.msra.mxu0 %v13586_v5  ;;  %734 = vmatprep.mubr.f32.mxu0 %v19685_v3  ;;  %v9070_v3 = vld [vmem:[%s19674_s1 + $0x2f8] sm:$0xff]  ;;  %v13659_v5 = vld [vmem:[%s19674_s1 + $0x270] sm:$0xff]  ;;  %v9094_v27 = vld [vmem:[%s19674_s1 + $0x388] sm:$0xff] }
  0x2f   :  { %10605 = vmatprep.subr.bf16.mxu0 %v13592_v10  ;;  %10599 = vmatpush1.bf16.msra.mxu1 %v13600_v19  ;;  %v9082_v19 = vld [vmem:[%s19674_s1 + $0x328] sm:$0xff]  ;;  %19837 = vst [vmem:[#allocation16_spill] sm:$0xff] %v13659_v5  ;;  %v13682_v24 = vpack.c.bf16 %v9070_v3, %v9066_v17 }
  0x30   :  { %9028 = vmatmul.mubr.msk.f32.gmra.mrb[2].mxu1 %vm121_vm0, %v13509_v2  ;;  %749 = vmatprep.subr.mxu1 %v13611_v21  ;;  %v9086_v10 = vld [vmem:[%s19674_s1 + $0x348] sm:$0xff]  ;;  %v9081_v21 = vld [vmem:[%s19674_s1 + $0x320] sm:$0xff] }
  0x31   :  { %9052 = vmatmul.mubr.msk.f32.gmra.mrb[2].mxu0 %vm121_vm0, %v13626_v37  ;;  %805 = vmatprep.mubr.f32.mxu1 %v19838_v54  ;;  %19839 = vst [vmem:[#allocation17_spill] sm:$0xff] %v13682_v24  ;;  %v13702_v3 = vld [vmem:[%s19675_s0 + $0x1] sm:$0xff]  ;;  %v13704_v17 = vpack.c.bf16 %v9085_v41, %v9081_v21  ;;  %v13729_v41 = vld [vmem:[%s19674_s1 + $0x318] sm:$0xff] }
  0x32   :  { %10607 = vmatpush1.bf16.msra.mxu0 %v13620_v36  ;;  %919 = vmatprep.mubr.f32.mxu0 %v19838_v54  ;;  %v13696_v36 = vpack.c.bf16 %v9086_v10, %v9082_v19  ;;  %v9089_v10 = vld [vmem:[%s19674_s1 + $0x360] sm:$0xff]  ;;  %19845 = vst [vmem:[#allocation23_spill] sm:$0xff] %v13729_v41  ;;  %v9088_v21 = vld [vmem:[%s19674_s1 + $0x358] sm:$0xff] }
  0x33   :  { %863 = vmatprep.subr.mxu0 %v13639_v16  ;;  %750 = vmatpush1.msra.mxu1 %v13659_v5  ;;  %19842 = vst [vmem:[#allocation20_spill] sm:$0xff] %v13704_v17  ;;  %v13710_v16 = vpack.c.bf16 %v9094_v27, %v9090_v15  ;;  %v9093_v19 = vld [vmem:[%s19674_s1 + $0x380] sm:$0xff]  ;;  %v13718_v5 = vpack.c.bf16 %v9069_v44, %v9065_v22  ;;  %v9084_v22 = vld [vmem:[%s19674_s1 + $0x338] sm:$0xff]  ;;  %v9083_v44 = vld [vmem:[%s19674_s1 + $0x330] sm:$0xff] }
  0x34   :  { %19841 = vst [vmem:[#allocation19_spill] sm:$0xff] %v13696_v36  ;;  %10609 = vmatprep.subr.bf16.mxu1 %v13661_v59  ;;  %9053 = vmatmul.mubr.msk.f32.vlgmr.msra.gmra.mrb[0].mxu1 %vm121_vm0, %v13584_v60  ;;  %v13739_v15 = vpack.c.bf16 %v9093_v19, %v9089_v10  ;;  %v13744_v27 = vld [vmem:[%s19675_s0 + $0x11] sm:$0xff] }
  0x35   :  { %10611 = vmatpush1.bf16.msra.mxu1 %v13672_v28  ;;  %19843 = vst [vmem:[#allocation21_spill] sm:$0xff] %v13710_v16  ;;  %19844 = vst [vmem:[#allocation22_spill] sm:$0xff] %v13718_v5  ;;  %811 = vmatprep.mubr.f32.mxu1 %v19838_v54  ;;  %v9092_v10 = vld [vmem:[%s19674_s1 + $0x378] sm:$0xff] }
  0x36   :  { %864 = vmatpush1.msra.mxu0 %v13694_v53  ;;  %10613 = vmatprep.subr.bf16.mxu1 %v13682_v24  ;;  %v9096_v19 = vld [vmem:[%s19674_s1 + $0x398] sm:$0xff] }
  0x37   :  { %10617 = vmatprep.subr.bf16.mxu0 %v13696_v36  ;;  %9075 = vmatmul.mubr.msk.f32.vlgmr.msra.gmra.mrb[0].mxu0 %vm121_vm0, %v13702_v3  ;;  %v9087_v36 = vld [vmem:[%s19674_s1 + $0x350] sm:$0xff]  ;;  %v13782_v53 = vpack.c.bf16 %v9096_v19, %v9092_v10  ;;  %v13817_v10 = vld [vmem:[%s19674_s1 + $0x3b8] sm:$0xff] }
  0x38   :  { %10619 = vmatpush1.bf16.msra.mxu0 %v13704_v17  ;;  %925 = vmatprep.mubr.f32.mxu0 %v19838_v54  ;;  %v13763_v17 = vld [vmem:[%s19674_s1 + $0x3a8] sm:$0xff]  ;;  %v13778_v24 = vpack.c.bf16 %v9087_v36, %v9083_v44  ;;  %v13794_v36 = vld [vmem:[%s19674_s1 + $0x3a0] sm:$0xff]  ;;  %v9257_v19 = vld [vmem:[%s19674_s1 + $0x110] sm:$0xff] }
  0x39   :  { %10621 = vmatprep.subr.bf16.mxu0 %v13710_v16  ;;  %10615 = vmatpush1.bf16.msra.mxu1 %v13718_v5  ;;  %v13771_v5 = vld [vmem:[%s19674_s1 + $0x310] sm:$0xff]  ;;  %v13773_v16 = vpack.c.bf16 %v9088_v21, %v9084_v22  ;;  %v13800_v21 = vld [vmem:[%s19675_s0 + $0x21] sm:$0xff] }
  0x3a   :  { %9054 = vmatmul.mubr.msk.f32.gmra.mrb[2].mxu1 %vm121_vm0, %v13626_v37  ;;  %940 = vmatprep.subr.mxu1 %v13729_v41  ;;  %v9091_v41 = vld [vmem:[%s19674_s1 + $0x370] sm:$0xff] }
  0x3b   :  { %9076 = vmatmul.mubr.msk.f32.gmra.mrb[2].mxu0 %vm121_vm0, %v13744_v27  ;;  %996 = vmatprep.mubr.f32.mxu1 %v19838_v54  ;;  %v9095_v22 = vld [vmem:[%s19674_s1 + $0x390] sm:$0xff] }
  0x3c   :  { %10623 = vmatpush1.bf16.msra.mxu0 %v13739_v15  ;;  %1110 = vmatprep.mubr.f32.mxu0 %v19838_v54  ;;  %v13807_v44 = vpack.c.bf16 %v9095_v22, %v9091_v41  ;;  %v13824_v41 = vld [vmem:[%s19675_s0 + $0x31] sm:$0xff]  ;;  %v14084_v22 = vld [vmem:[%s19674_s1 + $0x120] sm:$0xff] }
  0x3d   :  { %1054 = vmatprep.subr.mxu0 %v13763_v17  ;;  %941 = vmatpush1.msra.mxu1 %v13771_v5 }
  0x3e   :  { %10625 = vmatprep.subr.bf16.mxu1 %v13773_v16  ;;  %9077 = vmatmul.mubr.msk.f32.vlgmr.msra.gmra.mrb[0].mxu1 %vm121_vm0, %v13702_v3 }
  0x3f   :  { %10627 = vmatpush1.bf16.msra.mxu1 %v13778_v24  ;;  %1002 = vmatprep.mubr.f32.mxu1 %v19838_v54 }
  0x40   :  { %1055 = vmatpush1.msra.mxu0 %v13794_v36  ;;  %10629 = vmatprep.subr.bf16.mxu1 %v13782_v53 }
  0x41   :  { %9101 = vmatmul.mubr.msk.f32.vlgmr.msra.gmra.mrb[0].mxu0 %vm121_vm0, %v13800_v21  ;;  %10633 = vmatprep.subr.bf16.mxu0 %v13153_v4  ;;  %v13834_v4 = vld [vmem:[%s19674_s1 + $0x3b0] sm:$0xff] }
  0x42   :  { %10635 = vmatpush1.bf16.msra.mxu0 %v13164_v8  ;;  %1116 = vmatprep.mubr.f32.mxu0 %v19838_v54  ;;  %v19846_v8 = vld [vmem:[#allocation4_spill] sm:$0xff] }
  0x43   :  { %10637 = vmatprep.subr.bf16.mxu0 %v13166_v9  ;;  %10631 = vmatpush1.bf16.msra.mxu1 %v13807_v44  ;;  %v19847_v9 = vld [vmem:[#allocation5_spill] sm:$0xff] }
  0x44   :  { %9078 = vmatmul.mubr.msk.f32.gmra.mrb[2].mxu1 %vm121_vm0, %v13744_v27  ;;  %1131 = vmatprep.subr.mxu1 %v13817_v10 }
  0x45   :  { %9102 = vmatmul.mubr.msk.f32.gmra.mrb[2].mxu0 %vm121_vm0, %v13824_v41  ;;  %1187 = vmatprep.mubr.f32.mxu1 %v19838_v54 }
  0x46   :  { %10639 = vmatpush1.bf16.msra.mxu0 %v13176_v12  ;;  %1384 = vmatprep.mubr.f32.mxu0 %v19838_v54  ;;  %v19848_v12 = vld [vmem:[#allocation6_spill] sm:$0xff] }
  0x47   :  { %1328 = vmatprep.subr.mxu0 %v13181_v13  ;;  %1132 = vmatpush1.msra.mxu1 %v13834_v4  ;;  %v19849_v13 = vld [vmem:[#allocation8_spill] sm:$0xff] }
  0x48   :  { %9103 = vmatmul.mubr.msk.f32.vlgmr.msra.gmra.mrb[0].mxu1 %vm121_vm0, %v13800_v21  ;;  %10641 = vmatprep.subr.bf16.mxu1 %v13202_v20  ;;  %v19850_v20 = vld [vmem:[#allocation7_spill] sm:$0xff] }
  0x49   :  { %10643 = vmatpush1.bf16.msra.mxu1 %v13210_v23  ;;  %1193 = vmatprep.mubr.f32.mxu1 %v19838_v54  ;;  %v19851_v23 = vld [vmem:[#allocation9_spill] sm:$0xff] }
  0x4a   :  { %1329 = vmatpush1.msra.mxu0 %v13233_v29  ;;  %10645 = vmatprep.subr.bf16.mxu1 %v13238_v31  ;;  %v19852_v29 = vld [vmem:[#allocation10_spill] sm:$0xff]  ;;  %v19854_v31 = vld [vmem:[#allocation12_spill] sm:$0xff] }
  0x4b   :  { %10649 = vmatprep.subr.bf16.mxu0 %v13235_v30  ;;  %9129 = vmatmul.mubr.msk.f32.vlgmr.msra.gmra.mrb[4].mxu0 %vm121_vm0, %v13468_v48  ;;  %v19853_v30 = vld [vmem:[#allocation11_spill] sm:$0xff] }
  0x4c   :  { %10651 = vmatpush1.bf16.msra.mxu0 %v13248_v34  ;;  %1390 = vmatprep.mubr.f32.mxu0 %v19838_v54  ;;  %v19856_v34 = vld [vmem:[#allocation14_spill] sm:$0xff] }
  0x4d   :  { %10653 = vmatprep.subr.bf16.mxu0 %v13250_v35  ;;  %10647 = vmatpush1.bf16.msra.mxu1 %v13259_v38  ;;  %v19857_v35 = vld [vmem:[#allocation15_spill] sm:$0xff]  ;;  %v19858_v38 = vld [vmem:[#allocation16_spill] sm:$0xff] }
  0x4e   :  { %9104 = vmatmul.mubr.msk.f32.gmra.mrb[2].mxu1 %vm121_vm0, %v13824_v41  ;;  %1405 = vmatprep.subr.mxu1 %v13268_v39  ;;  %v19859_v39 = vld [vmem:[#allocation18_spill] sm:$0xff] }
  0x4f   :  { %9130 = vmatmul.mubr.msk.f32.gmra.mrb[6].mxu0 %vm121_vm0, %v13509_v2  ;;  %1461 = vmatprep.mubr.f32.mxu1 %v19838_v54 }
  0x50   :  { %10655 = vmatpush1.bf16.msra.mxu0 %v13277_v42  ;;  %1544 = vmatprep.mubr.f32.mxu0 %v19838_v54  ;;  %v19860_v42 = vld [vmem:[#allocation17_spill] sm:$0xff] }
  0x51   :  { %1488 = vmatprep.subr.mxu0 %v13296_v46  ;;  %1406 = vmatpush1.msra.mxu1 %v13314_v51  ;;  %v19862_v46 = vld [vmem:[#allocation20_spill] sm:$0xff]  ;;  %v19863_v51 = vld [vmem:[#allocation21_spill] sm:$0xff] }
  0x52   :  { %10657 = vmatprep.subr.bf16.mxu1 %v13316_v52  ;;  %9131 = vmatmul.mubr.msk.f32.vlgmr.msra.gmra.mrb[4].mxu1 %vm121_vm0, %v13468_v48  ;;  %v19864_v52 = vld [vmem:[#allocation22_spill] sm:$0xff] }
  0x53   :  { %10659 = vmatpush1.bf16.msra.mxu1 %v13326_v55  ;;  %1467 = vmatprep.mubr.f32.mxu1 %v19838_v54  ;;  %v19865_v55 = vld [vmem:[#allocation23_spill] sm:$0xff] }
  0x54   :  { %1489 = vmatpush1.msra.mxu0 %v13348_v61  ;;  %10661 = vmatprep.subr.bf16.mxu1 %v13336_v58  ;;  %v9244_v58 = vld [vmem:[%s19674_s1 + $0xa8] sm:$0xff] }
  0x55   :  { %10665 = vmatprep.subr.bf16.mxu0 %v13350_v62  ;;  %9133 = vmatmul.mubr.msk.f32.vlgmr.msra.gmra.mrb[4].mxu0 %vm121_vm0, %v13246_v33  ;;  %v9248_v61 = vld [vmem:[%s19674_s1 + $0xc8] sm:$0xff]  ;;  %v9243_v62 = vld [vmem:[%s19674_s1 + $0xa0] sm:$0xff] }
  0x56   :  { %10667 = vmatpush1.bf16.msra.mxu0 %v13356_v0  ;;  %1550 = vmatprep.mubr.f32.mxu0 %v19838_v54  ;;  %v9247_v0 = vld [vmem:[%s19674_s1 + $0xc0] sm:$0xff] }
  0x57   :  { %10669 = vmatprep.subr.bf16.mxu0 %v13362_v1  ;;  %10663 = vmatpush1.bf16.msra.mxu1 %v13370_v6  ;;  %v9252_v1 = vld [vmem:[%s19674_s1 + $0xe8] sm:$0xff] }
  0x58   :  { %9132 = vmatmul.mubr.msk.f32.gmra.mrb[6].mxu1 %vm121_vm0, %v13509_v2  ;;  %1565 = vmatprep.subr.mxu1 %v13380_v7  ;;  %v9256_v6 = vld [vmem:[%s19674_s1 + $0x108] sm:$0xff]  ;;  %v13980_v7 = vpack.c.bf16 %v9248_v61, %v9244_v58  ;;  %v2469_v61 = vld [vmem:[%s19674_s1 + $0x50] sm:$0xff] }
  0x59   :  { %9134 = vmatmul.mubr.msk.f32.gmra.mrb[6].mxu0 %vm121_vm0, %v13283_v43  ;;  %1621 = vmatprep.mubr.f32.mxu1 %v19838_v54  ;;  %v2460_v2 = vld [vmem:[%s19674_s1 + $0x8] sm:$0xff] }
  0x5a   :  { %10671 = vmatpush1.bf16.msra.mxu0 %v13389_v14  ;;  %1726 = vmatprep.mubr.f32.mxu0 %v19838_v54  ;;  %v13986_v14 = vld [vmem:[%s19675_s0 + $0x41] sm:$0xff] }
  0x5b   :  { %1670 = vmatprep.subr.mxu0 %v13406_v18  ;;  %1566 = vmatpush1.msra.mxu1 %v13426_v25  ;;  %v13988_v18 = vpack.c.bf16 %v9247_v0, %v9243_v62  ;;  %v13994_v25 = vpack.c.bf16 %v9256_v6, %v9252_v1  ;;  %v2473_v62 = vld [vmem:[%s19674_s1 + $0x70] sm:$0xff]  ;;  %v14194_v0 = vld [vmem:[%s19674_s1 + $0x80] sm:$0xff] }
  0x5c   :  { %10673 = vmatprep.subr.bf16.mxu1 %v13428_v26  ;;  %9135 = vmatmul.mubr.msk.f32.vlgmr.msra.gmra.mrb[4].mxu1 %vm121_vm0, %v13246_v33  ;;  %v19855_v33 = vld [vmem:[#allocation13_spill] sm:$0xff]  ;;  %v9251_v26 = vld [vmem:[%s19674_s1 + $0xe0] sm:$0xff] }
  0x5d   :  { %10675 = vmatpush1.bf16.msra.mxu1 %v13438_v32  ;;  %1627 = vmatprep.mubr.f32.mxu1 %v19838_v54  ;;  %v9255_v32 = vld [vmem:[%s19674_s1 + $0x100] sm:$0xff] }
  0x5e   :  { %1671 = vmatpush1.msra.mxu0 %v13460_v45  ;;  %10677 = vmatprep.subr.bf16.mxu1 %v13448_v40  ;;  %v9246_v40 = vld [vmem:[%s19674_s1 + $0xb8] sm:$0xff]  ;;  %v14021_v48 = vpack.c.bf16 %v9255_v32, %v9251_v26  ;;  %v9239_v6 = vld [vmem:[%s19675_s0 + $0x40] sm:$0xff] }
  0x5f   :  { %10681 = vmatprep.subr.bf16.mxu0 %v13462_v47  ;;  %9159 = vmatmul.mubr.msk.f32.vlgmr.msra.gmra.mrb[4].mxu0 %vm121_vm0, %v13584_v60  ;;  %v9250_v45 = vld [vmem:[%s19674_s1 + $0xd8] sm:$0xff] }
  0x60   :  { %10683 = vmatpush1.bf16.msra.mxu0 %v13470_v49  ;;  %1732 = vmatprep.mubr.f32.mxu0 %v19838_v54  ;;  %v14019_v47 = vld [vmem:[%s19675_s0 + $0x51] sm:$0xff] }
  0x61   :  { %10685 = vmatprep.subr.bf16.mxu0 %v13475_v50  ;;  %10679 = vmatpush1.bf16.msra.mxu1 %v13483_v56  ;;  %v9245_v49 = vld [vmem:[%s19674_s1 + $0xb0] sm:$0xff]  ;;  %v9254_v56 = vld [vmem:[%s19674_s1 + $0xf8] sm:$0xff] }
  0x62   :  { %9136 = vmatmul.mubr.msk.f32.gmra.mrb[6].mxu1 %vm121_vm0, %v13283_v43  ;;  %1747 = vmatprep.subr.mxu1 %v13494_v57  ;;  %v19861_v43 = vld [vmem:[#allocation19_spill] sm:$0xff]  ;;  %v9249_v50 = vld [vmem:[%s19674_s1 + $0xd0] sm:$0xff] }
  0x63   :  { %9160 = vmatmul.mubr.msk.f32.gmra.mrb[6].mxu0 %vm121_vm0, %v13626_v37  ;;  %1803 = vmatprep.mubr.f32.mxu1 %v19838_v54  ;;  %v9258_v57 = vld [vmem:[%s19674_s1 + $0x118] sm:$0xff] }
  0x64   :  { %10687 = vmatpush1.bf16.msra.mxu0 %v13503_v63  ;;  %1916 = vmatprep.mubr.f32.mxu0 %v19838_v54  ;;  %v14042_v63 = vld [vmem:[%s19674_s1 + $0x128] sm:$0xff] }
  0x65   :  { %1860 = vmatprep.subr.mxu0 %v13522_v11  ;;  %1748 = vmatpush1.msra.mxu1 %v19846_v8  ;;  %v2464_v11 = vld [vmem:[%s19674_s1 + $0x28] sm:$0xff]  ;;  %v2467_v8 = vld [vmem:[%s19674_s1 + $0x40] sm:$0xff] }
  0x66   :  { %10689 = vmatprep.subr.bf16.mxu1 %v19847_v9  ;;  %9161 = vmatmul.mubr.msk.f32.vlgmr.msra.gmra.mrb[4].mxu1 %vm121_vm0, %v13584_v60  ;;  %v2471_v9 = vld [vmem:[%s19674_s1 + $0x60] sm:$0xff] }
  0x67   :  { %10691 = vmatpush1.bf16.msra.mxu1 %v19848_v12  ;;  %1809 = vmatprep.mubr.f32.mxu1 %v19838_v54  ;;  %v14114_v12 = vld [vmem:[%s19674_s1 + $0x138] sm:$0xff] }
  0x68   :  { %1861 = vmatpush1.msra.mxu0 %v19849_v13  ;;  %10693 = vmatprep.subr.bf16.mxu1 %v19850_v20  ;;  %v2466_v13 = vld [vmem:[%s19674_s1 + $0x38] sm:$0xff]  ;;  %v14123_v20 = vpack.c.bf16 %v2471_v9, %v2467_v8  ;;  %v14272_v8 = vld [vmem:[%s19674_s1 + $0x90] sm:$0xff] }
  0x69   :  { %10697 = vmatprep.subr.bf16.mxu0 %v19851_v23  ;;  %9183 = vmatmul.mubr.msk.f32.vlgmr.msra.gmra.mrb[4].mxu0 %vm121_vm0, %v13702_v3  ;;  %v14125_v23 = vld [vmem:[#allocation2 + $0x20] sm:$0xff] }
  0x6a   :  { %10699 = vmatpush1.bf16.msra.mxu0 %v19852_v29  ;;  %1922 = vmatprep.mubr.f32.mxu0 %v19838_v54  ;;  %v2461_v29 = vld [vmem:[%s19674_s1 + $0x10] sm:$0xff] }
  0x6b   :  { %10701 = vmatprep.subr.bf16.mxu0 %v19853_v30  ;;  %10695 = vmatpush1.bf16.msra.mxu1 %v19854_v31  ;;  %v2465_v30 = vld [vmem:[%s19674_s1 + $0x30] sm:$0xff]  ;;  %v14139_v31 = vld [vmem:[%s19674_s1 + $0x88] sm:$0xff] }
  0x6c   :  { %9162 = vmatmul.mubr.msk.f32.gmra.mrb[6].mxu1 %vm121_vm0, %v13626_v37  ;;  %1937 = vmatprep.subr.mxu1 %v19855_v33  ;;  %v2470_v33 = vld [vmem:[%s19674_s1 + $0x58] sm:$0xff] }
  0x6d   :  { %9184 = vmatmul.mubr.msk.f32.gmra.mrb[6].mxu0 %vm121_vm0, %v13744_v27  ;;  %1993 = vmatprep.mubr.f32.mxu1 %v19838_v54 }
  0x6e   :  { %10703 = vmatpush1.bf16.msra.mxu0 %v19856_v34  ;;  %2106 = vmatprep.mubr.f32.mxu0 %v19838_v54  ;;  %v2474_v34 = vld [vmem:[%s19674_s1 + $0x78] sm:$0xff] }
  0x6f   :  { %2050 = vmatprep.subr.mxu0 %v19857_v35  ;;  %1938 = vmatpush1.msra.mxu1 %v19858_v38  ;;  %v9272_v35 = vld [vmem:[%s19674_s1 + $0x148] sm:$0xff]  ;;  %v14182_v58 = vpack.c.bf16 %v2474_v34, %v2470_v33  ;;  %v9281_v34 = vld [vmem:[%s19674_s1 + $0x190] sm:$0xff] }
  0x70   :  { %10705 = vmatprep.subr.bf16.mxu1 %v13661_v59  ;;  %9185 = vmatmul.mubr.msk.f32.vlgmr.msra.gmra.mrb[4].mxu1 %vm121_vm0, %v13702_v3  ;;  %v2463_v59 = vld [vmem:[%s19674_s1 + $0x20] sm:$0xff]  ;;  %v9276_v38 = vld [vmem:[%s19674_s1 + $0x168] sm:$0xff] }
  0x71   :  { %10707 = vmatpush1.bf16.msra.mxu1 %v13672_v28  ;;  %1999 = vmatprep.mubr.f32.mxu1 %v19838_v54  ;;  %v2459_v28 = vld [vmem:[%s19674_s1] sm:$0xff]  ;;  %v14196_v1 = vpack.c.bf16 %v9276_v38, %v9272_v35  ;;  %v9285_v35 = vld [vmem:[%s19674_s1 + $0x1b0] sm:$0xff] }
  0x72   :  { %2051 = vmatpush1.msra.mxu0 %v19859_v39  ;;  %10709 = vmatprep.subr.bf16.mxu1 %v19860_v42  ;;  %v14159_v39 = vld [vmem:[%s19674_s1 + $0x130] sm:$0xff]  ;;  %v14306_v38 = vld [vmem:[%s19674_s1 + $0x1c0] sm:$0xff] }
  0x73   :  { %10713 = vmatprep.subr.bf16.mxu0 %v19861_v43  ;;  %9209 = vmatmul.mubr.msk.f32.vlgmr.msra.gmra.mrb[4].mxu0 %vm121_vm0, %v13800_v21  ;;  %v9271_v43 = vld [vmem:[%s19674_s1 + $0x140] sm:$0xff] }
  0x74   :  { %10715 = vmatpush1.bf16.msra.mxu0 %v19862_v46  ;;  %2112 = vmatprep.mubr.f32.mxu0 %v19838_v54  ;;  %v9275_v46 = vld [vmem:[%s19674_s1 + $0x160] sm:$0xff] }
  0x75   :  { %10717 = vmatprep.subr.bf16.mxu0 %v19863_v51  ;;  %10711 = vmatpush1.bf16.msra.mxu1 %v19864_v52  ;;  %v14172_v51 = vpack.c.bf16 %v2465_v30, %v2461_v29  ;;  %v9280_v52 = vld [vmem:[%s19674_s1 + $0x188] sm:$0xff]  ;;  %v14202_v26 = vpack.c.bf16 %v9275_v46, %v9271_v43 }
  0x76   :  { %9186 = vmatmul.mubr.msk.f32.gmra.mrb[6].mxu1 %vm121_vm0, %v13744_v27  ;;  %2127 = vmatprep.subr.mxu1 %v19865_v55  ;;  %v9284_v55 = vld [vmem:[%s19674_s1 + $0x1a8] sm:$0xff] }
  0x77   :  { %9210 = vmatmul.mubr.msk.f32.gmra.mrb[6].mxu0 %vm121_vm0, %v13824_v41  ;;  %2183 = vmatprep.mubr.f32.mxu1 %v19838_v54  ;;  %v14208_v32 = vpack.c.bf16 %v9284_v55, %v9280_v52  ;;  %v9306_v29 = vld [vmem:[%s19674_s1 + $0x228] sm:$0xff]  ;;  %v9305_v55 = vld [vmem:[%s19674_s1 + $0x220] sm:$0xff] }
  0x78   :  { %10719 = vmatpush1.bf16.msra.mxu0 %v13739_v15  ;;  %2296 = vmatprep.mubr.f32.mxu0 %v19838_v54  ;;  %v9253_v15 = vld [vmem:[%s19674_s1 + $0xf0] sm:$0xff]  ;;  %v9310_v30 = vld [vmem:[%s19674_s1 + $0x248] sm:$0xff] }
  0x79   :  { %2240 = vmatprep.subr.mxu0 %v13763_v17  ;;  %2128 = vmatpush1.msra.mxu1 %v13771_v5  ;;  %v14062_v5 = vpack.c.bf16 %v9249_v50, %v9245_v49  ;;  %v14072_v17 = vpack.c.bf16 %v9258_v57, %v9254_v56  ;;  %v14216_v49 = vpack.c.bf16 %v2473_v62, %v2469_v61  ;;  %v9274_v50 = vld [vmem:[%s19674_s1 + $0x158] sm:$0xff]  ;;  %v9309_v61 = vld [vmem:[%s19674_s1 + $0x240] sm:$0xff] }
  0x7a   :  { %10721 = vmatprep.subr.bf16.mxu1 %v13773_v16  ;;  %9211 = vmatmul.mubr.msk.f32.vlgmr.msra.gmra.mrb[4].mxu1 %vm121_vm0, %v13800_v21  ;;  %v2468_v16 = vld [vmem:[%s19674_s1 + $0x48] sm:$0xff]  ;;  %v9278_v56 = vld [vmem:[%s19674_s1 + $0x178] sm:$0xff]  ;;  %v14316_v52 = vpack.c.bf16 %v9310_v30, %v9306_v29  ;;  %v14324_v62 = vpack.c.bf16 %v9285_v35, %v9281_v34  ;;  %v9327_v29 = vld [vmem:[%s19674_s1 + $0x2a0] sm:$0xff] }
  0x7b   :  { %10723 = vmatpush1.bf16.msra.mxu1 %v13778_v24  ;;  %2189 = vmatprep.mubr.f32.mxu1 %v19838_v54  ;;  %v14051_v24 = vpack.c.bf16 %v9250_v45, %v9246_v40  ;;  %v9279_v40 = vld [vmem:[%s19674_s1 + $0x180] sm:$0xff]  ;;  %v14274_v9 = vpack.c.bf16 %v9278_v56, %v9274_v50  ;;  %v14344_v50 = vpack.c.bf16 %v9309_v61, %v9305_v55  ;;  %v9299_v56 = vld [vmem:[%s19674_s1 + $0x1f0] sm:$0xff]  ;;  %v9332_v34 = vld [vmem:[%s19674_s1 + $0x2c8] sm:$0xff] }
  0x7c   :  { %2241 = vmatpush1.msra.mxu0 %v13794_v36  ;;  %10725 = vmatprep.subr.bf16.mxu1 %v13782_v53  ;;  %v2472_v53 = vld [vmem:[%s19674_s1 + $0x68] sm:$0xff]  ;;  %v14086_v36 = vpack.c.bf16 %v2464_v11, %v2460_v2  ;;  %v9283_v45 = vld [vmem:[%s19674_s1 + $0x1a0] sm:$0xff]  ;;  %v9240_v2 = vld [vmem:[%s19675_s0 + $0x50] sm:$0xff] }
  0x7d   :  { %9235 = vmatmul.mubr.msk.f32.vlgmr.msra.gmra.mrb[4].mxu0 %vm121_vm0, %v13986_v14  ;;  %10729 = vmatprep.subr.bf16.mxu0 %v13980_v7  ;;  %v14235_v57 = vpack.c.bf16 %v9283_v45, %v9279_v40  ;;  %v9273_v11 = vld [vmem:[%s19674_s1 + $0x150] sm:$0xff]  ;;  %v9300_v40 = vld [vmem:[%s19674_s1 + $0x1f8] sm:$0xff]  ;;  %v9336_v35 = vld [vmem:[%s19674_s1 + $0x2e8] sm:$0xff] }
  0x7e   :  { %10731 = vmatpush1.bf16.msra.mxu0 %v13988_v18  ;;  %2302 = vmatprep.mubr.f32.mxu0 %v19838_v54  ;;  %v9304_v45 = vld [vmem:[%s19674_s1 + $0x218] sm:$0xff]  ;;  %v9307_v61 = vld [vmem:[%s19674_s1 + $0x230] sm:$0xff] }
  0x7f   :  { %10733 = vmatprep.subr.bf16.mxu0 %v13994_v25  ;;  %10727 = vmatpush1.bf16.msra.mxu1 %v13807_v44  ;;  %v14089_v44 = vpack.c.bf16 %v2463_v59, %v2459_v28  ;;  %v9277_v28 = vld [vmem:[%s19674_s1 + $0x170] sm:$0xff]  ;;  %v14252_v59 = vld [vmem:[%s19674_s1 + $0x1c8] sm:$0xff] }
  0x80   :  { %9212 = vmatmul.mubr.msk.f32.gmra.mrb[6].mxu1 %vm121_vm0, %v13824_v41  ;;  %2317 = vmatprep.subr.mxu1 %v13817_v10  ;;  %v14095_v10 = vpack.c.bf16 %v2472_v53, %v2468_v16  ;;  %v9282_v16 = vld [vmem:[%s19674_s1 + $0x198] sm:$0xff] }
  0x81   :  { %9236 = vmatmul.mubr.msk.f32.gmra.mrb[6].mxu0 %vm121_vm0, %v14019_v47  ;;  %2373 = vmatprep.mubr.f32.mxu1 %v19838_v54  ;;  %v9286_v53 = vld [vmem:[%s19674_s1 + $0x1b8] sm:$0xff] }
  0x82   :  { %10735 = vmatpush1.bf16.msra.mxu0 %v14021_v48  ;;  %2571 = vmatprep.mubr.f32.mxu0 %v19838_v54  ;;  %v14294_v33 = vpack.c.bf16 %v9286_v53, %v9282_v16  ;;  %v9308_v16 = vld [vmem:[%s19674_s1 + $0x238] sm:$0xff] }
  0x83   :  { %2515 = vmatprep.subr.mxu0 %v14042_v63  ;;  %2318 = vmatpush1.msra.mxu1 %v13834_v4  ;;  %v14104_v4 = vpack.c.bf16 %v9257_v19, %v9253_v15  ;;  %v9298_v15 = vld [vmem:[%s19674_s1 + $0x1e8] sm:$0xff]  ;;  %v9312_v53 = vld [vmem:[%s19674_s1 + $0x258] sm:$0xff] }
  0x84   :  { %9237 = vmatmul.mubr.msk.f32.vlgmr.msra.gmra.mrb[4].mxu1 %vm121_vm0, %v13986_v14  ;;  %10737 = vmatprep.subr.bf16.mxu1 %v14051_v24  ;;  %v9302_v19 = vld [vmem:[%s19674_s1 + $0x208] sm:$0xff]  ;;  %v14400_v55 = vpack.c.bf16 %v9312_v53, %v9308_v16  ;;  %v14423_v16 = vpack.c.bf16 %v9336_v35, %v9332_v34  ;;  %v9331_v53 = vld [vmem:[%s19674_s1 + $0x2c0] sm:$0xff]  ;;  %v9325_v35 = vld [vmem:[%s19674_s1 + $0x290] sm:$0xff] }
  0x85   :  { %10739 = vmatpush1.bf16.msra.mxu1 %v14062_v5  ;;  %2379 = vmatprep.mubr.f32.mxu1 %v19838_v54  ;;  %v2462_v54 = vld [vmem:[%s19674_s1 + $0x18] sm:$0xff]  ;;  %v14308_v43 = vpack.c.bf16 %v9302_v19, %v9298_v15  ;;  %v9324_v15 = vld [vmem:[%s19674_s1 + $0x288] sm:$0xff] }
  0x86   :  { %2516 = vmatpush1.msra.mxu0 %v14084_v22  ;;  %10741 = vmatprep.subr.bf16.mxu1 %v14072_v17  ;;  %v14161_v42 = vpack.c.bf16 %v2466_v13, %v2462_v54  ;;  %v9301_v54 = vld [vmem:[%s19674_s1 + $0x200] sm:$0xff]  ;;  %v14284_v13 = vpack.c.bf16 %v9277_v28, %v9273_v11  ;;  %v9303_v11 = vld [vmem:[%s19674_s1 + $0x210] sm:$0xff]  ;;  %v14358_v28 = vld [vmem:[%s19674_s1 + $0x268] sm:$0xff]  ;;  %19867 = vst [vmem:[#allocation5_spill] sm:$0xff] %v14400_v55 }
  0x87   :  { %10745 = vmatprep.subr.bf16.mxu0 %v14086_v36  ;;  %9263 = vmatmul.mubr.msk.f32.vlgmr.msra.gmra.mrb[8].mxu0 %vm121_vm0, %v13584_v60  ;;  %v9328_v19 = vld [vmem:[%s19674_s1 + $0x2a8] sm:$0xff]  ;;  %v14390_v30 = vpack.c.bf16 %v9303_v11, %v9299_v56  ;;  %19871 = vst [vmem:[#allocation9_spill] sm:$0xff] %v14423_v16 }
  0x88   :  { %10747 = vmatpush1.bf16.msra.mxu0 %v14089_v44  ;;  %2577 = vmatprep.mubr.f32.mxu0 %v14125_v23  ;;  %v14414_v56 = vpack.c.bf16 %v9328_v19, %v9324_v15  ;;  %v9335_v15 = vld [vmem:[%s19674_s1 + $0x2e0] sm:$0xff] }
  0x89   :  { %10749 = vmatprep.subr.bf16.mxu0 %v14095_v10  ;;  %10743 = vmatpush1.bf16.msra.mxu1 %v14104_v4  ;;  %19866 = vst [vmem:[#allocation4_spill] sm:$0xff] %v14390_v30  ;;  %v14451_v34 = vpack.c.bf16 %v9335_v15, %v9331_v53  ;;  %v9334_v53 = vld [vmem:[%s19674_s1 + $0x2d8] sm:$0xff] }
  0x8a   :  { %9238 = vmatmul.mubr.msk.f32.gmra.mrb[6].mxu1 %vm121_vm0, %v14019_v47  ;;  %2592 = vmatprep.subr.mxu1 %v14114_v12  ;;  %19869 = vst [vmem:[#allocation8_spill] sm:$0xff] %v14414_v56  ;;  %v9338_v15 = vld [vmem:[%s19674_s1 + $0x2f8] sm:$0xff] }
  0x8b   :  { %9264 = vmatmul.mubr.msk.f32.gmra.mrb[10].mxu0 %vm121_vm0, %v13626_v37  ;;  %2648 = vmatprep.mubr.f32.mxu1 %v14125_v23  ;;  %19874 = vst [vmem:[#allocation12_spill] sm:$0xff] %v14451_v34 }
  0x8c   :  { %10751 = vmatpush1.bf16.msra.mxu0 %v14123_v20  ;;  %2731 = vmatprep.mubr.f32.mxu0 %v14125_v23 }
  0x8d   :  { %2675 = vmatprep.subr.mxu0 %v14139_v31  ;;  %2593 = vmatpush1.msra.mxu1 %v14159_v39 }
  0x8e   :  { %10753 = vmatprep.subr.bf16.mxu1 %v14161_v42  ;;  %9265 = vmatmul.mubr.msk.f32.vlgmr.msra.gmra.mrb[8].mxu1 %vm121_vm0, %v13584_v60  ;;  %v14226_v60 = vld [vmem:[%s19674_s1 + $0x98] sm:$0xff] }
  0x8f   :  { %10755 = vmatpush1.bf16.msra.mxu1 %v14172_v51  ;;  %2654 = vmatprep.mubr.f32.mxu1 %v14125_v23 }
  0x90   :  { %2676 = vmatpush1.msra.mxu0 %v14194_v0  ;;  %10757 = vmatprep.subr.bf16.mxu1 %v14182_v58 }
  0x91   :  { %10761 = vmatprep.subr.bf16.mxu0 %v14196_v1  ;;  %9267 = vmatmul.mubr.msk.f32.vlgmr.msra.gmra.mrb[8].mxu0 %vm121_vm0, %v9239_v6 }
  0x92   :  { %10763 = vmatpush1.bf16.msra.mxu0 %v14202_v26  ;;  %2737 = vmatprep.mubr.f32.mxu0 %v14125_v23 }
  0x93   :  { %10765 = vmatprep.subr.bf16.mxu0 %v14208_v32  ;;  %10759 = vmatpush1.bf16.msra.mxu1 %v14216_v49 }
  0x94   :  { %9266 = vmatmul.mubr.msk.f32.gmra.mrb[10].mxu1 %vm121_vm0, %v13626_v37  ;;  %2752 = vmatprep.subr.mxu1 %v14226_v60  ;;  %v9297_v37 = vld [vmem:[%s19674_s1 + $0x1e0] sm:$0xff] }
  0x95   :  { %9268 = vmatmul.mubr.msk.f32.gmra.mrb[10].mxu0 %vm121_vm0, %v9240_v2  ;;  %2808 = vmatprep.mubr.f32.mxu1 %v14125_v23  ;;  %v14311_v46 = vpack.c.bf16 %v9301_v54, %v9297_v37  ;;  %v14377_v37 = vld [vmem:[%s19674_s1 + $0x1d0] sm:$0xff]  ;;  %v14379_v54 = vpack.c.bf16 %v9304_v45, %v9300_v40  ;;  %v14412_v45 = vld [vmem:[%s19674_s1 + $0x260] sm:$0xff] }
  0x96   :  { %10767 = vmatpush1.bf16.msra.mxu0 %v14235_v57  ;;  %2913 = vmatprep.mubr.f32.mxu0 %v14125_v23  ;;  %v9311_v40 = vld [vmem:[%s19674_s1 + $0x250] sm:$0xff]  ;;  %19868 = vst [vmem:[#allocation6_spill] sm:$0xff] %v14412_v45 }
  0x97   :  { %2857 = vmatprep.subr.mxu0 %v14252_v59  ;;  %2753 = vmatpush1.msra.mxu1 %v14272_v8  ;;  %v14431_v19 = vpack.c.bf16 %v9311_v40, %v9307_v61  ;;  %v9329_v61 = vld [vmem:[%s19674_s1 + $0x2b0] sm:$0xff]  ;;  %v14465_v40 = vld [vmem:[%s19674_s1 + $0x308] sm:$0xff] }
  0x98   :  { %10769 = vmatprep.subr.bf16.mxu1 %v14274_v9  ;;  %9269 = vmatmul.mubr.msk.f32.vlgmr.msra.gmra.mrb[8].mxu1 %vm121_vm0, %v9239_v6  ;;  %v14335_v6 = vld [vmem:[%s19674_s1 + $0x1d8] sm:$0xff]  ;;  %19875 = vst [vmem:[#allocation13_spill] sm:$0xff] %v14465_v40 }
  0x99   :  { %10771 = vmatpush1.bf16.msra.mxu1 %v14284_v13  ;;  %2814 = vmatprep.mubr.f32.mxu1 %v14125_v23  ;;  %19872 = vst [vmem:[#allocation10_spill] sm:$0xff] %v14431_v19 }
  0x9a   :  { %2858 = vmatpush1.msra.mxu0 %v14306_v38  ;;  %10773 = vmatprep.subr.bf16.mxu1 %v14294_v33 }
  0x9b   :  { %10777 = vmatprep.subr.bf16.mxu0 %v14308_v43  ;;  %9291 = vmatmul.mubr.msk.f32.vlgmr.msra.gmra.mrb[8].mxu0 %vm121_vm0, %v13702_v3 }
  0x9c   :  { %10779 = vmatpush1.bf16.msra.mxu0 %v14311_v46  ;;  %2919 = vmatprep.mubr.f32.mxu0 %v14125_v23 }
  0x9d   :  { %10781 = vmatprep.subr.bf16.mxu0 %v14316_v52  ;;  %10775 = vmatpush1.bf16.msra.mxu1 %v14324_v62 }
  0x9e   :  { %9270 = vmatmul.mubr.msk.f32.gmra.mrb[10].mxu1 %vm121_vm0, %v9240_v2  ;;  %2934 = vmatprep.subr.mxu1 %v14335_v6  ;;  %v9323_v2 = vld [vmem:[%s19674_s1 + $0x280] sm:$0xff] }
  0x9f   :  { %9292 = vmatmul.mubr.msk.f32.gmra.mrb[10].mxu0 %vm121_vm0, %v13744_v27  ;;  %2990 = vmatprep.mubr.f32.mxu1 %v14125_v23  ;;  %v14417_v11 = vpack.c.bf16 %v9327_v29, %v9323_v2  ;;  %v9326_v2 = vld [vmem:[%s19674_s1 + $0x298] sm:$0xff] }
  0xa0   :  { %10783 = vmatpush1.bf16.msra.mxu0 %v14344_v50  ;;  %3103 = vmatprep.mubr.f32.mxu0 %v14125_v23  ;;  %v9330_v29 = vld [vmem:[%s19674_s1 + $0x2b8] sm:$0xff] }
  0xa1   :  { %3047 = vmatprep.subr.mxu0 %v14358_v28  ;;  %2935 = vmatpush1.msra.mxu1 %v14377_v37  ;;  %19870 = vst [vmem:[#allocation7_spill] sm:$0xff] %v14417_v11 }
  0xa2   :  { %10785 = vmatprep.subr.bf16.mxu1 %v14379_v54  ;;  %9293 = vmatmul.mubr.msk.f32.vlgmr.msra.gmra.mrb[8].mxu1 %vm121_vm0, %v13702_v3  ;;  %v14442_v3 = vld [vmem:[%s19674_s1 + $0x278] sm:$0xff] }
  0xa3   :  { %10787 = vmatpush1.bf16.msra.mxu1 %v14390_v30  ;;  %2996 = vmatprep.mubr.f32.mxu1 %v14125_v23  ;;  %19873 = vst [vmem:[#allocation11_spill] sm:$0xff] %v14442_v3  ;;  %v9333_v30 = vld [vmem:[%s19674_s1 + $0x2d0] sm:$0xff] }
  0xa4   :  { %3048 = vmatpush1.msra.mxu0 %v14412_v45  ;;  %10789 = vmatprep.subr.bf16.mxu1 %v14400_v55  ;;  %v14498_v55 = vpack.c.bf16 %v9329_v61, %v9325_v35  ;;  %v14508_v45 = vpack.c.bf16 %v9338_v15, %v9334_v53  ;;  %v9337_v35 = vld [vmem:[%s19674_s1 + $0x2f0] sm:$0xff]  ;;  %v14520_v61 = vld [vmem:[%s19674_s1 + $0x300] sm:$0xff] }
  0xa5   :  { %10793 = vmatprep.subr.bf16.mxu0 %v14414_v56  ;;  %9317 = vmatmul.mubr.msk.f32.vlgmr.msra.gmra.mrb[8].mxu0 %vm121_vm0, %v13800_v21  ;;  %v14487_v56 = vpack.c.bf16 %v9330_v29, %v9326_v2  ;;  %v9358_v2 = vld [vmem:[%s19674_s1 + $0x368] sm:$0xff] }
  0xa6   :  { %10795 = vmatpush1.bf16.msra.mxu0 %v14417_v11  ;;  %3109 = vmatprep.mubr.f32.mxu0 %v14125_v23  ;;  %v14485_v11 = vld [vmem:[%s19674_s1 + $0x270] sm:$0xff]  ;;  %v9362_v29 = vld [vmem:[%s19674_s1 + $0x388] sm:$0xff] }
  0xa7   :  { %10797 = vmatprep.subr.bf16.mxu0 %v14423_v16  ;;  %10791 = vmatpush1.bf16.msra.mxu1 %v14431_v19  ;;  %v9350_v19 = vld [vmem:[%s19674_s1 + $0x328] sm:$0xff]  ;;  %v14531_v15 = vpack.c.bf16 %v9362_v29, %v9358_v2  ;;  %v9351_v2 = vld [vmem:[%s19674_s1 + $0x330] sm:$0xff] }
  0xa8   :  { %9294 = vmatmul.mubr.msk.f32.gmra.mrb[10].mxu1 %vm121_vm0, %v13744_v27  ;;  %3124 = vmatprep.subr.mxu1 %v14442_v3  ;;  %v9354_v16 = vld [vmem:[%s19674_s1 + $0x348] sm:$0xff]  ;;  %v9349_v27 = vld [vmem:[%s19674_s1 + $0x320] sm:$0xff]  ;;  %v9355_v29 = vld [vmem:[%s19674_s1 + $0x350] sm:$0xff] }
  0xa9   :  { %9318 = vmatmul.mubr.msk.f32.gmra.mrb[10].mxu0 %vm121_vm0, %v13824_v41  ;;  %v9353_v3 = vld [vmem:[%s19674_s1 + $0x340] sm:$0xff]  ;;  %3180 = vmatprep.mubr.f32.mxu1 %v14125_v23  ;;  %19877 = vst [vmem:[#allocation15_spill] sm:$0xff] %v14531_v15 }
  0xaa   :  { %10799 = vmatpush1.bf16.msra.mxu0 %v14451_v34  ;;  %3293 = vmatprep.mubr.f32.mxu0 %v14125_v23  ;;  %v14522_v34 = vpack.c.bf16 %v9354_v16, %v9350_v19  ;;  %v14525_v53 = vpack.c.bf16 %v9353_v3, %v9349_v27  ;;  %v9361_v16 = vld [vmem:[%s19674_s1 + $0x380] sm:$0xff]  ;;  %v14539_v19 = vpack.c.bf16 %v9337_v35, %v9333_v30  ;;  %v9352_v30 = vld [vmem:[%s19674_s1 + $0x338] sm:$0xff] }
  0xab   :  { %3237 = vmatprep.subr.mxu0 %v14465_v40  ;;  %3125 = vmatpush1.msra.mxu1 %v14485_v11  ;;  %v9357_v40 = vld [vmem:[%s19674_s1 + $0x360] sm:$0xff]  ;;  %v9356_v3 = vld [vmem:[%s19674_s1 + $0x358] sm:$0xff] }
  0xac   :  { %19876 = vst [vmem:[#allocation14_spill] sm:$0xff] %v14525_v53  ;;  %10801 = vmatprep.subr.bf16.mxu1 %v14487_v56  ;;  %9319 = vmatmul.mubr.msk.f32.vlgmr.msra.gmra.mrb[8].mxu1 %vm121_vm0, %v13800_v21  ;;  %19878 = vst [vmem:[#allocation16_spill] sm:$0xff] %v14539_v19  ;;  %v14550_v21 = vld [vmem:[%s19674_s1 + $0x318] sm:$0xff]  ;;  %v14560_v27 = vpack.c.bf16 %v9361_v16, %v9357_v40  ;;  %v14579_v16 = vld [vmem:[%s19674_s1 + $0x3a8] sm:$0xff] }
  0xad   :  { %10803 = vmatpush1.bf16.msra.mxu1 %v14498_v55  ;;  %3186 = vmatprep.mubr.f32.mxu1 %v14125_v23  ;;  %19879 = vst [vmem:[#allocation18_spill] sm:$0xff] %v14550_v21  ;;  %v9360_v35 = vld [vmem:[%s19674_s1 + $0x378] sm:$0xff] }
  0xae   :  { %3238 = vmatpush1.msra.mxu0 %v14520_v61  ;;  %10805 = vmatprep.subr.bf16.mxu1 %v14508_v45  ;;  %v9364_v40 = vld [vmem:[%s19674_s1 + $0x398] sm:$0xff] }
  0xaf   :  { %10809 = vmatprep.subr.bf16.mxu0 %v14522_v34  ;;  %9343 = vmatmul.mubr.msk.f32.vlgmr.msra.gmra.mrb[8].mxu0 %vm121_vm0, %v13986_v14 }
  0xb0   :  { %10811 = vmatpush1.bf16.msra.mxu0 %v14525_v53  ;;  %3299 = vmatprep.mubr.f32.mxu0 %v14125_v23  ;;  %v14594_v53 = vpack.c.bf16 %v9355_v29, %v9351_v2  ;;  %v14616_v2 = vld [vmem:[%s19675_s0 + $0x61] sm:$0xff] }
  0xb1   :  { %10813 = vmatprep.subr.bf16.mxu0 %v14531_v15  ;;  %10807 = vmatpush1.bf16.msra.mxu1 %v14539_v19  ;;  %v14587_v19 = vld [vmem:[%s19674_s1 + $0x310] sm:$0xff]  ;;  %v14589_v15 = vpack.c.bf16 %v9356_v3, %v9352_v30  ;;  %v14610_v3 = vld [vmem:[%s19674_s1 + $0x3a0] sm:$0xff] }
  0xb2   :  { %9320 = vmatmul.mubr.msk.f32.gmra.mrb[10].mxu1 %vm121_vm0, %v13824_v41  ;;  %3314 = vmatprep.subr.mxu1 %v14550_v21  ;;  %v14598_v41 = vpack.c.bf16 %v9364_v40, %v9360_v35  ;;  %v9359_v21 = vld [vmem:[%s19674_s1 + $0x370] sm:$0xff]  ;;  %v14633_v35 = vld [vmem:[%s19674_s1 + $0x3b8] sm:$0xff]  ;;  %v1210_v40 = vlaneseq }
  0xb3   :  { %9344 = vmatmul.mubr.msk.f32.gmra.mrb[10].mxu0 %vm121_vm0, %v14019_v47  ;;  %3370 = vmatprep.mubr.f32.mxu1 %v14125_v23  ;;  %v9363_v30 = vld [vmem:[%s19674_s1 + $0x390] sm:$0xff] }
  0xb4   :  { %10815 = vmatpush1.bf16.msra.mxu0 %v14560_v27  ;;  %3483 = vmatprep.mubr.f32.mxu0 %v14125_v23  ;;  %v14623_v29 = vpack.c.bf16 %v9363_v30, %v9359_v21  ;;  %v14640_v21 = vld [vmem:[%s19675_s0 + $0x71] sm:$0xff] }
  0xb5   :  { %3427 = vmatprep.subr.mxu0 %v14579_v16  ;;  %3315 = vmatpush1.msra.mxu1 %v14587_v19  ;;  %v9527_v30 = vld [vmem:[%s19676_s3 + $0x4b0] sm:$0xff] }
  0xb6   :  { %10817 = vmatprep.subr.bf16.mxu1 %v14589_v15  ;;  %9345 = vmatmul.mubr.msk.f32.vlgmr.msra.gmra.mrb[8].mxu1 %vm121_vm0, %v13986_v14 }
  0xb7   :  { %10819 = vmatpush1.bf16.msra.mxu1 %v14594_v53  ;;  %3376 = vmatprep.mubr.f32.mxu1 %v14125_v23 }
  0xb8   :  { %3428 = vmatpush1.msra.mxu0 %v14610_v3  ;;  %10821 = vmatprep.subr.bf16.mxu1 %v14598_v41 }
  0xb9   :  { %9369 = vmatmul.mubr.msk.f32.vlgmr.msra.gmra.mrb[8].mxu0 %vm121_vm0, %v14616_v2  ;;  %10825 = vmatprep.subr.bf16.mxu0 %v13980_v7  ;;  %v14650_v7 = vld [vmem:[%s19674_s1 + $0x3b0] sm:$0xff] }
  0xba   :  { %10827 = vmatpush1.bf16.msra.mxu0 %v13988_v18  ;;  %3489 = vmatprep.mubr.f32.mxu0 %v14125_v23  ;;  %v3666_v18 = vld [vmem:[%s19675_s0 + $0x1] sm:$0xff] }
  0xbb   :  { %10829 = vmatprep.subr.bf16.mxu0 %v13994_v25  ;;  %10823 = vmatpush1.bf16.msra.mxu1 %v14623_v29  ;;  %v3667_v25 = vld [vmem:[%s19675_s0 + $0x11] sm:$0xff] }
  0xbc   :  { %9346 = vmatmul.mubr.msk.f32.gmra.mrb[10].mxu1 %vm121_vm0, %v14019_v47  ;;  %3504 = vmatprep.subr.mxu1 %v14633_v35 }
  0xbd   :  { %9370 = vmatmul.mubr.msk.f32.gmra.mrb[10].mxu0 %vm121_vm0, %v14640_v21  ;;  %3560 = vmatprep.mubr.f32.mxu1 %v14125_v23 }
  0xbe   :  { %10831 = vmatpush1.bf16.msra.mxu0 %v14021_v48  ;;  %3758 = vmatprep.mubr.f32.mxu0 %v14125_v23  ;;  %v9373_v48 = vld [vmem:[%s19675_s0 + $0x60] sm:$0xff] }
  0xbf   :  { %3702 = vmatprep.subr.mxu0 %v14042_v63  ;;  %3505 = vmatpush1.msra.mxu1 %v14650_v7  ;;  %v9374_v63 = vld [vmem:[%s19675_s0 + $0x70] sm:$0xff] }
  0xc0   :  { %9371 = vmatmul.mubr.msk.f32.vlgmr.msra.gmra.mrb[8].mxu1 %vm121_vm0, %v14616_v2  ;;  %10833 = vmatprep.subr.bf16.mxu1 %v14051_v24  ;;  %v9403_v24 = vld [vmem:[%s19675_s0 + $0x21] sm:$0xff] }
  0xc1   :  { %10835 = vmatpush1.bf16.msra.mxu1 %v14062_v5  ;;  %3566 = vmatprep.mubr.f32.mxu1 %v14125_v23  ;;  %v9404_v5 = vld [vmem:[%s19675_s0 + $0x31] sm:$0xff] }
  0xc2   :  { %3703 = vmatpush1.msra.mxu0 %v14084_v22  ;;  %10837 = vmatprep.subr.bf16.mxu1 %v14072_v17  ;;  %v19880_v17 = vld [vmem:[#allocation4_spill] sm:$0xff]  ;;  %v19881_v22 = vld [vmem:[#allocation6_spill] sm:$0xff] }
  0xc3   :  { %10841 = vmatprep.subr.bf16.mxu0 %v14086_v36  ;;  %9395 = vmatmul.mubr.msk.f32.vlgmr.msra.gmra.mrb[12].mxu0 %vm121_vm0, %v3666_v18  ;;  %v19882_v36 = vld [vmem:[#allocation5_spill] sm:$0xff] }
  0xc4   :  { %10843 = vmatpush1.bf16.msra.mxu0 %v14089_v44  ;;  %3764 = vmatprep.mubr.f32.mxu0 %v14125_v23  ;;  %v19883_v44 = vld [vmem:[#allocation8_spill] sm:$0xff] }
  0xc5   :  { %10845 = vmatprep.subr.bf16.mxu0 %v14095_v10  ;;  %10839 = vmatpush1.bf16.msra.mxu1 %v14104_v4  ;;  %v19884_v10 = vld [vmem:[#allocation7_spill] sm:$0xff]  ;;  %v19885_v4 = vld [vmem:[#allocation9_spill] sm:$0xff] }
  0xc6   :  { %9372 = vmatmul.mubr.msk.f32.gmra.mrb[10].mxu1 %vm121_vm0, %v14640_v21  ;;  %3779 = vmatprep.subr.mxu1 %v14114_v12  ;;  %v19886_v12 = vld [vmem:[#allocation10_spill] sm:$0xff] }
  0xc7   :  { %9396 = vmatmul.mubr.msk.f32.gmra.mrb[14].mxu0 %vm121_vm0, %v3667_v25  ;;  %3835 = vmatprep.mubr.f32.mxu1 %v14125_v23 }
  0xc8   :  { %10847 = vmatpush1.bf16.msra.mxu0 %v14123_v20  ;;  %3918 = vmatprep.mubr.f32.mxu0 %v14125_v23  ;;  %v19887_v20 = vld [vmem:[#allocation11_spill] sm:$0xff] }
  0xc9   :  { %3862 = vmatprep.subr.mxu0 %v14139_v31  ;;  %3780 = vmatpush1.msra.mxu1 %v14159_v39  ;;  %v19888_v31 = vld [vmem:[#allocation12_spill] sm:$0xff]  ;;  %v19889_v39 = vld [vmem:[#allocation13_spill] sm:$0xff] }
  0xca   :  { %10849 = vmatprep.subr.bf16.mxu1 %v14161_v42  ;;  %9397 = vmatmul.mubr.msk.f32.vlgmr.msra.gmra.mrb[12].mxu1 %vm121_vm0, %v3666_v18  ;;  %v19890_v42 = vld [vmem:[#allocation14_spill] sm:$0xff] }
  0xcb   :  { %10851 = vmatpush1.bf16.msra.mxu1 %v14172_v51  ;;  %3841 = vmatprep.mubr.f32.mxu1 %v14125_v23  ;;  %v19891_v51 = vld [vmem:[#allocation15_spill] sm:$0xff]  ;;  %v9531_v18 = vld [vmem:[%s19676_s3 + $0x4d0] sm:$0xff] }
  0xcc   :  { %3863 = vmatpush1.msra.mxu0 %v14194_v0  ;;  %10853 = vmatprep.subr.bf16.mxu1 %v14182_v58  ;;  %v19893_v58 = vld [vmem:[#allocation18_spill] sm:$0xff]  ;;  %v9506_v0 = vld [vmem:[%s19676_s3 + $0x408] sm:$0xff] }
  0xcd   :  { %10857 = vmatprep.subr.bf16.mxu0 %v14196_v1  ;;  %9399 = vmatmul.mubr.msk.f32.vlgmr.msra.gmra.mrb[12].mxu0 %vm121_vm0, %v9373_v48  ;;  %v9508_v1 = vld [vmem:[%s19676_s3 + $0x418] sm:$0xff] }
  0xce   :  { %10859 = vmatpush1.bf16.msra.mxu0 %v14202_v26  ;;  %3924 = vmatprep.mubr.f32.mxu0 %v14125_v23  ;;  %v9505_v26 = vld [vmem:[%s19676_s3 + $0x400] sm:$0xff] }
  0xcf   :  { %10861 = vmatprep.subr.bf16.mxu0 %v14208_v32  ;;  %10855 = vmatpush1.bf16.msra.mxu1 %v14216_v49  ;;  %v9507_v32 = vld [vmem:[%s19676_s3 + $0x410] sm:$0xff]  ;;  %v4578_v49 = vld [vmem:[%s19675_s0 + $0x2] sm:$0xff] }
  0xd0   :  { %9398 = vmatmul.mubr.msk.f32.gmra.mrb[14].mxu1 %vm121_vm0, %v3667_v25  ;;  %3939 = vmatprep.subr.mxu1 %v14226_v60  ;;  %v9510_v60 = vld [vmem:[%s19676_s3 + $0x428] sm:$0xff] }
  0xd1   :  { %9400 = vmatmul.mubr.msk.f32.gmra.mrb[14].mxu0 %vm121_vm0, %v9374_v63  ;;  %3995 = vmatprep.mubr.f32.mxu1 %v14125_v23  ;;  %v9534_v25 = vld [vmem:[%s19676_s3 + $0x4e8] sm:$0xff] }
  0xd2   :  { %10863 = vmatpush1.bf16.msra.mxu0 %v14235_v57  ;;  %4100 = vmatprep.mubr.f32.mxu0 %v14125_v23  ;;  %v9512_v57 = vld [vmem:[%s19676_s3 + $0x438] sm:$0xff] }
  0xd3   :  { %4044 = vmatprep.subr.mxu0 %v14252_v59  ;;  %3940 = vmatpush1.msra.mxu1 %v14272_v8  ;;  %v10922_v59 = vpack.c.bf16 %v9507_v32, %v9505_v26  ;;  %v10924_v8 = vpack.c.bf16 %v9512_v57, %v9510_v60  ;;  %v9541_v57 = vld [vmem:[%s19676_s3 + $0x520] sm:$0xff] }
  0xd4   :  { %10865 = vmatprep.subr.bf16.mxu1 %v14274_v9  ;;  %9401 = vmatmul.mubr.msk.f32.vlgmr.msra.gmra.mrb[12].mxu1 %vm121_vm0, %v9373_v48  ;;  %v9509_v9 = vld [vmem:[%s19676_s3 + $0x420] sm:$0xff]  ;;  %v9536_v48 = vld [vmem:[%s19676_s3 + $0x4f8] sm:$0xff] }
  0xd5   :  { %10867 = vmatpush1.bf16.msra.mxu1 %v14284_v13  ;;  %4001 = vmatprep.mubr.f32.mxu1 %v14125_v23  ;;  %v9511_v13 = vld [vmem:[%s19676_s3 + $0x430] sm:$0xff] }
  0xd6   :  { %4045 = vmatpush1.msra.mxu0 %v14306_v38  ;;  %10869 = vmatprep.subr.bf16.mxu1 %v14294_v33  ;;  %v4579_v33 = vld [vmem:[%s19675_s0 + $0x12] sm:$0xff]  ;;  %v9514_v38 = vld [vmem:[%s19676_s3 + $0x448] sm:$0xff] }
  0xd7   :  { %10873 = vmatprep.subr.bf16.mxu0 %v14308_v43  ;;  %9425 = vmatmul.mubr.msk.f32.vlgmr.msra.gmra.mrb[12].mxu0 %vm121_vm0, %v9403_v24  ;;  %v9516_v43 = vld [vmem:[%s19676_s3 + $0x458] sm:$0xff] }
  0xd8   :  { %10875 = vmatpush1.bf16.msra.mxu0 %v14311_v46  ;;  %4106 = vmatprep.mubr.f32.mxu0 %v14125_v23  ;;  %v10926_v46 = vpack.c.bf16 %v9511_v13, %v9509_v9  ;;  %v9546_v9 = vld [vmem:[%s19676_s3 + $0x548] sm:$0xff]  ;;  %v9548_v13 = vld [vmem:[%s19676_s3 + $0x558] sm:$0xff] }
  0xd9   :  { %10877 = vmatprep.subr.bf16.mxu0 %v14316_v52  ;;  %10871 = vmatpush1.bf16.msra.mxu1 %v14324_v62  ;;  %v10928_v52 = vpack.c.bf16 %v9516_v43, %v9514_v38  ;;  %v9513_v62 = vld [vmem:[%s19676_s3 + $0x440] sm:$0xff] }
  0xda   :  { %9402 = vmatmul.mubr.msk.f32.gmra.mrb[14].mxu1 %vm121_vm0, %v9374_v63  ;;  %4121 = vmatprep.subr.mxu1 %v14335_v6  ;;  %v9515_v6 = vld [vmem:[%s19676_s3 + $0x450] sm:$0xff] }
  0xdb   :  { %9426 = vmatmul.mubr.msk.f32.gmra.mrb[14].mxu0 %vm121_vm0, %v9404_v5  ;;  %4177 = vmatprep.mubr.f32.mxu1 %v14125_v23 }
  0xdc   :  { %10879 = vmatpush1.bf16.msra.mxu0 %v14344_v50  ;;  %4290 = vmatprep.mubr.f32.mxu0 %v14125_v23  ;;  %v9518_v50 = vld [vmem:[%s19676_s3 + $0x468] sm:$0xff] }
  0xdd   :  { %4234 = vmatprep.subr.mxu0 %v14358_v28  ;;  %4122 = vmatpush1.msra.mxu1 %v14377_v37  ;;  %v9520_v28 = vld [vmem:[%s19676_s3 + $0x478] sm:$0xff]  ;;  %v10930_v37 = vpack.c.bf16 %v9515_v6, %v9513_v62 }
  0xde   :  { %10881 = vmatprep.subr.bf16.mxu1 %v14379_v54  ;;  %9427 = vmatmul.mubr.msk.f32.vlgmr.msra.gmra.mrb[12].mxu1 %vm121_vm0, %v9403_v24  ;;  %v10932_v54 = vpack.c.bf16 %v9520_v28, %v9518_v50 }
  0xdf   :  { %10883 = vmatpush1.bf16.msra.mxu1 %v19880_v17  ;;  %4183 = vmatprep.mubr.f32.mxu1 %v14125_v23  ;;  %v9533_v17 = vld [vmem:[%s19676_s3 + $0x4e0] sm:$0xff] }
  0xe0   :  { %4235 = vmatpush1.msra.mxu0 %v19881_v22  ;;  %10885 = vmatprep.subr.bf16.mxu1 %v19882_v36  ;;  %v9535_v22 = vld [vmem:[%s19676_s3 + $0x4f0] sm:$0xff]  ;;  %v1208_v36 = vld [vmem:[%s19677_s2] sm:$0xf] }
  0xe1   :  { %10889 = vmatprep.subr.bf16.mxu0 %v19883_v44  ;;  %9451 = vmatmul.mubr.msk.f32.vlgmr.msra.gmra.mrb[12].mxu0 %vm121_vm0, %v13986_v14 }
  0xe2   :  { %10891 = vmatpush1.bf16.msra.mxu0 %v19884_v10  ;;  %4296 = vmatprep.mubr.f32.mxu0 %v14125_v23  ;;  %v9538_v10 = vld [vmem:[%s19676_s3 + $0x508] sm:$0xff] }
  0xe3   :  { %10893 = vmatprep.subr.bf16.mxu0 %v19885_v4  ;;  %10887 = vmatpush1.bf16.msra.mxu1 %v19886_v12  ;;  %v9540_v4 = vld [vmem:[%s19676_s3 + $0x518] sm:$0xff]  ;;  %v10950_v12 = vpack.c.bf16 %v9535_v22, %v9533_v17  ;;  %v9553_v22 = vld [vmem:[%s19676_s3 + $0x580] sm:$0xff] }
  0xe4   :  { %9428 = vmatmul.mubr.msk.f32.gmra.mrb[14].mxu1 %vm121_vm0, %v9404_v5  ;;  %4311 = vmatprep.subr.mxu1 %v19887_v20  ;;  %v10948_v5 = vpack.c.bf16 %v9536_v48, %v9534_v25 }
  0xe5   :  { %9452 = vmatmul.mubr.msk.f32.gmra.mrb[14].mxu0 %vm121_vm0, %v14019_v47  ;;  %4367 = vmatprep.mubr.f32.mxu1 %v14125_v23 }
  0xe6   :  { %10895 = vmatpush1.bf16.msra.mxu0 %v19888_v31  ;;  %4480 = vmatprep.mubr.f32.mxu0 %v14125_v23  ;;  %v10952_v31 = vpack.c.bf16 %v9540_v4, %v9538_v10 }
  0xe7   :  { %4424 = vmatprep.subr.mxu0 %v19889_v39  ;;  %4312 = vmatpush1.msra.mxu1 %v14485_v11  ;;  %v9524_v11 = vld [vmem:[%s19676_s3 + $0x498] sm:$0xff]  ;;  %v9537_v39 = vld [vmem:[%s19676_s3 + $0x500] sm:$0xff] }
  0xe8   :  { %10897 = vmatprep.subr.bf16.mxu1 %v14487_v56  ;;  %9453 = vmatmul.mubr.msk.f32.vlgmr.msra.gmra.mrb[12].mxu1 %vm121_vm0, %v13986_v14  ;;  %v19892_v14 = vld [vmem:[#allocation16_spill] sm:$0xff]  ;;  %v9522_v56 = vld [vmem:[%s19676_s3 + $0x488] sm:$0xff] }
  0xe9   :  { %10899 = vmatpush1.bf16.msra.mxu1 %v14498_v55  ;;  %4373 = vmatprep.mubr.f32.mxu1 %v14125_v23  ;;  %v9517_v55 = vld [vmem:[%s19676_s3 + $0x460] sm:$0xff] }
  0xea   :  { %4425 = vmatpush1.msra.mxu0 %v14520_v61  ;;  %10901 = vmatprep.subr.bf16.mxu1 %v14508_v45  ;;  %v9519_v45 = vld [vmem:[%s19676_s3 + $0x470] sm:$0xff]  ;;  %v9521_v61 = vld [vmem:[%s19676_s3 + $0x480] sm:$0xff] }
  0xeb   :  { %10905 = vmatprep.subr.bf16.mxu0 %v14522_v34  ;;  %9477 = vmatmul.mubr.msk.f32.vlgmr.msra.gmra.mrb[12].mxu0 %vm121_vm0, %v14616_v2  ;;  %v10936_v34 = vpack.c.bf16 %v9524_v11, %v9522_v56  ;;  %v9550_v11 = vld [vmem:[%s19676_s3 + $0x568] sm:$0xff] }
  0xec   :  { %10907 = vmatpush1.bf16.msra.mxu0 %v19890_v42  ;;  %4486 = vmatprep.mubr.f32.mxu0 %v14125_v23  ;;  %v9539_v42 = vld [vmem:[%s19676_s3 + $0x510] sm:$0xff] }
  0xed   :  { %10909 = vmatprep.subr.bf16.mxu0 %v19891_v51  ;;  %10903 = vmatpush1.bf16.msra.mxu1 %v19892_v14  ;;  %v9542_v14 = vld [vmem:[%s19676_s3 + $0x528] sm:$0xff] }
  0xee   :  { %9454 = vmatmul.mubr.msk.f32.gmra.mrb[14].mxu1 %vm121_vm0, %v14019_v47  ;;  %4501 = vmatprep.subr.mxu1 %v19893_v58  ;;  %v10920_v47 = vpack.c.bf16 %v9508_v1, %v9506_v0  ;;  %v9544_v58 = vld [vmem:[%s19676_s3 + $0x538] sm:$0xff] }
  0xef   :  { %9478 = vmatmul.mubr.msk.f32.gmra.mrb[14].mxu0 %vm121_vm0, %v14640_v21  ;;  %4557 = vmatprep.mubr.f32.mxu1 %v14125_v23  ;;  %v10956_v60 = vpack.c.bf16 %v9544_v58, %v9542_v14  ;;  %v9557_v58 = vld [vmem:[%s19676_s3 + $0x5a0] sm:$0xff] }
  0xf0   :  { %10911 = vmatpush1.bf16.msra.mxu0 %v14560_v27  ;;  %4670 = vmatprep.mubr.f32.mxu0 %v14125_v23 }
  0xf1   :  { %4614 = vmatprep.subr.mxu0 %v14579_v16  ;;  %4502 = vmatpush1.msra.mxu1 %v14587_v19  ;;  %v9528_v19 = vld [vmem:[%s19676_s3 + $0x4b8] sm:$0xff] }
  0xf2   :  { %10913 = vmatprep.subr.bf16.mxu1 %v14589_v15  ;;  %9479 = vmatmul.mubr.msk.f32.vlgmr.msra.gmra.mrb[12].mxu1 %vm121_vm0, %v14616_v2  ;;  %v9526_v15 = vld [vmem:[%s19676_s3 + $0x4a8] sm:$0xff]  ;;  %v9532_v2 = vld [vmem:[%s19676_s3 + $0x4d8] sm:$0xff] }
  0xf3   :  { %10915 = vmatpush1.bf16.msra.mxu1 %v14594_v53  ;;  %4563 = vmatprep.mubr.f32.mxu1 %v14125_v23  ;;  %v9523_v53 = vld [vmem:[%s19676_s3 + $0x490] sm:$0xff]  ;;  %v10940_v16 = vpack.c.bf16 %v9528_v19, %v9526_v15 }
  0xf4   :  { %4615 = vmatpush1.msra.mxu0 %v14610_v3  ;;  %10917 = vmatprep.subr.bf16.mxu1 %v14598_v41  ;;  %v10938_v27 = vpack.c.bf16 %v9523_v53, %v9521_v61  ;;  %v9525_v41 = vld [vmem:[%s19676_s3 + $0x4a0] sm:$0xff]  ;;  %v9530_v3 = vld [vmem:[%s19676_s3 + $0x4c8] sm:$0xff] }
  0xf5   :  { %9501 = vmatmul.mubr.msk.f32.vlgmr.msra.gmra.mrb[12].mxu0 %vm121_vm0, %v4578_v49  ;;  %10921 = vmatprep.subr.bf16.mxu0 %v10920_v47 }
  0xf6   :  { %4676 = vmatprep.mubr.f32.mxu0 %v14125_v23  ;;  %9480 = vmatmul.mubr.msk.f32.gmra.mrb[14].mxu1 %vm121_vm0, %v14640_v21  ;;  %v10944_v21 = vpack.c.bf16 %v9532_v2, %v9530_v3  ;;  %v9551_v3 = vld [vmem:[%s19676_s3 + $0x570] sm:$0xff] }
  0xf7   :  { %10919 = vmatpush1.bf16.msra.mxu1 %v14623_v29  ;;  %4747 = vmatprep.mubr.f32.mxu1 %v14125_v23  ;;  %v10942_v29 = vpack.c.bf16 %v9527_v30, %v9525_v41  ;;  %v9549_v30 = vld [vmem:[%s19676_s3 + $0x560] sm:$0xff] }
  0xf8   :  { %4691 = vmatprep.subr.mxu1 %v14633_v35  ;;  %10923 = vmatpush1.bf16.msra.mxu0 %v10922_v59  ;;  %v14888_v35 = vshrl.u32 %v1210_v40, 7  ;;  %v10966_v48 = vpack.c.bf16 %v9551_v3, %v9549_v30 }
  0xf9   :  { %9502 = vmatmul.mubr.msk.f32.gmra.mrb[14].mxu0 %vm121_vm0, %v4579_v33  ;;  %10925 = vmatprep.subr.bf16.mxu0 %v10924_v8 }
  0xfa   :  { %19894 = vst [vmem:[#allocation17_spill] sm:$0xff] %v14888_v35  ;;  %v14903_v24 = vsub.s32 0, %v14888_v35  ;;  %v14915_v44 = vsub.s32 1, %v14888_v35  ;;  %v14938_v1 = vsub.s32 2, %v14888_v35 }
  0xfb   :  { %4692 = vmatpush1.msra.mxu1 %v14650_v7  ;;  %v9529_v7 = vld [vmem:[%s19676_s3 + $0x4c0] sm:$0xff] }
  0xfc   :  { %9503 = vmatmul.mubr.msk.f32.vlgmr.msra.gmra.mrb[12].mxu1 %vm121_vm0, %v4578_v49  ;;  %10927 = vmatpush1.bf16.msra.mxu0 %v10926_v46  ;;  %v10946_v63 = vpack.c.bf16 %v9531_v18, %v9529_v7  ;;  %19895 = vst [vmem:[#allocation19_spill] sm:$0xff] %v14903_v24  ;;  %19896 = vst [vmem:[#allocation20_spill] sm:$0xff] %v14915_v44  ;;  %v1213_v20 = vrot.slane %v1208_v36, %v14903_v24  ;;  %v14941_v49 = vsub.s32 3, %v14888_v35  ;;  %v9556_v7 = vld [vmem:[%s19676_s3 + $0x598] sm:$0xff]  ;;  %v4884_v35 = vld [vmem:[%s19676_s3 + $0x168] sm:$0xff] }
  0xfd   :  { %4753 = vmatprep.mubr.f32.mxu1 %v14125_v23  ;;  %10929 = vmatprep.subr.bf16.mxu0 %v10928_v52  ;;  %v10934_v23 = vpack.c.bf16 %v9519_v45, %v9517_v55  ;;  %v1217_v51 = vrot.slane %v1208_v36, %v14915_v44  ;;  %v9547_v55 = vld [vmem:[%s19676_s3 + $0x550] sm:$0xff] }
  0xfe   :  { %11689 = vmatprep.subr.bf16.mxu1 %v10920_v47  ;;  %v10954_v47 = vpack.c.bf16 %v9539_v42, %v9537_v39  ;;  %v1225_v28 = vrot.slane %v1208_v36, %v14941_v49 }
  0xff   :  { %11691 = vmatpush1.bf16.msra.mxu1 %v10922_v59  ;;  %v9543_v59 = vld [vmem:[%s19676_s3 + $0x530] sm:$0xff] }
 0x100   :  { %9504 = vmatmul.mubr.msk.f32.gmra.mrb[14].mxu1 %vm121_vm0, %v4579_v33  ;;  %10931 = vmatpush1.bf16.msra.mxu0 %v10930_v37 }
 0x101   :  { %10933 = vmatprep.subr.bf16.mxu0 %v10932_v54  ;;  %11693 = vmatprep.subr.bf16.mxu1 %v10924_v8 }
 0x103   :  { %11695 = vmatpush1.bf16.msra.mxu1 %v10926_v46  ;;  %v1221_v46 = vrot.slane %v1208_v36, %v14938_v1  ;;  %v9555_v36 = vld [vmem:[%s19676_s3 + $0x590] sm:$0xff] }
 0x104   :  { %10935 = vmatpush1.bf16.msra.mxu0 %v10934_v23  ;;  %11697 = vmatprep.subr.bf16.mxu1 %v10928_v52  ;;  %v10958_v52 = vpack.c.bf16 %v9543_v59, %v9541_v57  ;;  %v10970_v42 = vpack.c.bf16 %v9555_v36, %v9553_v22  ;;  %v9578_v22 = vld [vmem:[%s19676_s3 + $0x648] sm:$0xff]  ;;  %v9580_v36 = vld [vmem:[%s19676_s3 + $0x658] sm:$0xff] }
 0x105   :  { %10937 = vmatprep.subr.bf16.mxu0 %v10936_v34 }
 0x107   :  { %11699 = vmatpush1.bf16.msra.mxu1 %v10930_v37  ;;  %v10960_v37 = vpack.c.bf16 %v9548_v13, %v9546_v9  ;;  %v9563_v9 = vld [vmem:[%s19676_s3 + $0x5d0] sm:$0xff]  ;;  %v9566_v13 = vld [vmem:[%s19676_s3 + $0x5e8] sm:$0xff] }
 0x108   :  { %10939 = vmatpush1.bf16.msra.mxu0 %v10938_v27  ;;  %11701 = vmatprep.subr.bf16.mxu1 %v10932_v54  ;;  %v9545_v54 = vld [vmem:[%s19676_s3 + $0x540] sm:$0xff] }
 0x109   :  { %10941 = vmatprep.subr.bf16.mxu0 %v10940_v16 }
 0x10b   :  { %11703 = vmatpush1.bf16.msra.mxu1 %v10934_v23  ;;  %v9552_v23 = vld [vmem:[%s19676_s3 + $0x578] sm:$0xff] }
 0x10c   :  { %10943 = vmatpush1.bf16.msra.mxu0 %v10942_v29  ;;  %11705 = vmatprep.subr.bf16.mxu1 %v10936_v34  ;;  %v10964_v41 = vpack.c.bf16 %v9552_v23, %v9550_v11 }
 0x10d   :  { %10945 = vmatprep.subr.bf16.mxu0 %v10944_v21 }
 0x10f   :  { %11707 = vmatpush1.bf16.msra.mxu1 %v10938_v27  ;;  %v10962_v27 = vpack.c.bf16 %v9547_v55, %v9545_v54 }
 0x110   :  { %10947 = vmatpush1.bf16.msra.mxu0 %v10946_v63  ;;  %11709 = vmatprep.subr.bf16.mxu1 %v10940_v16 }
 0x111   :  { %10949 = vmatprep.subr.bf16.mxu0 %v10948_v5 }
 0x113   :  { %11711 = vmatpush1.bf16.msra.mxu1 %v10942_v29 }
 0x114   :  { %v1112_v0 = vpop.f32.mrb[0].mxu0  ;;  %10951 = vmatpush1.bf16.msra.mxu0 %v10950_v12  ;;  %11713 = vmatprep.subr.bf16.mxu1 %v10944_v21  ;;  %v9554_v21 = vld [vmem:[%s19676_s3 + $0x588] sm:$0xff] }
 0x115   :  { %v1230_v26 = vadd.f32 %v1213_v20, %v1112_v0  ;;  %v1114_v32 = vpop.f32.mrb[1].mxu0  ;;  %10953 = vmatprep.subr.bf16.mxu0 %v10952_v31  ;;  %v10968_v17 = vpack.c.bf16 %v9556_v7, %v9554_v21  ;;  %v9559_v0 = vld [vmem:[%s19676_s3 + $0x5b0] sm:$0xff] }
 0x116   :  { %v1231_v8 = vadd.f32 %v1217_v51, %v1114_v32  ;;  %v9564_v32 = vld [vmem:[%s19676_s3 + $0x5d8] sm:$0xff]  ;;  %v10974_v57 = vpack.c.bf16 %v9559_v0, %v9557_v58  ;;  %v9577_v58 = vld [vmem:[%s19676_s3 + $0x640] sm:$0xff]  ;;  %v9579_v0 = vld [vmem:[%s19676_s3 + $0x650] sm:$0xff] }
 0x117   :  { %vm1238_vm1 = vcmp.gt.f32.partialorder %v1230_v26, 0.0  ;;  %v1246_v33 = vmul.f32 0.2, %v1230_v26  ;;  %11715 = vmatpush1.bf16.msra.mxu1 %v10946_v63 }
 0x118   :  { %vm1239_vm2 = vcmp.gt.f32.partialorder %v1231_v8, 0.0  ;;  %v1247_v38 = vmul.f32 0.2, %v1231_v8  ;;  %v1118_v43 = vpop.f32.mrb[2].mxu0  ;;  %10955 = vmatpush1.bf16.msra.mxu0 %v10954_v47  ;;  %11717 = vmatprep.subr.bf16.mxu1 %v10948_v5 }
 0x119   :  { %v1254_v62 = vsel %vm1238_vm1, %v1230_v26, %v1246_v33  ;;  %v1234_v6 = vadd.f32 %v1213_v20, %v1118_v43  ;;  %v1120_v50 = vpop.f32.mrb[3].mxu0  ;;  %10957 = vmatprep.subr.bf16.mxu0 %v10956_v60  ;;  %v9560_v20 = vld [vmem:[%s19676_s3 + $0x5b8] sm:$0xff]  ;;  %v9562_v26 = vld [vmem:[%s19676_s3 + $0x5c8] sm:$0xff] }
 0x11a   :  { %1262 = vst [vmem:[#allocation2] sm:$0xff] %v1254_v62  ;;  %v14964_v45 = vsel %vm1239_vm2, %v1231_v8, %v1247_v38  ;;  %v1235_v56 = vadd.f32 %v1217_v51, %v1120_v50  ;;  %v10976_v59 = vpack.c.bf16 %v9564_v32, %v9562_v26  ;;  %v9561_v8 = vld [vmem:[%s19676_s3 + $0x5c0] sm:$0xff]  ;;  %v9568_v33 = vld [vmem:[%s19676_s3 + $0x5f8] sm:$0xff]  ;;  %v9570_v62 = vld [vmem:[%s19676_s3 + $0x608] sm:$0xff] }
 0x11b   :  { %1263 = vst [vmem:[#allocation2 + $0x8] sm:$0xff] %v14964_v45  ;;  %vm1242_vm3 = vcmp.gt.f32.partialorder %v1234_v6, 0.0  ;;  %v1250_v34 = vmul.f32 0.2, %v1234_v6  ;;  %v1189_v61 = vpop.f32.mrb[0].mxu1  ;;  %11719 = vmatpush1.bf16.msra.mxu1 %v10950_v12  ;;  %v9558_v12 = vld [vmem:[%s19676_s3 + $0x5a8] sm:$0xff]  ;;  %v10978_v38 = vpack.c.bf16 %v9563_v9, %v9561_v8  ;;  %v10980_v43 = vpack.c.bf16 %v9568_v33, %v9566_v13 }
 0x11c   :  { %vm1243_vm4 = vcmp.gt.f32.partialorder %v1235_v56, 0.0  ;;  %v1251_v53 = vmul.f32 0.2, %v1235_v56  ;;  %v1232_v15 = vadd.f32 %v1221_v46, %v1189_v61  ;;  %v1191_v19 = vpop.f32.mrb[1].mxu1  ;;  %10959 = vmatpush1.bf16.msra.mxu0 %v10958_v52  ;;  %11721 = vmatprep.subr.bf16.mxu1 %v10952_v31  ;;  %v10972_v14 = vpack.c.bf16 %v9560_v20, %v9558_v12  ;;  %v9569_v61 = vld [vmem:[%s19676_s3 + $0x600] sm:$0xff]  ;;  %v9582_v26 = vld [vmem:[%s19676_s3 + $0x668] sm:$0xff] }
 0x11d   :  { %v1258_v40 = vsel %vm1242_vm3, %v1234_v6, %v1250_v34  ;;  %v1233_v16 = vadd.f32 %v1225_v28, %v1191_v19  ;;  %10961 = vmatprep.subr.bf16.mxu0 %v10960_v37  ;;  %v9572_v6 = vld [vmem:[%s19676_s3 + $0x618] sm:$0xff]  ;;  %v9574_v19 = vld [vmem:[%s19676_s3 + $0x628] sm:$0xff]  ;;  %v15090_v8 = vpack.c.bf16 %v9579_v0, %v9577_v58  ;;  %v9607_v58 = vld [vmem:[%s19676_s3 + $0x730] sm:$0xff] }
 0x11e   :  { %1266 = vst [vmem:[#allocation2 + $0x40] sm:$0xff] %v1258_v40  ;;  %v1259_v2 = vsel %vm1243_vm4, %v1235_v56, %v1251_v53  ;;  %vm1240_vm5 = vcmp.gt.f32.partialorder %v1232_v15, 0.0  ;;  %v1248_v29 = vmul.f32 0.2, %v1232_v15  ;;  %v9571_v53 = vld [vmem:[%s19676_s3 + $0x610] sm:$0xff]  ;;  %v9584_v32 = vld [vmem:[%s19676_s3 + $0x678] sm:$0xff] }
 0x11f   :  { %1267 = vst [vmem:[#allocation2 + $0x48] sm:$0xff] %v1259_v2  ;;  %vm1241_vm6 = vcmp.gt.f32.partialorder %v1233_v16, 0.0  ;;  %v1249_v18 = vmul.f32 0.2, %v1233_v16  ;;  %11723 = vmatpush1.bf16.msra.mxu1 %v10954_v47  ;;  %v15052_v21 = vpack.c.bf16 %v9571_v53, %v9569_v61  ;;  %v15093_v33 = vpack.c.bf16 %v9584_v32, %v9582_v26  ;;  %v9610_v0 = vld [vmem:[%s19676_s3 + $0x748] sm:$0xff] }
 0x120   :  { %v1256_v25 = vsel %vm1240_vm5, %v1232_v15, %v1248_v29  ;;  %10963 = vmatpush1.bf16.msra.mxu0 %v10962_v27  ;;  %11725 = vmatprep.subr.bf16.mxu1 %v10956_v60 }
 0x121   :  { %1264 = vst [vmem:[#allocation2 + $0x10] sm:$0xff] %v1256_v25  ;;  %v1257_v63 = vsel %vm1241_vm6, %v1233_v16, %v1249_v18  ;;  %v1195_v5 = vpop.f32.mrb[2].mxu1  ;;  %10965 = vmatprep.subr.bf16.mxu0 %v10964_v41 }
 0x122   :  { %1265 = vst [vmem:[#allocation2 + $0x18] sm:$0xff] %v1257_v63  ;;  %v1236_v10 = vadd.f32 %v1221_v46, %v1195_v5  ;;  %v1197_v4 = vpop.f32.mrb[3].mxu1  ;;  %v9565_v46 = vld [vmem:[%s19676_s3 + $0x5e0] sm:$0xff]  ;;  %v9575_v63 = vld [vmem:[%s19676_s3 + $0x630] sm:$0xff] }
 0x123   :  { %v1237_v31 = vadd.f32 %v1225_v28, %v1197_v4  ;;  %11727 = vmatpush1.bf16.msra.mxu1 %v10958_v52  ;;  %v9567_v52 = vld [vmem:[%s19676_s3 + $0x5f0] sm:$0xff]  ;;  %v10984_v28 = vpack.c.bf16 %v9572_v6, %v9570_v62  ;;  %v9588_v62 = vld [vmem:[%s19676_s3 + $0x698] sm:$0xff] }
 0x124   :  { %vm1244_vm7 = vcmp.gt.f32.partialorder %v1236_v10, 0.0  ;;  %v1252_v39 = vmul.f32 0.2, %v1236_v10  ;;  %10967 = vmatpush1.bf16.msra.mxu0 %v10966_v48  ;;  %11729 = vmatprep.subr.bf16.mxu1 %v10960_v37  ;;  %v10982_v50 = vpack.c.bf16 %v9567_v52, %v9565_v46  ;;  %v2394_v37 = vld [vmem:[%s19677_s2] sm:$0xf]  ;;  %v9586_v52 = vld [vmem:[%s19676_s3 + $0x688] sm:$0xff] }
 0x125   :  { %vm1245_vm8 = vcmp.gt.f32.partialorder %v1237_v31, 0.0  ;;  %v1253_v51 = vmul.f32 0.2, %v1237_v31  ;;  %10969 = vmatprep.subr.bf16.mxu0 %v10968_v17  ;;  %v2399_v54 = vrot.slane %v2394_v37, %v14903_v24  ;;  %v2403_v55 = vrot.slane %v2394_v37, %v14915_v44 }
 0x126   :  { %v1260_v47 = vsel %vm1244_vm7, %v1236_v10, %v1252_v39  ;;  %v2411_v29 = vrot.slane %v2394_v37, %v14941_v49 }
 0x127   :  { %1268 = vst [vmem:[#allocation2 + $0x50] sm:$0xff] %v1260_v47  ;;  %v1261_v60 = vsel %vm1245_vm8, %v1237_v31, %v1253_v51  ;;  %11731 = vmatpush1.bf16.msra.mxu1 %v10962_v27  ;;  %v9576_v27 = vld [vmem:[%s19676_s3 + $0x638] sm:$0xff] }
 0x128   :  { %1269 = vst [vmem:[#allocation2 + $0x58] sm:$0xff] %v1261_v60  ;;  %10971 = vmatpush1.bf16.msra.mxu0 %v10970_v42  ;;  %11733 = vmatprep.subr.bf16.mxu1 %v10964_v41  ;;  %v2407_v41 = vrot.slane %v2394_v37, %v14938_v1  ;;  %v15054_v25 = vpack.c.bf16 %v9576_v27, %v9574_v19  ;;  %v9591_v19 = vld [vmem:[%s19676_s3 + $0x6b0] sm:$0xff]  ;;  %v9594_v27 = vld [vmem:[%s19676_s3 + $0x6c8] sm:$0xff] }
 0x129   :  { %10973 = vmatprep.subr.bf16.mxu0 %v10972_v14 }
 0x12b   :  { %11735 = vmatpush1.bf16.msra.mxu1 %v10966_v48  ;;  %v9573_v48 = vld [vmem:[%s19676_s3 + $0x620] sm:$0xff] }
 0x12c   :  { %10975 = vmatpush1.bf16.msra.mxu0 %v10974_v57  ;;  %11737 = vmatprep.subr.bf16.mxu1 %v10968_v17  ;;  %v15069_v39 = vpack.c.bf16 %v9575_v63, %v9573_v48  ;;  %v9597_v48 = vld [vmem:[%s19676_s3 + $0x6e0] sm:$0xff]  ;;  %v9599_v63 = vld [vmem:[%s19676_s3 + $0x6f0] sm:$0xff] }
 0x12d   :  { %10977 = vmatprep.subr.bf16.mxu0 %v10976_v59 }
 0x12f   :  { %11739 = vmatpush1.bf16.msra.mxu1 %v10970_v42 }
 0x130   :  { %10979 = vmatpush1.bf16.msra.mxu0 %v10978_v38  ;;  %11741 = vmatprep.subr.bf16.mxu1 %v10972_v14  ;;  %v15072_v14 = vpack.c.bf16 %v9580_v36, %v9578_v22  ;;  %v15186_v22 = vpack.c.bf16 %v9599_v63, %v9597_v48 }
 0x131   :  { %10981 = vmatprep.subr.bf16.mxu0 %v10980_v43 }
 0x133   :  { %11743 = vmatpush1.bf16.msra.mxu1 %v10974_v57 }
 0x134   :  { %10983 = vmatpush1.bf16.msra.mxu0 %v10982_v50  ;;  %11745 = vmatprep.subr.bf16.mxu1 %v10976_v59 }
 0x135   :  { %10985 = vmatprep.subr.bf16.mxu0 %v10984_v28 }
 0x137   :  { %11747 = vmatpush1.bf16.msra.mxu1 %v10978_v38  ;;  %v9581_v38 = vld [vmem:[%s19676_s3 + $0x660] sm:$0xff] }
 0x138   :  { %11749 = vmatprep.subr.bf16.mxu1 %v10980_v43  ;;  %v9583_v43 = vld [vmem:[%s19676_s3 + $0x670] sm:$0xff] }
 0x13b   :  { %11751 = vmatpush1.bf16.msra.mxu1 %v10982_v50 }
 0x13c   :  { %11753 = vmatprep.subr.bf16.mxu1 %v10984_v28  ;;  %v15108_v28 = vpack.c.bf16 %v9583_v43, %v9581_v38 }
 0x150   :  { %v2298_v56 = vpop.f32.mrb[4].mxu0 }
 0x151   :  { %v2416_v11 = vadd.f32 %v2399_v54, %v2298_v56  ;;  %v2300_v23 = vpop.f32.mrb[5].mxu0  ;;  %v9587_v56 = vld [vmem:[%s19676_s3 + $0x690] sm:$0xff] }
 0x152   :  { %v2417_v34 = vadd.f32 %v2403_v55, %v2300_v23  ;;  %v9590_v23 = vld [vmem:[%s19676_s3 + $0x6a8] sm:$0xff] }
 0x153   :  { %vm2424_vm9 = vcmp.gt.f32.partialorder %v2416_v11, 0.0  ;;  %v2432_v15 = vmul.f32 0.2, %v2416_v11 }
 0x154   :  { %vm2425_vm10 = vcmp.gt.f32.partialorder %v2417_v34, 0.0  ;;  %v2433_v40 = vmul.f32 0.2, %v2417_v34  ;;  %v2304_v16 = vpop.f32.mrb[6].mxu0 }
 0x155   :  { %v2440_v30 = vsel %vm2424_vm9, %v2416_v11, %v2432_v15  ;;  %v2420_v3 = vadd.f32 %v2399_v54, %v2304_v16  ;;  %v2306_v2 = vpop.f32.mrb[7].mxu0  ;;  %v15113_v54 = vpack.c.bf16 %v9588_v62, %v9586_v52  ;;  %v9589_v15 = vld [vmem:[%s19676_s3 + $0x6a0] sm:$0xff]  ;;  %v9615_v52 = vld [vmem:[%s19676_s3 + $0x770] sm:$0xff]  ;;  %v9618_v62 = vld [vmem:[%s19676_s3 + $0x788] sm:$0xff] }
 0x156   :  { %2449 = vst [vmem:[#allocation2 + $0x80] sm:$0xff] %v2440_v30  ;;  %v2441_v7 = vsel %vm2425_vm10, %v2417_v34, %v2433_v40  ;;  %v2421_v18 = vadd.f32 %v2403_v55, %v2306_v2  ;;  %v9585_v55 = vld [vmem:[%s19676_s3 + $0x680] sm:$0xff]  ;;  %v9592_v34 = vld [vmem:[%s19676_s3 + $0x6b8] sm:$0xff]  ;;  %v15150_v16 = vpack.c.bf16 %v9591_v19, %v9589_v15  ;;  %v9598_v2 = vld [vmem:[%s19676_s3 + $0x6e8] sm:$0xff] }
 0x157   :  { %2450 = vst [vmem:[#allocation2 + $0x88] sm:$0xff] %v2441_v7  ;;  %vm2428_vm11 = vcmp.gt.f32.partialorder %v2420_v3, 0.0  ;;  %v2436_v5 = vmul.f32 0.2, %v2420_v3  ;;  %v2375_v17 = vpop.f32.mrb[4].mxu1  ;;  %5168 = vmatprep.mubr.f32.mxu0 %v2441_v7  ;;  %v15132_v61 = vpack.c.bf16 %v9587_v56, %v9585_v55  ;;  %v15135_v53 = vpack.c.bf16 %v9592_v34, %v9590_v23  ;;  %v9596_v40 = vld [vmem:[%s19676_s3 + $0x6d8] sm:$0xff] }
 0x158   :  { %vm2429_vm12 = vcmp.gt.f32.partialorder %v2421_v18, 0.0  ;;  %v2437_v10 = vmul.f32 0.2, %v2421_v18  ;;  %v2418_v4 = vadd.f32 %v2407_v41, %v2375_v17  ;;  %v2377_v12 = vpop.f32.mrb[5].mxu1  ;;  %5169 = vmatmul.mubr.f32.vlgmr.msra.gmra.mrb[16].mxu0 %v2440_v30  ;;  %v9593_v30 = vld [vmem:[%s19676_s3 + $0x6c0] sm:$0xff]  ;;  %v9604_v17 = vld [vmem:[%s19676_s3 + $0x718] sm:$0xff] }
 0x159   :  { %v2444_v20 = vsel %vm2428_vm11, %v2420_v3, %v2436_v5  ;;  %v2419_v31 = vadd.f32 %v2411_v29, %v2377_v12  ;;  %10987 = vmatpush1.bf16.msra.mxu0 %v15052_v21  ;;  %v9595_v3 = vld [vmem:[%s19676_s3 + $0x6d0] sm:$0xff]  ;;  %v9602_v5 = vld [vmem:[%s19676_s3 + $0x708] sm:$0xff]  ;;  %v9617_v56 = vld [vmem:[%s19676_s3 + $0x780] sm:$0xff] }
 0x15a   :  { %2453 = vst [vmem:[#allocation2 + $0xc0] sm:$0xff] %v2444_v20  ;;  %v2445_v42 = vsel %vm2429_vm12, %v2421_v18, %v2437_v10  ;;  %vm2426_vm13 = vcmp.gt.f32.partialorder %v2418_v4, 0.0  ;;  %v2434_v51 = vmul.f32 0.2, %v2418_v4  ;;  %10989 = vmatprep.subr.bf16.mxu0 %v15054_v25  ;;  %v15168_v7 = vpack.c.bf16 %v9595_v3, %v9593_v30  ;;  %v9601_v10 = vld [vmem:[%s19676_s3 + $0x700] sm:$0xff]  ;;  %v9606_v12 = vld [vmem:[%s19676_s3 + $0x728] sm:$0xff] }
 0x15b   :  { %2454 = vst [vmem:[#allocation2 + $0xc8] sm:$0xff] %v2445_v42  ;;  %vm2427_vm14 = vcmp.gt.f32.partialorder %v2419_v31, 0.0  ;;  %v2435_v47 = vmul.f32 0.2, %v2419_v31  ;;  %5174 = vmatprep.mubr.f32.mxu0 %v2445_v42  ;;  %v15189_v36 = vpack.c.bf16 %v9604_v17, %v9602_v5  ;;  %v9619_v23 = vld [vmem:[%s19676_s3 + $0x790] sm:$0xff]  ;;  %v9622_v34 = vld [vmem:[%s19676_s3 + $0x7a8] sm:$0xff] }
 0x15c   :  { %v15086_v60 = vsel %vm2426_vm13, %v2418_v4, %v2434_v51  ;;  %5175 = vmatmul.mubr.f32.gmra.mrb[18].mxu0 %v2444_v20  ;;  %v9603_v4 = vld [vmem:[%s19676_s3 + $0x710] sm:$0xff]  ;;  %v9608_v20 = vld [vmem:[%s19676_s3 + $0x738] sm:$0xff]  ;;  %v9605_v51 = vld [vmem:[%s19676_s3 + $0x720] sm:$0xff]  ;;  %v15276_v19 = vpack.c.bf16 %v9619_v23, %v9617_v56 }
 0x15d   :  { %2451 = vst [vmem:[#allocation2 + $0x90] sm:$0xff] %v15086_v60  ;;  %v2443_v57 = vsel %vm2427_vm14, %v2419_v31, %v2435_v47  ;;  %v2381_v59 = vpop.f32.mrb[6].mxu1  ;;  %10991 = vmatpush1.bf16.msra.mxu0 %v15069_v39  ;;  %v15204_v31 = vpack.c.bf16 %v9603_v4, %v9601_v10  ;;  %v15207_v42 = vpack.c.bf16 %v9608_v20, %v9606_v12  ;;  %v9612_v47 = vld [vmem:[%s19676_s3 + $0x758] sm:$0xff]  ;;  %v9621_v30 = vld [vmem:[%s19676_s3 + $0x7a0] sm:$0xff]  ;;  %v9623_v3 = vld [vmem:[%s19676_s3 + $0x7b0] sm:$0xff] }
 0x15e   :  { %2452 = vst [vmem:[#allocation2 + $0x98] sm:$0xff] %v2443_v57  ;;  %v2422_v9 = vadd.f32 %v2407_v41, %v2381_v59  ;;  %v2383_v13 = vpop.f32.mrb[7].mxu1  ;;  %10993 = vmatprep.subr.bf16.mxu0 %v15072_v14  ;;  %5245 = vmatprep.mubr.f32.mxu0 %v2443_v57  ;;  %v15153_v41 = vpack.c.bf16 %v9596_v40, %v9594_v27  ;;  %v9609_v57 = vld [vmem:[%s19676_s3 + $0x740] sm:$0xff]  ;;  %v9611_v59 = vld [vmem:[%s19676_s3 + $0x750] sm:$0xff]  ;;  %v9624_v15 = vld [vmem:[%s19676_s3 + $0x7b8] sm:$0xff] }
 0x15f   :  { %v2423_v46 = vadd.f32 %v2411_v29, %v2383_v13  ;;  %v9600_v29 = vld [vmem:[%s19676_s3 + $0x6f8] sm:$0xff]  ;;  %v15222_v26 = vpack.c.bf16 %v9607_v58, %v9605_v51  ;;  %v15225_v32 = vpack.c.bf16 %v9612_v47, %v9610_v0  ;;  %v15240_v38 = vpack.c.bf16 %v9611_v59, %v9609_v57  ;;  %v3581_v27 = vld [vmem:[%s19677_s2] sm:$0xf]  ;;  %v9627_v4 = vld [vmem:[%s19676_s3 + $0x7d0] sm:$0xff] }
 0x160   :  { %vm2430_vm15 = vcmp.gt.f32.partialorder %v2422_v9, 0.0  ;;  %v2438_v6 = vmul.f32 0.2, %v2422_v9  ;;  %v15171_v18 = vpack.c.bf16 %v9600_v29, %v9598_v2  ;;  %v9616_v13 = vld [vmem:[%s19676_s3 + $0x778] sm:$0xff]  ;;  %v15282_v40 = vpack.c.bf16 %v9624_v15, %v9622_v34  ;;  %v9626_v2 = vld [vmem:[%s19676_s3 + $0x7c8] sm:$0xff]  ;;  %v9625_v10 = vld [vmem:[%s19676_s3 + $0x7c0] sm:$0xff] }
 0x161   :  { %vm2431_vm0 = vcmp.gt.f32.partialorder %v2423_v46, 0.0  ;;  %v2439_v50 = vmul.f32 0.2, %v2423_v46  ;;  %10995 = vmatpush1.bf16.msra.mxu0 %v15090_v8  ;;  %v9628_v29 = vld [vmem:[%s19676_s3 + $0x7d8] sm:$0xff]  ;;  %v3586_v48 = vrot.slane %v3581_v27, %v14903_v24  ;;  %v15298_v63 = vpack.c.bf16 %v9623_v3, %v9621_v30  ;;  %v9630_v12 = vld [vmem:[%s19676_s3 + $0x7e8] sm:$0xff] }
 0x162   :  { %v15110_v37 = vsel %vm2430_vm15, %v2422_v9, %v2438_v6  ;;  %10997 = vmatprep.subr.bf16.mxu0 %v15093_v33  ;;  %v9614_v9 = vld [vmem:[%s19676_s3 + $0x768] sm:$0xff]  ;;  %v9620_v6 = vld [vmem:[%s19676_s3 + $0x798] sm:$0xff]  ;;  %v3590_v5 = vrot.slane %v3581_v27, %v14915_v44  ;;  %v15302_v17 = vpack.c.bf16 %v9628_v29, %v9626_v2  ;;  %v15317_v47 = vpack.c.bf16 %v9627_v4, %v9625_v10 }
 0x163   :  { %2455 = vst [vmem:[#allocation2 + $0xd0] sm:$0xff] %v15110_v37  ;;  %v15122_v11 = vsel %vm2431_vm0, %v2423_v46, %v2439_v50  ;;  %v15243_v43 = vpack.c.bf16 %v9616_v13, %v9614_v9  ;;  %v9613_v46 = vld [vmem:[%s19676_s3 + $0x760] sm:$0xff]  ;;  %v15261_v55 = vpack.c.bf16 %v9620_v6, %v9618_v62  ;;  %v9632_v20 = vld [vmem:[%s19676_s3 + $0x7f8] sm:$0xff]  ;;  %v9631_v13 = vld [vmem:[%s19676_s3 + $0x7f0] sm:$0xff]  ;;  %v3594_v23 = vrot.slane %v3581_v27, %v14938_v1 }
 0x164   :  { %2456 = vst [vmem:[#allocation2 + $0xd8] sm:$0xff] %v15122_v11  ;;  %v15258_v50 = vpack.c.bf16 %v9615_v52, %v9613_v46  ;;  %v15320_v59 = vpack.c.bf16 %v9632_v20, %v9630_v12  ;;  %v9629_v9 = vld [vmem:[%s19676_s3 + $0x7e0] sm:$0xff]  ;;  %v4840_v52 = vld [vmem:[%s19676_s3 + $0x8] sm:$0xff]  ;;  %v4842_v62 = vld [vmem:[%s19676_s3 + $0x18] sm:$0xff]  ;;  %v3598_v3 = vrot.slane %v3581_v27, %v14941_v49 }
 0x165   :  { %10999 = vmatpush1.bf16.msra.mxu0 %v15108_v28  ;;  %v15337_v2 = vpack.c.bf16 %v9631_v13, %v9629_v9  ;;  %v15342_v4 = vpack.c.bf16 %v4842_v62, %v4840_v52  ;;  %v4839_v12 = vld [vmem:[%s19676_s3] sm:$0xff] }
 0x166   :  { %11001 = vmatprep.subr.bf16.mxu0 %v15113_v54 }
 0x169   :  { %11003 = vmatpush1.bf16.msra.mxu0 %v15132_v61 }
 0x16a   :  { %11005 = vmatprep.subr.bf16.mxu0 %v15135_v53 }
 0x16d   :  { %11007 = vmatpush1.bf16.msra.mxu0 %v15150_v16 }
 0x16e   :  { %11009 = vmatprep.subr.bf16.mxu0 %v15153_v41 }
 0x171   :  { %11011 = vmatpush1.bf16.msra.mxu0 %v15168_v7 }
 0x172   :  { %11013 = vmatprep.subr.bf16.mxu0 %v15171_v18 }
 0x175   :  { %11015 = vmatpush1.bf16.msra.mxu0 %v15186_v22 }
 0x176   :  { %11017 = vmatprep.subr.bf16.mxu0 %v15189_v36 }
 0x179   :  { %11019 = vmatpush1.bf16.msra.mxu0 %v15204_v31 }
 0x17a   :  { %11021 = vmatprep.subr.bf16.mxu0 %v15207_v42 }
 0x17d   :  { %11023 = vmatpush1.bf16.msra.mxu0 %v15222_v26 }
 0x17e   :  { %11025 = vmatprep.subr.bf16.mxu0 %v15225_v32 }
 0x181   :  { %11027 = vmatpush1.bf16.msra.mxu0 %v15240_v38 }
 0x182   :  { %11029 = vmatprep.subr.bf16.mxu0 %v15243_v43 }
 0x185   :  { %11031 = vmatpush1.bf16.msra.mxu0 %v15258_v50 }
 0x186   :  { %11033 = vmatprep.subr.bf16.mxu0 %v15261_v55 }
 0x189   :  { %11035 = vmatpush1.bf16.msra.mxu0 %v15276_v19 }
 0x18a   :  { %11037 = vmatprep.subr.bf16.mxu0 %v15282_v40 }
 0x18c   :  { %v3485_v51 = vpop.f32.mrb[8].mxu0 }
 0x18d   :  { %v3603_v58 = vadd.f32 %v3586_v48, %v3485_v51  ;;  %v3487_v0 = vpop.f32.mrb[9].mxu0  ;;  %11039 = vmatpush1.bf16.msra.mxu0 %v15298_v63  ;;  %v4846_v51 = vld [vmem:[%s19676_s3 + $0x38] sm:$0xff] }
 0x18e   :  { %v3604_v57 = vadd.f32 %v3590_v5, %v3487_v0  ;;  %11041 = vmatprep.subr.bf16.mxu0 %v15302_v17 }
 0x18f   :  { %vm3611_vm1 = vcmp.gt.f32.partialorder %v3603_v58, 0.0  ;;  %v3619_v46 = vmul.f32 0.2, %v3603_v58 }
 0x190   :  { %vm3612_vm2 = vcmp.gt.f32.partialorder %v3604_v57, 0.0  ;;  %v3620_v6 = vmul.f32 0.2, %v3604_v57  ;;  %v3491_v56 = vpop.f32.mrb[10].mxu0 }
 0x191   :  { %v3627_v34 = vsel %vm3611_vm1, %v3603_v58, %v3619_v46  ;;  %v3607_v15 = vadd.f32 %v3586_v48, %v3491_v56  ;;  %v3493_v30 = vpop.f32.mrb[11].mxu0  ;;  %11043 = vmatpush1.bf16.msra.mxu0 %v15317_v47  ;;  %v4841_v48 = vld [vmem:[%s19676_s3 + $0x10] sm:$0xff]  ;;  %v4843_v56 = vld [vmem:[%s19676_s3 + $0x20] sm:$0xff]  ;;  %vm6034_vm1 = vcmask 1046528  }
 0x192   :  { %3636 = vst [vmem:[#allocation2 + $0x100] sm:$0xff] %v3627_v34  ;;  %v15339_v29 = vsel %vm3612_vm2, %v3604_v57, %v3620_v6  ;;  %v3608_v10 = vadd.f32 %v3590_v5, %v3493_v30  ;;  %11045 = vmatprep.subr.bf16.mxu0 %v15320_v59  ;;  %v4844_v5 = vld [vmem:[%s19676_s3 + $0x28] sm:$0xff]  ;;  %v15358_v46 = vpack.c.bf16 %v4841_v48, %v4839_v12  ;;  %v4845_v34 = vld [vmem:[%s19676_s3 + $0x30] sm:$0xff] }
 0x193   :  { %3637 = vst [vmem:[#allocation2 + $0x108] sm:$0xff] %v15339_v29  ;;  %vm3615_vm3 = vcmp.gt.f32.partialorder %v3607_v15, 0.0  ;;  %v3623_v27 = vmul.f32 0.2, %v3607_v15  ;;  %v3562_v20 = vpop.f32.mrb[8].mxu1  ;;  %v15361_v6 = vpack.c.bf16 %v4846_v51, %v4844_v5  ;;  %v4848_v30 = vld [vmem:[%s19676_s3 + $0x48] sm:$0xff] }
 0x194   :  { %vm3616_vm4 = vcmp.gt.f32.partialorder %v3608_v10, 0.0  ;;  %v3624_v58 = vmul.f32 0.2, %v3608_v10  ;;  %v3605_v0 = vadd.f32 %v3594_v23, %v3562_v20  ;;  %v3564_v57 = vpop.f32.mrb[9].mxu1  ;;  %v15378_v20 = vpack.c.bf16 %v4845_v34, %v4843_v56  ;;  %v4851_v56 = vld [vmem:[%s19676_s3 + $0x60] sm:$0xff] }
 0x195   :  { %v3631_v9 = vsel %vm3615_vm3, %v3607_v15, %v3623_v27  ;;  %v3606_v13 = vadd.f32 %v3598_v3, %v3564_v57  ;;  %11047 = vmatpush1.bf16.msra.mxu0 %v15337_v2  ;;  %v4852_v57 = vld [vmem:[%s19676_s3 + $0x68] sm:$0xff] }
 0x196   :  { %3640 = vst [vmem:[#allocation2 + $0x140] sm:$0xff] %v3631_v9  ;;  %v3632_v52 = vsel %vm3616_vm4, %v3608_v10, %v3624_v58  ;;  %vm3613_vm5 = vcmp.gt.f32.partialorder %v3605_v0, 0.0  ;;  %v3621_v62 = vmul.f32 0.2, %v3605_v0  ;;  %11049 = vmatprep.subr.bf16.mxu0 %v15342_v4  ;;  %v4850_v10 = vld [vmem:[%s19676_s3 + $0x58] sm:$0xff] }
 0x197   :  { %3641 = vst [vmem:[#allocation2 + $0x148] sm:$0xff] %v3632_v52  ;;  %vm3614_vm6 = vcmp.gt.f32.partialorder %v3606_v13, 0.0  ;;  %v3622_v15 = vmul.f32 0.2, %v3606_v13  ;;  %v15381_v58 = vpack.c.bf16 %v4850_v10, %v4848_v30 }
 0x198   :  { %v3629_v12 = vsel %vm3613_vm5, %v3605_v0, %v3621_v62  ;;  %5246 = vmatmul.mubr.f32.vlgmr.msra.gmra.mrb[16].mxu0 %v15086_v60  ;;  %v4847_v60 = vld [vmem:[%s19676_s3 + $0x40] sm:$0xff]  ;;  %v4849_v0 = vld [vmem:[%s19676_s3 + $0x50] sm:$0xff] }
 0x199   :  { %3638 = vst [vmem:[#allocation2 + $0x110] sm:$0xff] %v3629_v12  ;;  %v3630_v48 = vsel %vm3614_vm6, %v3606_v13, %v3622_v15  ;;  %v3568_v27 = vpop.f32.mrb[10].mxu1  ;;  %5251 = vmatprep.mubr.f32.mxu0 %v15122_v11  ;;  %11051 = vmatpush1.bf16.msra.mxu0 %v15358_v46  ;;  %v15398_v52 = vpack.c.bf16 %v4849_v0, %v4847_v60  ;;  %v4858_v15 = vld [vmem:[%s19676_s3 + $0x98] sm:$0xff]  ;;  %v4855_v12 = vld [vmem:[%s19676_s3 + $0x80] sm:$0xff] }
 0x19a   :  { %3639 = vst [vmem:[#allocation2 + $0x118] sm:$0xff] %v3630_v48  ;;  %v3609_v5 = vadd.f32 %v3594_v23, %v3568_v27  ;;  %v3570_v51 = vpop.f32.mrb[11].mxu1  ;;  %11053 = vmatprep.subr.bf16.mxu0 %v15361_v6  ;;  %v4854_v23 = vld [vmem:[%s19676_s3 + $0x78] sm:$0xff]  ;;  %v4857_v48 = vld [vmem:[%s19676_s3 + $0x90] sm:$0xff]  ;;  %v4860_v27 = vld [vmem:[%s19676_s3 + $0xa8] sm:$0xff] }
 0x19b   :  { %v3610_v11 = vadd.f32 %v3598_v3, %v3570_v51  ;;  %v15401_v62 = vpack.c.bf16 %v4854_v23, %v4852_v57  ;;  %v15434_v51 = vpack.c.bf16 %v4857_v48, %v4855_v12  ;;  %v4859_v0 = vld [vmem:[%s19676_s3 + $0xa0] sm:$0xff]  ;;  %v4864_v57 = vld [vmem:[%s19676_s3 + $0xc8] sm:$0xff]  ;;  %v4866_v23 = vld [vmem:[%s19676_s3 + $0xd8] sm:$0xff] }
 0x19c   :  { %vm3617_vm7 = vcmp.gt.f32.partialorder %v3609_v5, 0.0  ;;  %v3625_v9 = vmul.f32 0.2, %v3609_v5  ;;  %5252 = vmatmul.mubr.f32.gmra.mrb[18].mxu0 %v15110_v37  ;;  %v4853_v37 = vld [vmem:[%s19676_s3 + $0x70] sm:$0xff]  ;;  %v4867_v12 = vld [vmem:[%s19676_s3 + $0xe0] sm:$0xff] }
 0x19d   :  { %vm3618_vm8 = vcmp.gt.f32.partialorder %v3610_v11, 0.0  ;;  %v3626_v13 = vmul.f32 0.2, %v3610_v11  ;;  %11055 = vmatpush1.bf16.msra.mxu0 %v15378_v20  ;;  %5322 = vmatprep.mubr.f32.mxu0 %v14964_v45  ;;  %v4856_v45 = vld [vmem:[%s19676_s3 + $0x88] sm:$0xff]  ;;  %v15416_v30 = vpack.c.bf16 %v4853_v37, %v4851_v56  ;;  %19899 = vst [vmem:[#allocation23_spill] sm:$0xff] %v15434_v51  ;;  %v4865_v56 = vld [vmem:[%s19676_s3 + $0xd0] sm:$0xff] }
 0x19e   :  { %v3633_v3 = vsel %vm3617_vm7, %v3609_v5, %v3625_v9  ;;  %11057 = vmatprep.subr.bf16.mxu0 %v15381_v58  ;;  %v15419_v10 = vpack.c.bf16 %v4858_v15, %v4856_v45  ;;  %v4862_v5 = vld [vmem:[%s19676_s3 + $0xb8] sm:$0xff]  ;;  %v4868_v37 = vld [vmem:[%s19676_s3 + $0xe8] sm:$0xff]  ;;  %v4869_v48 = vld [vmem:[%s19676_s3 + $0xf0] sm:$0xff] }
 0x19f   :  { %3642 = vst [vmem:[#allocation2 + $0x150] sm:$0xff] %v3633_v3  ;;  %v3634_v34 = vsel %vm3618_vm8, %v3610_v11, %v3626_v13  ;;  %19897 = vst [vmem:[#allocation21_spill] sm:$0xff] %v15416_v30  ;;  %v15437_v60 = vpack.c.bf16 %v4862_v5, %v4860_v27  ;;  %v4861_v11 = vld [vmem:[%s19676_s3 + $0xb0] sm:$0xff]  ;;  %v15455_v13 = vpack.c.bf16 %v4866_v23, %v4864_v57  ;;  %v4863_v3 = vld [vmem:[%s19676_s3 + $0xc0] sm:$0xff] }
 0x1a0   :  { %3643 = vst [vmem:[#allocation2 + $0x158] sm:$0xff] %v3634_v34  ;;  %19898 = vst [vmem:[#allocation22_spill] sm:$0xff] %v15419_v10  ;;  %v15452_v9 = vpack.c.bf16 %v4861_v11, %v4859_v0  ;;  %v4870_v34 = vld [vmem:[%s19676_s3 + $0xf8] sm:$0xff]  ;;  %v15470_v45 = vpack.c.bf16 %v4865_v56, %v4863_v3  ;;  %v4872_v27 = vld [vmem:[%s19676_s3 + $0x108] sm:$0xff]  ;;  %v15488_v0 = vpack.c.bf16 %v4869_v48, %v4867_v12 }
 0x1a1   :  { %11059 = vmatpush1.bf16.msra.mxu0 %v15398_v52  ;;  %19900 = vst [vmem:[#allocation4_spill] sm:$0xff] %v15437_v60  ;;  %19902 = vst [vmem:[#allocation5_spill] sm:$0xff] %v15455_v13  ;;  %v15473_v15 = vpack.c.bf16 %v4870_v34, %v4868_v37  ;;  %v4874_v5 = vld [vmem:[%s19676_s3 + $0x118] sm:$0xff]  ;;  %v4871_v57 = vld [vmem:[%s19676_s3 + $0x100] sm:$0xff] }
 0x1a2   :  { %11061 = vmatprep.subr.bf16.mxu0 %v15401_v62  ;;  %19901 = vst [vmem:[#allocation6_spill] sm:$0xff] %v15452_v9  ;;  %19903 = vst [vmem:[#allocation8_spill] sm:$0xff] %v15470_v45  ;;  %v15491_v11 = vpack.c.bf16 %v4874_v5, %v4872_v27  ;;  %v4873_v23 = vld [vmem:[%s19676_s3 + $0x110] sm:$0xff]  ;;  %v4876_v3 = vld [vmem:[%s19676_s3 + $0x128] sm:$0xff] }
 0x1a3   :  { %19904 = vst [vmem:[#allocation7_spill] sm:$0xff] %v15473_v15  ;;  %19905 = vst [vmem:[#allocation9_spill] sm:$0xff] %v15488_v0  ;;  %v4878_v56 = vld [vmem:[%s19676_s3 + $0x138] sm:$0xff]  ;;  %v15506_v37 = vpack.c.bf16 %v4873_v23, %v4871_v57  ;;  %v4875_v12 = vld [vmem:[%s19676_s3 + $0x120] sm:$0xff] }
 0x1a4   :  { %19906 = vst [vmem:[#allocation10_spill] sm:$0xff] %v15491_v11  ;;  %v15509_v34 = vpack.c.bf16 %v4878_v56, %v4876_v3  ;;  %v4877_v48 = vld [vmem:[%s19676_s3 + $0x130] sm:$0xff]  ;;  %v4880_v27 = vld [vmem:[%s19676_s3 + $0x148] sm:$0xff]  ;;  %v4882_v5 = vld [vmem:[%s19676_s3 + $0x158] sm:$0xff] }
 0x1a5   :  { %11063 = vmatpush1.bf16.msra.mxu0 %v15416_v30  ;;  %19907 = vst [vmem:[#allocation11_spill] sm:$0xff] %v15506_v37  ;;  %v15524_v57 = vpack.c.bf16 %v4877_v48, %v4875_v12  ;;  %v15527_v23 = vpack.c.bf16 %v4882_v5, %v4880_v27  ;;  %v4879_v3 = vld [vmem:[%s19676_s3 + $0x140] sm:$0xff]  ;;  %v4881_v56 = vld [vmem:[%s19676_s3 + $0x150] sm:$0xff]  ;;  %v4886_v12 = vld [vmem:[%s19676_s3 + $0x178] sm:$0xff] }
 0x1a6   :  { %11065 = vmatprep.subr.bf16.mxu0 %v15419_v10  ;;  %19908 = vst [vmem:[#allocation12_spill] sm:$0xff] %v15509_v34  ;;  %v15542_v48 = vpack.c.bf16 %v4881_v56, %v4879_v3  ;;  %v15545_v27 = vpack.c.bf16 %v4886_v12, %v4884_v35  ;;  %v4883_v5 = vld [vmem:[%s19676_s3 + $0x160] sm:$0xff]  ;;  %v4890_v3 = vld [vmem:[%s19676_s3 + $0x198] sm:$0xff] }
 0x1a7   :  { %19909 = vst [vmem:[#allocation13_spill] sm:$0xff] %v15524_v57  ;;  %19910 = vst [vmem:[#allocation14_spill] sm:$0xff] %v15527_v23  ;;  %v4768_v56 = vld [vmem:[%s19677_s2] sm:$0xf] }
 0x1a8   :  { %19911 = vst [vmem:[#allocation15_spill] sm:$0xff] %v15542_v48  ;;  %19912 = vst [vmem:[#allocation16_spill] sm:$0xff] %v15545_v27 }
 0x1a9   :  { %11067 = vmatpush1.bf16.msra.mxu0 %v15434_v51 }
 0x1aa   :  { %11069 = vmatprep.subr.bf16.mxu0 %v15437_v60 }
 0x1ad   :  { %11071 = vmatpush1.bf16.msra.mxu0 %v15452_v9  ;;  %v4785_v9 = vrot.slane %v4768_v56, %v14941_v49 }
 0x1ae   :  { %11073 = vmatprep.subr.bf16.mxu0 %v15455_v13 }
 0x1b1   :  { %11075 = vmatpush1.bf16.msra.mxu0 %v15470_v45  ;;  %v4897_v45 = vld [vmem:[%s19676_s3 + $0x1d0] sm:$0xff] }
 0x1b2   :  { %11077 = vmatprep.subr.bf16.mxu0 %v15473_v15  ;;  %v4895_v15 = vld [vmem:[%s19676_s3 + $0x1c0] sm:$0xff] }
 0x1b3   :  { %v15621_v60 = vpack.c.bf16 %v4897_v45, %v4895_v15  ;;  %v4906_v15 = vld [vmem:[%s19676_s3 + $0x218] sm:$0xff] }
 0x1b5   :  { %11079 = vmatpush1.bf16.msra.mxu0 %v15488_v0  ;;  %v4893_v0 = vld [vmem:[%s19676_s3 + $0x1b0] sm:$0xff] }
 0x1b6   :  { %11081 = vmatprep.subr.bf16.mxu0 %v15491_v11  ;;  %v4891_v11 = vld [vmem:[%s19676_s3 + $0x1a0] sm:$0xff] }
 0x1b9   :  { %11083 = vmatpush1.bf16.msra.mxu0 %v15506_v37  ;;  %v4888_v37 = vld [vmem:[%s19676_s3 + $0x188] sm:$0xff] }
 0x1ba   :  { %11085 = vmatprep.subr.bf16.mxu0 %v15509_v34  ;;  %v4885_v34 = vld [vmem:[%s19676_s3 + $0x170] sm:$0xff]  ;;  %v15566_v12 = vpack.c.bf16 %v4890_v3, %v4888_v37  ;;  %v4777_v3 = vrot.slane %v4768_v56, %v14915_v44 }
 0x1bb   :  { %v15560_v35 = vpack.c.bf16 %v4885_v34, %v4883_v5  ;;  %v4892_v34 = vld [vmem:[%s19676_s3 + $0x1a8] sm:$0xff]  ;;  %v4894_v5 = vld [vmem:[%s19676_s3 + $0x1b8] sm:$0xff] }
 0x1bc   :  { %19914 = vst [vmem:[#allocation24_spill] sm:$0xff] %v15566_v12 }
 0x1bd   :  { %11087 = vmatpush1.bf16.msra.mxu0 %v15524_v57  ;;  %19913 = vst [vmem:[#allocation18_spill] sm:$0xff] %v15560_v35  ;;  %v4889_v57 = vld [vmem:[%s19676_s3 + $0x190] sm:$0xff] }
 0x1be   :  { %11089 = vmatprep.subr.bf16.mxu0 %v15527_v23  ;;  %v4887_v23 = vld [vmem:[%s19676_s3 + $0x180] sm:$0xff] }
 0x1bf   :  { %v15582_v37 = vpack.c.bf16 %v4889_v57, %v4887_v23  ;;  %v4898_v57 = vld [vmem:[%s19676_s3 + $0x1d8] sm:$0xff] }
 0x1c1   :  { %11091 = vmatpush1.bf16.msra.mxu0 %v15542_v48  ;;  %19915 = vst [vmem:[#allocation25_spill] sm:$0xff] %v15582_v37  ;;  %v15586_v48 = vpack.c.bf16 %v4894_v5, %v4892_v34  ;;  %v15601_v5 = vpack.c.bf16 %v4893_v0, %v4891_v11  ;;  %v4900_v0 = vld [vmem:[%s19676_s3 + $0x1e8] sm:$0xff]  ;;  %v4902_v11 = vld [vmem:[%s19676_s3 + $0x1f8] sm:$0xff] }
 0x1c2   :  { %11093 = vmatprep.subr.bf16.mxu0 %v15545_v27  ;;  %v4773_v27 = vrot.slane %v4768_v56, %v14903_v24  ;;  %v4896_v24 = vld [vmem:[%s19676_s3 + $0x1c8] sm:$0xff]  ;;  %v15624_v30 = vpack.c.bf16 %v4902_v11, %v4900_v0 }
 0x1c3   :  { %19916 = vst [vmem:[#allocation26_spill] sm:$0xff] %v15586_v48 }
 0x1c5   :  { %11095 = vmatpush1.bf16.msra.mxu0 %v15560_v35  ;;  %v15604_v35 = vpack.c.bf16 %v4898_v57, %v4896_v24 }
 0x1c6   :  { %11097 = vmatprep.subr.bf16.mxu0 %v15566_v12 }
 0x1c8   :  { %v4672_v23 = vpop.f32.mrb[12].mxu0 }
 0x1c9   :  { %v4790_v44 = vadd.f32 %v4773_v27, %v4672_v23  ;;  %v4674_v34 = vpop.f32.mrb[13].mxu0  ;;  %11099 = vmatpush1.bf16.msra.mxu0 %v15582_v37 }
 0x1ca   :  { %v4791_v12 = vadd.f32 %v4777_v3, %v4674_v34  ;;  %11101 = vmatprep.subr.bf16.mxu0 %v15586_v48  ;;  %v4781_v34 = vrot.slane %v4768_v56, %v14938_v1  ;;  %v4899_v1 = vld [vmem:[%s19676_s3 + $0x1e0] sm:$0xff] }
 0x1cb   :  { %vm4798_vm9 = vcmp.gt.f32.partialorder %v4790_v44, 0.0  ;;  %v4806_v23 = vmul.f32 0.2, %v4790_v44 }
 0x1cc   :  { %vm4799_vm10 = vcmp.gt.f32.partialorder %v4791_v12, 0.0  ;;  %v4807_v24 = vmul.f32 0.2, %v4791_v12  ;;  %v4678_v57 = vpop.f32.mrb[14].mxu0 }
 0x1cd   :  { %v4814_v48 = vsel %vm4798_vm9, %v4790_v44, %v4806_v23  ;;  %v4794_v37 = vadd.f32 %v4773_v27, %v4678_v57  ;;  %v4680_v13 = vpop.f32.mrb[15].mxu0  ;;  %11103 = vmatpush1.bf16.msra.mxu0 %v15601_v5  ;;  %v4901_v44 = vld [vmem:[%s19676_s3 + $0x1f0] sm:$0xff]  ;;  %v4908_v57 = vld [vmem:[%s19676_s3 + $0x228] sm:$0xff] }
 0x1ce   :  { %4823 = vst [vmem:[#allocation2 + $0x180] sm:$0xff] %v4814_v48  ;;  %v4815_v51 = vsel %vm4799_vm10, %v4791_v12, %v4807_v24  ;;  %v4795_v10 = vadd.f32 %v4777_v3, %v4680_v13  ;;  %11105 = vmatprep.subr.bf16.mxu0 %v15604_v35  ;;  %v4904_v13 = vld [vmem:[%s19676_s3 + $0x208] sm:$0xff] }
 0x1cf   :  { %4824 = vst [vmem:[#allocation2 + $0x188] sm:$0xff] %v4815_v51  ;;  %vm4802_vm11 = vcmp.gt.f32.partialorder %v4794_v37, 0.0  ;;  %v4810_v49 = vmul.f32 0.2, %v4794_v37  ;;  %v4749_v45 = vpop.f32.mrb[12].mxu1  ;;  %6785 = vmatprep.mubr.f32.mxu1 %v4815_v51  ;;  %v15640_v51 = vpack.c.bf16 %v4901_v44, %v4899_v1  ;;  %v15644_v24 = vpack.c.bf16 %v4906_v15, %v4904_v13 }
 0x1d0   :  { %vm4803_vm12 = vcmp.gt.f32.partialorder %v4795_v10, 0.0  ;;  %v4811_v27 = vmul.f32 0.2, %v4795_v10  ;;  %v4792_v56 = vadd.f32 %v4781_v34, %v4749_v45  ;;  %v4751_v12 = vpop.f32.mrb[13].mxu1  ;;  %6786 = vmatmul.mubr.f32.vlgmr.msra.gmra.mrb[16].mxu1 %v4814_v48  ;;  %v4903_v48 = vld [vmem:[%s19676_s3 + $0x200] sm:$0xff] }
 0x1d1   :  { %v4818_v3 = vsel %vm4802_vm11, %v4794_v37, %v4810_v49  ;;  %v4793_v23 = vadd.f32 %v4785_v9, %v4751_v12  ;;  %11107 = vmatpush1.bf16.msra.mxu0 %v15621_v60  ;;  %11755 = vmatpush1.bf16.msra.mxu1 %v15052_v21  ;;  %v4905_v21 = vld [vmem:[%s19676_s3 + $0x210] sm:$0xff]  ;;  %v4831_v12 = vld [vmem:[#allocation2] sm:$0xff] }
 0x1d2   :  { %4827 = vst [vmem:[#allocation2 + $0x1c0] sm:$0xff] %v4818_v3  ;;  %v4819_v0 = vsel %vm4803_vm12, %v4795_v10, %v4811_v27  ;;  %vm4800_vm13 = vcmp.gt.f32.partialorder %v4792_v56, 0.0  ;;  %v4808_v11 = vmul.f32 0.2, %v4792_v56  ;;  %11109 = vmatprep.subr.bf16.mxu0 %v15624_v30  ;;  %11757 = vmatprep.subr.bf16.mxu1 %v15054_v25  ;;  %v4910_v25 = vld [vmem:[%s19676_s3 + $0x238] sm:$0xff]  ;;  %v15663_v15 = vpack.c.bf16 %v4905_v21, %v4903_v48 }
 0x1d3   :  { %4828 = vst [vmem:[#allocation2 + $0x1c8] sm:$0xff] %v4819_v0  ;;  %vm4801_vm14 = vcmp.gt.f32.partialorder %v4793_v23, 0.0  ;;  %v4809_v37 = vmul.f32 0.2, %v4793_v23  ;;  %v4755_v10 = vpop.f32.mrb[14].mxu1  ;;  %6791 = vmatprep.mubr.f32.mxu1 %v4819_v0  ;;  %v4836_v0 = vld [vmem:[#allocation2 + $0x48] sm:$0xff] }
 0x1d4   :  { %v15658_v1 = vsel %vm4800_vm13, %v4792_v56, %v4808_v11  ;;  %v4796_v44 = vadd.f32 %v4781_v34, %v4755_v10  ;;  %v4757_v49 = vpop.f32.mrb[15].mxu1  ;;  %6792 = vmatmul.mubr.f32.gmra.mrb[18].mxu1 %v4818_v3  ;;  %v15667_v34 = vpack.c.bf16 %v4910_v25, %v4908_v57  ;;  %v4907_v56 = vld [vmem:[%s19676_s3 + $0x220] sm:$0xff]  ;;  %v4912_v3 = vld [vmem:[%s19676_s3 + $0x248] sm:$0xff]  ;;  %v4913_v10 = vld [vmem:[%s19676_s3 + $0x250] sm:$0xff]  ;;  %vm8677_vm12 = vcmask 1045504  }
 0x1d5   :  { %4825 = vst [vmem:[#allocation2 + $0x190] sm:$0xff] %v15658_v1  ;;  %v4817_v45 = vsel %vm4801_vm14, %v4793_v23, %v4809_v37  ;;  %v4797_v13 = vadd.f32 %v4785_v9, %v4757_v49  ;;  %11111 = vmatpush1.bf16.msra.mxu0 %v15640_v51  ;;  %11759 = vmatpush1.bf16.msra.mxu1 %v15069_v39  ;;  %v4909_v9 = vld [vmem:[%s19676_s3 + $0x230] sm:$0xff]  ;;  %v4911_v37 = vld [vmem:[%s19676_s3 + $0x240] sm:$0xff]  ;;  %v4916_v25 = vld [vmem:[%s19676_s3 + $0x268] sm:$0xff] }
 0x1d6   :  { %4826 = vst [vmem:[#allocation2 + $0x198] sm:$0xff] %v4817_v45  ;;  %vm4804_vm15 = vcmp.gt.f32.partialorder %v4796_v44, 0.0  ;;  %v4812_v27 = vmul.f32 0.2, %v4796_v44  ;;  %11113 = vmatprep.subr.bf16.mxu0 %v15644_v24  ;;  %11761 = vmatprep.subr.bf16.mxu1 %v15072_v14  ;;  %v4914_v14 = vld [vmem:[%s19676_s3 + $0x258] sm:$0xff]  ;;  %v15687_v48 = vpack.c.bf16 %v4909_v9, %v4907_v56  ;;  %v4835_v57 = vld [vmem:[#allocation2 + $0x40] sm:$0xff]  ;;  %v15708_v49 = vpack.c.bf16 %v4913_v10, %v4911_v37 }
 0x1d7   :  { %vm4805_vm0 = vcmp.gt.f32.partialorder %v4797_v13, 0.0  ;;  %v4813_v39 = vmul.f32 0.2, %v4797_v13  ;;  %6862 = vmatprep.mubr.f32.mxu1 %v4817_v45  ;;  %v15692_v21 = vpack.c.bf16 %v4914_v14, %v4912_v3  ;;  %v4915_v45 = vld [vmem:[%s19676_s3 + $0x260] sm:$0xff]  ;;  %v4928_v37 = vld [vmem:[%s19676_s3 + $0x2c8] sm:$0xff] }
 0x1d8   :  { %v15681_v23 = vsel %vm4804_vm15, %v4796_v44, %v4812_v27  ;;  %5323 = vmatmul.mubr.f32.vlgmr.msra.gmra.mrb[16].mxu0 %v4831_v12  ;;  %v4834_v44 = vld [vmem:[#allocation2 + $0x18] sm:$0xff]  ;;  %v4920_v27 = vld [vmem:[%s19676_s3 + $0x288] sm:$0xff] }
 0x1d9   :  { %4829 = vst [vmem:[#allocation2 + $0x1d0] sm:$0xff] %v15681_v23  ;;  %v15684_v11 = vsel %vm4805_vm0, %v4797_v13, %v4813_v39  ;;  %5328 = vmatprep.mubr.f32.mxu0 %v4836_v0  ;;  %11115 = vmatpush1.bf16.msra.mxu0 %v15663_v15  ;;  %v4917_v13 = vld [vmem:[%s19676_s3 + $0x270] sm:$0xff]  ;;  %v4924_v12 = vld [vmem:[%s19676_s3 + $0x2a8] sm:$0xff] }
 0x1da   :  { %4830 = vst [vmem:[#allocation2 + $0x1d8] sm:$0xff] %v15684_v11  ;;  %11763 = vmatpush1.bf16.msra.mxu1 %v15090_v8  ;;  %11117 = vmatprep.subr.bf16.mxu0 %v15667_v34  ;;  %v4918_v8 = vld [vmem:[%s19676_s3 + $0x278] sm:$0xff]  ;;  %v15728_v56 = vpack.c.bf16 %v4917_v13, %v4915_v45  ;;  %v4921_v39 = vld [vmem:[%s19676_s3 + $0x290] sm:$0xff] }
 0x1db   :  { %11765 = vmatprep.subr.bf16.mxu1 %v15093_v33  ;;  %v15712_v33 = vpack.c.bf16 %v4918_v8, %v4916_v25  ;;  %v4925_v0 = vld [vmem:[%s19676_s3 + $0x2b0] sm:$0xff]  ;;  %v4932_v8 = vld [vmem:[%s19676_s3 + $0x2e8] sm:$0xff] }
 0x1dc   :  { %5329 = vmatmul.mubr.f32.gmra.mrb[18].mxu0 %v4835_v57  ;;  %v4929_v25 = vld [vmem:[%s19676_s3 + $0x2d0] sm:$0xff] }
 0x1dd   :  { %11119 = vmatpush1.bf16.msra.mxu0 %v15687_v48  ;;  %5399 = vmatprep.mubr.f32.mxu0 %v4834_v44  ;;  %v4933_v13 = vld [vmem:[%s19676_s3 + $0x2f0] sm:$0xff] }
 0x1de   :  { %11767 = vmatpush1.bf16.msra.mxu1 %v15108_v28  ;;  %11121 = vmatprep.subr.bf16.mxu0 %v15692_v21  ;;  %v4922_v28 = vld [vmem:[%s19676_s3 + $0x298] sm:$0xff] }
 0x1df   :  { %11769 = vmatprep.subr.bf16.mxu1 %v15113_v54  ;;  %v15732_v9 = vpack.c.bf16 %v4922_v28, %v4920_v27  ;;  %v4919_v54 = vld [vmem:[%s19676_s3 + $0x280] sm:$0xff]  ;;  %v4936_v27 = vld [vmem:[%s19676_s3 + $0x308] sm:$0xff] }
 0x1e0   :  { %v15748_v3 = vpack.c.bf16 %v4921_v39, %v4919_v54  ;;  %v4937_v39 = vld [vmem:[%s19676_s3 + $0x310] sm:$0xff] }
 0x1e1   :  { %11123 = vmatpush1.bf16.msra.mxu0 %v15708_v49 }
 0x1e2   :  { %11771 = vmatpush1.bf16.msra.mxu1 %v15132_v61  ;;  %11125 = vmatprep.subr.bf16.mxu0 %v15712_v33  ;;  %v4926_v61 = vld [vmem:[%s19676_s3 + $0x2b8] sm:$0xff] }
 0x1e3   :  { %11773 = vmatprep.subr.bf16.mxu1 %v15135_v53  ;;  %v15752_v14 = vpack.c.bf16 %v4926_v61, %v4924_v12  ;;  %v4923_v53 = vld [vmem:[%s19676_s3 + $0x2a0] sm:$0xff]  ;;  %v4940_v12 = vld [vmem:[%s19676_s3 + $0x328] sm:$0xff] }
 0x1e4   :  { %v15768_v10 = vpack.c.bf16 %v4925_v0, %v4923_v53  ;;  %v4941_v0 = vld [vmem:[%s19676_s3 + $0x330] sm:$0xff] }
 0x1e5   :  { %11127 = vmatpush1.bf16.msra.mxu0 %v15728_v56 }
 0x1e6   :  { %11775 = vmatpush1.bf16.msra.mxu1 %v15150_v16  ;;  %11129 = vmatprep.subr.bf16.mxu0 %v15732_v9  ;;  %v4930_v16 = vld [vmem:[%s19676_s3 + $0x2d8] sm:$0xff] }
 0x1e7   :  { %11777 = vmatprep.subr.bf16.mxu1 %v15153_v41  ;;  %v15772_v57 = vpack.c.bf16 %v4930_v16, %v4928_v37  ;;  %v4927_v41 = vld [vmem:[%s19676_s3 + $0x2c0] sm:$0xff]  ;;  %v4944_v37 = vld [vmem:[%s19676_s3 + $0x348] sm:$0xff] }
 0x1e8   :  { %v15788_v44 = vpack.c.bf16 %v4929_v25, %v4927_v41  ;;  %v4945_v25 = vld [vmem:[%s19676_s3 + $0x350] sm:$0xff] }
 0x1e9   :  { %11131 = vmatpush1.bf16.msra.mxu0 %v15748_v3 }
 0x1ea   :  { %11779 = vmatpush1.bf16.msra.mxu1 %v15168_v7  ;;  %11133 = vmatprep.subr.bf16.mxu0 %v15752_v14  ;;  %v4934_v7 = vld [vmem:[%s19676_s3 + $0x2f8] sm:$0xff] }
 0x1eb   :  { %11781 = vmatprep.subr.bf16.mxu1 %v15171_v18  ;;  %v15792_v45 = vpack.c.bf16 %v4934_v7, %v4932_v8  ;;  %v4931_v18 = vld [vmem:[%s19676_s3 + $0x2e0] sm:$0xff]  ;;  %v4948_v8 = vld [vmem:[%s19676_s3 + $0x368] sm:$0xff] }
 0x1ec   :  { %v15808_v28 = vpack.c.bf16 %v4933_v13, %v4931_v18  ;;  %v4949_v13 = vld [vmem:[%s19676_s3 + $0x370] sm:$0xff] }
 0x1ed   :  { %11135 = vmatpush1.bf16.msra.mxu0 %v15768_v10 }
 0x1ee   :  { %11783 = vmatpush1.bf16.msra.mxu1 %v15186_v22  ;;  %11137 = vmatprep.subr.bf16.mxu0 %v15772_v57  ;;  %v4938_v22 = vld [vmem:[%s19676_s3 + $0x318] sm:$0xff] }
 0x1ef   :  { %11785 = vmatprep.subr.bf16.mxu1 %v15189_v36  ;;  %v15812_v54 = vpack.c.bf16 %v4938_v22, %v4936_v27  ;;  %v4935_v36 = vld [vmem:[%s19676_s3 + $0x300] sm:$0xff]  ;;  %v4952_v27 = vld [vmem:[%s19676_s3 + $0x388] sm:$0xff] }
 0x1f0   :  { %v15828_v61 = vpack.c.bf16 %v4937_v39, %v4935_v36  ;;  %v4953_v39 = vld [vmem:[%s19676_s3 + $0x390] sm:$0xff] }
 0x1f1   :  { %11139 = vmatpush1.bf16.msra.mxu0 %v15788_v44 }
 0x1f2   :  { %11787 = vmatpush1.bf16.msra.mxu1 %v15204_v31  ;;  %11141 = vmatprep.subr.bf16.mxu0 %v15792_v45  ;;  %v4942_v31 = vld [vmem:[%s19676_s3 + $0x338] sm:$0xff] }
 0x1f3   :  { %11789 = vmatprep.subr.bf16.mxu1 %v15207_v42  ;;  %v15832_v53 = vpack.c.bf16 %v4942_v31, %v4940_v12  ;;  %v4939_v42 = vld [vmem:[%s19676_s3 + $0x320] sm:$0xff]  ;;  %v4956_v12 = vld [vmem:[%s19676_s3 + $0x3a8] sm:$0xff] }
 0x1f4   :  { %v15848_v16 = vpack.c.bf16 %v4941_v0, %v4939_v42  ;;  %v4957_v0 = vld [vmem:[%s19676_s3 + $0x3b0] sm:$0xff] }
 0x1f5   :  { %11143 = vmatpush1.bf16.msra.mxu0 %v15808_v28 }
 0x1f6   :  { %11791 = vmatpush1.bf16.msra.mxu1 %v15222_v26  ;;  %11145 = vmatprep.subr.bf16.mxu0 %v15812_v54  ;;  %v4946_v26 = vld [vmem:[%s19676_s3 + $0x358] sm:$0xff] }
 0x1f7   :  { %11793 = vmatprep.subr.bf16.mxu1 %v15225_v32  ;;  %v15852_v41 = vpack.c.bf16 %v4946_v26, %v4944_v37  ;;  %v4943_v32 = vld [vmem:[%s19676_s3 + $0x340] sm:$0xff]  ;;  %v4960_v37 = vld [vmem:[%s19676_s3 + $0x3c8] sm:$0xff] }
 0x1f8   :  { %v15868_v7 = vpack.c.bf16 %v4945_v25, %v4943_v32  ;;  %v4961_v25 = vld [vmem:[%s19676_s3 + $0x3d0] sm:$0xff] }
 0x1f9   :  { %11147 = vmatpush1.bf16.msra.mxu0 %v15828_v61 }
 0x1fa   :  { %11795 = vmatpush1.bf16.msra.mxu1 %v15240_v38  ;;  %11149 = vmatprep.subr.bf16.mxu0 %v15832_v53  ;;  %v4950_v38 = vld [vmem:[%s19676_s3 + $0x378] sm:$0xff] }
 0x1fb   :  { %11797 = vmatprep.subr.bf16.mxu1 %v15243_v43  ;;  %v15872_v18 = vpack.c.bf16 %v4950_v38, %v4948_v8  ;;  %v4947_v43 = vld [vmem:[%s19676_s3 + $0x360] sm:$0xff]  ;;  %v4964_v8 = vld [vmem:[%s19676_s3 + $0x3e8] sm:$0xff] }
 0x1fc   :  { %v15888_v22 = vpack.c.bf16 %v4949_v13, %v4947_v43  ;;  %v4965_v43 = vld [vmem:[%s19676_s3 + $0x3f0] sm:$0xff] }
 0x1fd   :  { %11151 = vmatpush1.bf16.msra.mxu0 %v15848_v16 }
 0x1fe   :  { %11799 = vmatpush1.bf16.msra.mxu1 %v15258_v50  ;;  %11153 = vmatprep.subr.bf16.mxu0 %v15852_v41  ;;  %v4954_v50 = vld [vmem:[%s19676_s3 + $0x398] sm:$0xff] }
 0x1ff   :  { %11801 = vmatprep.subr.bf16.mxu1 %v15261_v55  ;;  %v15892_v36 = vpack.c.bf16 %v4954_v50, %v4952_v27  ;;  %v4951_v55 = vld [vmem:[%s19676_s3 + $0x380] sm:$0xff]  ;;  %v9634_v27 = vld [vmem:[%s19676_s3 + $0x808] sm:$0xff] }
 0x200   :  { %v15908_v31 = vpack.c.bf16 %v4953_v39, %v4951_v55  ;;  %v9635_v55 = vld [vmem:[%s19676_s3 + $0x810] sm:$0xff] }
 0x201   :  { %11155 = vmatpush1.bf16.msra.mxu0 %v15868_v7 }
 0x202   :  { %11803 = vmatpush1.bf16.msra.mxu1 %v15276_v19  ;;  %11157 = vmatprep.subr.bf16.mxu0 %v15872_v18  ;;  %v4958_v19 = vld [vmem:[%s19676_s3 + $0x3b8] sm:$0xff] }
 0x203   :  { %11805 = vmatprep.subr.bf16.mxu1 %v15282_v40  ;;  %v15912_v42 = vpack.c.bf16 %v4958_v19, %v4956_v12  ;;  %v4955_v40 = vld [vmem:[%s19676_s3 + $0x3a0] sm:$0xff]  ;;  %v9639_v19 = vld [vmem:[%s19676_s3 + $0x830] sm:$0xff] }
 0x204   :  { %v15928_v26 = vpack.c.bf16 %v4957_v0, %v4955_v40  ;;  %v9637_v12 = vld [vmem:[%s19676_s3 + $0x820] sm:$0xff]  ;;  %v4833_v40 = vld [vmem:[#allocation2 + $0x10] sm:$0xff]  ;;  %v4838_v0 = vld [vmem:[#allocation2 + $0x58] sm:$0xff] }
 0x205   :  { %11159 = vmatpush1.bf16.msra.mxu0 %v15888_v22 }
 0x206   :  { %11807 = vmatpush1.bf16.msra.mxu1 %v15298_v63  ;;  %11161 = vmatprep.subr.bf16.mxu0 %v15892_v36  ;;  %v4962_v63 = vld [vmem:[%s19676_s3 + $0x3d8] sm:$0xff] }
 0x207   :  { %11809 = vmatprep.subr.bf16.mxu1 %v15302_v17  ;;  %v15932_v32 = vpack.c.bf16 %v4962_v63, %v4960_v37  ;;  %v4959_v17 = vld [vmem:[%s19676_s3 + $0x3c0] sm:$0xff]  ;;  %v16012_v37 = vpack.c.bf16 %v9639_v19, %v9637_v12  ;;  %v9651_v19 = vld [vmem:[%s19676_s3 + $0x890] sm:$0xff] }
 0x208   :  { %v15948_v38 = vpack.c.bf16 %v4961_v25, %v4959_v17  ;;  %v9641_v63 = vld [vmem:[%s19676_s3 + $0x840] sm:$0xff]  ;;  %v9643_v17 = vld [vmem:[%s19676_s3 + $0x850] sm:$0xff] }
 0x209   :  { %11163 = vmatpush1.bf16.msra.mxu0 %v15908_v31  ;;  %v4837_v25 = vld [vmem:[#allocation2 + $0x50] sm:$0xff]  ;;  %v9649_v12 = vld [vmem:[%s19676_s3 + $0x880] sm:$0xff] }
 0x20a   :  { %11811 = vmatpush1.bf16.msra.mxu1 %v15317_v47  ;;  %11165 = vmatprep.subr.bf16.mxu0 %v15912_v42  ;;  %v4966_v47 = vld [vmem:[%s19676_s3 + $0x3f8] sm:$0xff] }
 0x20b   :  { %11813 = vmatprep.subr.bf16.mxu1 %v15320_v59  ;;  %v4963_v59 = vld [vmem:[%s19676_s3 + $0x3e0] sm:$0xff]  ;;  %v15959_v13 = vpack.c.bf16 %v4966_v47, %v4964_v8  ;;  %v9646_v8 = vld [vmem:[%s19676_s3 + $0x868] sm:$0xff]  ;;  %v16033_v47 = vpack.c.bf16 %v9643_v17, %v9641_v63  ;;  %v19921_v63 = vld [vmem:[#allocation6_spill] sm:$0xff] }
 0x20c   :  { %v15969_v50 = vpack.c.bf16 %v4965_v43, %v4963_v59  ;;  %v19917_v59 = vld [vmem:[#allocation21_spill] sm:$0xff]  ;;  %v9645_v43 = vld [vmem:[%s19676_s3 + $0x860] sm:$0xff] }
 0x20d   :  { %11167 = vmatpush1.bf16.msra.mxu0 %v15928_v26 }
 0x20e   :  { %11815 = vmatpush1.bf16.msra.mxu1 %v15337_v2  ;;  %11169 = vmatprep.subr.bf16.mxu0 %v15932_v32  ;;  %v9636_v2 = vld [vmem:[%s19676_s3 + $0x818] sm:$0xff] }
 0x20f   :  { %11817 = vmatprep.subr.bf16.mxu1 %v15342_v4  ;;  %v9633_v4 = vld [vmem:[%s19676_s3 + $0x800] sm:$0xff] }
 0x210   :  { %v15991_v39 = vpack.c.bf16 %v9635_v55, %v9633_v4  ;;  %v9652_v4 = vld [vmem:[%s19676_s3 + $0x898] sm:$0xff] }
 0x211   :  { %6863 = vmatmul.mubr.f32.vlgmr.msra.gmra.mrb[16].mxu1 %v15658_v1  ;;  %11171 = vmatpush1.bf16.msra.mxu0 %v15948_v38  ;;  %v15981_v1 = vpack.c.bf16 %v9636_v2, %v9634_v27  ;;  %v9647_v27 = vld [vmem:[%s19676_s3 + $0x870] sm:$0xff] }
 0x212   :  { %6868 = vmatprep.mubr.f32.mxu1 %v15684_v11  ;;  %11819 = vmatpush1.bf16.msra.mxu1 %v15358_v46  ;;  %v9638_v11 = vld [vmem:[%s19676_s3 + $0x828] sm:$0xff]  ;;  %v9640_v46 = vld [vmem:[%s19676_s3 + $0x838] sm:$0xff]  ;;  %v19918_v2 = vld [vmem:[#allocation22_spill] sm:$0xff]  ;;  %v16053_v55 = vpack.c.bf16 %v9647_v27, %v9645_v43 }
 0x213   :  { %11173 = vmatprep.subr.bf16.mxu0 %v15959_v13  ;;  %11821 = vmatprep.subr.bf16.mxu1 %v15361_v6  ;;  %v15995_v6 = vpack.c.bf16 %v9640_v46, %v9638_v11  ;;  %v19919_v11 = vld [vmem:[#allocation23_spill] sm:$0xff] }
 0x214   :  { %v9660_v43 = vld [vmem:[%s19676_s3 + $0x8d8] sm:$0xff] }
 0x215   :  { %6869 = vmatmul.mubr.f32.gmra.mrb[18].mxu1 %v15681_v23  ;;  %11175 = vmatpush1.bf16.msra.mxu0 %v15969_v50  ;;  %v9644_v23 = vld [vmem:[%s19676_s3 + $0x858] sm:$0xff] }
 0x216   :  { %11823 = vmatpush1.bf16.msra.mxu1 %v15378_v20  ;;  %6939 = vmatprep.mubr.f32.mxu1 %v15339_v29  ;;  %v9642_v20 = vld [vmem:[%s19676_s3 + $0x848] sm:$0xff] }
 0x217   :  { %11177 = vmatprep.subr.bf16.mxu0 %v15981_v1  ;;  %11825 = vmatprep.subr.bf16.mxu1 %v15381_v58  ;;  %v16016_v58 = vpack.c.bf16 %v9644_v23, %v9642_v20  ;;  %v9654_v20 = vld [vmem:[%s19676_s3 + $0x8a8] sm:$0xff]  ;;  %v9656_v23 = vld [vmem:[%s19676_s3 + $0x8b8] sm:$0xff] }
 0x218   :  { %5400 = vmatmul.mubr.f32.vlgmr.msra.gmra.mrb[16].mxu0 %v4833_v40  ;;  %v19920_v40 = vld [vmem:[#allocation4_spill] sm:$0xff]  ;;  %v16077_v17 = vpack.c.bf16 %v9656_v23, %v9654_v20  ;;  %v19925_v23 = vld [vmem:[#allocation9_spill] sm:$0xff] }
 0x219   :  { %5405 = vmatprep.mubr.f32.mxu0 %v4838_v0  ;;  %11179 = vmatpush1.bf16.msra.mxu0 %v15991_v39  ;;  %v16073_v0 = vpack.c.bf16 %v9651_v19, %v9649_v12  ;;  %v19924_v12 = vld [vmem:[#allocation7_spill] sm:$0xff]  ;;  %v9662_v19 = vld [vmem:[%s19676_s3 + $0x8e8] sm:$0xff] }
 0x21a   :  { %11827 = vmatpush1.bf16.msra.mxu1 %v15398_v52  ;;  %11181 = vmatprep.subr.bf16.mxu0 %v15995_v6  ;;  %v9648_v52 = vld [vmem:[%s19676_s3 + $0x878] sm:$0xff] }
 0x21b   :  { %11829 = vmatprep.subr.bf16.mxu1 %v15401_v62  ;;  %v16037_v62 = vpack.c.bf16 %v9648_v52, %v9646_v8  ;;  %v9655_v8 = vld [vmem:[%s19676_s3 + $0x8b0] sm:$0xff]  ;;  %v19922_v52 = vld [vmem:[#allocation5_spill] sm:$0xff] }
 0x21c   :  { %5406 = vmatmul.mubr.f32.gmra.mrb[18].mxu0 %v4837_v25  ;;  %v9653_v25 = vld [vmem:[%s19676_s3 + $0x8a0] sm:$0xff] }
 0x21d   :  { %11183 = vmatpush1.bf16.msra.mxu0 %v16012_v37  ;;  %5613 = vmatprep.mubr.f32.mxu0 %v15339_v29  ;;  %v9650_v29 = vld [vmem:[%s19676_s3 + $0x888] sm:$0xff]  ;;  %v16093_v27 = vpack.c.bf16 %v9655_v8, %v9653_v25  ;;  %v9661_v25 = vld [vmem:[%s19676_s3 + $0x8e0] sm:$0xff]  ;;  %v9663_v8 = vld [vmem:[%s19676_s3 + $0x8f0] sm:$0xff] }
 0x21e   :  { %11831 = vmatpush1.bf16.msra.mxu1 %v19917_v59  ;;  %11185 = vmatprep.subr.bf16.mxu0 %v16016_v58  ;;  %v16057_v46 = vpack.c.bf16 %v9652_v4, %v9650_v29  ;;  %v9658_v59 = vld [vmem:[%s19676_s3 + $0x8c8] sm:$0xff]  ;;  %v9657_v4 = vld [vmem:[%s19676_s3 + $0x8c0] sm:$0xff] }
 0x21f   :  { %11833 = vmatprep.subr.bf16.mxu1 %v19918_v2  ;;  %v19923_v2 = vld [vmem:[#allocation8_spill] sm:$0xff]  ;;  %v16097_v29 = vpack.c.bf16 %v9660_v43, %v9658_v59  ;;  %v9666_v59 = vld [vmem:[%s19676_s3 + $0x908] sm:$0xff]  ;;  %v9668_v43 = vld [vmem:[%s19676_s3 + $0x918] sm:$0xff] }
 0x221   :  { %11187 = vmatpush1.bf16.msra.mxu0 %v16033_v47 }
 0x222   :  { %11835 = vmatpush1.bf16.msra.mxu1 %v19919_v11  ;;  %11189 = vmatprep.subr.bf16.mxu0 %v16037_v62  ;;  %v9659_v11 = vld [vmem:[%s19676_s3 + $0x8d0] sm:$0xff] }
 0x223   :  { %11837 = vmatprep.subr.bf16.mxu1 %v19920_v40  ;;  %v9664_v40 = vld [vmem:[%s19676_s3 + $0x8f8] sm:$0xff]  ;;  %v16113_v20 = vpack.c.bf16 %v9659_v11, %v9657_v4  ;;  %v16137_v11 = vpack.c.bf16 %v9668_v43, %v9666_v59  ;;  %v9669_v43 = vld [vmem:[%s19676_s3 + $0x920] sm:$0xff] }
 0x224   :  { %v19928_v4 = vld [vmem:[#allocation11_spill] sm:$0xff] }
 0x225   :  { %11191 = vmatpush1.bf16.msra.mxu0 %v16053_v55  ;;  %19929 = vst [vmem:[#allocation22_spill] sm:$0xff] %v16137_v11 }
 0x226   :  { %11839 = vmatpush1.bf16.msra.mxu1 %v19921_v63  ;;  %11193 = vmatprep.subr.bf16.mxu0 %v16057_v46  ;;  %v16117_v63 = vpack.c.bf16 %v9664_v40, %v9662_v19  ;;  %v9667_v19 = vld [vmem:[%s19676_s3 + $0x910] sm:$0xff]  ;;  %v19930_v40 = vld [vmem:[#allocation12_spill] sm:$0xff] }
 0x227   :  { %11841 = vmatprep.subr.bf16.mxu1 %v19922_v52  ;;  %v19926_v52 = vld [vmem:[#allocation10_spill] sm:$0xff] }
 0x229   :  { %11195 = vmatpush1.bf16.msra.mxu0 %v16073_v0 }
 0x22a   :  { %11843 = vmatpush1.bf16.msra.mxu1 %v19923_v2  ;;  %11197 = vmatprep.subr.bf16.mxu0 %v16077_v17  ;;  %v16133_v2 = vpack.c.bf16 %v9663_v8, %v9661_v25  ;;  %v9672_v25 = vld [vmem:[%s19676_s3 + $0x938] sm:$0xff] }
 0x22b   :  { %11845 = vmatprep.subr.bf16.mxu1 %v19924_v12  ;;  %v9665_v12 = vld [vmem:[%s19676_s3 + $0x900] sm:$0xff] }
 0x22c   :  { %19927 = vst [vmem:[#allocation21_spill] sm:$0xff] %v16133_v2  ;;  %v16153_v8 = vpack.c.bf16 %v9667_v19, %v9665_v12  ;;  %v9674_v12 = vld [vmem:[%s19676_s3 + $0x948] sm:$0xff]  ;;  %v9676_v19 = vld [vmem:[%s19676_s3 + $0x958] sm:$0xff] }
 0x22d   :  { %11199 = vmatpush1.bf16.msra.mxu0 %v16093_v27 }
 0x22e   :  { %11847 = vmatpush1.bf16.msra.mxu1 %v19925_v23  ;;  %11201 = vmatprep.subr.bf16.mxu0 %v16097_v29  ;;  %v9670_v23 = vld [vmem:[%s19676_s3 + $0x928] sm:$0xff]  ;;  %19931 = vst [vmem:[#allocation23_spill] sm:$0xff] %v16153_v8 }
 0x22f   :  { %11849 = vmatprep.subr.bf16.mxu1 %v19926_v52  ;;  %v19932_v52 = vld [vmem:[#allocation13_spill] sm:$0xff]  ;;  %v16157_v59 = vpack.c.bf16 %v9672_v25, %v9670_v23  ;;  %v19936_v25 = vld [vmem:[#allocation15_spill] sm:$0xff] }
 0x231   :  { %11203 = vmatpush1.bf16.msra.mxu0 %v16113_v20  ;;  %19933 = vst [vmem:[#allocation4_spill] sm:$0xff] %v16157_v59 }
 0x232   :  { %11851 = vmatpush1.bf16.msra.mxu1 %v19928_v4  ;;  %11205 = vmatprep.subr.bf16.mxu0 %v16117_v63  ;;  %v9671_v4 = vld [vmem:[%s19676_s3 + $0x930] sm:$0xff] }
 0x233   :  { %11853 = vmatprep.subr.bf16.mxu1 %v19930_v40  ;;  %v19934_v40 = vld [vmem:[#allocation14_spill] sm:$0xff]  ;;  %v16173_v23 = vpack.c.bf16 %v9671_v4, %v9669_v43  ;;  %v9678_v43 = vld [vmem:[%s19676_s3 + $0x968] sm:$0xff]  ;;  %v9680_v4 = vld [vmem:[%s19676_s3 + $0x978] sm:$0xff] }
 0x235   :  { %11207 = vmatpush1.bf16.msra.mxu0 %v16133_v2  ;;  %19935 = vst [vmem:[#allocation6_spill] sm:$0xff] %v16173_v23  ;;  %v19938_v2 = vld [vmem:[#allocation16_spill] sm:$0xff] }
 0x236   :  { %11855 = vmatpush1.bf16.msra.mxu1 %v19932_v52  ;;  %11209 = vmatprep.subr.bf16.mxu0 %v16137_v11  ;;  %v16177_v52 = vpack.c.bf16 %v9676_v19, %v9674_v12  ;;  %v9675_v11 = vld [vmem:[%s19676_s3 + $0x950] sm:$0xff] }
 0x237   :  { %11857 = vmatprep.subr.bf16.mxu1 %v19934_v40  ;;  %v9673_v40 = vld [vmem:[%s19676_s3 + $0x940] sm:$0xff]  ;;  %v19939_v19 = vld [vmem:[#allocation18_spill] sm:$0xff] }
 0x238   :  { %19937 = vst [vmem:[#allocation5_spill] sm:$0xff] %v16177_v52  ;;  %v16193_v12 = vpack.c.bf16 %v9675_v11, %v9673_v40  ;;  %v9682_v11 = vld [vmem:[%s19676_s3 + $0x988] sm:$0xff]  ;;  %v9684_v40 = vld [vmem:[%s19676_s3 + $0x998] sm:$0xff] }
 0x239   :  { %11211 = vmatpush1.bf16.msra.mxu0 %v16153_v8  ;;  %v19940_v8 = vld [vmem:[#allocation24_spill] sm:$0xff] }
 0x23a   :  { %11859 = vmatpush1.bf16.msra.mxu1 %v19936_v25  ;;  %11213 = vmatprep.subr.bf16.mxu0 %v16157_v59  ;;  %v16197_v25 = vpack.c.bf16 %v9680_v4, %v9678_v43  ;;  %v9679_v59 = vld [vmem:[%s19676_s3 + $0x970] sm:$0xff]  ;;  %v19941_v4 = vld [vmem:[#allocation25_spill] sm:$0xff] }
 0x23b   :  { %11861 = vmatprep.subr.bf16.mxu1 %v19938_v2  ;;  %v9677_v2 = vld [vmem:[%s19676_s3 + $0x960] sm:$0xff] }
 0x23c   :  { %v16213_v43 = vpack.c.bf16 %v9679_v59, %v9677_v2  ;;  %v9686_v59 = vld [vmem:[%s19676_s3 + $0x9a8] sm:$0xff]  ;;  %v9688_v2 = vld [vmem:[%s19676_s3 + $0x9b8] sm:$0xff] }
 0x23d   :  { %11215 = vmatpush1.bf16.msra.mxu0 %v16173_v23  ;;  %v19942_v23 = vld [vmem:[#allocation26_spill] sm:$0xff] }
 0x23e   :  { %11863 = vmatpush1.bf16.msra.mxu1 %v19939_v19  ;;  %11217 = vmatprep.subr.bf16.mxu0 %v16177_v52  ;;  %v16217_v19 = vpack.c.bf16 %v9684_v40, %v9682_v11  ;;  %v9683_v52 = vld [vmem:[%s19676_s3 + $0x990] sm:$0xff]  ;;  %v16237_v40 = vpack.c.bf16 %v9688_v2, %v9686_v59 }
 0x23f   :  { %11865 = vmatprep.subr.bf16.mxu1 %v19940_v8  ;;  %v9681_v8 = vld [vmem:[%s19676_s3 + $0x980] sm:$0xff]  ;;  %v9691_v2 = vld [vmem:[%s19676_s3 + $0x9d0] sm:$0xff] }
 0x240   :  { %v16233_v11 = vpack.c.bf16 %v9683_v52, %v9681_v8  ;;  %19943 = vst [vmem:[#allocation8_spill] sm:$0xff] %v16237_v40  ;;  %v9690_v52 = vld [vmem:[%s19676_s3 + $0x9c8] sm:$0xff] }
 0x241   :  { %11219 = vmatpush1.bf16.msra.mxu0 %v16193_v12 }
 0x242   :  { %11867 = vmatpush1.bf16.msra.mxu1 %v19941_v4  ;;  %11221 = vmatprep.subr.bf16.mxu0 %v16197_v25  ;;  %v9687_v4 = vld [vmem:[%s19676_s3 + $0x9b0] sm:$0xff] }
 0x243   :  { %11869 = vmatprep.subr.bf16.mxu1 %v19942_v23  ;;  %v9685_v23 = vld [vmem:[%s19676_s3 + $0x9a0] sm:$0xff] }
 0x244   :  { %v16253_v8 = vpack.c.bf16 %v9687_v4, %v9685_v23  ;;  %v9694_v23 = vld [vmem:[%s19676_s3 + $0x9e8] sm:$0xff] }
 0x245   :  { %11223 = vmatpush1.bf16.msra.mxu0 %v16213_v43 }
 0x246   :  { %11871 = vmatpush1.bf16.msra.mxu1 %v15601_v5  ;;  %11225 = vmatprep.subr.bf16.mxu0 %v16217_v19  ;;  %v9692_v5 = vld [vmem:[%s19676_s3 + $0x9d8] sm:$0xff]  ;;  %19944 = vst [vmem:[#allocation7_spill] sm:$0xff] %v16253_v8 }
 0x247   :  { %11873 = vmatprep.subr.bf16.mxu1 %v15604_v35  ;;  %v16257_v59 = vpack.c.bf16 %v9692_v5, %v9690_v52  ;;  %v9689_v35 = vld [vmem:[%s19676_s3 + $0x9c0] sm:$0xff]  ;;  %v9695_v52 = vld [vmem:[%s19676_s3 + $0x9f0] sm:$0xff] }
 0x248   :  { %v16273_v4 = vpack.c.bf16 %v9691_v2, %v9689_v35  ;;  %v9698_v35 = vld [vmem:[%s19676_s3 + $0xa08] sm:$0xff] }
 0x249   :  { %11227 = vmatpush1.bf16.msra.mxu0 %v16233_v11  ;;  %19945 = vst [vmem:[#allocation9_spill] sm:$0xff] %v16257_v59  ;;  %v5417_v2 = vld [vmem:[#allocation2 + $0x148] sm:$0xff] }
 0x24a   :  { %11875 = vmatpush1.bf16.msra.mxu1 %v15621_v60  ;;  %11229 = vmatprep.subr.bf16.mxu0 %v16237_v40  ;;  %v9696_v60 = vld [vmem:[%s19676_s3 + $0x9f8] sm:$0xff]  ;;  %19946 = vst [vmem:[#allocation10_spill] sm:$0xff] %v16273_v4  ;;  %v5412_v40 = vld [vmem:[#allocation2 + $0x100] sm:$0xff] }
 0x24b   :  { %11877 = vmatprep.subr.bf16.mxu1 %v15624_v30  ;;  %v9693_v30 = vld [vmem:[%s19676_s3 + $0x9e0] sm:$0xff]  ;;  %v16284_v5 = vpack.c.bf16 %v9696_v60, %v9694_v23  ;;  %v9699_v23 = vld [vmem:[%s19676_s3 + $0xa10] sm:$0xff] }
 0x24d   :  { %11231 = vmatpush1.bf16.msra.mxu0 %v16253_v8 }
 0x24e   :  { %11879 = vmatpush1.bf16.msra.mxu1 %v15640_v51  ;;  %11233 = vmatprep.subr.bf16.mxu0 %v16257_v59  ;;  %v9700_v51 = vld [vmem:[%s19676_s3 + $0xa18] sm:$0xff]  ;;  %v16293_v59 = vpack.c.bf16 %v9695_v52, %v9693_v30  ;;  %v9702_v30 = vld [vmem:[%s19676_s3 + $0xa28] sm:$0xff]  ;;  %v5416_v52 = vld [vmem:[#allocation2 + $0x140] sm:$0xff] }
 0x24f   :  { %11881 = vmatprep.subr.bf16.mxu1 %v15644_v24  ;;  %v9697_v24 = vld [vmem:[%s19676_s3 + $0xa00] sm:$0xff]  ;;  %v16304_v60 = vpack.c.bf16 %v9700_v51, %v9698_v35  ;;  %v9703_v51 = vld [vmem:[%s19676_s3 + $0xa30] sm:$0xff] }
 0x250   :  { %v16313_v8 = vpack.c.bf16 %v9699_v23, %v9697_v24  ;;  %v9701_v35 = vld [vmem:[%s19676_s3 + $0xa20] sm:$0xff]  ;;  %v9706_v24 = vld [vmem:[%s19676_s3 + $0xa48] sm:$0xff] }
 0x251   :  { %6940 = vmatmul.mubr.f32.vlgmr.msra.gmra.mrb[16].mxu1 %v5412_v40  ;;  %11235 = vmatpush1.bf16.msra.mxu0 %v16273_v4  ;;  %v5415_v4 = vld [vmem:[#allocation2 + $0x118] sm:$0xff]  ;;  %v16333_v23 = vpack.c.bf16 %v9703_v51, %v9701_v35  ;;  %v9711_v51 = vld [vmem:[%s19676_s3 + $0xa70] sm:$0xff] }
 0x252   :  { %6945 = vmatprep.mubr.f32.mxu1 %v5417_v2  ;;  %11883 = vmatpush1.bf16.msra.mxu1 %v15663_v15  ;;  %v9704_v15 = vld [vmem:[%s19676_s3 + $0xa38] sm:$0xff] }
 0x253   :  { %11237 = vmatprep.subr.bf16.mxu0 %v16284_v5  ;;  %11885 = vmatprep.subr.bf16.mxu1 %v15667_v34  ;;  %v16316_v34 = vpack.c.bf16 %v9704_v15, %v9702_v30  ;;  %v9707_v15 = vld [vmem:[%s19676_s3 + $0xa50] sm:$0xff] }
 0x255   :  { %6946 = vmatmul.mubr.f32.gmra.mrb[18].mxu1 %v5416_v52  ;;  %11239 = vmatpush1.bf16.msra.mxu0 %v16293_v59 }
 0x256   :  { %11887 = vmatpush1.bf16.msra.mxu1 %v15687_v48  ;;  %7016 = vmatprep.mubr.f32.mxu1 %v5415_v4  ;;  %v9708_v48 = vld [vmem:[%s19676_s3 + $0xa58] sm:$0xff] }
 0x257   :  { %11241 = vmatprep.subr.bf16.mxu0 %v16304_v60  ;;  %11889 = vmatprep.subr.bf16.mxu1 %v15692_v21  ;;  %v16337_v30 = vpack.c.bf16 %v9708_v48, %v9706_v24  ;;  %v9705_v21 = vld [vmem:[%s19676_s3 + $0xa40] sm:$0xff]  ;;  %v9715_v48 = vld [vmem:[%s19676_s3 + $0xa90] sm:$0xff] }
 0x258   :  { %5614 = vmatmul.mubr.f32.vlgmr.msra.gmra.mrb[16].mxu0 %v5412_v40  ;;  %v9710_v40 = vld [vmem:[%s19676_s3 + $0xa68] sm:$0xff] }
 0x259   :  { %5619 = vmatprep.mubr.f32.mxu0 %v5417_v2  ;;  %11243 = vmatpush1.bf16.msra.mxu0 %v16313_v8  ;;  %v16353_v2 = vpack.c.bf16 %v9707_v15, %v9705_v21  ;;  %v9718_v21 = vld [vmem:[%s19676_s3 + $0xaa8] sm:$0xff] }
 0x25a   :  { %11891 = vmatpush1.bf16.msra.mxu1 %v15708_v49  ;;  %11245 = vmatprep.subr.bf16.mxu0 %v16316_v34  ;;  %v9712_v49 = vld [vmem:[%s19676_s3 + $0xa78] sm:$0xff] }
 0x25b   :  { %11893 = vmatprep.subr.bf16.mxu1 %v15712_v33  ;;  %v16357_v35 = vpack.c.bf16 %v9712_v49, %v9710_v40  ;;  %v9709_v33 = vld [vmem:[%s19676_s3 + $0xa60] sm:$0xff]  ;;  %v9719_v49 = vld [vmem:[%s19676_s3 + $0xab0] sm:$0xff] }
 0x25c   :  { %5620 = vmatmul.mubr.f32.gmra.mrb[18].mxu0 %v5416_v52  ;;  %v16373_v52 = vpack.c.bf16 %v9711_v51, %v9709_v33  ;;  %v9722_v33 = vld [vmem:[%s19676_s3 + $0xac8] sm:$0xff] }
 0x25d   :  { %11247 = vmatpush1.bf16.msra.mxu0 %v16333_v23  ;;  %5690 = vmatprep.mubr.f32.mxu0 %v5415_v4  ;;  %v9714_v4 = vld [vmem:[%s19676_s3 + $0xa88] sm:$0xff] }
 0x25e   :  { %11895 = vmatpush1.bf16.msra.mxu1 %v15728_v56  ;;  %11249 = vmatprep.subr.bf16.mxu0 %v16337_v30  ;;  %v9716_v56 = vld [vmem:[%s19676_s3 + $0xa98] sm:$0xff] }
 0x25f   :  { %11897 = vmatprep.subr.bf16.mxu1 %v15732_v9  ;;  %v16377_v24 = vpack.c.bf16 %v9716_v56, %v9714_v4  ;;  %v9713_v9 = vld [vmem:[%s19676_s3 + $0xa80] sm:$0xff]  ;;  %v9723_v56 = vld [vmem:[%s19676_s3 + $0xad0] sm:$0xff] }
 0x260   :  { %v16393_v15 = vpack.c.bf16 %v9715_v48, %v9713_v9  ;;  %v9726_v9 = vld [vmem:[%s19676_s3 + $0xae8] sm:$0xff] }
 0x261   :  { %11251 = vmatpush1.bf16.msra.mxu0 %v16353_v2 }
 0x262   :  { %11899 = vmatpush1.bf16.msra.mxu1 %v15748_v3  ;;  %11253 = vmatprep.subr.bf16.mxu0 %v16357_v35  ;;  %v9720_v3 = vld [vmem:[%s19676_s3 + $0xab8] sm:$0xff] }
 0x263   :  { %11901 = vmatprep.subr.bf16.mxu1 %v15752_v14  ;;  %v16397_v40 = vpack.c.bf16 %v9720_v3, %v9718_v21  ;;  %v9717_v14 = vld [vmem:[%s19676_s3 + $0xaa0] sm:$0xff]  ;;  %v9727_v3 = vld [vmem:[%s19676_s3 + $0xaf0] sm:$0xff] }
 0x264   :  { %v16413_v51 = vpack.c.bf16 %v9719_v49, %v9717_v14  ;;  %v9730_v14 = vld [vmem:[%s19676_s3 + $0xb08] sm:$0xff] }
 0x265   :  { %11255 = vmatpush1.bf16.msra.mxu0 %v16373_v52 }
 0x266   :  { %11903 = vmatpush1.bf16.msra.mxu1 %v15768_v10  ;;  %11257 = vmatprep.subr.bf16.mxu0 %v16377_v24  ;;  %v9724_v10 = vld [vmem:[%s19676_s3 + $0xad8] sm:$0xff] }
 0x267   :  { %11905 = vmatprep.subr.bf16.mxu1 %v15772_v57  ;;  %v16417_v4 = vpack.c.bf16 %v9724_v10, %v9722_v33  ;;  %v9721_v57 = vld [vmem:[%s19676_s3 + $0xac0] sm:$0xff]  ;;  %v9731_v10 = vld [vmem:[%s19676_s3 + $0xb10] sm:$0xff] }
 0x268   :  { %v16433_v48 = vpack.c.bf16 %v9723_v56, %v9721_v57  ;;  %v9734_v57 = vld [vmem:[%s19676_s3 + $0xb28] sm:$0xff] }
 0x269   :  { %11259 = vmatpush1.bf16.msra.mxu0 %v16393_v15 }
 0x26a   :  { %11907 = vmatpush1.bf16.msra.mxu1 %v15788_v44  ;;  %11261 = vmatprep.subr.bf16.mxu0 %v16397_v40  ;;  %v9728_v44 = vld [vmem:[%s19676_s3 + $0xaf8] sm:$0xff] }
 0x26b   :  { %11909 = vmatprep.subr.bf16.mxu1 %v15792_v45  ;;  %v16437_v21 = vpack.c.bf16 %v9728_v44, %v9726_v9  ;;  %v9725_v45 = vld [vmem:[%s19676_s3 + $0xae0] sm:$0xff]  ;;  %v9735_v44 = vld [vmem:[%s19676_s3 + $0xb30] sm:$0xff] }
 0x26c   :  { %v16453_v49 = vpack.c.bf16 %v9727_v3, %v9725_v45  ;;  %v9738_v45 = vld [vmem:[%s19676_s3 + $0xb48] sm:$0xff] }
 0x26d   :  { %11263 = vmatpush1.bf16.msra.mxu0 %v16413_v51 }
 0x26e   :  { %11911 = vmatpush1.bf16.msra.mxu1 %v15808_v28  ;;  %11265 = vmatprep.subr.bf16.mxu0 %v16417_v4  ;;  %v9732_v28 = vld [vmem:[%s19676_s3 + $0xb18] sm:$0xff] }
 0x26f   :  { %11913 = vmatprep.subr.bf16.mxu1 %v15812_v54  ;;  %v16457_v33 = vpack.c.bf16 %v9732_v28, %v9730_v14  ;;  %v9729_v54 = vld [vmem:[%s19676_s3 + $0xb00] sm:$0xff]  ;;  %v9739_v28 = vld [vmem:[%s19676_s3 + $0xb50] sm:$0xff] }
 0x270   :  { %v16473_v56 = vpack.c.bf16 %v9731_v10, %v9729_v54  ;;  %v9742_v54 = vld [vmem:[%s19676_s3 + $0xb68] sm:$0xff] }
 0x271   :  { %11267 = vmatpush1.bf16.msra.mxu0 %v16433_v48 }
 0x272   :  { %11915 = vmatpush1.bf16.msra.mxu1 %v15828_v61  ;;  %11269 = vmatprep.subr.bf16.mxu0 %v16437_v21  ;;  %v9736_v61 = vld [vmem:[%s19676_s3 + $0xb38] sm:$0xff] }
 0x273   :  { %11917 = vmatprep.subr.bf16.mxu1 %v15832_v53  ;;  %v16477_v9 = vpack.c.bf16 %v9736_v61, %v9734_v57  ;;  %v9733_v53 = vld [vmem:[%s19676_s3 + $0xb20] sm:$0xff]  ;;  %v9743_v61 = vld [vmem:[%s19676_s3 + $0xb70] sm:$0xff] }
 0x274   :  { %v16493_v3 = vpack.c.bf16 %v9735_v44, %v9733_v53  ;;  %v9746_v53 = vld [vmem:[%s19676_s3 + $0xb88] sm:$0xff] }
 0x275   :  { %11271 = vmatpush1.bf16.msra.mxu0 %v16453_v49 }
 0x276   :  { %11919 = vmatpush1.bf16.msra.mxu1 %v15848_v16  ;;  %11273 = vmatprep.subr.bf16.mxu0 %v16457_v33  ;;  %v9740_v16 = vld [vmem:[%s19676_s3 + $0xb58] sm:$0xff] }
 0x277   :  { %11921 = vmatprep.subr.bf16.mxu1 %v15852_v41  ;;  %v16497_v14 = vpack.c.bf16 %v9740_v16, %v9738_v45  ;;  %v9737_v41 = vld [vmem:[%s19676_s3 + $0xb40] sm:$0xff]  ;;  %v9747_v16 = vld [vmem:[%s19676_s3 + $0xb90] sm:$0xff] }
 0x278   :  { %v16513_v10 = vpack.c.bf16 %v9739_v28, %v9737_v41  ;;  %v9750_v41 = vld [vmem:[%s19676_s3 + $0xba8] sm:$0xff] }
 0x279   :  { %11275 = vmatpush1.bf16.msra.mxu0 %v16473_v56 }
 0x27a   :  { %11923 = vmatpush1.bf16.msra.mxu1 %v15868_v7  ;;  %11277 = vmatprep.subr.bf16.mxu0 %v16477_v9  ;;  %v9744_v7 = vld [vmem:[%s19676_s3 + $0xb78] sm:$0xff] }
 0x27b   :  { %11925 = vmatprep.subr.bf16.mxu1 %v15872_v18  ;;  %v16517_v57 = vpack.c.bf16 %v9744_v7, %v9742_v54  ;;  %v9741_v18 = vld [vmem:[%s19676_s3 + $0xb60] sm:$0xff]  ;;  %v9751_v7 = vld [vmem:[%s19676_s3 + $0xbb0] sm:$0xff] }
 0x27c   :  { %v16533_v44 = vpack.c.bf16 %v9743_v61, %v9741_v18  ;;  %v9754_v18 = vld [vmem:[%s19676_s3 + $0xbc8] sm:$0xff] }
 0x27d   :  { %11279 = vmatpush1.bf16.msra.mxu0 %v16493_v3 }
 0x27e   :  { %11927 = vmatpush1.bf16.msra.mxu1 %v15888_v22  ;;  %11281 = vmatprep.subr.bf16.mxu0 %v16497_v14  ;;  %v9748_v22 = vld [vmem:[%s19676_s3 + $0xb98] sm:$0xff] }
 0x27f   :  { %11929 = vmatprep.subr.bf16.mxu1 %v15892_v36  ;;  %v16537_v45 = vpack.c.bf16 %v9748_v22, %v9746_v53  ;;  %v9745_v36 = vld [vmem:[%s19676_s3 + $0xb80] sm:$0xff]  ;;  %v9755_v22 = vld [vmem:[%s19676_s3 + $0xbd0] sm:$0xff] }
 0x280   :  { %v16553_v28 = vpack.c.bf16 %v9747_v16, %v9745_v36  ;;  %v9758_v36 = vld [vmem:[%s19676_s3 + $0xbe8] sm:$0xff] }
 0x281   :  { %11283 = vmatpush1.bf16.msra.mxu0 %v16513_v10 }
 0x282   :  { %11931 = vmatpush1.bf16.msra.mxu1 %v15908_v31  ;;  %11285 = vmatprep.subr.bf16.mxu0 %v16517_v57  ;;  %v9752_v31 = vld [vmem:[%s19676_s3 + $0xbb8] sm:$0xff] }
 0x283   :  { %11933 = vmatprep.subr.bf16.mxu1 %v15912_v42  ;;  %v16557_v54 = vpack.c.bf16 %v9752_v31, %v9750_v41  ;;  %v9749_v42 = vld [vmem:[%s19676_s3 + $0xba0] sm:$0xff]  ;;  %v6007_v41 = vld [vmem:[#allocation2 + $0x28] sm:$0x1]  ;;  %v9759_v31 = vld [vmem:[%s19676_s3 + $0xbf0] sm:$0xff] }
 0x284   :  { %v16573_v61 = vpack.c.bf16 %v9751_v7, %v9749_v42  ;;  %v6003_v42 = vld [vmem:[#allocation2 + $0x8] sm:$0xfe] }
 0x285   :  { %11287 = vmatpush1.bf16.msra.mxu0 %v16533_v44 }
 0x286   :  { %11935 = vmatpush1.bf16.msra.mxu1 %v15928_v26  ;;  %11289 = vmatprep.subr.bf16.mxu0 %v16537_v45  ;;  %v9756_v26 = vld [vmem:[%s19676_s3 + $0xbd8] sm:$0xff]  ;;  %19947 = vst [vmem:[#allocation11_spill] sm:$0xff] %v16573_v61 }
 0x287   :  { %11937 = vmatprep.subr.bf16.mxu1 %v15932_v32  ;;  %v16577_v53 = vpack.c.bf16 %v9756_v26, %v9754_v18  ;;  %v9753_v32 = vld [vmem:[%s19676_s3 + $0xbc0] sm:$0xff]  ;;  %v5414_v18 = vld [vmem:[#allocation2 + $0x110] sm:$0xff]  ;;  %v9764_v26 = vld [vmem:[%s19676_s3 + $0xc18] sm:$0xff] }
 0x288   :  { %v16593_v16 = vpack.c.bf16 %v9755_v22, %v9753_v32  ;;  %v5419_v32 = vld [vmem:[#allocation2 + $0x158] sm:$0xff] }
 0x289   :  { %11291 = vmatpush1.bf16.msra.mxu0 %v16553_v28  ;;  %19948 = vst [vmem:[#allocation12_spill] sm:$0xff] %v16577_v53 }
 0x28a   :  { %11939 = vmatpush1.bf16.msra.mxu1 %v15948_v38  ;;  %11293 = vmatprep.subr.bf16.mxu0 %v16557_v54  ;;  %v9760_v38 = vld [vmem:[%s19676_s3 + $0xbf8] sm:$0xff] }
 0x28b   :  { %11941 = vmatprep.subr.bf16.mxu1 %v15959_v13  ;;  %v9757_v13 = vld [vmem:[%s19676_s3 + $0xbe0] sm:$0xff]  ;;  %v16604_v7 = vpack.c.bf16 %v9760_v38, %v9758_v36  ;;  %v9763_v36 = vld [vmem:[%s19676_s3 + $0xc10] sm:$0xff] }
 0x28c   :  { %v16613_v22 = vpack.c.bf16 %v9759_v31, %v9757_v13  ;;  %v5418_v13 = vld [vmem:[#allocation2 + $0x150] sm:$0xff] }
 0x28d   :  { %11295 = vmatpush1.bf16.msra.mxu0 %v16573_v61  ;;  %v6039_v61 = vrot.slane %v6007_v41, 1  ;;  %v9766_v41 = vld [vmem:[%s19676_s3 + $0xc28] sm:$0xff] }
 0x28e   :  { %11943 = vmatpush1.bf16.msra.mxu1 %v15969_v50  ;;  %11297 = vmatprep.subr.bf16.mxu0 %v16577_v53  ;;  %v9762_v50 = vld [vmem:[%s19676_s3 + $0xc08] sm:$0xff]  ;;  %v6038_v53 = vrot.slane %v6003_v42, 1 }
 0x28f   :  { %11945 = vmatprep.subr.bf16.mxu1 %v15981_v1  ;;  %v9761_v1 = vld [vmem:[%s19676_s3 + $0xc00] sm:$0xff]  ;;  %v16624_v38 = vpack.c.bf16 %v9764_v26, %v9762_v50  ;;  %v9767_v26 = vld [vmem:[%s19676_s3 + $0xc30] sm:$0xff] }
 0x290   :  { %v16634_v31 = vsel %vm6034_vm1, %v6038_v53, %v6039_v61  ;;  %v16636_v42 = vpack.c.bf16 %v9763_v36, %v9761_v1  ;;  %v9765_v50 = vld [vmem:[%s19676_s3 + $0xc20] sm:$0xff]  ;;  %v9772_v61 = vld [vmem:[%s19676_s3 + $0xc58] sm:$0xff]  ;;  %v9771_v36 = vld [vmem:[%s19676_s3 + $0xc50] sm:$0xff] }
 0x291   :  { %7017 = vmatmul.mubr.f32.vlgmr.msra.gmra.mrb[16].mxu1 %v5414_v18  ;;  %11299 = vmatpush1.bf16.msra.mxu0 %v16593_v16  ;;  %v16657_v53 = vpack.c.bf16 %v9767_v26, %v9765_v50  ;;  %v9778_v50 = vld [vmem:[%s19676_s3 + $0xc88] sm:$0xff] }
 0x292   :  { %7022 = vmatprep.mubr.f32.mxu1 %v5419_v32  ;;  %11947 = vmatpush1.bf16.msra.mxu1 %v15991_v39  ;;  %v9768_v39 = vld [vmem:[%s19676_s3 + $0xc38] sm:$0xff] }
 0x293   :  { %11301 = vmatprep.subr.bf16.mxu0 %v16604_v7  ;;  %11949 = vmatprep.subr.bf16.mxu1 %v15995_v6  ;;  %v16640_v6 = vpack.c.bf16 %v9768_v39, %v9766_v41  ;;  %v9773_v39 = vld [vmem:[%s19676_s3 + $0xc60] sm:$0xff] }
 0x295   :  { %7023 = vmatmul.mubr.f32.gmra.mrb[18].mxu1 %v5418_v13  ;;  %11303 = vmatpush1.bf16.msra.mxu0 %v16613_v22 }
 0x296   :  { %11951 = vmatpush1.bf16.msra.mxu1 %v16012_v37  ;;  %7093 = vmatprep.mubr.f32.mxu1 %v16634_v31  ;;  %v9770_v37 = vld [vmem:[%s19676_s3 + $0xc48] sm:$0xff] }
 0x297   :  { %11305 = vmatprep.subr.bf16.mxu0 %v16624_v38  ;;  %11953 = vmatprep.subr.bf16.mxu1 %v16016_v58  ;;  %v16661_v1 = vpack.c.bf16 %v9772_v61, %v9770_v37  ;;  %v9769_v58 = vld [vmem:[%s19676_s3 + $0xc40] sm:$0xff]  ;;  %v9779_v61 = vld [vmem:[%s19676_s3 + $0xc90] sm:$0xff] }
 0x298   :  { %5691 = vmatmul.mubr.f32.vlgmr.msra.gmra.mrb[16].mxu0 %v5414_v18  ;;  %v9774_v18 = vld [vmem:[%s19676_s3 + $0xc68] sm:$0xff]  ;;  %v16677_v41 = vpack.c.bf16 %v9771_v36, %v9769_v58 }
 0x299   :  { %5696 = vmatprep.mubr.f32.mxu0 %v5419_v32  ;;  %11307 = vmatpush1.bf16.msra.mxu0 %v16636_v42  ;;  %v13038_v32 = vld [vmem:[#allocation2 + $0x188] sm:$0xff] }
 0x29a   :  { %11955 = vmatpush1.bf16.msra.mxu1 %v16033_v47  ;;  %11309 = vmatprep.subr.bf16.mxu0 %v16640_v6  ;;  %v9776_v47 = vld [vmem:[%s19676_s3 + $0xc78] sm:$0xff]  ;;  %v9782_v58 = vld [vmem:[%s19676_s3 + $0xca8] sm:$0xff] }
 0x29b   :  { %11957 = vmatprep.subr.bf16.mxu1 %v16037_v62  ;;  %v16681_v62 = vpack.c.bf16 %v9776_v47, %v9774_v18  ;;  %v9783_v47 = vld [vmem:[%s19676_s3 + $0xcb0] sm:$0xff] }
 0x29c   :  { %5697 = vmatmul.mubr.f32.gmra.mrb[18].mxu0 %v5418_v13  ;;  %v9775_v13 = vld [vmem:[%s19676_s3 + $0xc70] sm:$0xff] }
 0x29d   :  { %11311 = vmatpush1.bf16.msra.mxu0 %v16657_v53  ;;  %5908 = vmatprep.mubr.f32.mxu0 %v13038_v32  ;;  %v16697_v26 = vpack.c.bf16 %v9775_v13, %v9773_v39  ;;  %v9786_v32 = vld [vmem:[%s19676_s3 + $0xcc8] sm:$0xff] }
 0x29e   :  { %11959 = vmatpush1.bf16.msra.mxu1 %v16053_v55  ;;  %11313 = vmatprep.subr.bf16.mxu0 %v16661_v1  ;;  %v9780_v55 = vld [vmem:[%s19676_s3 + $0xc98] sm:$0xff] }
 0x29f   :  { %11961 = vmatprep.subr.bf16.mxu1 %v16057_v46  ;;  %v16701_v37 = vpack.c.bf16 %v9780_v55, %v9778_v50  ;;  %v9777_v46 = vld [vmem:[%s19676_s3 + $0xc80] sm:$0xff]  ;;  %v9787_v50 = vld [vmem:[%s19676_s3 + $0xcd0] sm:$0xff]  ;;  %v9790_v55 = vld [vmem:[%s19676_s3 + $0xce8] sm:$0xff] }
 0x2a0   :  { %v16717_v36 = vpack.c.bf16 %v9779_v61, %v9777_v46  ;;  %v19950_v61 = vld [vmem:[#allocation21_spill] sm:$0xff] }
 0x2a1   :  { %11315 = vmatpush1.bf16.msra.mxu0 %v16677_v41 }
 0x2a2   :  { %11963 = vmatpush1.bf16.msra.mxu1 %v16073_v0  ;;  %11317 = vmatprep.subr.bf16.mxu0 %v16681_v62  ;;  %v9784_v0 = vld [vmem:[%s19676_s3 + $0xcb8] sm:$0xff] }
 0x2a3   :  { %11965 = vmatprep.subr.bf16.mxu1 %v16077_v17  ;;  %v16721_v18 = vpack.c.bf16 %v9784_v0, %v9782_v58  ;;  %v9781_v17 = vld [vmem:[%s19676_s3 + $0xca0] sm:$0xff]  ;;  %v9791_v0 = vld [vmem:[%s19676_s3 + $0xcf0] sm:$0xff] }
 0x2a4   :  { %v16737_v39 = vpack.c.bf16 %v9783_v47, %v9781_v17  ;;  %v19952_v17 = vld [vmem:[#allocation22_spill] sm:$0xff]  ;;  %v9794_v47 = vld [vmem:[%s19676_s3 + $0xd08] sm:$0xff] }
 0x2a5   :  { %11319 = vmatpush1.bf16.msra.mxu0 %v16697_v26 }
 0x2a6   :  { %11967 = vmatpush1.bf16.msra.mxu1 %v16093_v27  ;;  %11321 = vmatprep.subr.bf16.mxu0 %v16701_v37  ;;  %v9788_v27 = vld [vmem:[%s19676_s3 + $0xcd8] sm:$0xff] }
 0x2a7   :  { %11969 = vmatprep.subr.bf16.mxu1 %v16097_v29  ;;  %v16741_v13 = vpack.c.bf16 %v9788_v27, %v9786_v32  ;;  %v9785_v29 = vld [vmem:[%s19676_s3 + $0xcc0] sm:$0xff]  ;;  %v9796_v32 = vld [vmem:[%s19676_s3 + $0xd18] sm:$0xff] }
 0x2a8   :  { %v16757_v46 = vpack.c.bf16 %v9787_v50, %v9785_v29  ;;  %v19954_v29 = vld [vmem:[#allocation23_spill] sm:$0xff]  ;;  %v16781_v50 = vpack.c.bf16 %v9796_v32, %v9794_v47  ;;  %v19958_v47 = vld [vmem:[#allocation6_spill] sm:$0xff] }
 0x2a9   :  { %11323 = vmatpush1.bf16.msra.mxu0 %v16717_v36 }
 0x2aa   :  { %11971 = vmatpush1.bf16.msra.mxu1 %v16113_v20  ;;  %11325 = vmatprep.subr.bf16.mxu0 %v16721_v18  ;;  %v9792_v20 = vld [vmem:[%s19676_s3 + $0xcf8] sm:$0xff]  ;;  %19949 = vst [vmem:[#allocation13_spill] sm:$0xff] %v16757_v46  ;;  %19955 = vst [vmem:[#allocation16_spill] sm:$0xff] %v16781_v50 }
 0x2ab   :  { %11973 = vmatprep.subr.bf16.mxu1 %v16117_v63  ;;  %v16761_v58 = vpack.c.bf16 %v9792_v20, %v9790_v55  ;;  %v9789_v63 = vld [vmem:[%s19676_s3 + $0xce0] sm:$0xff]  ;;  %v9795_v20 = vld [vmem:[%s19676_s3 + $0xd10] sm:$0xff] }
 0x2ac   :  { %v16777_v27 = vpack.c.bf16 %v9791_v0, %v9789_v63  ;;  %v9793_v55 = vld [vmem:[%s19676_s3 + $0xd00] sm:$0xff]  ;;  %v9798_v63 = vld [vmem:[%s19676_s3 + $0xd28] sm:$0xff]  ;;  %v9800_v0 = vld [vmem:[%s19676_s3 + $0xd38] sm:$0xff] }
 0x2ad   :  { %11327 = vmatpush1.bf16.msra.mxu0 %v16737_v39  ;;  %19951 = vst [vmem:[#allocation14_spill] sm:$0xff] %v16761_v58  ;;  %v16801_v32 = vpack.c.bf16 %v9800_v0, %v9798_v63 }
 0x2ae   :  { %11975 = vmatpush1.bf16.msra.mxu1 %v19950_v61  ;;  %11329 = vmatprep.subr.bf16.mxu0 %v16741_v13  ;;  %19953 = vst [vmem:[#allocation15_spill] sm:$0xff] %v16777_v27  ;;  %v19956_v61 = vld [vmem:[#allocation4_spill] sm:$0xff] }
 0x2af   :  { %11977 = vmatprep.subr.bf16.mxu1 %v19952_v17  ;;  %v16797_v17 = vpack.c.bf16 %v9795_v20, %v9793_v55  ;;  %19959 = vst [vmem:[#allocation24_spill] sm:$0xff] %v16801_v32  ;;  %v9802_v55 = vld [vmem:[%s19676_s3 + $0xd48] sm:$0xff]  ;;  %v9804_v20 = vld [vmem:[%s19676_s3 + $0xd58] sm:$0xff] }
 0x2b0   :  { %v16821_v0 = vpack.c.bf16 %v9804_v20, %v9802_v55  ;;  %v9807_v20 = vld [vmem:[%s19676_s3 + $0xd70] sm:$0xff] }
 0x2b1   :  { %11331 = vmatpush1.bf16.msra.mxu0 %v16757_v46  ;;  %19957 = vst [vmem:[#allocation18_spill] sm:$0xff] %v16797_v17  ;;  %v6009_v46 = vld [vmem:[#allocation2 + $0x38] sm:$0x1] }
 0x2b2   :  { %11979 = vmatpush1.bf16.msra.mxu1 %v19954_v29  ;;  %11333 = vmatprep.subr.bf16.mxu0 %v16761_v58  ;;  %v9797_v29 = vld [vmem:[%s19676_s3 + $0xd20] sm:$0xff]  ;;  %v19960_v58 = vld [vmem:[#allocation5_spill] sm:$0xff]  ;;  %19962 = vst [vmem:[#allocation26_spill] sm:$0xff] %v16821_v0 }
 0x2b3   :  { %11981 = vmatprep.subr.bf16.mxu1 %v19956_v61  ;;  %v9799_v61 = vld [vmem:[%s19676_s3 + $0xd30] sm:$0xff] }
 0x2b4   :  { %v16817_v63 = vpack.c.bf16 %v9799_v61, %v9797_v29  ;;  %v9806_v29 = vld [vmem:[%s19676_s3 + $0xd68] sm:$0xff] }
 0x2b5   :  { %11335 = vmatpush1.bf16.msra.mxu0 %v16777_v27  ;;  %v6010_v27 = vld [vmem:[#allocation2 + $0x40] sm:$0xfe] }
 0x2b6   :  { %11983 = vmatpush1.bf16.msra.mxu1 %v19958_v47  ;;  %11337 = vmatprep.subr.bf16.mxu0 %v16781_v50  ;;  %19961 = vst [vmem:[#allocation25_spill] sm:$0xff] %v16817_v63  ;;  %v9803_v47 = vld [vmem:[%s19676_s3 + $0xd50] sm:$0xff] }
 0x2b7   :  { %11985 = vmatprep.subr.bf16.mxu1 %v19960_v58  ;;  %v9801_v58 = vld [vmem:[%s19676_s3 + $0xd40] sm:$0xff] }
 0x2b8   :  { %v16837_v61 = vpack.c.bf16 %v9803_v47, %v9801_v58  ;;  %v9810_v58 = vld [vmem:[%s19676_s3 + $0xd88] sm:$0xff] }
 0x2b9   :  { %11339 = vmatpush1.bf16.msra.mxu0 %v16797_v17 }
 0x2ba   :  { %11987 = vmatpush1.bf16.msra.mxu1 %v16193_v12  ;;  %11341 = vmatprep.subr.bf16.mxu0 %v16801_v32  ;;  %v9808_v12 = vld [vmem:[%s19676_s3 + $0xd78] sm:$0xff]  ;;  %19963 = vst [vmem:[#allocation21_spill] sm:$0xff] %v16837_v61  ;;  %v9819_v32 = vld [vmem:[%s19676_s3 + $0xdd0] sm:$0xff] }
 0x2bb   :  { %11989 = vmatprep.subr.bf16.mxu1 %v16197_v25  ;;  %v16841_v55 = vpack.c.bf16 %v9808_v12, %v9806_v29  ;;  %v9805_v25 = vld [vmem:[%s19676_s3 + $0xd60] sm:$0xff]  ;;  %v9811_v12 = vld [vmem:[%s19676_s3 + $0xd90] sm:$0xff] }
 0x2bc   :  { %v16857_v47 = vpack.c.bf16 %v9807_v20, %v9805_v25  ;;  %v9814_v25 = vld [vmem:[%s19676_s3 + $0xda8] sm:$0xff] }
 0x2bd   :  { %11343 = vmatpush1.bf16.msra.mxu0 %v16817_v63  ;;  %19964 = vst [vmem:[#allocation22_spill] sm:$0xff] %v16841_v55  ;;  %v9817_v63 = vld [vmem:[%s19676_s3 + $0xdc0] sm:$0xff] }
 0x2be   :  { %11991 = vmatpush1.bf16.msra.mxu1 %v16213_v43  ;;  %11345 = vmatprep.subr.bf16.mxu0 %v16821_v0  ;;  %v9812_v43 = vld [vmem:[%s19676_s3 + $0xd98] sm:$0xff]  ;;  %19965 = vst [vmem:[#allocation23_spill] sm:$0xff] %v16857_v47  ;;  %v19967_v0 = vld [vmem:[#allocation8_spill] sm:$0xff] }
 0x2bf   :  { %11993 = vmatprep.subr.bf16.mxu1 %v16217_v19  ;;  %v16861_v29 = vpack.c.bf16 %v9812_v43, %v9810_v58  ;;  %v9809_v19 = vld [vmem:[%s19676_s3 + $0xd80] sm:$0xff]  ;;  %v19969_v58 = vld [vmem:[#allocation7_spill] sm:$0xff] }
 0x2c0   :  { %v16877_v20 = vpack.c.bf16 %v9811_v12, %v9809_v19  ;;  %v9818_v19 = vld [vmem:[%s19676_s3 + $0xdc8] sm:$0xff]  ;;  %v9820_v12 = vld [vmem:[%s19676_s3 + $0xdd8] sm:$0xff] }
 0x2c1   :  { %11347 = vmatpush1.bf16.msra.mxu0 %v16837_v61  ;;  %19966 = vst [vmem:[#allocation4_spill] sm:$0xff] %v16861_v29  ;;  %v19971_v61 = vld [vmem:[#allocation9_spill] sm:$0xff] }
 0x2c2   :  { %11995 = vmatpush1.bf16.msra.mxu1 %v16233_v11  ;;  %11349 = vmatprep.subr.bf16.mxu0 %v16841_v55  ;;  %v9816_v11 = vld [vmem:[%s19676_s3 + $0xdb8] sm:$0xff]  ;;  %19968 = vst [vmem:[#allocation6_spill] sm:$0xff] %v16877_v20  ;;  %v9815_v55 = vld [vmem:[%s19676_s3 + $0xdb0] sm:$0xff] }
 0x2c3   :  { %11997 = vmatprep.subr.bf16.mxu1 %v19967_v0  ;;  %v16881_v43 = vpack.c.bf16 %v9816_v11, %v9814_v25  ;;  %v9813_v0 = vld [vmem:[%s19676_s3 + $0xda0] sm:$0xff] }
 0x2c4   :  { %v16897_v25 = vpack.c.bf16 %v9815_v55, %v9813_v0  ;;  %v6002_v11 = vld [vmem:[#allocation2] sm:$0xfe] }
 0x2c5   :  { %11351 = vmatpush1.bf16.msra.mxu0 %v16857_v47  ;;  %19970 = vst [vmem:[#allocation5_spill] sm:$0xff] %v16881_v43  ;;  %v19972_v47 = vld [vmem:[#allocation10_spill] sm:$0xff]  ;;  %v6035_v55 = vrot.slane %v6002_v11, 1 }
 0x2c6   :  { %11999 = vmatpush1.bf16.msra.mxu1 %v19969_v58  ;;  %11353 = vmatprep.subr.bf16.mxu0 %v16861_v29  ;;  %v6006_v58 = vld [vmem:[#allocation2 + $0x20] sm:$0x1]  ;;  %v6015_v29 = vld [vmem:[#allocation2 + $0x68] sm:$0x1]  ;;  %v9823_v11 = vld [vmem:[%s19676_s3 + $0xdf0] sm:$0xff] }
 0x2c7   :  { %12001 = vmatprep.subr.bf16.mxu1 %v19971_v61  ;;  %v16901_v61 = vpack.c.bf16 %v9820_v12, %v9818_v19  ;;  %v6036_v0 = vrot.slane %v6006_v58, 1  ;;  %v9824_v19 = vld [vmem:[%s19676_s3 + $0xdf8] sm:$0xff]  ;;  %v6014_v12 = vld [vmem:[#allocation2 + $0x60] sm:$0x1]  ;;  %v6051_v50 = vrot.slane %v6015_v29, 1  ;;  %v6047_v29 = vrot.slane %v6010_v27, 1 }
 0x2c8   :  { %v6005_v58 = vld [vmem:[#allocation2 + $0x18] sm:$0xfe]  ;;  %v6045_v27 = vrot.slane %v6009_v46, 1  ;;  %v9830_v46 = vld [vmem:[%s19676_s3 + $0xe28] sm:$0xff] }
 0x2c9   :  { %11355 = vmatpush1.bf16.msra.mxu0 %v16877_v20  ;;  %19973 = vst [vmem:[#allocation8_spill] sm:$0xff] %v16901_v61  ;;  %v6011_v20 = vld [vmem:[#allocation2 + $0x48] sm:$0xfe] }
 0x2ca   :  { %12003 = vmatpush1.bf16.msra.mxu1 %v19972_v47  ;;  %11357 = vmatprep.subr.bf16.mxu0 %v16881_v43  ;;  %v9822_v47 = vld [vmem:[%s19676_s3 + $0xde8] sm:$0xff]  ;;  %v16917_v43 = vpack.c.bf16 %v9819_v32, %v9817_v63  ;;  %v6050_v17 = vrot.slane %v6011_v20, 1  ;;  %v16931_v63 = vsel %vm6034_vm1, %v6035_v55, %v6036_v0  ;;  %v6044_v55 = vrot.slane %v6005_v58, 1  ;;  %v9825_v0 = vld [vmem:[%s19676_s3 + $0xe00] sm:$0xff]  ;;  %v9836_v58 = vld [vmem:[%s19676_s3 + $0xe58] sm:$0xff] }
 0x2cb   :  { %12005 = vmatprep.subr.bf16.mxu1 %v16284_v5  ;;  %v9821_v5 = vld [vmem:[%s19676_s3 + $0xde0] sm:$0xff]  ;;  %v16928_v32 = vpack.c.bf16 %v9824_v19, %v9822_v47  ;;  %v9826_v20 = vld [vmem:[%s19676_s3 + $0xe08] sm:$0xff]  ;;  %v9827_v19 = vld [vmem:[%s19676_s3 + $0xe10] sm:$0xff] }
 0x2cc   :  { %v16944_v47 = vpack.c.bf16 %v9823_v11, %v9821_v5  ;;  %v9829_v5 = vld [vmem:[%s19676_s3 + $0xe20] sm:$0xff]  ;;  %v9831_v11 = vld [vmem:[%s19676_s3 + $0xe30] sm:$0xff] }
 0x2cd   :  { %11359 = vmatpush1.bf16.msra.mxu0 %v16897_v25 }
 0x2ce   :  { %12007 = vmatpush1.bf16.msra.mxu1 %v16293_v59  ;;  %11361 = vmatprep.subr.bf16.mxu0 %v16901_v61  ;;  %v6048_v59 = vrot.slane %v6014_v12, 1  ;;  %v9828_v61 = vld [vmem:[%s19676_s3 + $0xe18] sm:$0xff]  ;;  %v16970_v12 = vsel %vm6034_vm1, %v6044_v55, %v6045_v27  ;;  %v9833_v55 = vld [vmem:[%s19676_s3 + $0xe40] sm:$0xff]  ;;  %v9835_v27 = vld [vmem:[%s19676_s3 + $0xe50] sm:$0xff] }
 0x2cf   :  { %12009 = vmatprep.subr.bf16.mxu1 %v16304_v60  ;;  %v16942_v60 = vsel %vm6034_vm1, %v6050_v17, %v6051_v50  ;;  %v16956_v50 = vpack.c.bf16 %v9828_v61, %v9826_v20  ;;  %v16993_v20 = vpack.c.bf16 %v9831_v11, %v9829_v5  ;;  %v9837_v5 = vld [vmem:[%s19676_s3 + $0xe60] sm:$0xff]  ;;  %v9839_v11 = vld [vmem:[%s19676_s3 + $0xe70] sm:$0xff] }
 0x2d0   :  { %v16965_v17 = vsel %vm6034_vm1, %v6047_v29, %v6048_v59  ;;  %v13039_v29 = vld [vmem:[#allocation2 + $0x180] sm:$0xff]  ;;  %v13040_v59 = vld [vmem:[#allocation2 + $0x1c8] sm:$0xff] }
 0x2d1   :  { %7094 = vmatmul.mubr.f32.vlgmr.msra.gmra.mrb[16].mxu1 %v16931_v63  ;;  %11363 = vmatpush1.bf16.msra.mxu0 %v16917_v43 }
 0x2d2   :  { %7099 = vmatprep.mubr.f32.mxu1 %v16942_v60  ;;  %12011 = vmatpush1.bf16.msra.mxu1 %v16313_v8  ;;  %v9832_v8 = vld [vmem:[%s19676_s3 + $0xe38] sm:$0xff] }
 0x2d3   :  { %11365 = vmatprep.subr.bf16.mxu0 %v16928_v32  ;;  %12013 = vmatprep.subr.bf16.mxu1 %v16316_v34  ;;  %v16972_v34 = vpack.c.bf16 %v9827_v19, %v9825_v0  ;;  %v16976_v61 = vpack.c.bf16 %v9832_v8, %v9830_v46  ;;  %v9838_v0 = vld [vmem:[%s19676_s3 + $0xe68] sm:$0xff]  ;;  %v13041_v19 = vld [vmem:[#allocation2 + $0x1c0] sm:$0xff]  ;;  %v13042_v46 = vld [vmem:[#allocation2 + $0x198] sm:$0xff]  ;;  %v17013_v8 = vpack.c.bf16 %v9835_v27, %v9833_v55 }
 0x2d4   :  { %v9846_v55 = vld [vmem:[%s19676_s3 + $0xea8] sm:$0xff] }
 0x2d5   :  { %7100 = vmatmul.mubr.f32.gmra.mrb[18].mxu1 %v16965_v17  ;;  %11367 = vmatpush1.bf16.msra.mxu0 %v16944_v47 }
 0x2d6   :  { %12015 = vmatpush1.bf16.msra.mxu1 %v16333_v23  ;;  %7170 = vmatprep.mubr.f32.mxu1 %v16970_v12  ;;  %v9834_v23 = vld [vmem:[%s19676_s3 + $0xe48] sm:$0xff] }
 0x2d7   :  { %11369 = vmatprep.subr.bf16.mxu0 %v16956_v50  ;;  %12017 = vmatprep.subr.bf16.mxu1 %v16337_v30  ;;  %v16997_v30 = vpack.c.bf16 %v9836_v58, %v9834_v23  ;;  %v9842_v23 = vld [vmem:[%s19676_s3 + $0xe88] sm:$0xff]  ;;  %v17033_v58 = vpack.c.bf16 %v9839_v11, %v9837_v5  ;;  %v9851_v11 = vld [vmem:[%s19676_s3 + $0xed0] sm:$0xff] }
 0x2d8   :  { %5909 = vmatmul.mubr.f32.vlgmr.msra.gmra.mrb[16].mxu0 %v13039_v29 }
 0x2d9   :  { %5914 = vmatprep.mubr.f32.mxu0 %v13040_v59  ;;  %11371 = vmatpush1.bf16.msra.mxu0 %v16972_v34  ;;  %v9843_v59 = vld [vmem:[%s19676_s3 + $0xe90] sm:$0xff] }
 0x2da   :  { %12019 = vmatpush1.bf16.msra.mxu1 %v16353_v2  ;;  %11373 = vmatprep.subr.bf16.mxu0 %v16976_v61  ;;  %v9840_v2 = vld [vmem:[%s19676_s3 + $0xe78] sm:$0xff] }
 0x2db   :  { %12021 = vmatprep.subr.bf16.mxu1 %v16357_v35  ;;  %v17017_v35 = vpack.c.bf16 %v9840_v2, %v9838_v0  ;;  %v9847_v2 = vld [vmem:[%s19676_s3 + $0xeb0] sm:$0xff] }
 0x2dc   :  { %5915 = vmatmul.mubr.f32.gmra.mrb[18].mxu0 %v13041_v19  ;;  %v9850_v19 = vld [vmem:[%s19676_s3 + $0xec8] sm:$0xff] }
 0x2dd   :  { %11375 = vmatpush1.bf16.msra.mxu0 %v16993_v20  ;;  %5985 = vmatprep.mubr.f32.mxu0 %v13042_v46 }
 0x2de   :  { %12023 = vmatpush1.bf16.msra.mxu1 %v16373_v52  ;;  %11377 = vmatprep.subr.bf16.mxu0 %v16997_v30  ;;  %v9844_v52 = vld [vmem:[%s19676_s3 + $0xe98] sm:$0xff] }
 0x2df   :  { %12025 = vmatprep.subr.bf16.mxu1 %v16377_v24  ;;  %v17037_v29 = vpack.c.bf16 %v9844_v52, %v9842_v23  ;;  %v9841_v24 = vld [vmem:[%s19676_s3 + $0xe80] sm:$0xff]  ;;  %v9854_v23 = vld [vmem:[%s19676_s3 + $0xee8] sm:$0xff] }
 0x2e0   :  { %v17053_v27 = vpack.c.bf16 %v9843_v59, %v9841_v24  ;;  %v9855_v59 = vld [vmem:[%s19676_s3 + $0xef0] sm:$0xff] }
 0x2e1   :  { %11379 = vmatpush1.bf16.msra.mxu0 %v17013_v8 }
 0x2e2   :  { %12027 = vmatpush1.bf16.msra.mxu1 %v16393_v15  ;;  %11381 = vmatprep.subr.bf16.mxu0 %v17017_v35  ;;  %v9848_v15 = vld [vmem:[%s19676_s3 + $0xeb8] sm:$0xff] }
 0x2e3   :  { %12029 = vmatprep.subr.bf16.mxu1 %v16397_v40  ;;  %v17057_v0 = vpack.c.bf16 %v9848_v15, %v9846_v55  ;;  %v9845_v40 = vld [vmem:[%s19676_s3 + $0xea0] sm:$0xff]  ;;  %v9858_v55 = vld [vmem:[%s19676_s3 + $0xf08] sm:$0xff] }
 0x2e4   :  { %v17073_v46 = vpack.c.bf16 %v9847_v2, %v9845_v40  ;;  %v9859_v2 = vld [vmem:[%s19676_s3 + $0xf10] sm:$0xff] }
 0x2e5   :  { %11383 = vmatpush1.bf16.msra.mxu0 %v17033_v58 }
 0x2e6   :  { %12031 = vmatpush1.bf16.msra.mxu1 %v16413_v51  ;;  %11385 = vmatprep.subr.bf16.mxu0 %v17037_v29  ;;  %v9852_v51 = vld [vmem:[%s19676_s3 + $0xed8] sm:$0xff] }
 0x2e7   :  { %12033 = vmatprep.subr.bf16.mxu1 %v16417_v4  ;;  %v17077_v5 = vpack.c.bf16 %v9852_v51, %v9850_v19  ;;  %v9849_v4 = vld [vmem:[%s19676_s3 + $0xec0] sm:$0xff]  ;;  %v9862_v19 = vld [vmem:[%s19676_s3 + $0xf28] sm:$0xff] }
 0x2e8   :  { %v17093_v52 = vpack.c.bf16 %v9851_v11, %v9849_v4  ;;  %v9863_v11 = vld [vmem:[%s19676_s3 + $0xf30] sm:$0xff] }
 0x2e9   :  { %11387 = vmatpush1.bf16.msra.mxu0 %v17053_v27 }
 0x2ea   :  { %12035 = vmatpush1.bf16.msra.mxu1 %v16433_v48  ;;  %11389 = vmatprep.subr.bf16.mxu0 %v17057_v0  ;;  %v9856_v48 = vld [vmem:[%s19676_s3 + $0xef8] sm:$0xff] }
 0x2eb   :  { %12037 = vmatprep.subr.bf16.mxu1 %v16437_v21  ;;  %v17097_v24 = vpack.c.bf16 %v9856_v48, %v9854_v23  ;;  %v9853_v21 = vld [vmem:[%s19676_s3 + $0xee0] sm:$0xff]  ;;  %v9866_v23 = vld [vmem:[%s19676_s3 + $0xf48] sm:$0xff] }
 0x2ec   :  { %v17113_v15 = vpack.c.bf16 %v9855_v59, %v9853_v21  ;;  %v9867_v59 = vld [vmem:[%s19676_s3 + $0xf50] sm:$0xff] }
 0x2ed   :  { %11391 = vmatpush1.bf16.msra.mxu0 %v17073_v46 }
 0x2ee   :  { %12039 = vmatpush1.bf16.msra.mxu1 %v16453_v49  ;;  %11393 = vmatprep.subr.bf16.mxu0 %v17077_v5  ;;  %v9860_v49 = vld [vmem:[%s19676_s3 + $0xf18] sm:$0xff] }
 0x2ef   :  { %12041 = vmatprep.subr.bf16.mxu1 %v16457_v33  ;;  %v17117_v40 = vpack.c.bf16 %v9860_v49, %v9858_v55  ;;  %v9857_v33 = vld [vmem:[%s19676_s3 + $0xf00] sm:$0xff]  ;;  %v9870_v55 = vld [vmem:[%s19676_s3 + $0xf68] sm:$0xff] }
 0x2f0   :  { %v17133_v51 = vpack.c.bf16 %v9859_v2, %v9857_v33  ;;  %v9871_v2 = vld [vmem:[%s19676_s3 + $0xf70] sm:$0xff] }
 0x2f1   :  { %11395 = vmatpush1.bf16.msra.mxu0 %v17093_v52 }
 0x2f2   :  { %12043 = vmatpush1.bf16.msra.mxu1 %v16473_v56  ;;  %11397 = vmatprep.subr.bf16.mxu0 %v17097_v24  ;;  %v9864_v56 = vld [vmem:[%s19676_s3 + $0xf38] sm:$0xff] }
 0x2f3   :  { %12045 = vmatprep.subr.bf16.mxu1 %v16477_v9  ;;  %v17137_v4 = vpack.c.bf16 %v9864_v56, %v9862_v19  ;;  %v9861_v9 = vld [vmem:[%s19676_s3 + $0xf20] sm:$0xff]  ;;  %v9874_v19 = vld [vmem:[%s19676_s3 + $0xf88] sm:$0xff] }
 0x2f4   :  { %v17153_v48 = vpack.c.bf16 %v9863_v11, %v9861_v9  ;;  %v9875_v11 = vld [vmem:[%s19676_s3 + $0xf90] sm:$0xff] }
 0x2f5   :  { %11399 = vmatpush1.bf16.msra.mxu0 %v17113_v15 }
 0x2f6   :  { %12047 = vmatpush1.bf16.msra.mxu1 %v16493_v3  ;;  %11401 = vmatprep.subr.bf16.mxu0 %v17117_v40  ;;  %v9868_v3 = vld [vmem:[%s19676_s3 + $0xf58] sm:$0xff] }
 0x2f7   :  { %12049 = vmatprep.subr.bf16.mxu1 %v16497_v14  ;;  %v17157_v21 = vpack.c.bf16 %v9868_v3, %v9866_v23  ;;  %v9865_v14 = vld [vmem:[%s19676_s3 + $0xf40] sm:$0xff]  ;;  %v9878_v23 = vld [vmem:[%s19676_s3 + $0xfa8] sm:$0xff] }
 0x2f8   :  { %v17173_v49 = vpack.c.bf16 %v9867_v59, %v9865_v14  ;;  %v19978_v14 = vld [vmem:[#allocation11_spill] sm:$0xff] }
 0x2f9   :  { %11403 = vmatpush1.bf16.msra.mxu0 %v17133_v51 }
 0x2fa   :  { %12051 = vmatpush1.bf16.msra.mxu1 %v16513_v10  ;;  %11405 = vmatprep.subr.bf16.mxu0 %v17137_v4  ;;  %v9872_v10 = vld [vmem:[%s19676_s3 + $0xf78] sm:$0xff] }
 0x2fb   :  { %12053 = vmatprep.subr.bf16.mxu1 %v16517_v57  ;;  %v17177_v33 = vpack.c.bf16 %v9872_v10, %v9870_v55  ;;  %v9869_v57 = vld [vmem:[%s19676_s3 + $0xf60] sm:$0xff]  ;;  %v9879_v55 = vld [vmem:[%s19676_s3 + $0xfb0] sm:$0xff] }
 0x2fc   :  { %v17193_v56 = vpack.c.bf16 %v9871_v2, %v9869_v57  ;;  %v19980_v10 = vld [vmem:[#allocation12_spill] sm:$0xff]  ;;  %v9882_v57 = vld [vmem:[%s19676_s3 + $0xfc8] sm:$0xff]  ;;  %v9884_v2 = vld [vmem:[%s19676_s3 + $0xfd8] sm:$0xff] }
 0x2fd   :  { %11407 = vmatpush1.bf16.msra.mxu0 %v17153_v48  ;;  %19974 = vst [vmem:[#allocation7_spill] sm:$0xff] %v17177_v33 }
 0x2fe   :  { %12055 = vmatpush1.bf16.msra.mxu1 %v16533_v44  ;;  %11409 = vmatprep.subr.bf16.mxu0 %v17157_v21  ;;  %v9876_v44 = vld [vmem:[%s19676_s3 + $0xf98] sm:$0xff]  ;;  %19975 = vst [vmem:[#allocation9_spill] sm:$0xff] %v17193_v56 }
 0x2ff   :  { %12057 = vmatprep.subr.bf16.mxu1 %v16537_v45  ;;  %v17197_v9 = vpack.c.bf16 %v9876_v44, %v9874_v19  ;;  %v9873_v45 = vld [vmem:[%s19676_s3 + $0xf80] sm:$0xff]  ;;  %v6004_v44 = vld [vmem:[#allocation2 + $0x10] sm:$0xfe] }
 0x300   :  { %v17213_v3 = vpack.c.bf16 %v9875_v11, %v9873_v45  ;;  %v6008_v45 = vld [vmem:[#allocation2 + $0x30] sm:$0x1]  ;;  %v6017_v11 = vld [vmem:[#allocation2 + $0x78] sm:$0x1] }
 0x301   :  { %11411 = vmatpush1.bf16.msra.mxu0 %v17173_v49  ;;  %19976 = vst [vmem:[#allocation10_spill] sm:$0xff] %v17197_v9 }
 0x302   :  { %12059 = vmatpush1.bf16.msra.mxu1 %v16553_v28  ;;  %11413 = vmatprep.subr.bf16.mxu0 %v17177_v33  ;;  %v9880_v28 = vld [vmem:[%s19676_s3 + $0xfb8] sm:$0xff]  ;;  %19977 = vst [vmem:[#allocation27_spill] sm:$0xff] %v17213_v3  ;;  %v6359_v33 = vld [vmem:[#allocation2 + $0xa8] sm:$0x1] }
 0x303   :  { %12061 = vmatprep.subr.bf16.mxu1 %v16557_v54  ;;  %v17217_v59 = vpack.c.bf16 %v9880_v28, %v9878_v23  ;;  %v9877_v54 = vld [vmem:[%s19676_s3 + $0xfa0] sm:$0xff]  ;;  %v17237_v23 = vpack.c.bf16 %v9884_v2, %v9882_v57  ;;  %v9888_v57 = vld [vmem:[%s19676_s3 + $0xff8] sm:$0xff]  ;;  %v6016_v2 = vld [vmem:[#allocation2 + $0x70] sm:$0x1] }
 0x304   :  { %v17233_v19 = vpack.c.bf16 %v9879_v55, %v9877_v54  ;;  %v9881_v28 = vld [vmem:[%s19676_s3 + $0xfc0] sm:$0xff]  ;;  %v6041_v54 = vrot.slane %v6004_v44, 1  ;;  %v6042_v55 = vrot.slane %v6008_v45, 1  ;;  %v9887_v44 = vld [vmem:[%s19676_s3 + $0xff0] sm:$0xff]  ;;  %v6355_v45 = vld [vmem:[#allocation2 + $0x88] sm:$0xfe] }
 0x305   :  { %11415 = vmatpush1.bf16.msra.mxu0 %v17193_v56  ;;  %19979 = vst [vmem:[#allocation11_spill] sm:$0xff] %v17217_v59  ;;  %19981 = vst [vmem:[#allocation12_spill] sm:$0xff] %v17237_v23  ;;  %v6012_v56 = vld [vmem:[#allocation2 + $0x50] sm:$0xfe] }
 0x306   :  { %12063 = vmatpush1.bf16.msra.mxu1 %v19978_v14  ;;  %11417 = vmatprep.subr.bf16.mxu0 %v17197_v9  ;;  %v9883_v14 = vld [vmem:[%s19676_s3 + $0xfd0] sm:$0xff]  ;;  %v6057_v9 = vrot.slane %v6017_v11, 1  ;;  %v17267_v11 = vsel %vm6034_vm1, %v6041_v54, %v6042_v55  ;;  %v6389_v54 = vrot.slane %v6355_v45, 1  ;;  %v9889_v55 = vld [vmem:[%s19676_s3 + $0x1000] sm:$0xff]  ;;  %v9900_v45 = vld [vmem:[%s19676_s3 + $0x1058] sm:$0xff] }
 0x307   :  { %12065 = vmatprep.subr.bf16.mxu1 %v19980_v10  ;;  %v6013_v10 = vld [vmem:[#allocation2 + $0x58] sm:$0xfe] }
 0x309   :  { %11419 = vmatpush1.bf16.msra.mxu0 %v17213_v3  ;;  %v6056_v3 = vrot.slane %v6013_v10, 1  ;;  %v9890_v10 = vld [vmem:[%s19676_s3 + $0x1008] sm:$0xff] }
 0x30a   :  { %12067 = vmatpush1.bf16.msra.mxu1 %v16593_v16  ;;  %11421 = vmatprep.subr.bf16.mxu0 %v17217_v59  ;;  %v9886_v16 = vld [vmem:[%s19676_s3 + $0xfe8] sm:$0xff]  ;;  %v17253_v59 = vpack.c.bf16 %v9883_v14, %v9881_v28  ;;  %v6053_v14 = vrot.slane %v6012_v56, 1  ;;  %v6390_v56 = vrot.slane %v6359_v33, 1 }
 0x30b   :  { %12069 = vmatprep.subr.bf16.mxu1 %v16604_v7  ;;  %v9885_v7 = vld [vmem:[%s19676_s3 + $0xfe0] sm:$0xff]  ;;  %v17264_v28 = vpack.c.bf16 %v9888_v57, %v9886_v16  ;;  %v9891_v57 = vld [vmem:[%s19676_s3 + $0x1010] sm:$0xff]  ;;  %v9894_v33 = vld [vmem:[%s19676_s3 + $0x1028] sm:$0xff] }
 0x30c   :  { %v17280_v16 = vpack.c.bf16 %v9887_v44, %v9885_v7  ;;  %v9893_v7 = vld [vmem:[%s19676_s3 + $0x1020] sm:$0xff]  ;;  %v9895_v44 = vld [vmem:[%s19676_s3 + $0x1030] sm:$0xff] }
 0x30d   :  { %11423 = vmatpush1.bf16.msra.mxu0 %v17233_v19 }
 0x30e   :  { %12071 = vmatpush1.bf16.msra.mxu1 %v16613_v22  ;;  %11425 = vmatprep.subr.bf16.mxu0 %v17237_v23  ;;  %v6054_v22 = vrot.slane %v6016_v2, 1  ;;  %v9892_v23 = vld [vmem:[%s19676_s3 + $0x1018] sm:$0xff]  ;;  %v17306_v2 = vsel %vm6034_vm1, %v6389_v54, %v6390_v56  ;;  %v9897_v54 = vld [vmem:[%s19676_s3 + $0x1040] sm:$0xff]  ;;  %v9899_v56 = vld [vmem:[%s19676_s3 + $0x1050] sm:$0xff] }
 0x30f   :  { %12073 = vmatprep.subr.bf16.mxu1 %v16624_v38  ;;  %v17278_v38 = vsel %vm6034_vm1, %v6056_v3, %v6057_v9  ;;  %v17292_v9 = vpack.c.bf16 %v9892_v23, %v9890_v10  ;;  %v17329_v10 = vpack.c.bf16 %v9895_v44, %v9893_v7  ;;  %v9903_v7 = vld [vmem:[%s19676_s3 + $0x1070] sm:$0xff] }
 0x310   :  { %v17301_v3 = vsel %vm6034_vm1, %v6053_v14, %v6054_v22  ;;  %v13043_v14 = vld [vmem:[#allocation2 + $0x190] sm:$0xff]  ;;  %v13044_v22 = vld [vmem:[#allocation2 + $0x1d8] sm:$0xff] }
 0x311   :  { %7171 = vmatmul.mubr.f32.vlgmr.msra.gmra.mrb[16].mxu1 %v17267_v11  ;;  %11427 = vmatpush1.bf16.msra.mxu0 %v17253_v59 }
 0x312   :  { %7176 = vmatprep.mubr.f32.mxu1 %v17278_v38  ;;  %12075 = vmatpush1.bf16.msra.mxu1 %v16636_v42  ;;  %v9896_v42 = vld [vmem:[%s19676_s3 + $0x1038] sm:$0xff] }
 0x313   :  { %11429 = vmatprep.subr.bf16.mxu0 %v17264_v28  ;;  %12077 = vmatprep.subr.bf16.mxu1 %v16640_v6  ;;  %v17308_v6 = vpack.c.bf16 %v9891_v57, %v9889_v55  ;;  %v17312_v23 = vpack.c.bf16 %v9896_v42, %v9894_v33  ;;  %v9902_v55 = vld [vmem:[%s19676_s3 + $0x1068] sm:$0xff]  ;;  %v13045_v57 = vld [vmem:[#allocation2 + $0x1d0] sm:$0xff]  ;;  %v17350_v33 = vpack.c.bf16 %v9899_v56, %v9897_v54  ;;  %v9901_v42 = vld [vmem:[%s19676_s3 + $0x1060] sm:$0xff] }
 0x314   :  { %v17370_v44 = vpack.c.bf16 %v9903_v7, %v9901_v42  ;;  %v9911_v56 = vld [vmem:[%s19676_s3 + $0x10b0] sm:$0xff] }
 0x315   :  { %7177 = vmatmul.mubr.f32.gmra.mrb[18].mxu1 %v17301_v3  ;;  %11431 = vmatpush1.bf16.msra.mxu0 %v17280_v16  ;;  %v9915_v7 = vld [vmem:[%s19676_s3 + $0x10d0] sm:$0xff] }
 0x316   :  { %12079 = vmatpush1.bf16.msra.mxu1 %v16657_v53  ;;  %7251 = vmatprep.mubr.f32.mxu1 %v17306_v2  ;;  %v9898_v53 = vld [vmem:[%s19676_s3 + $0x1048] sm:$0xff] }
 0x317   :  { %11433 = vmatprep.subr.bf16.mxu0 %v17292_v9  ;;  %12081 = vmatprep.subr.bf16.mxu1 %v16661_v1  ;;  %v17333_v1 = vpack.c.bf16 %v9900_v45, %v9898_v53  ;;  %v9907_v45 = vld [vmem:[%s19676_s3 + $0x1090] sm:$0xff] }
 0x318   :  { %5986 = vmatmul.mubr.f32.vlgmr.msra.gmra.mrb[16].mxu0 %v13043_v14  ;;  %v9910_v14 = vld [vmem:[%s19676_s3 + $0x10a8] sm:$0xff] }
 0x319   :  { %5991 = vmatprep.mubr.f32.mxu0 %v13044_v22  ;;  %11435 = vmatpush1.bf16.msra.mxu0 %v17308_v6 }
 0x31a   :  { %12083 = vmatpush1.bf16.msra.mxu1 %v16677_v41  ;;  %11437 = vmatprep.subr.bf16.mxu0 %v17312_v23  ;;  %v9904_v41 = vld [vmem:[%s19676_s3 + $0x1078] sm:$0xff] }
 0x31b   :  { %12085 = vmatprep.subr.bf16.mxu1 %v16681_v62  ;;  %v17354_v62 = vpack.c.bf16 %v9904_v41, %v9902_v55  ;;  %v9914_v55 = vld [vmem:[%s19676_s3 + $0x10c8] sm:$0xff] }
 0x31c   :  { %5992 = vmatmul.mubr.f32.gmra.mrb[18].mxu0 %v13045_v57  ;;  %v19984_v57 = vld [vmem:[#allocation13_spill] sm:$0xff] }
 0x31d   :  { %11439 = vmatpush1.bf16.msra.mxu0 %v17329_v10  ;;  %6260 = vmatprep.mubr.f32.mxu0 %v16634_v31  ;;  %v9906_v31 = vld [vmem:[%s19676_s3 + $0x1088] sm:$0xff] }
 0x31e   :  { %12087 = vmatpush1.bf16.msra.mxu1 %v16697_v26  ;;  %11441 = vmatprep.subr.bf16.mxu0 %v17333_v1  ;;  %v9908_v26 = vld [vmem:[%s19676_s3 + $0x1098] sm:$0xff] }
 0x31f   :  { %12089 = vmatprep.subr.bf16.mxu1 %v16701_v37  ;;  %v17374_v53 = vpack.c.bf16 %v9908_v26, %v9906_v31  ;;  %v9905_v37 = vld [vmem:[%s19676_s3 + $0x1080] sm:$0xff]  ;;  %v19986_v31 = vld [vmem:[#allocation14_spill] sm:$0xff]  ;;  %v9918_v26 = vld [vmem:[%s19676_s3 + $0x10e8] sm:$0xff] }
 0x320   :  { %v17390_v22 = vpack.c.bf16 %v9907_v45, %v9905_v37  ;;  %v9920_v37 = vld [vmem:[%s19676_s3 + $0x10f8] sm:$0xff] }
 0x321   :  { %11443 = vmatpush1.bf16.msra.mxu0 %v17350_v33 }
 0x322   :  { %12091 = vmatpush1.bf16.msra.mxu1 %v16717_v36  ;;  %11445 = vmatprep.subr.bf16.mxu0 %v17354_v62  ;;  %v9912_v36 = vld [vmem:[%s19676_s3 + $0x10b8] sm:$0xff] }
 0x323   :  { %12093 = vmatprep.subr.bf16.mxu1 %v16721_v18  ;;  %v17394_v54 = vpack.c.bf16 %v9912_v36, %v9910_v14  ;;  %v9909_v18 = vld [vmem:[%s19676_s3 + $0x10a0] sm:$0xff]  ;;  %v19988_v14 = vld [vmem:[#allocation15_spill] sm:$0xff]  ;;  %v17434_v36 = vpack.c.bf16 %v9920_v37, %v9918_v26  ;;  %v9923_v37 = vld [vmem:[%s19676_s3 + $0x1110] sm:$0xff] }
 0x324   :  { %v17410_v41 = vpack.c.bf16 %v9911_v56, %v9909_v18  ;;  %v9917_v18 = vld [vmem:[%s19676_s3 + $0x10e0] sm:$0xff]  ;;  %v9919_v56 = vld [vmem:[%s19676_s3 + $0x10f0] sm:$0xff] }
 0x325   :  { %11447 = vmatpush1.bf16.msra.mxu0 %v17370_v44  ;;  %19982 = vst [vmem:[#allocation28_spill] sm:$0xff] %v17394_v54  ;;  %19989 = vst [vmem:[#allocation15_spill] sm:$0xff] %v17434_v36  ;;  %v9921_v26 = vld [vmem:[%s19676_s3 + $0x1100] sm:$0xff] }
 0x326   :  { %12095 = vmatpush1.bf16.msra.mxu1 %v16737_v39  ;;  %11449 = vmatprep.subr.bf16.mxu0 %v17374_v53  ;;  %v9916_v39 = vld [vmem:[%s19676_s3 + $0x10d8] sm:$0xff]  ;;  %19983 = vst [vmem:[#allocation29_spill] sm:$0xff] %v17410_v41 }
 0x327   :  { %12097 = vmatprep.subr.bf16.mxu1 %v16741_v13  ;;  %v17414_v42 = vpack.c.bf16 %v9916_v39, %v9914_v55  ;;  %v9913_v13 = vld [vmem:[%s19676_s3 + $0x10c0] sm:$0xff]  ;;  %v9922_v39 = vld [vmem:[%s19676_s3 + $0x1108] sm:$0xff] }
 0x328   :  { %v17430_v45 = vpack.c.bf16 %v9915_v7, %v9913_v13  ;;  %v19990_v55 = vld [vmem:[#allocation16_spill] sm:$0xff]  ;;  %v17450_v13 = vpack.c.bf16 %v9919_v56, %v9917_v18  ;;  %v19992_v7 = vld [vmem:[#allocation18_spill] sm:$0xff]  ;;  %v9926_v18 = vld [vmem:[%s19676_s3 + $0x1128] sm:$0xff] }
 0x329   :  { %11451 = vmatpush1.bf16.msra.mxu0 %v17390_v22  ;;  %19985 = vst [vmem:[#allocation13_spill] sm:$0xff] %v17414_v42  ;;  %v9928_v56 = vld [vmem:[%s19676_s3 + $0x1138] sm:$0xff] }
 0x32a   :  { %12099 = vmatpush1.bf16.msra.mxu1 %v19984_v57  ;;  %11453 = vmatprep.subr.bf16.mxu0 %v17394_v54  ;;  %19987 = vst [vmem:[#allocation14_spill] sm:$0xff] %v17430_v45  ;;  %v9924_v57 = vld [vmem:[%s19676_s3 + $0x1118] sm:$0xff]  ;;  %19991 = vst [vmem:[#allocation16_spill] sm:$0xff] %v17450_v13 }
 0x32b   :  { %12101 = vmatprep.subr.bf16.mxu1 %v19986_v31  ;;  %v17454_v31 = vpack.c.bf16 %v9924_v57, %v9922_v39  ;;  %v19996_v39 = vld [vmem:[#allocation25_spill] sm:$0xff]  ;;  %v17474_v57 = vpack.c.bf16 %v9928_v56, %v9926_v18  ;;  %v6361_v54 = vld [vmem:[#allocation2 + $0xb8] sm:$0x1] }
 0x32c   :  { %v20000_v56 = vld [vmem:[#allocation21_spill] sm:$0xff] }
 0x32d   :  { %11455 = vmatpush1.bf16.msra.mxu0 %v17410_v41  ;;  %19993 = vst [vmem:[#allocation18_spill] sm:$0xff] %v17454_v31  ;;  %19997 = vst [vmem:[#allocation25_spill] sm:$0xff] %v17474_v57  ;;  %v6362_v41 = vld [vmem:[#allocation2 + $0xc0] sm:$0xfe] }
 0x32e   :  { %12103 = vmatpush1.bf16.msra.mxu1 %v19988_v14  ;;  %11457 = vmatprep.subr.bf16.mxu0 %v17414_v42  ;;  %v19994_v14 = vld [vmem:[#allocation24_spill] sm:$0xff] }
 0x32f   :  { %12105 = vmatprep.subr.bf16.mxu1 %v19990_v55  ;;  %v17470_v55 = vpack.c.bf16 %v9923_v37, %v9921_v26  ;;  %v9930_v26 = vld [vmem:[%s19676_s3 + $0x1148] sm:$0xff]  ;;  %v9932_v37 = vld [vmem:[%s19676_s3 + $0x1158] sm:$0xff] }
 0x331   :  { %11459 = vmatpush1.bf16.msra.mxu0 %v17430_v45  ;;  %19995 = vst [vmem:[#allocation24_spill] sm:$0xff] %v17470_v55 }
 0x332   :  { %12107 = vmatpush1.bf16.msra.mxu1 %v19992_v7  ;;  %11461 = vmatprep.subr.bf16.mxu0 %v17434_v36  ;;  %v9925_v7 = vld [vmem:[%s19676_s3 + $0x1120] sm:$0xff]  ;;  %v19998_v36 = vld [vmem:[#allocation26_spill] sm:$0xff] }
 0x333   :  { %12109 = vmatprep.subr.bf16.mxu1 %v19994_v14  ;;  %v9927_v14 = vld [vmem:[%s19676_s3 + $0x1130] sm:$0xff] }
 0x334   :  { %v17490_v18 = vpack.c.bf16 %v9927_v14, %v9925_v7  ;;  %v9934_v7 = vld [vmem:[%s19676_s3 + $0x1168] sm:$0xff]  ;;  %v9936_v14 = vld [vmem:[%s19676_s3 + $0x1178] sm:$0xff] }
 0x335   :  { %11463 = vmatpush1.bf16.msra.mxu0 %v17450_v13  ;;  %v20002_v13 = vld [vmem:[#allocation22_spill] sm:$0xff] }
 0x336   :  { %12111 = vmatpush1.bf16.msra.mxu1 %v19996_v39  ;;  %11465 = vmatprep.subr.bf16.mxu0 %v17454_v31  ;;  %19999 = vst [vmem:[#allocation26_spill] sm:$0xff] %v17490_v18  ;;  %v17494_v39 = vpack.c.bf16 %v9932_v37, %v9930_v26  ;;  %v9931_v31 = vld [vmem:[%s19676_s3 + $0x1150] sm:$0xff]  ;;  %v20004_v37 = vld [vmem:[#allocation23_spill] sm:$0xff] }
 0x337   :  { %12113 = vmatprep.subr.bf16.mxu1 %v19998_v36  ;;  %v9929_v36 = vld [vmem:[%s19676_s3 + $0x1140] sm:$0xff] }
 0x338   :  { %20001 = vst [vmem:[#allocation21_spill] sm:$0xff] %v17494_v39  ;;  %v17510_v26 = vpack.c.bf16 %v9931_v31, %v9929_v36  ;;  %v9938_v31 = vld [vmem:[%s19676_s3 + $0x1188] sm:$0xff]  ;;  %v9940_v36 = vld [vmem:[%s19676_s3 + $0x1198] sm:$0xff] }
 0x339   :  { %11467 = vmatpush1.bf16.msra.mxu0 %v17470_v55  ;;  %v20006_v55 = vld [vmem:[#allocation4_spill] sm:$0xff] }
 0x33a   :  { %12115 = vmatpush1.bf16.msra.mxu1 %v20000_v56  ;;  %11469 = vmatprep.subr.bf16.mxu0 %v17474_v57  ;;  %20003 = vst [vmem:[#allocation22_spill] sm:$0xff] %v17510_v26  ;;  %v17514_v56 = vpack.c.bf16 %v9936_v14, %v9934_v7  ;;  %v9935_v57 = vld [vmem:[%s19676_s3 + $0x1170] sm:$0xff] }
 0x33b   :  { %12117 = vmatprep.subr.bf16.mxu1 %v20002_v13  ;;  %v9933_v13 = vld [vmem:[%s19676_s3 + $0x1160] sm:$0xff]  ;;  %v20008_v14 = vld [vmem:[#allocation6_spill] sm:$0xff] }
 0x33c   :  { %20005 = vst [vmem:[#allocation23_spill] sm:$0xff] %v17514_v56  ;;  %v17530_v7 = vpack.c.bf16 %v9935_v57, %v9933_v13  ;;  %v9942_v57 = vld [vmem:[%s19676_s3 + $0x11a8] sm:$0xff]  ;;  %v9944_v13 = vld [vmem:[%s19676_s3 + $0x11b8] sm:$0xff] }
 0x33d   :  { %11471 = vmatpush1.bf16.msra.mxu0 %v17490_v18  ;;  %v20010_v18 = vld [vmem:[#allocation5_spill] sm:$0xff] }
 0x33e   :  { %12119 = vmatpush1.bf16.msra.mxu1 %v20004_v37  ;;  %11473 = vmatprep.subr.bf16.mxu0 %v17494_v39  ;;  %20007 = vst [vmem:[#allocation4_spill] sm:$0xff] %v17530_v7  ;;  %v17534_v37 = vpack.c.bf16 %v9940_v36, %v9938_v31  ;;  %v9939_v39 = vld [vmem:[%s19676_s3 + $0x1190] sm:$0xff]  ;;  %v17554_v36 = vpack.c.bf16 %v9944_v13, %v9942_v57  ;;  %v6354_v57 = vld [vmem:[#allocation2 + $0x80] sm:$0xfe]  ;;  %v6358_v13 = vld [vmem:[#allocation2 + $0xa0] sm:$0x1] }
 0x33f   :  { %12121 = vmatprep.subr.bf16.mxu1 %v20006_v55  ;;  %v9937_v55 = vld [vmem:[%s19676_s3 + $0x1180] sm:$0xff] }
 0x340   :  { %20009 = vst [vmem:[#allocation6_spill] sm:$0xff] %v17534_v37  ;;  %v17550_v31 = vpack.c.bf16 %v9939_v39, %v9937_v55  ;;  %20012 = vst [vmem:[#allocation30_spill] sm:$0xff] %v17554_v36  ;;  %v9946_v39 = vld [vmem:[%s19676_s3 + $0x11c8] sm:$0xff] }
 0x341   :  { %11475 = vmatpush1.bf16.msra.mxu0 %v17510_v26  ;;  %v9947_v26 = vld [vmem:[%s19676_s3 + $0x11d0] sm:$0xff] }
 0x342   :  { %12123 = vmatpush1.bf16.msra.mxu1 %v20008_v14  ;;  %11477 = vmatprep.subr.bf16.mxu0 %v17514_v56  ;;  %20011 = vst [vmem:[#allocation5_spill] sm:$0xff] %v17550_v31  ;;  %v9943_v14 = vld [vmem:[%s19676_s3 + $0x11b0] sm:$0xff]  ;;  %v20013_v56 = vld [vmem:[#allocation8_spill] sm:$0xff] }
 0x343   :  { %12125 = vmatprep.subr.bf16.mxu1 %v20010_v18  ;;  %v9941_v18 = vld [vmem:[%s19676_s3 + $0x11a0] sm:$0xff] }
 0x344   :  { %v17570_v55 = vpack.c.bf16 %v9943_v14, %v9941_v18  ;;  %v6386_v18 = vrot.slane %v6354_v57, 1  ;;  %v6387_v14 = vrot.slane %v6358_v13, 1  ;;  %v9951_v57 = vld [vmem:[%s19676_s3 + $0x11f0] sm:$0xff]  ;;  %v6357_v13 = vld [vmem:[#allocation2 + $0x98] sm:$0xfe] }
 0x345   :  { %11479 = vmatpush1.bf16.msra.mxu0 %v17530_v7  ;;  %v9945_v7 = vld [vmem:[%s19676_s3 + $0x11c0] sm:$0xff] }
 0x346   :  { %12127 = vmatpush1.bf16.msra.mxu1 %v16897_v25  ;;  %11481 = vmatprep.subr.bf16.mxu0 %v17534_v37  ;;  %v9948_v25 = vld [vmem:[%s19676_s3 + $0x11d8] sm:$0xff]  ;;  %v6367_v37 = vld [vmem:[#allocation2 + $0xe8] sm:$0x1] }
 0x347   :  { %12129 = vmatprep.subr.bf16.mxu1 %v20013_v56  ;;  %v17574_v56 = vpack.c.bf16 %v9948_v25, %v9946_v39  ;;  %v9952_v39 = vld [vmem:[%s19676_s3 + $0x11f8] sm:$0xff]  ;;  %v6366_v25 = vld [vmem:[#allocation2 + $0xe0] sm:$0x1]  ;;  %v6402_v42 = vrot.slane %v6367_v37, 1  ;;  %v6398_v37 = vrot.slane %v6362_v41, 1  ;;  %v6396_v41 = vrot.slane %v6361_v54, 1 }
 0x348   :  { %v9958_v54 = vld [vmem:[%s19676_s3 + $0x1228] sm:$0xff] }
 0x349   :  { %11483 = vmatpush1.bf16.msra.mxu0 %v17550_v31  ;;  %20014 = vst [vmem:[#allocation8_spill] sm:$0xff] %v17574_v56  ;;  %v6363_v31 = vld [vmem:[#allocation2 + $0xc8] sm:$0xfe] }
 0x34a   :  { %12131 = vmatpush1.bf16.msra.mxu1 %v16917_v43  ;;  %11485 = vmatprep.subr.bf16.mxu0 %v17554_v36  ;;  %v9950_v43 = vld [vmem:[%s19676_s3 + $0x11e8] sm:$0xff]  ;;  %v17590_v36 = vpack.c.bf16 %v9947_v26, %v9945_v7  ;;  %v6401_v45 = vrot.slane %v6363_v31, 1  ;;  %v17604_v7 = vsel %vm6034_vm1, %v6386_v18, %v6387_v14  ;;  %v6395_v18 = vrot.slane %v6357_v13, 1  ;;  %v9953_v14 = vld [vmem:[%s19676_s3 + $0x1200] sm:$0xff]  ;;  %v9964_v13 = vld [vmem:[%s19676_s3 + $0x1258] sm:$0xff] }
 0x34b   :  { %12133 = vmatprep.subr.bf16.mxu1 %v16928_v32  ;;  %v9949_v32 = vld [vmem:[%s19676_s3 + $0x11e0] sm:$0xff]  ;;  %v17601_v26 = vpack.c.bf16 %v9952_v39, %v9950_v43  ;;  %v9954_v31 = vld [vmem:[%s19676_s3 + $0x1208] sm:$0xff]  ;;  %v9955_v39 = vld [vmem:[%s19676_s3 + $0x1210] sm:$0xff] }
 0x34c   :  { %v17617_v43 = vpack.c.bf16 %v9951_v57, %v9949_v32  ;;  %v9957_v32 = vld [vmem:[%s19676_s3 + $0x1220] sm:$0xff]  ;;  %v9959_v57 = vld [vmem:[%s19676_s3 + $0x1230] sm:$0xff] }
 0x34d   :  { %11487 = vmatpush1.bf16.msra.mxu0 %v17570_v55 }
 0x34e   :  { %12135 = vmatpush1.bf16.msra.mxu1 %v16944_v47  ;;  %11489 = vmatprep.subr.bf16.mxu0 %v17574_v56  ;;  %v6399_v47 = vrot.slane %v6366_v25, 1  ;;  %v9956_v56 = vld [vmem:[%s19676_s3 + $0x1218] sm:$0xff]  ;;  %v17643_v25 = vsel %vm6034_vm1, %v6395_v18, %v6396_v41  ;;  %v9965_v18 = vld [vmem:[%s19676_s3 + $0x1260] sm:$0xff] }
 0x34f   :  { %12137 = vmatprep.subr.bf16.mxu1 %v16956_v50  ;;  %v17615_v50 = vsel %vm6034_vm1, %v6401_v45, %v6402_v42  ;;  %v17629_v42 = vpack.c.bf16 %v9956_v56, %v9954_v31 }
 0x350   :  { %v17638_v45 = vsel %vm6034_vm1, %v6398_v37, %v6399_v47  ;;  %v17668_v37 = vpack.c.bf16 %v9959_v57, %v9957_v32  ;;  %v9961_v47 = vld [vmem:[%s19676_s3 + $0x1240] sm:$0xff]  ;;  %v9975_v57 = vld [vmem:[%s19676_s3 + $0x12b0] sm:$0xff] }
 0x351   :  { %7252 = vmatmul.mubr.f32.vlgmr.msra.gmra.mrb[16].mxu1 %v17604_v7  ;;  %11491 = vmatpush1.bf16.msra.mxu0 %v17590_v36 }
 0x352   :  { %7257 = vmatprep.mubr.f32.mxu1 %v17615_v50  ;;  %12139 = vmatpush1.bf16.msra.mxu1 %v16972_v34  ;;  %v9960_v34 = vld [vmem:[%s19676_s3 + $0x1238] sm:$0xff] }
 0x353   :  { %11493 = vmatprep.subr.bf16.mxu0 %v17601_v26  ;;  %12141 = vmatprep.subr.bf16.mxu1 %v16976_v61  ;;  %v17645_v61 = vpack.c.bf16 %v9955_v39, %v9953_v14  ;;  %v17649_v56 = vpack.c.bf16 %v9960_v34, %v9958_v54  ;;  %v9971_v39 = vld [vmem:[%s19676_s3 + $0x1290] sm:$0xff]  ;;  %v9974_v54 = vld [vmem:[%s19676_s3 + $0x12a8] sm:$0xff] }
 0x355   :  { %7258 = vmatmul.mubr.f32.gmra.mrb[18].mxu1 %v17638_v45  ;;  %11495 = vmatpush1.bf16.msra.mxu0 %v17617_v43 }
 0x356   :  { %12143 = vmatpush1.bf16.msra.mxu1 %v16993_v20  ;;  %7328 = vmatprep.mubr.f32.mxu1 %v17643_v25  ;;  %v9962_v20 = vld [vmem:[%s19676_s3 + $0x1248] sm:$0xff] }
 0x357   :  { %11497 = vmatprep.subr.bf16.mxu0 %v17629_v42  ;;  %12145 = vmatprep.subr.bf16.mxu1 %v16997_v30  ;;  %v17672_v30 = vpack.c.bf16 %v9964_v13, %v9962_v20  ;;  %v9978_v20 = vld [vmem:[%s19676_s3 + $0x12c8] sm:$0xff] }
 0x358   :  { %6261 = vmatmul.mubr.f32.vlgmr.msra.gmra.mrb[16].mxu0 %v16931_v63  ;;  %v9963_v63 = vld [vmem:[%s19676_s3 + $0x1250] sm:$0xff] }
 0x359   :  { %6266 = vmatprep.mubr.f32.mxu0 %v16942_v60  ;;  %11499 = vmatpush1.bf16.msra.mxu0 %v17645_v61  ;;  %v9966_v60 = vld [vmem:[%s19676_s3 + $0x1268] sm:$0xff]  ;;  %v17690_v31 = vpack.c.bf16 %v9963_v63, %v9961_v47  ;;  %v9979_v63 = vld [vmem:[%s19676_s3 + $0x12d0] sm:$0xff] }
 0x35a   :  { %12147 = vmatpush1.bf16.msra.mxu1 %v17013_v8  ;;  %11501 = vmatprep.subr.bf16.mxu0 %v17649_v56  ;;  %v9968_v8 = vld [vmem:[%s19676_s3 + $0x1278] sm:$0xff] }
 0x35b   :  { %12149 = vmatprep.subr.bf16.mxu1 %v17017_v35  ;;  %v17694_v35 = vpack.c.bf16 %v9968_v8, %v9966_v60  ;;  %v9982_v60 = vld [vmem:[%s19676_s3 + $0x12e8] sm:$0xff] }
 0x35c   :  { %6267 = vmatmul.mubr.f32.gmra.mrb[18].mxu0 %v16965_v17  ;;  %v9967_v17 = vld [vmem:[%s19676_s3 + $0x1270] sm:$0xff] }
 0x35d   :  { %11503 = vmatpush1.bf16.msra.mxu0 %v17668_v37  ;;  %6337 = vmatprep.mubr.f32.mxu0 %v16970_v12  ;;  %v9970_v12 = vld [vmem:[%s19676_s3 + $0x1288] sm:$0xff]  ;;  %v17710_v41 = vpack.c.bf16 %v9967_v17, %v9965_v18  ;;  %v9983_v17 = vld [vmem:[%s19676_s3 + $0x12f0] sm:$0xff] }
 0x35e   :  { %12151 = vmatpush1.bf16.msra.mxu1 %v17033_v58  ;;  %11505 = vmatprep.subr.bf16.mxu0 %v17672_v30  ;;  %v9972_v58 = vld [vmem:[%s19676_s3 + $0x1298] sm:$0xff] }
 0x35f   :  { %12153 = vmatprep.subr.bf16.mxu1 %v17037_v29  ;;  %v17714_v14 = vpack.c.bf16 %v9972_v58, %v9970_v12  ;;  %v9969_v29 = vld [vmem:[%s19676_s3 + $0x1280] sm:$0xff]  ;;  %v9986_v12 = vld [vmem:[%s19676_s3 + $0x1308] sm:$0xff] }
 0x360   :  { %v17730_v34 = vpack.c.bf16 %v9971_v39, %v9969_v29  ;;  %v9987_v39 = vld [vmem:[%s19676_s3 + $0x1310] sm:$0xff] }
 0x361   :  { %11507 = vmatpush1.bf16.msra.mxu0 %v17690_v31 }
 0x362   :  { %12155 = vmatpush1.bf16.msra.mxu1 %v17053_v27  ;;  %11509 = vmatprep.subr.bf16.mxu0 %v17694_v35  ;;  %v9976_v27 = vld [vmem:[%s19676_s3 + $0x12b8] sm:$0xff] }
 0x363   :  { %12157 = vmatprep.subr.bf16.mxu1 %v17057_v0  ;;  %v17734_v32 = vpack.c.bf16 %v9976_v27, %v9974_v54  ;;  %v9973_v0 = vld [vmem:[%s19676_s3 + $0x12a0] sm:$0xff]  ;;  %v9990_v54 = vld [vmem:[%s19676_s3 + $0x1328] sm:$0xff] }
 0x364   :  { %v17750_v13 = vpack.c.bf16 %v9975_v57, %v9973_v0  ;;  %v9991_v57 = vld [vmem:[%s19676_s3 + $0x1330] sm:$0xff] }
 0x365   :  { %11511 = vmatpush1.bf16.msra.mxu0 %v17710_v41 }
 0x366   :  { %12159 = vmatpush1.bf16.msra.mxu1 %v17073_v46  ;;  %11513 = vmatprep.subr.bf16.mxu0 %v17714_v14  ;;  %v9980_v46 = vld [vmem:[%s19676_s3 + $0x12d8] sm:$0xff] }
 0x367   :  { %12161 = vmatprep.subr.bf16.mxu1 %v17077_v5  ;;  %v17754_v47 = vpack.c.bf16 %v9980_v46, %v9978_v20  ;;  %v9977_v5 = vld [vmem:[%s19676_s3 + $0x12c0] sm:$0xff]  ;;  %v9994_v20 = vld [vmem:[%s19676_s3 + $0x1348] sm:$0xff] }
 0x368   :  { %v17770_v8 = vpack.c.bf16 %v9979_v63, %v9977_v5  ;;  %v9995_v63 = vld [vmem:[%s19676_s3 + $0x1350] sm:$0xff] }
 0x369   :  { %11515 = vmatpush1.bf16.msra.mxu0 %v17730_v34 }
 0x36a   :  { %12163 = vmatpush1.bf16.msra.mxu1 %v17093_v52  ;;  %11517 = vmatprep.subr.bf16.mxu0 %v17734_v32  ;;  %v9984_v52 = vld [vmem:[%s19676_s3 + $0x12f8] sm:$0xff] }
 0x36b   :  { %12165 = vmatprep.subr.bf16.mxu1 %v17097_v24  ;;  %v17774_v18 = vpack.c.bf16 %v9984_v52, %v9982_v60  ;;  %v9981_v24 = vld [vmem:[%s19676_s3 + $0x12e0] sm:$0xff]  ;;  %v20015_v60 = vld [vmem:[#allocation7_spill] sm:$0xff]  ;;  %v9998_v52 = vld [vmem:[%s19676_s3 + $0x1368] sm:$0xff] }
 0x36c   :  { %v17790_v58 = vpack.c.bf16 %v9983_v17, %v9981_v24  ;;  %v20016_v17 = vld [vmem:[#allocation9_spill] sm:$0xff] }
 0x36d   :  { %11519 = vmatpush1.bf16.msra.mxu0 %v17750_v13 }
 0x36e   :  { %12167 = vmatpush1.bf16.msra.mxu1 %v17113_v15  ;;  %11521 = vmatprep.subr.bf16.mxu0 %v17754_v47  ;;  %v9988_v15 = vld [vmem:[%s19676_s3 + $0x1318] sm:$0xff] }
 0x36f   :  { %12169 = vmatprep.subr.bf16.mxu1 %v17117_v40  ;;  %v17794_v29 = vpack.c.bf16 %v9988_v15, %v9986_v12  ;;  %v9985_v40 = vld [vmem:[%s19676_s3 + $0x1300] sm:$0xff] }
 0x370   :  { %v17810_v27 = vpack.c.bf16 %v9987_v39, %v9985_v40  ;;  %v9997_v15 = vld [vmem:[%s19676_s3 + $0x1360] sm:$0xff]  ;;  %v9999_v40 = vld [vmem:[%s19676_s3 + $0x1370] sm:$0xff] }
 0x371   :  { %11523 = vmatpush1.bf16.msra.mxu0 %v17770_v8  ;;  %v20018_v39 = vld [vmem:[#allocation10_spill] sm:$0xff] }
 0x372   :  { %12171 = vmatpush1.bf16.msra.mxu1 %v17133_v51  ;;  %11525 = vmatprep.subr.bf16.mxu0 %v17774_v18  ;;  %v9992_v51 = vld [vmem:[%s19676_s3 + $0x1338] sm:$0xff] }
 0x373   :  { %12173 = vmatprep.subr.bf16.mxu1 %v17137_v4  ;;  %v17814_v0 = vpack.c.bf16 %v9992_v51, %v9990_v54  ;;  %v9989_v4 = vld [vmem:[%s19676_s3 + $0x1320] sm:$0xff]  ;;  %v10002_v54 = vld [vmem:[%s19676_s3 + $0x1388] sm:$0xff]  ;;  %v10004_v51 = vld [vmem:[%s19676_s3 + $0x1398] sm:$0xff] }
 0x374   :  { %v17830_v46 = vpack.c.bf16 %v9991_v57, %v9989_v4  ;;  %v17870_v4 = vpack.c.bf16 %v9999_v40, %v9997_v15  ;;  %v20020_v57 = vld [vmem:[#allocation27_spill] sm:$0xff]  ;;  %v10005_v15 = vld [vmem:[%s19676_s3 + $0x13a0] sm:$0xff]  ;;  %v10007_v40 = vld [vmem:[%s19676_s3 + $0x13b0] sm:$0xff] }
 0x375   :  { %11527 = vmatpush1.bf16.msra.mxu0 %v17790_v58 }
 0x376   :  { %12175 = vmatpush1.bf16.msra.mxu1 %v17153_v48  ;;  %11529 = vmatprep.subr.bf16.mxu0 %v17794_v29  ;;  %v9996_v48 = vld [vmem:[%s19676_s3 + $0x1358] sm:$0xff]  ;;  %20019 = vst [vmem:[#allocation9_spill] sm:$0xff] %v17870_v4 }
 0x377   :  { %12177 = vmatprep.subr.bf16.mxu1 %v17157_v21  ;;  %v17834_v5 = vpack.c.bf16 %v9996_v48, %v9994_v20  ;;  %v9993_v21 = vld [vmem:[%s19676_s3 + $0x1340] sm:$0xff]  ;;  %v17874_v20 = vpack.c.bf16 %v10004_v51, %v10002_v54  ;;  %v10010_v54 = vld [vmem:[%s19676_s3 + $0x13c8] sm:$0xff]  ;;  %v17910_v51 = vpack.c.bf16 %v10007_v40, %v10005_v15 }
 0x378   :  { %v17850_v24 = vpack.c.bf16 %v9995_v63, %v9993_v21  ;;  %v10001_v48 = vld [vmem:[%s19676_s3 + $0x1380] sm:$0xff]  ;;  %v10003_v21 = vld [vmem:[%s19676_s3 + $0x1390] sm:$0xff]  ;;  %v20022_v63 = vld [vmem:[#allocation11_spill] sm:$0xff] }
 0x379   :  { %11531 = vmatpush1.bf16.msra.mxu0 %v17810_v27  ;;  %20021 = vst [vmem:[#allocation10_spill] sm:$0xff] %v17874_v20 }
 0x37a   :  { %12179 = vmatpush1.bf16.msra.mxu1 %v17173_v49  ;;  %11533 = vmatprep.subr.bf16.mxu0 %v17814_v0  ;;  %v10000_v49 = vld [vmem:[%s19676_s3 + $0x1378] sm:$0xff] }
 0x37b   :  { %12181 = vmatprep.subr.bf16.mxu1 %v20015_v60  ;;  %v17854_v12 = vpack.c.bf16 %v10000_v49, %v9998_v52  ;;  %v10006_v60 = vld [vmem:[%s19676_s3 + $0x13a8] sm:$0xff]  ;;  %v10008_v52 = vld [vmem:[%s19676_s3 + $0x13b8] sm:$0xff]  ;;  %v17890_v49 = vpack.c.bf16 %v10003_v21, %v10001_v48  ;;  %v6360_v48 = vld [vmem:[#allocation2 + $0xb0] sm:$0x1] }
 0x37c   :  { %v6369_v21 = vld [vmem:[#allocation2 + $0xf8] sm:$0x1]  ;;  %v6393_v40 = vrot.slane %v6360_v48, 1  ;;  %v7346_v48 = vld [vmem:[#allocation2 + $0x108] sm:$0xfe] }
 0x37d   :  { %11535 = vmatpush1.bf16.msra.mxu0 %v17830_v46  ;;  %20017 = vst [vmem:[#allocation7_spill] sm:$0xff] %v17854_v12  ;;  %20023 = vst [vmem:[#allocation27_spill] sm:$0xff] %v17890_v49 }
 0x37e   :  { %12183 = vmatpush1.bf16.msra.mxu1 %v20016_v17  ;;  %11537 = vmatprep.subr.bf16.mxu0 %v17834_v5  ;;  %v17894_v17 = vpack.c.bf16 %v10008_v52, %v10006_v60  ;;  %v10009_v60 = vld [vmem:[%s19676_s3 + $0x13c0] sm:$0xff]  ;;  %v10011_v52 = vld [vmem:[%s19676_s3 + $0x13d0] sm:$0xff] }
 0x37f   :  { %12185 = vmatprep.subr.bf16.mxu1 %v20018_v39  ;;  %v20025_v39 = vld [vmem:[#allocation12_spill] sm:$0xff] }
 0x380   :  { %20024 = vst [vmem:[#allocation11_spill] sm:$0xff] %v17894_v17 }
 0x381   :  { %11539 = vmatpush1.bf16.msra.mxu0 %v17850_v24 }
 0x382   :  { %12187 = vmatpush1.bf16.msra.mxu1 %v20020_v57  ;;  %11541 = vmatprep.subr.bf16.mxu0 %v17854_v12  ;;  %v6356_v57 = vld [vmem:[#allocation2 + $0x90] sm:$0xfe]  ;;  %v7350_v12 = vld [vmem:[#allocation2 + $0x128] sm:$0x1] }
 0x383   :  { %12189 = vmatprep.subr.bf16.mxu1 %v20022_v63  ;;  %v6392_v15 = vrot.slane %v6356_v57, 1  ;;  %v10015_v57 = vld [vmem:[%s19676_s3 + $0x13f0] sm:$0xff] }
 0x385   :  { %11543 = vmatpush1.bf16.msra.mxu0 %v17870_v4  ;;  %v6364_v4 = vld [vmem:[#allocation2 + $0xd0] sm:$0xfe] }
 0x386   :  { %12191 = vmatpush1.bf16.msra.mxu1 %v17233_v19  ;;  %11545 = vmatprep.subr.bf16.mxu0 %v17874_v20  ;;  %v10012_v19 = vld [vmem:[%s19676_s3 + $0x13d8] sm:$0xff]  ;;  %v6408_v20 = vrot.slane %v6369_v21, 1  ;;  %v17944_v21 = vsel %vm6034_vm1, %v6392_v15, %v6393_v40  ;;  %v7380_v15 = vrot.slane %v7346_v48, 1  ;;  %v10017_v40 = vld [vmem:[%s19676_s3 + $0x1400] sm:$0xff]  ;;  %v10026_v48 = vld [vmem:[%s19676_s3 + $0x1448] sm:$0xff] }
 0x387   :  { %12193 = vmatprep.subr.bf16.mxu1 %v20025_v39  ;;  %v17914_v63 = vpack.c.bf16 %v10012_v19, %v10010_v54  ;;  %v6365_v39 = vld [vmem:[#allocation2 + $0xd8] sm:$0xfe]  ;;  %v6368_v19 = vld [vmem:[#allocation2 + $0xf0] sm:$0x1] }
 0x388   :  { %v10016_v54 = vld [vmem:[%s19676_s3 + $0x13f8] sm:$0xff] }
 0x389   :  { %11547 = vmatpush1.bf16.msra.mxu0 %v17890_v49  ;;  %20026 = vst [vmem:[#allocation12_spill] sm:$0xff] %v17914_v63  ;;  %v6407_v49 = vrot.slane %v6365_v39, 1  ;;  %v10018_v39 = vld [vmem:[%s19676_s3 + $0x1408] sm:$0xff] }
 0x38a   :  { %12195 = vmatpush1.bf16.msra.mxu1 %v17253_v59  ;;  %11549 = vmatprep.subr.bf16.mxu0 %v17894_v17  ;;  %v10014_v59 = vld [vmem:[%s19676_s3 + $0x13e8] sm:$0xff]  ;;  %v17930_v17 = vpack.c.bf16 %v10011_v52, %v10009_v60  ;;  %v6404_v52 = vrot.slane %v6364_v4, 1  ;;  %v7381_v4 = vrot.slane %v7350_v12, 1 }
 0x38b   :  { %12197 = vmatprep.subr.bf16.mxu1 %v17264_v28  ;;  %v10013_v28 = vld [vmem:[%s19676_s3 + $0x13e0] sm:$0xff]  ;;  %v17941_v60 = vpack.c.bf16 %v10016_v54, %v10014_v59  ;;  %v10019_v54 = vld [vmem:[%s19676_s3 + $0x1410] sm:$0xff]  ;;  %v10022_v12 = vld [vmem:[%s19676_s3 + $0x1428] sm:$0xff] }
 0x38c   :  { %v17957_v59 = vpack.c.bf16 %v10015_v57, %v10013_v28  ;;  %v10021_v28 = vld [vmem:[%s19676_s3 + $0x1420] sm:$0xff]  ;;  %v10023_v57 = vld [vmem:[%s19676_s3 + $0x1430] sm:$0xff] }
 0x38d   :  { %11551 = vmatpush1.bf16.msra.mxu0 %v17910_v51 }
 0x38e   :  { %12199 = vmatpush1.bf16.msra.mxu1 %v17280_v16  ;;  %11553 = vmatprep.subr.bf16.mxu0 %v17914_v63  ;;  %v6405_v16 = vrot.slane %v6368_v19, 1  ;;  %v10020_v63 = vld [vmem:[%s19676_s3 + $0x1418] sm:$0xff]  ;;  %v7382_v19 = vsel %vm6034_vm1, %v7380_v15, %v7381_v4  ;;  %v10029_v15 = vld [vmem:[%s19676_s3 + $0x1460] sm:$0xff] }
 0x38f   :  { %12201 = vmatprep.subr.bf16.mxu1 %v17292_v9  ;;  %v17955_v9 = vsel %vm6034_vm1, %v6407_v49, %v6408_v20  ;;  %v17969_v20 = vpack.c.bf16 %v10020_v63, %v10018_v39 }
 0x390   :  { %v17978_v49 = vsel %vm6034_vm1, %v6404_v52, %v6405_v16  ;;  %v18005_v52 = vpack.c.bf16 %v10023_v57, %v10021_v28  ;;  %v10025_v16 = vld [vmem:[%s19676_s3 + $0x1440] sm:$0xff]  ;;  %v20028_v28 = vld [vmem:[#allocation29_spill] sm:$0xff] }
 0x391   :  { %7329 = vmatmul.mubr.f32.vlgmr.msra.gmra.mrb[16].mxu1 %v17944_v21  ;;  %11555 = vmatpush1.bf16.msra.mxu0 %v17930_v17 }
 0x392   :  { %7334 = vmatprep.mubr.f32.mxu1 %v17955_v9  ;;  %12203 = vmatpush1.bf16.msra.mxu1 %v17308_v6  ;;  %v10024_v6 = vld [vmem:[%s19676_s3 + $0x1438] sm:$0xff] }
 0x393   :  { %11557 = vmatprep.subr.bf16.mxu0 %v17941_v60  ;;  %12205 = vmatprep.subr.bf16.mxu1 %v17312_v23  ;;  %v17983_v23 = vpack.c.bf16 %v10019_v54, %v10017_v40  ;;  %v17986_v63 = vpack.c.bf16 %v10024_v6, %v10022_v12  ;;  %v10035_v54 = vld [vmem:[%s19676_s3 + $0x1490] sm:$0xff]  ;;  %v20027_v12 = vld [vmem:[#allocation28_spill] sm:$0xff]  ;;  %v10038_v6 = vld [vmem:[%s19676_s3 + $0x14a8] sm:$0xff] }
 0x395   :  { %7335 = vmatmul.mubr.f32.gmra.mrb[18].mxu1 %v17978_v49  ;;  %11559 = vmatpush1.bf16.msra.mxu0 %v17957_v59 }
 0x396   :  { %12207 = vmatpush1.bf16.msra.mxu1 %v17329_v10  ;;  %7473 = vmatprep.mubr.f32.mxu1 %v7382_v19  ;;  %v10028_v10 = vld [vmem:[%s19676_s3 + $0x1458] sm:$0xff] }
 0x397   :  { %11561 = vmatprep.subr.bf16.mxu0 %v17969_v20  ;;  %12209 = vmatprep.subr.bf16.mxu1 %v17333_v1  ;;  %v18009_v1 = vpack.c.bf16 %v10028_v10, %v10026_v48  ;;  %v10037_v48 = vld [vmem:[%s19676_s3 + $0x14a0] sm:$0xff]  ;;  %v10039_v10 = vld [vmem:[%s19676_s3 + $0x14b0] sm:$0xff] }
 0x398   :  { %6338 = vmatmul.mubr.f32.vlgmr.msra.gmra.mrb[16].mxu0 %v17267_v11  ;;  %v10027_v11 = vld [vmem:[%s19676_s3 + $0x1450] sm:$0xff] }
 0x399   :  { %6343 = vmatprep.mubr.f32.mxu0 %v17278_v38  ;;  %11563 = vmatpush1.bf16.msra.mxu0 %v17983_v23  ;;  %v10030_v38 = vld [vmem:[%s19676_s3 + $0x1468] sm:$0xff]  ;;  %v18027_v39 = vpack.c.bf16 %v10027_v11, %v10025_v16 }
 0x39a   :  { %12211 = vmatpush1.bf16.msra.mxu1 %v17350_v33  ;;  %11565 = vmatprep.subr.bf16.mxu0 %v17986_v63  ;;  %v10032_v33 = vld [vmem:[%s19676_s3 + $0x1478] sm:$0xff]  ;;  %v20029_v16 = vld [vmem:[#allocation13_spill] sm:$0xff] }
 0x39b   :  { %12213 = vmatprep.subr.bf16.mxu1 %v17354_v62  ;;  %v18031_v62 = vpack.c.bf16 %v10032_v33, %v10030_v38  ;;  %v10042_v11 = vld [vmem:[%s19676_s3 + $0x14c8] sm:$0xff]  ;;  %v10044_v38 = vld [vmem:[%s19676_s3 + $0x14d8] sm:$0xff]  ;;  %v18087_v33 = vpack.c.bf16 %v10039_v10, %v10037_v48  ;;  %v10045_v48 = vld [vmem:[%s19676_s3 + $0x14e0] sm:$0xff] }
 0x39c   :  { %6344 = vmatmul.mubr.f32.gmra.mrb[18].mxu0 %v17301_v3  ;;  %v10031_v3 = vld [vmem:[%s19676_s3 + $0x1470] sm:$0xff] }
 0x39d   :  { %11567 = vmatpush1.bf16.msra.mxu0 %v18005_v52  ;;  %6611 = vmatprep.mubr.f32.mxu0 %v17306_v2  ;;  %v10034_v2 = vld [vmem:[%s19676_s3 + $0x1488] sm:$0xff]  ;;  %v18047_v4 = vpack.c.bf16 %v10031_v3, %v10029_v15  ;;  %20030 = vst [vmem:[#allocation28_spill] sm:$0xff] %v18087_v33  ;;  %v20031_v15 = vld [vmem:[#allocation14_spill] sm:$0xff]  ;;  %v18091_v3 = vpack.c.bf16 %v10044_v38, %v10042_v11  ;;  %v10052_v38 = vld [vmem:[%s19676_s3 + $0x1518] sm:$0xff] }
 0x39e   :  { %12215 = vmatpush1.bf16.msra.mxu1 %v17370_v44  ;;  %11569 = vmatprep.subr.bf16.mxu0 %v18009_v1  ;;  %v10036_v44 = vld [vmem:[%s19676_s3 + $0x1498] sm:$0xff]  ;;  %v10047_v10 = vld [vmem:[%s19676_s3 + $0x14f0] sm:$0xff]  ;;  %v10050_v11 = vld [vmem:[%s19676_s3 + $0x1508] sm:$0xff] }
 0x39f   :  { %12217 = vmatprep.subr.bf16.mxu1 %v17374_v53  ;;  %v18051_v40 = vpack.c.bf16 %v10036_v44, %v10034_v2  ;;  %v10033_v53 = vld [vmem:[%s19676_s3 + $0x1480] sm:$0xff]  ;;  %20032 = vst [vmem:[#allocation29_spill] sm:$0xff] %v18091_v3  ;;  %v10043_v44 = vld [vmem:[%s19676_s3 + $0x14d0] sm:$0xff] }
 0x3a0   :  { %v18067_v19 = vpack.c.bf16 %v10035_v54, %v10033_v53  ;;  %v10041_v2 = vld [vmem:[%s19676_s3 + $0x14c0] sm:$0xff]  ;;  %v20033_v53 = vld [vmem:[#allocation15_spill] sm:$0xff]  ;;  %v10046_v54 = vld [vmem:[%s19676_s3 + $0x14e8] sm:$0xff] }
 0x3a1   :  { %11571 = vmatpush1.bf16.msra.mxu0 %v18027_v39 }
 0x3a2   :  { %12219 = vmatpush1.bf16.msra.mxu1 %v17390_v22  ;;  %11573 = vmatprep.subr.bf16.mxu0 %v18031_v62  ;;  %v10040_v22 = vld [vmem:[%s19676_s3 + $0x14b8] sm:$0xff] }
 0x3a3   :  { %12221 = vmatprep.subr.bf16.mxu1 %v20027_v12  ;;  %v18071_v57 = vpack.c.bf16 %v10040_v22, %v10038_v6  ;;  %v10048_v12 = vld [vmem:[%s19676_s3 + $0x14f8] sm:$0xff]  ;;  %v18107_v6 = vpack.c.bf16 %v10043_v44, %v10041_v2  ;;  %v20035_v22 = vld [vmem:[#allocation16_spill] sm:$0xff]  ;;  %v18131_v44 = vpack.c.bf16 %v10052_v38, %v10050_v11 }
 0x3a4   :  { %v20039_v2 = vld [vmem:[#allocation24_spill] sm:$0xff] }
 0x3a5   :  { %11575 = vmatpush1.bf16.msra.mxu0 %v18047_v4  ;;  %20034 = vst [vmem:[#allocation13_spill] sm:$0xff] %v18107_v6  ;;  %20040 = vst [vmem:[#allocation16_spill] sm:$0xff] %v18131_v44  ;;  %v10053_v38 = vld [vmem:[%s19676_s3 + $0x1520] sm:$0xff] }
 0x3a6   :  { %12223 = vmatpush1.bf16.msra.mxu1 %v20028_v28  ;;  %11577 = vmatprep.subr.bf16.mxu0 %v18051_v40  ;;  %v18111_v28 = vpack.c.bf16 %v10048_v12, %v10046_v54  ;;  %v10051_v54 = vld [vmem:[%s19676_s3 + $0x1510] sm:$0xff]  ;;  %v20041_v12 = vld [vmem:[#allocation25_spill] sm:$0xff] }
 0x3a7   :  { %12225 = vmatprep.subr.bf16.mxu1 %v20029_v16  ;;  %v20037_v16 = vld [vmem:[#allocation18_spill] sm:$0xff] }
 0x3a8   :  { %20036 = vst [vmem:[#allocation14_spill] sm:$0xff] %v18111_v28 }
 0x3a9   :  { %11579 = vmatpush1.bf16.msra.mxu0 %v18067_v19 }
 0x3aa   :  { %12227 = vmatpush1.bf16.msra.mxu1 %v20031_v15  ;;  %11581 = vmatprep.subr.bf16.mxu0 %v18071_v57  ;;  %v18127_v15 = vpack.c.bf16 %v10047_v10, %v10045_v48  ;;  %v10056_v48 = vld [vmem:[%s19676_s3 + $0x1538] sm:$0xff] }
 0x3ab   :  { %12229 = vmatprep.subr.bf16.mxu1 %v20033_v53  ;;  %v10049_v53 = vld [vmem:[%s19676_s3 + $0x1500] sm:$0xff] }
 0x3ac   :  { %20038 = vst [vmem:[#allocation15_spill] sm:$0xff] %v18127_v15  ;;  %v18147_v10 = vpack.c.bf16 %v10051_v54, %v10049_v53  ;;  %v10058_v53 = vld [vmem:[%s19676_s3 + $0x1548] sm:$0xff]  ;;  %v10060_v54 = vld [vmem:[%s19676_s3 + $0x1558] sm:$0xff] }
 0x3ad   :  { %11583 = vmatpush1.bf16.msra.mxu0 %v18087_v33  ;;  %v7352_v33 = vld [vmem:[#allocation2 + $0x138] sm:$0x1] }
 0x3ae   :  { %12231 = vmatpush1.bf16.msra.mxu1 %v20035_v22  ;;  %11585 = vmatprep.subr.bf16.mxu0 %v18091_v3  ;;  %v10054_v22 = vld [vmem:[%s19676_s3 + $0x1528] sm:$0xff]  ;;  %20042 = vst [vmem:[#allocation18_spill] sm:$0xff] %v18147_v10  ;;  %v7353_v3 = vld [vmem:[#allocation2 + $0x140] sm:$0xfe] }
 0x3af   :  { %12233 = vmatprep.subr.bf16.mxu1 %v20037_v16  ;;  %v20043_v16 = vld [vmem:[#allocation26_spill] sm:$0xff]  ;;  %v18151_v11 = vpack.c.bf16 %v10056_v48, %v10054_v22 }
 0x3b0   :  { %v20047_v48 = vld [vmem:[#allocation22_spill] sm:$0xff] }
 0x3b1   :  { %11587 = vmatpush1.bf16.msra.mxu0 %v18107_v6  ;;  %20044 = vst [vmem:[#allocation24_spill] sm:$0xff] %v18151_v11 }
 0x3b2   :  { %12235 = vmatpush1.bf16.msra.mxu1 %v20039_v2  ;;  %11589 = vmatprep.subr.bf16.mxu0 %v18111_v28  ;;  %v10055_v2 = vld [vmem:[%s19676_s3 + $0x1530] sm:$0xff] }
 0x3b3   :  { %12237 = vmatprep.subr.bf16.mxu1 %v20041_v12  ;;  %v20045_v12 = vld [vmem:[#allocation21_spill] sm:$0xff]  ;;  %v18167_v22 = vpack.c.bf16 %v10055_v2, %v10053_v38  ;;  %v10064_v2 = vld [vmem:[%s19676_s3 + $0x1578] sm:$0xff] }
 0x3b4   :  { %v10062_v38 = vld [vmem:[%s19676_s3 + $0x1568] sm:$0xff] }
 0x3b5   :  { %11591 = vmatpush1.bf16.msra.mxu0 %v18127_v15  ;;  %20046 = vst [vmem:[#allocation25_spill] sm:$0xff] %v18167_v22  ;;  %v20049_v15 = vld [vmem:[#allocation23_spill] sm:$0xff] }
 0x3b6   :  { %12239 = vmatpush1.bf16.msra.mxu1 %v20043_v16  ;;  %11593 = vmatprep.subr.bf16.mxu0 %v18131_v44  ;;  %v18171_v16 = vpack.c.bf16 %v10060_v54, %v10058_v53  ;;  %v10059_v44 = vld [vmem:[%s19676_s3 + $0x1550] sm:$0xff]  ;;  %v20051_v54 = vld [vmem:[#allocation4_spill] sm:$0xff] }
 0x3b7   :  { %12241 = vmatprep.subr.bf16.mxu1 %v20045_v12  ;;  %v10057_v12 = vld [vmem:[%s19676_s3 + $0x1540] sm:$0xff] }
 0x3b8   :  { %20048 = vst [vmem:[#allocation26_spill] sm:$0xff] %v18171_v16  ;;  %v18187_v53 = vpack.c.bf16 %v10059_v44, %v10057_v12  ;;  %v10066_v44 = vld [vmem:[%s19676_s3 + $0x1588] sm:$0xff]  ;;  %v10068_v12 = vld [vmem:[%s19676_s3 + $0x1598] sm:$0xff] }
 0x3b9   :  { %11595 = vmatpush1.bf16.msra.mxu0 %v18147_v10  ;;  %v20053_v10 = vld [vmem:[#allocation6_spill] sm:$0xff] }
 0x3ba   :  { %12243 = vmatpush1.bf16.msra.mxu1 %v20047_v48  ;;  %11597 = vmatprep.subr.bf16.mxu0 %v18151_v11  ;;  %20050 = vst [vmem:[#allocation21_spill] sm:$0xff] %v18187_v53  ;;  %v18191_v48 = vpack.c.bf16 %v10064_v2, %v10062_v38  ;;  %v10063_v11 = vld [vmem:[%s19676_s3 + $0x1570] sm:$0xff]  ;;  %v20055_v2 = vld [vmem:[#allocation5_spill] sm:$0xff] }
 0x3bb   :  { %12245 = vmatprep.subr.bf16.mxu1 %v20049_v15  ;;  %v10061_v15 = vld [vmem:[%s19676_s3 + $0x1560] sm:$0xff] }
 0x3bc   :  { %20052 = vst [vmem:[#allocation22_spill] sm:$0xff] %v18191_v48  ;;  %v18207_v38 = vpack.c.bf16 %v10063_v11, %v10061_v15  ;;  %v10070_v11 = vld [vmem:[%s19676_s3 + $0x15a8] sm:$0xff]  ;;  %v10072_v15 = vld [vmem:[%s19676_s3 + $0x15b8] sm:$0xff] }
 0x3bd   :  { %11599 = vmatpush1.bf16.msra.mxu0 %v18167_v22  ;;  %v20057_v22 = vld [vmem:[#allocation30_spill] sm:$0xff] }
 0x3be   :  { %12247 = vmatpush1.bf16.msra.mxu1 %v20051_v54  ;;  %11601 = vmatprep.subr.bf16.mxu0 %v18171_v16  ;;  %20054 = vst [vmem:[#allocation23_spill] sm:$0xff] %v18207_v38  ;;  %v18211_v54 = vpack.c.bf16 %v10068_v12, %v10066_v44  ;;  %v10067_v16 = vld [vmem:[%s19676_s3 + $0x1590] sm:$0xff]  ;;  %v18231_v12 = vpack.c.bf16 %v10072_v15, %v10070_v11  ;;  %v7345_v11 = vld [vmem:[#allocation2 + $0x100] sm:$0xfe]  ;;  %v7349_v15 = vld [vmem:[#allocation2 + $0x120] sm:$0x1] }
 0x3bf   :  { %12249 = vmatprep.subr.bf16.mxu1 %v20053_v10  ;;  %v10065_v10 = vld [vmem:[%s19676_s3 + $0x1580] sm:$0xff] }
 0x3c0   :  { %20056 = vst [vmem:[#allocation4_spill] sm:$0xff] %v18211_v54  ;;  %v18227_v44 = vpack.c.bf16 %v10067_v16, %v10065_v10  ;;  %20059 = vst [vmem:[#allocation5_spill] sm:$0xff] %v18231_v12  ;;  %v10074_v16 = vld [vmem:[%s19676_s3 + $0x15c8] sm:$0xff] }
 0x3c1   :  { %11603 = vmatpush1.bf16.msra.mxu0 %v18187_v53  ;;  %v10075_v53 = vld [vmem:[%s19676_s3 + $0x15d0] sm:$0xff] }
 0x3c2   :  { %12251 = vmatpush1.bf16.msra.mxu1 %v20055_v2  ;;  %11605 = vmatprep.subr.bf16.mxu0 %v18191_v48  ;;  %20058 = vst [vmem:[#allocation6_spill] sm:$0xff] %v18227_v44  ;;  %v10071_v2 = vld [vmem:[%s19676_s3 + $0x15b0] sm:$0xff]  ;;  %v20060_v48 = vld [vmem:[#allocation8_spill] sm:$0xff] }
 0x3c3   :  { %12253 = vmatprep.subr.bf16.mxu1 %v20057_v22  ;;  %v10069_v22 = vld [vmem:[%s19676_s3 + $0x15a0] sm:$0xff] }
 0x3c4   :  { %v18247_v10 = vpack.c.bf16 %v10071_v2, %v10069_v22  ;;  %v7377_v22 = vrot.slane %v7345_v11, 1  ;;  %v7378_v2 = vrot.slane %v7349_v15, 1  ;;  %v10079_v11 = vld [vmem:[%s19676_s3 + $0x15f0] sm:$0xff]  ;;  %v7348_v15 = vld [vmem:[#allocation2 + $0x118] sm:$0xfe] }
 0x3c5   :  { %11607 = vmatpush1.bf16.msra.mxu0 %v18207_v38  ;;  %v10073_v38 = vld [vmem:[%s19676_s3 + $0x15c0] sm:$0xff] }
 0x3c6   :  { %12255 = vmatpush1.bf16.msra.mxu1 %v17570_v55  ;;  %11609 = vmatprep.subr.bf16.mxu0 %v18211_v54  ;;  %v10076_v55 = vld [vmem:[%s19676_s3 + $0x15d8] sm:$0xff]  ;;  %20061 = vst [vmem:[#allocation30_spill] sm:$0xff] %v18247_v10  ;;  %v7358_v54 = vld [vmem:[#allocation2 + $0x168] sm:$0x1] }
 0x3c7   :  { %12257 = vmatprep.subr.bf16.mxu1 %v20060_v48  ;;  %v18251_v48 = vpack.c.bf16 %v10076_v55, %v10074_v16  ;;  %v10080_v16 = vld [vmem:[%s19676_s3 + $0x15f8] sm:$0xff]  ;;  %v7357_v55 = vld [vmem:[#allocation2 + $0x160] sm:$0x1]  ;;  %v7393_v6 = vrot.slane %v7358_v54, 1  ;;  %v7389_v54 = vrot.slane %v7353_v3, 1 }
 0x3c8   :  { %v10081_v3 = vld [vmem:[%s19676_s3 + $0x1600] sm:$0xff] }
 0x3c9   :  { %11611 = vmatpush1.bf16.msra.mxu0 %v18227_v44  ;;  %20062 = vst [vmem:[#allocation8_spill] sm:$0xff] %v18251_v48  ;;  %v7354_v44 = vld [vmem:[#allocation2 + $0x148] sm:$0xfe] }
 0x3ca   :  { %12259 = vmatpush1.bf16.msra.mxu1 %v17590_v36  ;;  %11613 = vmatprep.subr.bf16.mxu0 %v18231_v12  ;;  %v10078_v36 = vld [vmem:[%s19676_s3 + $0x15e8] sm:$0xff]  ;;  %v18267_v12 = vpack.c.bf16 %v10075_v53, %v10073_v38  ;;  %v7392_v28 = vrot.slane %v7354_v44, 1  ;;  %v7379_v38 = vsel %vm6034_vm1, %v7377_v22, %v7378_v2  ;;  %v7390_v44 = vrot.slane %v7357_v55, 1  ;;  %v10083_v22 = vld [vmem:[%s19676_s3 + $0x1610] sm:$0xff] }
 0x3cb   :  { %12261 = vmatprep.subr.bf16.mxu1 %v17601_v26  ;;  %v10077_v26 = vld [vmem:[%s19676_s3 + $0x15e0] sm:$0xff]  ;;  %v18278_v53 = vpack.c.bf16 %v10080_v16, %v10078_v36  ;;  %v7386_v36 = vrot.slane %v7348_v15, 1  ;;  %v7387_v16 = vrot.slane %v7352_v33, 1  ;;  %v10086_v33 = vld [vmem:[%s19676_s3 + $0x1628] sm:$0xff]  ;;  %v18311_v2 = vpack.c.bf16 %v10083_v22, %v10081_v3  ;;  %v10087_v55 = vld [vmem:[%s19676_s3 + $0x1630] sm:$0xff] }
 0x3cc   :  { %v10089_v15 = vld [vmem:[%s19676_s3 + $0x1640] sm:$0xff] }
 0x3cd   :  { %11615 = vmatpush1.bf16.msra.mxu0 %v18247_v10  ;;  %v7394_v10 = vsel %vm6034_vm1, %v7392_v28, %v7393_v6  ;;  %v7391_v28 = vsel %vm6034_vm1, %v7389_v54, %v7390_v44  ;;  %v10093_v54 = vld [vmem:[%s19676_s3 + $0x1660] sm:$0xff] }
 0x3ce   :  { %12263 = vmatpush1.bf16.msra.mxu1 %v17617_v43  ;;  %11617 = vmatprep.subr.bf16.mxu0 %v18251_v48  ;;  %v10082_v43 = vld [vmem:[%s19676_s3 + $0x1608] sm:$0xff]  ;;  %v10084_v48 = vld [vmem:[%s19676_s3 + $0x1618] sm:$0xff] }
 0x3cf   :  { %12265 = vmatprep.subr.bf16.mxu1 %v17629_v42  ;;  %v18289_v42 = vpack.c.bf16 %v10079_v11, %v10077_v26  ;;  %v18300_v6 = vpack.c.bf16 %v10084_v48, %v10082_v43  ;;  %v10085_v48 = vld [vmem:[%s19676_s3 + $0x1620] sm:$0xff]  ;;  %v10090_v26 = vld [vmem:[%s19676_s3 + $0x1648] sm:$0xff] }
 0x3d0   :  { %v18333_v11 = vpack.c.bf16 %v10087_v55, %v10085_v48  ;;  %v10107_v48 = vld [vmem:[%s19676_s3 + $0x16d0] sm:$0xff]  ;;  %v10110_v55 = vld [vmem:[%s19676_s3 + $0x16e8] sm:$0xff] }
 0x3d1   :  { %7474 = vmatmul.mubr.f32.vlgmr.msra.gmra.mrb[16].mxu1 %v7379_v38  ;;  %11619 = vmatpush1.bf16.msra.mxu0 %v18267_v12 }
 0x3d2   :  { %7479 = vmatprep.mubr.f32.mxu1 %v7394_v10  ;;  %12267 = vmatpush1.bf16.msra.mxu1 %v17645_v61  ;;  %v10088_v61 = vld [vmem:[%s19676_s3 + $0x1638] sm:$0xff]  ;;  %v7388_v10 = vsel %vm6034_vm1, %v7386_v36, %v7387_v16  ;;  %v10099_v36 = vld [vmem:[%s19676_s3 + $0x1690] sm:$0xff]  ;;  %v10102_v16 = vld [vmem:[%s19676_s3 + $0x16a8] sm:$0xff] }
 0x3d3   :  { %11621 = vmatprep.subr.bf16.mxu0 %v18278_v53  ;;  %12269 = vmatprep.subr.bf16.mxu1 %v17649_v56  ;;  %v18314_v56 = vpack.c.bf16 %v10088_v61, %v10086_v33  ;;  %v10103_v33 = vld [vmem:[%s19676_s3 + $0x16b0] sm:$0xff]  ;;  %v10106_v61 = vld [vmem:[%s19676_s3 + $0x16c8] sm:$0xff] }
 0x3d5   :  { %7480 = vmatmul.mubr.f32.gmra.mrb[18].mxu1 %v7391_v28  ;;  %11623 = vmatpush1.bf16.msra.mxu0 %v18289_v42 }
 0x3d6   :  { %12271 = vmatpush1.bf16.msra.mxu1 %v17668_v37  ;;  %7550 = vmatprep.mubr.f32.mxu1 %v7388_v10  ;;  %v10092_v37 = vld [vmem:[%s19676_s3 + $0x1658] sm:$0xff] }
 0x3d7   :  { %11625 = vmatprep.subr.bf16.mxu0 %v18300_v6  ;;  %12273 = vmatprep.subr.bf16.mxu1 %v17672_v30  ;;  %v18337_v30 = vpack.c.bf16 %v10092_v37, %v10090_v26 }
 0x3d8   :  { %6612 = vmatmul.mubr.f32.vlgmr.msra.gmra.mrb[16].mxu0 %v17604_v7  ;;  %v10091_v7 = vld [vmem:[%s19676_s3 + $0x1650] sm:$0xff] }
 0x3d9   :  { %6617 = vmatprep.mubr.f32.mxu0 %v17615_v50  ;;  %11627 = vmatpush1.bf16.msra.mxu0 %v18311_v2  ;;  %v10094_v50 = vld [vmem:[%s19676_s3 + $0x1668] sm:$0xff]  ;;  %v18355_v38 = vpack.c.bf16 %v10091_v7, %v10089_v15  ;;  %v10111_v15 = vld [vmem:[%s19676_s3 + $0x16f0] sm:$0xff] }
 0x3da   :  { %12275 = vmatpush1.bf16.msra.mxu1 %v17690_v31  ;;  %11629 = vmatprep.subr.bf16.mxu0 %v18314_v56  ;;  %v10096_v31 = vld [vmem:[%s19676_s3 + $0x1678] sm:$0xff]  ;;  %v10114_v7 = vld [vmem:[%s19676_s3 + $0x1708] sm:$0xff] }
 0x3db   :  { %12277 = vmatprep.subr.bf16.mxu1 %v17694_v35  ;;  %v18359_v35 = vpack.c.bf16 %v10096_v31, %v10094_v50 }
 0x3dc   :  { %6618 = vmatmul.mubr.f32.gmra.mrb[18].mxu0 %v17638_v45  ;;  %v10095_v45 = vld [vmem:[%s19676_s3 + $0x1670] sm:$0xff] }
 0x3dd   :  { %11631 = vmatpush1.bf16.msra.mxu0 %v18333_v11  ;;  %6688 = vmatprep.mubr.f32.mxu0 %v17643_v25  ;;  %v10098_v25 = vld [vmem:[%s19676_s3 + $0x1688] sm:$0xff]  ;;  %v18375_v44 = vpack.c.bf16 %v10095_v45, %v10093_v54  ;;  %v10115_v54 = vld [vmem:[%s19676_s3 + $0x1710] sm:$0xff] }
 0x3de   :  { %12279 = vmatpush1.bf16.msra.mxu1 %v17710_v41  ;;  %11633 = vmatprep.subr.bf16.mxu0 %v18337_v30  ;;  %v10100_v41 = vld [vmem:[%s19676_s3 + $0x1698] sm:$0xff]  ;;  %v10118_v45 = vld [vmem:[%s19676_s3 + $0x1728] sm:$0xff] }
 0x3df   :  { %12281 = vmatprep.subr.bf16.mxu1 %v17714_v14  ;;  %v18379_v43 = vpack.c.bf16 %v10100_v41, %v10098_v25  ;;  %v10097_v14 = vld [vmem:[%s19676_s3 + $0x1680] sm:$0xff] }
 0x3e0   :  { %v18395_v3 = vpack.c.bf16 %v10099_v36, %v10097_v14  ;;  %v10119_v14 = vld [vmem:[%s19676_s3 + $0x1730] sm:$0xff]  ;;  %v10122_v36 = vld [vmem:[%s19676_s3 + $0x1748] sm:$0xff] }
 0x3e1   :  { %11635 = vmatpush1.bf16.msra.mxu0 %v18355_v38 }
 0x3e2   :  { %12283 = vmatpush1.bf16.msra.mxu1 %v17730_v34  ;;  %11637 = vmatprep.subr.bf16.mxu0 %v18359_v35  ;;  %v10104_v34 = vld [vmem:[%s19676_s3 + $0x16b8] sm:$0xff] }
 0x3e3   :  { %12285 = vmatprep.subr.bf16.mxu1 %v17734_v32  ;;  %v18399_v22 = vpack.c.bf16 %v10104_v34, %v10102_v16  ;;  %v10101_v32 = vld [vmem:[%s19676_s3 + $0x16a0] sm:$0xff] }
 0x3e4   :  { %v18415_v28 = vpack.c.bf16 %v10103_v33, %v10101_v32  ;;  %v10123_v32 = vld [vmem:[%s19676_s3 + $0x1750] sm:$0xff]  ;;  %v20063_v33 = vld [vmem:[#allocation7_spill] sm:$0xff] }
 0x3e5   :  { %11639 = vmatpush1.bf16.msra.mxu0 %v18375_v44 }
 0x3e6   :  { %12287 = vmatpush1.bf16.msra.mxu1 %v17750_v13  ;;  %11641 = vmatprep.subr.bf16.mxu0 %v18379_v43  ;;  %v10108_v13 = vld [vmem:[%s19676_s3 + $0x16d8] sm:$0xff] }
 0x3e7   :  { %12289 = vmatprep.subr.bf16.mxu1 %v17754_v47  ;;  %v18419_v10 = vpack.c.bf16 %v10108_v13, %v10106_v61  ;;  %v10105_v47 = vld [vmem:[%s19676_s3 + $0x16c0] sm:$0xff]  ;;  %v10126_v61 = vld [vmem:[%s19676_s3 + $0x1768] sm:$0xff] }
 0x3e8   :  { %v18435_v26 = vpack.c.bf16 %v10107_v48, %v10105_v47  ;;  %v20064_v47 = vld [vmem:[#allocation9_spill] sm:$0xff] }
 0x3e9   :  { %11643 = vmatpush1.bf16.msra.mxu0 %v18395_v3 }
 0x3ea   :  { %12291 = vmatpush1.bf16.msra.mxu1 %v17770_v8  ;;  %11645 = vmatprep.subr.bf16.mxu0 %v18399_v22  ;;  %v10112_v8 = vld [vmem:[%s19676_s3 + $0x16f8] sm:$0xff] }
 0x3eb   :  { %12293 = vmatprep.subr.bf16.mxu1 %v17774_v18  ;;  %v18439_v37 = vpack.c.bf16 %v10112_v8, %v10110_v55  ;;  %v10109_v18 = vld [vmem:[%s19676_s3 + $0x16e0] sm:$0xff]  ;;  %v10127_v8 = vld [vmem:[%s19676_s3 + $0x1770] sm:$0xff] }
 0x3ec   :  { %v18455_v50 = vpack.c.bf16 %v10111_v15, %v10109_v18  ;;  %v10125_v55 = vld [vmem:[%s19676_s3 + $0x1760] sm:$0xff]  ;;  %v20065_v18 = vld [vmem:[#allocation10_spill] sm:$0xff]  ;;  %v10130_v15 = vld [vmem:[%s19676_s3 + $0x1788] sm:$0xff] }
 0x3ed   :  { %11647 = vmatpush1.bf16.msra.mxu0 %v18415_v28 }
 0x3ee   :  { %12295 = vmatpush1.bf16.msra.mxu1 %v17790_v58  ;;  %11649 = vmatprep.subr.bf16.mxu0 %v18419_v10  ;;  %v10116_v58 = vld [vmem:[%s19676_s3 + $0x1718] sm:$0xff] }
 0x3ef   :  { %12297 = vmatprep.subr.bf16.mxu1 %v17794_v29  ;;  %v18459_v31 = vpack.c.bf16 %v10116_v58, %v10114_v7  ;;  %v10113_v29 = vld [vmem:[%s19676_s3 + $0x1700] sm:$0xff]  ;;  %v10132_v7 = vld [vmem:[%s19676_s3 + $0x1798] sm:$0xff]  ;;  %v18535_v58 = vpack.c.bf16 %v10127_v8, %v10125_v55  ;;  %v7347_v55 = vld [vmem:[#allocation2 + $0x110] sm:$0xfe] }
 0x3f0   :  { %v18475_v25 = vpack.c.bf16 %v10115_v54, %v10113_v29  ;;  %v20066_v29 = vld [vmem:[#allocation27_spill] sm:$0xff]  ;;  %v18539_v54 = vpack.c.bf16 %v10132_v7, %v10130_v15  ;;  %v7351_v8 = vld [vmem:[#allocation2 + $0x130] sm:$0x1]  ;;  %v10137_v7 = vld [vmem:[%s19676_s3 + $0x17c0] sm:$0xff] }
 0x3f1   :  { %11651 = vmatpush1.bf16.msra.mxu0 %v18435_v26 }
 0x3f2   :  { %12299 = vmatpush1.bf16.msra.mxu1 %v17810_v27  ;;  %11653 = vmatprep.subr.bf16.mxu0 %v18439_v37  ;;  %v10120_v27 = vld [vmem:[%s19676_s3 + $0x1738] sm:$0xff] }
 0x3f3   :  { %12301 = vmatprep.subr.bf16.mxu1 %v17814_v0  ;;  %v18479_v41 = vpack.c.bf16 %v10120_v27, %v10118_v45  ;;  %v10117_v0 = vld [vmem:[%s19676_s3 + $0x1720] sm:$0xff]  ;;  %v10131_v27 = vld [vmem:[%s19676_s3 + $0x1790] sm:$0xff] }
 0x3f4   :  { %v18495_v16 = vpack.c.bf16 %v10119_v14, %v10117_v0  ;;  %v10129_v45 = vld [vmem:[%s19676_s3 + $0x1780] sm:$0xff]  ;;  %v20067_v0 = vld [vmem:[#allocation11_spill] sm:$0xff]  ;;  %v10134_v14 = vld [vmem:[%s19676_s3 + $0x17a8] sm:$0xff] }
 0x3f5   :  { %11655 = vmatpush1.bf16.msra.mxu0 %v18455_v50 }
 0x3f6   :  { %12303 = vmatpush1.bf16.msra.mxu1 %v17830_v46  ;;  %11657 = vmatprep.subr.bf16.mxu0 %v18459_v31  ;;  %v10124_v46 = vld [vmem:[%s19676_s3 + $0x1758] sm:$0xff] }
 0x3f7   :  { %12305 = vmatprep.subr.bf16.mxu1 %v17834_v5  ;;  %v18499_v34 = vpack.c.bf16 %v10124_v46, %v10122_v36  ;;  %v10121_v5 = vld [vmem:[%s19676_s3 + $0x1740] sm:$0xff]  ;;  %v10136_v36 = vld [vmem:[%s19676_s3 + $0x17b8] sm:$0xff]  ;;  %v18555_v46 = vpack.c.bf16 %v10131_v27, %v10129_v45  ;;  %v7383_v27 = vrot.slane %v7347_v55, 1  ;;  %v10143_v55 = vld [vmem:[%s19676_s3 + $0x17f0] sm:$0xff] }
 0x3f8   :  { %v18515_v13 = vpack.c.bf16 %v10123_v32, %v10121_v5  ;;  %v18559_v5 = vpack.c.bf16 %v10136_v36, %v10134_v14  ;;  %v10133_v32 = vld [vmem:[%s19676_s3 + $0x17a0] sm:$0xff]  ;;  %v7356_v45 = vld [vmem:[#allocation2 + $0x158] sm:$0xfe]  ;;  %v7359_v36 = vld [vmem:[#allocation2 + $0x170] sm:$0x1] }
 0x3f9   :  { %11659 = vmatpush1.bf16.msra.mxu0 %v18475_v25  ;;  %v10144_v14 = vld [vmem:[%s19676_s3 + $0x17f8] sm:$0xff] }
 0x3fa   :  { %12307 = vmatpush1.bf16.msra.mxu1 %v17850_v24  ;;  %11661 = vmatprep.subr.bf16.mxu0 %v18479_v41  ;;  %v10128_v24 = vld [vmem:[%s19676_s3 + $0x1778] sm:$0xff]  ;;  %20068 = vst [vmem:[#allocation7_spill] sm:$0xff] %v18559_v5 }
 0x3fb   :  { %12309 = vmatprep.subr.bf16.mxu1 %v20063_v33  ;;  %v18519_v48 = vpack.c.bf16 %v10128_v24, %v10126_v61  ;;  %v10135_v33 = vld [vmem:[%s19676_s3 + $0x17b0] sm:$0xff]  ;;  %v20069_v61 = vld [vmem:[#allocation12_spill] sm:$0xff]  ;;  %v10138_v24 = vld [vmem:[%s19676_s3 + $0x17c8] sm:$0xff] }
 0x3fd   :  { %11663 = vmatpush1.bf16.msra.mxu0 %v18495_v16 }
 0x3fe   :  { %12311 = vmatpush1.bf16.msra.mxu1 %v20064_v47  ;;  %11665 = vmatprep.subr.bf16.mxu0 %v18499_v34  ;;  %v18575_v47 = vpack.c.bf16 %v10135_v33, %v10133_v32  ;;  %v7398_v33 = vrot.slane %v7356_v45, 1  ;;  %v7396_v45 = vrot.slane %v7359_v36, 1  ;;  %v7567_v36 = vld [vmem:[#allocation2 + $0x180] sm:$0xfe] }
 0x3ff   :  { %12313 = vmatprep.subr.bf16.mxu1 %v20065_v18  ;;  %v7360_v18 = vld [vmem:[#allocation2 + $0x178] sm:$0x1] }
 0x400   :  { %20070 = vst [vmem:[#allocation9_spill] sm:$0xff] %v18575_v47 }
 0x401   :  { %11667 = vmatpush1.bf16.msra.mxu0 %v18515_v13 }
 0x402   :  { %12315 = vmatpush1.bf16.msra.mxu1 %v20066_v29  ;;  %11669 = vmatprep.subr.bf16.mxu0 %v18519_v48  ;;  %v10139_v29 = vld [vmem:[%s19676_s3 + $0x17d0] sm:$0xff] }
 0x403   :  { %12317 = vmatprep.subr.bf16.mxu1 %v20067_v0  ;;  %v7384_v0 = vrot.slane %v7351_v8, 1  ;;  %v18595_v32 = vpack.c.bf16 %v10139_v29, %v10137_v7  ;;  %v7568_v8 = vld [vmem:[#allocation2 + $0x188] sm:$0xfe] }
 0x405   :  { %11671 = vmatpush1.bf16.msra.mxu0 %v18535_v58 }
 0x406   :  { %12319 = vmatpush1.bf16.msra.mxu1 %v17910_v51  ;;  %11673 = vmatprep.subr.bf16.mxu0 %v18539_v54  ;;  %v10140_v51 = vld [vmem:[%s19676_s3 + $0x17d8] sm:$0xff] }
 0x407   :  { %12321 = vmatprep.subr.bf16.mxu1 %v20069_v61  ;;  %v18579_v15 = vpack.c.bf16 %v10140_v51, %v10138_v24  ;;  %v7399_v61 = vrot.slane %v7360_v18, 1  ;;  %v7355_v24 = vld [vmem:[#allocation2 + $0x150] sm:$0xfe]  ;;  %v7572_v51 = vld [vmem:[#allocation2 + $0x1a8] sm:$0x1]  ;;  %v7385_v18 = vsel %vm6034_vm1, %v7383_v27, %v7384_v0 }
 0x408   :  { %v7395_v29 = vrot.slane %v7355_v24, 1  ;;  %v20087_v0 = vld [vmem:[#allocation5_spill] sm:$0xff] }
 0x409   :  { %11675 = vmatpush1.bf16.msra.mxu0 %v18555_v46  ;;  %20071 = vst [vmem:[#allocation10_spill] sm:$0xff] %v18579_v15  ;;  %v7580_v24 = vld [vmem:[#allocation2 + $0x1e8] sm:$0x1] }
 0x40a   :  { %12323 = vmatpush1.bf16.msra.mxu1 %v17930_v17  ;;  %11677 = vmatprep.subr.bf16.mxu0 %v18559_v5  ;;  %v10142_v17 = vld [vmem:[%s19676_s3 + $0x17e8] sm:$0xff]  ;;  %v7603_v5 = vrot.slane %v7572_v51, 1  ;;  %v7599_v51 = vrot.slane %v7567_v36, 1  ;;  %v7582_v36 = vld [vmem:[#allocation2 + $0x1f8] sm:$0x1] }
 0x40b   :  { %12325 = vmatprep.subr.bf16.mxu1 %v17941_v60  ;;  %v10141_v60 = vld [vmem:[%s19676_s3 + $0x17e0] sm:$0xff]  ;;  %v18606_v7 = vpack.c.bf16 %v10144_v14, %v10142_v17  ;;  %v20088_v17 = vld [vmem:[#allocation30_spill] sm:$0xff] }
 0x40c   :  { %v20089_v14 = vld [vmem:[#allocation8_spill] sm:$0xff] }
 0x40d   :  { %11679 = vmatpush1.bf16.msra.mxu0 %v18575_v47  ;;  %v7602_v47 = vrot.slane %v7568_v8, 1  ;;  %v7615_v8 = vrot.slane %v7580_v24, 1 }
 0x40e   :  { %12327 = vmatpush1.bf16.msra.mxu1 %v17957_v59  ;;  %11681 = vmatprep.subr.bf16.mxu0 %v18579_v15  ;;  %v7400_v59 = vsel %vm6034_vm1, %v7398_v33, %v7399_v61  ;;  %v18611_v15 = vpack.c.bf16 %v10143_v55, %v10141_v60  ;;  %v7571_v33 = vld [vmem:[#allocation2 + $0x1a0] sm:$0x1]  ;;  %v7576_v61 = vld [vmem:[#allocation2 + $0x1c8] sm:$0xfe] }
 0x40f   :  { %12329 = vmatprep.subr.bf16.mxu1 %v17969_v20  ;;  %v7397_v20 = vsel %vm6034_vm1, %v7395_v29, %v7396_v45  ;;  %v7604_v27 = vsel %vm6034_vm1, %v7602_v47, %v7603_v5  ;;  %v20085_v5 = vld [vmem:[#allocation4_spill] sm:$0xff]  ;;  %v20086_v47 = vld [vmem:[#allocation6_spill] sm:$0xff]  ;;  %v7600_v60 = vrot.slane %v7571_v33, 1  ;;  %v7614_v55 = vrot.slane %v7576_v61, 1  ;;  %v7570_v45 = vld [vmem:[#allocation2 + $0x198] sm:$0xfe] }
 0x410   :  { %v7579_v29 = vld [vmem:[#allocation2 + $0x1e0] sm:$0x1]  ;;  %v7569_v61 = vld [vmem:[#allocation2 + $0x190] sm:$0xfe] }
 0x411   :  { %7551 = vmatmul.mubr.f32.vlgmr.msra.gmra.mrb[16].mxu1 %v7385_v18  ;;  %11683 = vmatpush1.bf16.msra.mxu0 %v18595_v32  ;;  %v7575_v18 = vld [vmem:[#allocation2 + $0x1c0] sm:$0xfe] }
 0x412   :  { %7556 = vmatprep.mubr.f32.mxu1 %v7400_v59  ;;  %12331 = vmatpush1.bf16.msra.mxu1 %v17983_v23  ;;  %v20072_v23 = vld [vmem:[#allocation28_spill] sm:$0xff]  ;;  %v7574_v59 = vld [vmem:[#allocation2 + $0x1b8] sm:$0x1] }
 0x413   :  { %11685 = vmatprep.subr.bf16.mxu0 %v18606_v7  ;;  %12333 = vmatprep.subr.bf16.mxu1 %v17986_v63  ;;  %v20073_v63 = vld [vmem:[#allocation29_spill] sm:$0xff] }
 0x415   :  { %7557 = vmatmul.mubr.f32.gmra.mrb[18].mxu1 %v7397_v20  ;;  %11687 = vmatpush1.bf16.msra.mxu0 %v18611_v15  ;;  %v7601_v20 = vsel %vm6034_vm1, %v7599_v51, %v7600_v60  ;;  %v7847_v51 = vld [vmem:[%s19678_s9 + $0xc0] sm:$0xff]  ;;  %v7849_v60 = vld [vmem:[%s19678_s9 + $0xd0] sm:$0xff] }
 0x416   :  { %12335 = vmatpush1.bf16.msra.mxu1 %v18005_v52  ;;  %7695 = vmatprep.mubr.f32.mxu1 %v7604_v27  ;;  %v20076_v52 = vld [vmem:[#allocation15_spill] sm:$0xff]  ;;  %v7611_v27 = vrot.slane %v7575_v18, 1 }
 0x417   :  { %12337 = vmatprep.subr.bf16.mxu1 %v18009_v1  ;;  %v20077_v1 = vld [vmem:[#allocation16_spill] sm:$0xff]  ;;  %v7854_v18 = vld [vmem:[%s19678_s9 + $0xf8] sm:$0xff] }
 0x418   :  { %6689 = vmatmul.mubr.f32.vlgmr.msra.gmra.mrb[16].mxu0 %v17944_v21  ;;  %v20074_v21 = vld [vmem:[#allocation13_spill] sm:$0xff] }
 0x419   :  { %6694 = vmatprep.mubr.f32.mxu0 %v17955_v9  ;;  %v20075_v9 = vld [vmem:[#allocation14_spill] sm:$0xff] }
 0x41a   :  { %12339 = vmatpush1.bf16.msra.mxu1 %v18027_v39  ;;  %v20079_v39 = vld [vmem:[#allocation24_spill] sm:$0xff] }
 0x41b   :  { %12341 = vmatprep.subr.bf16.mxu1 %v18031_v62  ;;  %v20080_v62 = vld [vmem:[#allocation25_spill] sm:$0xff] }
 0x41c   :  { %6695 = vmatmul.mubr.f32.gmra.mrb[18].mxu0 %v17978_v49  ;;  %v20078_v49 = vld [vmem:[#allocation18_spill] sm:$0xff] }
 0x41e   :  { %12343 = vmatpush1.bf16.msra.mxu1 %v18047_v4  ;;  %v20081_v4 = vld [vmem:[#allocation26_spill] sm:$0xff] }
 0x41f   :  { %12345 = vmatprep.subr.bf16.mxu1 %v18051_v40  ;;  %v20082_v40 = vld [vmem:[#allocation21_spill] sm:$0xff] }
 0x422   :  { %12347 = vmatpush1.bf16.msra.mxu1 %v18067_v19  ;;  %v20083_v19 = vld [vmem:[#allocation22_spill] sm:$0xff] }
 0x423   :  { %12349 = vmatprep.subr.bf16.mxu1 %v18071_v57  ;;  %v20084_v57 = vld [vmem:[#allocation23_spill] sm:$0xff] }
 0x426   :  { %12351 = vmatpush1.bf16.msra.mxu1 %v20072_v23  ;;  %v7616_v23 = vsel %vm6034_vm1, %v7614_v55, %v7615_v8  ;;  %v7578_v55 = vld [vmem:[#allocation2 + $0x1d8] sm:$0xfe]  ;;  %v7852_v8 = vld [vmem:[%s19678_s9 + $0xe8] sm:$0xff] }
 0x427   :  { %12353 = vmatprep.subr.bf16.mxu1 %v20073_v63  ;;  %v7609_v63 = vrot.slane %v7574_v59, 1  ;;  %v7581_v59 = vld [vmem:[#allocation2 + $0x1f0] sm:$0x1] }
 0x42a   :  { %12355 = vmatpush1.bf16.msra.mxu1 %v20074_v21 }
 0x42b   :  { %12357 = vmatprep.subr.bf16.mxu1 %v20075_v9  ;;  %v7837_v9 = vld [vmem:[%s19678_s9 + $0x70] sm:$0xff] }
 0x42e   :  { %12359 = vmatpush1.bf16.msra.mxu1 %v20076_v52  ;;  %v7842_v52 = vld [vmem:[%s19678_s9 + $0x98] sm:$0xff] }
 0x42f   :  { %12361 = vmatprep.subr.bf16.mxu1 %v20077_v1 }
 0x432   :  { %12363 = vmatpush1.bf16.msra.mxu1 %v20078_v49 }
 0x433   :  { %12365 = vmatprep.subr.bf16.mxu1 %v20079_v39  ;;  %v7841_v39 = vld [vmem:[%s19678_s9 + $0x90] sm:$0xff] }
 0x436   :  { %12367 = vmatpush1.bf16.msra.mxu1 %v20080_v62  ;;  %v7846_v62 = vld [vmem:[%s19678_s9 + $0xb8] sm:$0xff] }
 0x437   :  { %12369 = vmatprep.subr.bf16.mxu1 %v20081_v4  ;;  %v20090_v4 = vld [vmem:[#allocation7_spill] sm:$0xff] }
 0x43a   :  { %12371 = vmatpush1.bf16.msra.mxu1 %v20082_v40 }
 0x43b   :  { %12373 = vmatprep.subr.bf16.mxu1 %v20083_v19 }
 0x43e   :  { %12375 = vmatpush1.bf16.msra.mxu1 %v20084_v57  ;;  %v7845_v57 = vld [vmem:[%s19678_s9 + $0xb0] sm:$0xff] }
 0x43f   :  { %12377 = vmatprep.subr.bf16.mxu1 %v20085_v5  ;;  %v20091_v5 = vld [vmem:[#allocation9_spill] sm:$0xff] }
 0x442   :  { %12379 = vmatpush1.bf16.msra.mxu1 %v20086_v47  ;;  %v7848_v47 = vld [vmem:[%s19678_s9 + $0xc8] sm:$0xff] }
 0x443   :  { %12381 = vmatprep.subr.bf16.mxu1 %v20087_v0  ;;  %v7850_v0 = vld [vmem:[%s19678_s9 + $0xd8] sm:$0xff] }
 0x444   :  { %v12480_v24 = vpack.c.bf16 %v7850_v0, %v7848_v47 }
 0x446   :  { %12383 = vmatpush1.bf16.msra.mxu1 %v20088_v17  ;;  %v20092_v17 = vld [vmem:[#allocation10_spill] sm:$0xff] }
 0x447   :  { %12385 = vmatprep.subr.bf16.mxu1 %v20089_v14  ;;  %v7573_v14 = vld [vmem:[#allocation2 + $0x1b0] sm:$0x1] }
 0x44a   :  { %12387 = vmatpush1.bf16.msra.mxu1 %v18267_v12  ;;  %v7612_v12 = vrot.slane %v7579_v29, 1  ;;  %v7605_v29 = vrot.slane %v7569_v61, 1  ;;  %v7882_v61 = vld [vmem:[%s19678_s9 + $0x1d8] sm:$0xff] }
 0x44b   :  { %12389 = vmatprep.subr.bf16.mxu1 %v18278_v53  ;;  %v7608_v53 = vrot.slane %v7570_v45, 1  ;;  %v7606_v45 = vrot.slane %v7573_v14, 1  ;;  %v7877_v14 = vld [vmem:[%s19678_s9 + $0x1b0] sm:$0xff] }
 0x44d   :  { %v7610_v21 = vsel %vm6034_vm1, %v7608_v53, %v7609_v63  ;;  %v7851_v53 = vld [vmem:[%s19678_s9 + $0xe0] sm:$0xff]  ;;  %v7853_v63 = vld [vmem:[%s19678_s9 + $0xf0] sm:$0xff] }
 0x44e   :  { %12391 = vmatpush1.bf16.msra.mxu1 %v18289_v42  ;;  %v7613_v42 = vsel %vm6034_vm1, %v7611_v27, %v7612_v12  ;;  %v7620_v27 = vrot.slane %v7578_v55, 1  ;;  %v7621_v12 = vrot.slane %v7582_v36, 1 }
 0x44f   :  { %12393 = vmatprep.subr.bf16.mxu1 %v18300_v6  ;;  %v7824_v6 = vld [vmem:[%s19678_s9 + $0x8] sm:$0xff] }
 0x451   :  { %7696 = vmatmul.mubr.f32.vlgmr.msra.gmra.mrb[16].mxu1 %v7601_v20  ;;  %v12482_v20 = vpack.c.bf16 %v7849_v60, %v7847_v51  ;;  %v7879_v51 = vld [vmem:[%s19678_s9 + $0x1c0] sm:$0xff]  ;;  %v7881_v60 = vld [vmem:[%s19678_s9 + $0x1d0] sm:$0xff] }
 0x452   :  { %7701 = vmatprep.mubr.f32.mxu1 %v7616_v23  ;;  %12395 = vmatpush1.bf16.msra.mxu1 %v18311_v2  ;;  %v7826_v2 = vld [vmem:[%s19678_s9 + $0x18] sm:$0xff]  ;;  %v7577_v23 = vld [vmem:[#allocation2 + $0x1d0] sm:$0xfe]  ;;  %v12514_v55 = vpack.c.bf16 %v7881_v60, %v7879_v51 }
 0x453   :  { %12397 = vmatprep.subr.bf16.mxu1 %v18314_v56  ;;  %v7823_v56 = vld [vmem:[%s19678_s9] sm:$0xff] }
 0x455   :  { %7702 = vmatmul.mubr.f32.gmra.mrb[18].mxu1 %v7613_v42  ;;  %v7858_v42 = vld [vmem:[%s19678_s9 + $0x118] sm:$0xff] }
 0x456   :  { %12399 = vmatpush1.bf16.msra.mxu1 %v18333_v11  ;;  %7772 = vmatprep.mubr.f32.mxu1 %v7610_v21  ;;  %v18683_v11 = vpack.c.bf16 %v7826_v2, %v7824_v6  ;;  %v7607_v21 = vsel %vm6034_vm1, %v7605_v29, %v7606_v45  ;;  %v7617_v6 = vrot.slane %v7577_v23, 1  ;;  %v7618_v2 = vrot.slane %v7581_v59, 1  ;;  %v7883_v45 = vld [vmem:[%s19678_s9 + $0x1e0] sm:$0xff]  ;;  %v7885_v59 = vld [vmem:[%s19678_s9 + $0x1f0] sm:$0xff] }
 0x457   :  { %12401 = vmatprep.subr.bf16.mxu1 %v18337_v30  ;;  %v7825_v30 = vld [vmem:[%s19678_s9 + $0x10] sm:$0xff] }
 0x458   :  { %12457 = vmatprep.subr.bf16.mxu0 %v18683_v11 }
 0x45a   :  { %12403 = vmatpush1.bf16.msra.mxu1 %v18355_v38  ;;  %v7828_v38 = vld [vmem:[%s19678_s9 + $0x28] sm:$0xff] }
 0x45b   :  { %12405 = vmatprep.subr.bf16.mxu1 %v18359_v35  ;;  %v7830_v35 = vld [vmem:[%s19678_s9 + $0x38] sm:$0xff] }
 0x45e   :  { %12407 = vmatpush1.bf16.msra.mxu1 %v18375_v44  ;;  %v18695_v44 = vpack.c.bf16 %v7825_v30, %v7823_v56  ;;  %v12486_v56 = vpack.c.bf16 %v7853_v63, %v7851_v53  ;;  %v7622_v30 = vsel %vm6034_vm1, %v7620_v27, %v7621_v12  ;;  %v6705_v27 = vld [vmem:[%s19679_s4] sm:$0x3]  ;;  %v20093_v12 = vld [vmem:[#allocation19_spill] sm:$0xff] }
 0x45f   :  { %12409 = vmatprep.subr.bf16.mxu1 %v18379_v43  ;;  %v18697_v43 = vpack.c.bf16 %v7830_v35, %v7828_v38  ;;  %v7855_v38 = vld [vmem:[%s19678_s9 + $0x100] sm:$0xff]  ;;  %v7857_v35 = vld [vmem:[%s19678_s9 + $0x110] sm:$0xff]  ;;  %v6710_v23 = vrot.slane %v6705_v27, %v20093_v12 }
 0x460   :  { %12459 = vmatpush1.bf16.msra.mxu0 %v18695_v44 }
 0x461   :  { %12461 = vmatprep.subr.bf16.mxu0 %v18697_v43 }
 0x462   :  { %12411 = vmatpush1.bf16.msra.mxu1 %v18395_v3  ;;  %v7827_v3 = vld [vmem:[%s19678_s9 + $0x20] sm:$0xff] }
 0x463   :  { %12413 = vmatprep.subr.bf16.mxu1 %v18399_v22  ;;  %v7829_v22 = vld [vmem:[%s19678_s9 + $0x30] sm:$0xff] }
 0x466   :  { %12415 = vmatpush1.bf16.msra.mxu1 %v18415_v28  ;;  %v7832_v28 = vld [vmem:[%s19678_s9 + $0x48] sm:$0xff] }
 0x467   :  { %12417 = vmatprep.subr.bf16.mxu1 %v18419_v10  ;;  %v7834_v10 = vld [vmem:[%s19678_s9 + $0x58] sm:$0xff] }
 0x46a   :  { %12419 = vmatpush1.bf16.msra.mxu1 %v18435_v26  ;;  %v18714_v26 = vpack.c.bf16 %v7829_v22, %v7827_v3  ;;  %v7862_v3 = vld [vmem:[%s19678_s9 + $0x138] sm:$0xff]  ;;  %v7619_v22 = vsel %vm6034_vm1, %v7617_v6, %v7618_v2 }
 0x46b   :  { %12421 = vmatprep.subr.bf16.mxu1 %v18439_v37  ;;  %v18717_v37 = vpack.c.bf16 %v7834_v10, %v7832_v28  ;;  %v12490_v28 = vpack.c.bf16 %v7857_v35, %v7855_v38 }
 0x46c   :  { %12463 = vmatpush1.bf16.msra.mxu0 %v18714_v26 }
 0x46d   :  { %12465 = vmatprep.subr.bf16.mxu0 %v18717_v37 }
 0x46e   :  { %12423 = vmatpush1.bf16.msra.mxu1 %v18455_v50  ;;  %v7831_v50 = vld [vmem:[%s19678_s9 + $0x40] sm:$0xff] }
 0x46f   :  { %12425 = vmatprep.subr.bf16.mxu1 %v18459_v31  ;;  %v7833_v31 = vld [vmem:[%s19678_s9 + $0x50] sm:$0xff] }
 0x472   :  { %12427 = vmatpush1.bf16.msra.mxu1 %v18475_v25  ;;  %v7836_v25 = vld [vmem:[%s19678_s9 + $0x68] sm:$0xff] }
 0x473   :  { %12429 = vmatprep.subr.bf16.mxu1 %v18479_v41  ;;  %v7838_v41 = vld [vmem:[%s19678_s9 + $0x78] sm:$0xff] }
 0x476   :  { %12431 = vmatpush1.bf16.msra.mxu1 %v18495_v16  ;;  %v18734_v16 = vpack.c.bf16 %v7833_v31, %v7831_v50  ;;  %v7859_v50 = vld [vmem:[%s19678_s9 + $0x120] sm:$0xff]  ;;  %v7861_v31 = vld [vmem:[%s19678_s9 + $0x130] sm:$0xff] }
 0x477   :  { %12433 = vmatprep.subr.bf16.mxu1 %v18499_v34  ;;  %v18737_v34 = vpack.c.bf16 %v7838_v41, %v7836_v25  ;;  %v7863_v25 = vld [vmem:[%s19678_s9 + $0x140] sm:$0xff]  ;;  %v7865_v41 = vld [vmem:[%s19678_s9 + $0x150] sm:$0xff] }
 0x478   :  { %12467 = vmatpush1.bf16.msra.mxu0 %v18734_v16 }
 0x479   :  { %12469 = vmatprep.subr.bf16.mxu0 %v18737_v34 }
 0x47a   :  { %12435 = vmatpush1.bf16.msra.mxu1 %v18515_v13  ;;  %v7835_v13 = vld [vmem:[%s19678_s9 + $0x60] sm:$0xff] }
 0x47b   :  { %12437 = vmatprep.subr.bf16.mxu1 %v18519_v48  ;;  %v7840_v48 = vld [vmem:[%s19678_s9 + $0x88] sm:$0xff]  ;;  %v18754_v1 = vpack.c.bf16 %v7837_v9, %v7835_v13  ;;  %v7870_v13 = vld [vmem:[%s19678_s9 + $0x178] sm:$0xff] }
 0x47c   :  { %v18757_v49 = vpack.c.bf16 %v7842_v52, %v7840_v48  ;;  %v7867_v48 = vld [vmem:[%s19678_s9 + $0x160] sm:$0xff]  ;;  %v7869_v52 = vld [vmem:[%s19678_s9 + $0x170] sm:$0xff] }
 0x47d   :  { %12471 = vmatpush1.bf16.msra.mxu0 %v18754_v1 }
 0x47e   :  { %12439 = vmatpush1.bf16.msra.mxu1 %v18535_v58  ;;  %v7839_v58 = vld [vmem:[%s19678_s9 + $0x80] sm:$0xff]  ;;  %12473 = vmatprep.subr.bf16.mxu0 %v18757_v49 }
 0x47f   :  { %12441 = vmatprep.subr.bf16.mxu1 %v18539_v54  ;;  %v7844_v54 = vld [vmem:[%s19678_s9 + $0xa8] sm:$0xff]  ;;  %v18774_v40 = vpack.c.bf16 %v7841_v39, %v7839_v58  ;;  %v7874_v39 = vld [vmem:[%s19678_s9 + $0x198] sm:$0xff] }
 0x480   :  { %v18777_v19 = vpack.c.bf16 %v7846_v62, %v7844_v54  ;;  %v7872_v58 = vld [vmem:[%s19678_s9 + $0x188] sm:$0xff] }
 0x481   :  { %12475 = vmatpush1.bf16.msra.mxu0 %v18774_v40  ;;  %v12504_v62 = vpack.c.bf16 %v7874_v39, %v7872_v58 }
 0x482   :  { %12443 = vmatpush1.bf16.msra.mxu1 %v18555_v46  ;;  %v7843_v46 = vld [vmem:[%s19678_s9 + $0xa0] sm:$0xff]  ;;  %12477 = vmatprep.subr.bf16.mxu0 %v18777_v19 }
 0x483   :  { %12445 = vmatprep.subr.bf16.mxu1 %v20090_v4  ;;  %v12478_v33 = vpack.c.bf16 %v7845_v57, %v7843_v46  ;;  %v7871_v4 = vld [vmem:[%s19678_s9 + $0x180] sm:$0xff]  ;;  %v7876_v57 = vld [vmem:[%s19678_s9 + $0x1a8] sm:$0xff] }
 0x485   :  { %12479 = vmatpush1.bf16.msra.mxu0 %v12478_v33 }
 0x486   :  { %12447 = vmatpush1.bf16.msra.mxu1 %v20091_v5  ;;  %12481 = vmatprep.subr.bf16.mxu0 %v12480_v24  ;;  %v7878_v5 = vld [vmem:[%s19678_s9 + $0x1b8] sm:$0xff] }
 0x487   :  { %12449 = vmatprep.subr.bf16.mxu1 %v20092_v17  ;;  %v12508_v0 = vpack.c.bf16 %v7878_v5, %v7876_v57  ;;  %v7875_v17 = vld [vmem:[%s19678_s9 + $0x1a0] sm:$0xff] }
 0x488   :  { %v12510_v36 = vpack.c.bf16 %v7877_v14, %v7875_v17 }
 0x489   :  { %12483 = vmatpush1.bf16.msra.mxu0 %v12482_v20 }
 0x48a   :  { %12451 = vmatpush1.bf16.msra.mxu1 %v18595_v32  ;;  %v12484_v32 = vpack.c.bf16 %v7854_v18, %v7852_v8  ;;  %v7884_v8 = vld [vmem:[%s19678_s9 + $0x1e8] sm:$0xff]  ;;  %v7886_v18 = vld [vmem:[%s19678_s9 + $0x1f8] sm:$0xff] }
 0x48b   :  { %12453 = vmatprep.subr.bf16.mxu1 %v18606_v7  ;;  %v7856_v7 = vld [vmem:[%s19678_s9 + $0x108] sm:$0xff]  ;;  %v12516_v29 = vpack.c.bf16 %v7886_v18, %v7884_v8 }
 0x48c   :  { %12485 = vmatprep.subr.bf16.mxu0 %v12484_v32 }
 0x48d   :  { %12487 = vmatpush1.bf16.msra.mxu0 %v12486_v56 }
 0x48e   :  { %12455 = vmatpush1.bf16.msra.mxu1 %v18611_v15  ;;  %v12488_v15 = vpack.c.bf16 %v7858_v42, %v7856_v7 }
 0x48f   :  { %12521 = vmatprep.subr.bf16.mxu1 %v18683_v11  ;;  %v7860_v11 = vld [vmem:[%s19678_s9 + $0x128] sm:$0xff] }
 0x490   :  { %12489 = vmatprep.subr.bf16.mxu0 %v12488_v15  ;;  %v12492_v10 = vpack.c.bf16 %v7862_v3, %v7860_v11 }
 0x491   :  { %7773 = vmatmul.mubr.f32.vlgmr.msra.gmra.mrb[16].mxu1 %v7607_v21  ;;  %12491 = vmatpush1.bf16.msra.mxu0 %v12490_v28  ;;  %v20095_v21 = vld [vmem:[#allocation17_spill] sm:$0xff] }
 0x492   :  { %7778 = vmatprep.mubr.f32.mxu1 %v7622_v30  ;;  %12523 = vmatpush1.bf16.msra.mxu1 %v18695_v44  ;;  %v12494_v44 = vpack.c.bf16 %v7861_v31, %v7859_v50  ;;  %vm7796_vm2 = vcmp.lt.s32.totalorder %v20095_v21, 5  ;;  %vm7795_vm3 = vcmp.lt.s32.totalorder %v20095_v21, 6 }
 0x493   :  { %12525 = vmatprep.subr.bf16.mxu1 %v18697_v43  ;;  %12493 = vmatprep.subr.bf16.mxu0 %v12492_v10  ;;  %v7864_v43 = vld [vmem:[%s19678_s9 + $0x148] sm:$0xff] }
 0x495   :  { %7779 = vmatmul.mubr.f32.gmra.mrb[18].mxu1 %v7619_v22  ;;  %12495 = vmatpush1.bf16.msra.mxu0 %v12494_v44 }
 0x496   :  { %12527 = vmatpush1.bf16.msra.mxu1 %v18714_v26  ;;  %v7866_v26 = vld [vmem:[%s19678_s9 + $0x158] sm:$0xff] }
 0x497   :  { %12529 = vmatprep.subr.bf16.mxu1 %v18717_v37  ;;  %v12496_v37 = vpack.c.bf16 %v7866_v26, %v7864_v43 }
 0x499   :  { %12497 = vmatprep.subr.bf16.mxu0 %v12496_v37 }
 0x49a   :  { %12531 = vmatpush1.bf16.msra.mxu1 %v18734_v16  ;;  %v12498_v16 = vpack.c.bf16 %v7865_v41, %v7863_v25 }
 0x49b   :  { %12533 = vmatprep.subr.bf16.mxu1 %v18737_v34  ;;  %v7868_v34 = vld [vmem:[%s19678_s9 + $0x168] sm:$0xff] }
 0x49c   :  { %12499 = vmatpush1.bf16.msra.mxu0 %v12498_v16  ;;  %v12500_v9 = vpack.c.bf16 %v7870_v13, %v7868_v34 }
 0x49e   :  { %12535 = vmatpush1.bf16.msra.mxu1 %v18754_v1  ;;  %v12502_v1 = vpack.c.bf16 %v7869_v52, %v7867_v48  ;;  %12501 = vmatprep.subr.bf16.mxu0 %v12500_v9 }
 0x49f   :  { %12537 = vmatprep.subr.bf16.mxu1 %v18757_v49 }
 0x4a0   :  { %12503 = vmatpush1.bf16.msra.mxu0 %v12502_v1 }
 0x4a1   :  { %12505 = vmatprep.subr.bf16.mxu0 %v12504_v62 }
 0x4a2   :  { %12539 = vmatpush1.bf16.msra.mxu1 %v18774_v40  ;;  %v7873_v40 = vld [vmem:[%s19678_s9 + $0x190] sm:$0xff] }
 0x4a3   :  { %12541 = vmatprep.subr.bf16.mxu1 %v18777_v19  ;;  %v12506_v19 = vpack.c.bf16 %v7873_v40, %v7871_v4 }
 0x4a5   :  { %12507 = vmatpush1.bf16.msra.mxu0 %v12506_v19 }
 0x4a6   :  { %12543 = vmatpush1.bf16.msra.mxu1 %v12478_v33  ;;  %12509 = vmatprep.subr.bf16.mxu0 %v12508_v0  ;;  %v7880_v33 = vld [vmem:[%s19678_s9 + $0x1c8] sm:$0xff] }
 0x4a7   :  { %12545 = vmatprep.subr.bf16.mxu1 %v12480_v24  ;;  %v12512_v24 = vpack.c.bf16 %v7882_v61, %v7880_v33 }
 0x4a9   :  { %12511 = vmatpush1.bf16.msra.mxu0 %v12510_v36 }
 0x4aa   :  { %12547 = vmatpush1.bf16.msra.mxu1 %v12482_v20  ;;  %12513 = vmatprep.subr.bf16.mxu0 %v12512_v24  ;;  %v12518_v20 = vpack.c.bf16 %v7885_v59, %v7883_v45 }
 0x4ab   :  { %12549 = vmatprep.subr.bf16.mxu1 %v12484_v32  ;;  %v20094_v32 = vld [vmem:[#allocation20_spill] sm:$0xff] }
 0x4ac   :  { %v6714_v53 = vrot.slane %v6705_v27, %v20094_v32 }
 0x4ad   :  { %12515 = vmatpush1.bf16.msra.mxu0 %v12514_v55 }
 0x4ae   :  { %12551 = vmatpush1.bf16.msra.mxu1 %v12486_v56  ;;  %12517 = vmatprep.subr.bf16.mxu0 %v12516_v29 }
 0x4af   :  { %12553 = vmatprep.subr.bf16.mxu1 %v12488_v15 }
 0x4b1   :  { %12519 = vmatpush1.bf16.msra.mxu0 %v12518_v20 }
 0x4b2   :  { %12555 = vmatpush1.bf16.msra.mxu1 %v12490_v28 }
 0x4b3   :  { %12557 = vmatprep.subr.bf16.mxu1 %v12492_v10 }
 0x4b6   :  { %12559 = vmatpush1.bf16.msra.mxu1 %v12494_v44 }
 0x4b7   :  { %12561 = vmatprep.subr.bf16.mxu1 %v12496_v37 }
 0x4ba   :  { %12563 = vmatpush1.bf16.msra.mxu1 %v12498_v16 }
 0x4bb   :  { %12565 = vmatprep.subr.bf16.mxu1 %v12500_v9 }
 0x4be   :  { %12567 = vmatpush1.bf16.msra.mxu1 %v12502_v1 }
 0x4bf   :  { %12569 = vmatprep.subr.bf16.mxu1 %v12504_v62 }
 0x4c2   :  { %12571 = vmatpush1.bf16.msra.mxu1 %v12506_v19 }
 0x4c3   :  { %12573 = vmatprep.subr.bf16.mxu1 %v12508_v0 }
 0x4c6   :  { %12575 = vmatpush1.bf16.msra.mxu1 %v12510_v36 }
 0x4c7   :  { %12577 = vmatprep.subr.bf16.mxu1 %v12512_v24 }
 0x4ca   :  { %12579 = vmatpush1.bf16.msra.mxu1 %v12514_v55 }
 0x4cb   :  { %12581 = vmatprep.subr.bf16.mxu1 %v12516_v29 }
 0x4ce   :  { %12583 = vmatpush1.bf16.msra.mxu1 %v12518_v20 }
 0x4eb   :  { %v6690_v49 = vpop.f32.mrb[16].mxu0 }
 0x4ec   :  { %v6692_v54 = vpop.f32.mrb[17].mxu0  ;;  %v6717_v2 = vadd.f32 %v6710_v23, %v6690_v49 }
 0x4ed   :  { %v6718_v56 = vadd.f32 %v6714_v53, %v6692_v54 }
 0x4ee   :  { %v7797_v10 = vsel %vm7795_vm3, %v6717_v2, 0.0 }
 0x4ef   :  { %v6696_v46 = vpop.f32.mrb[18].mxu0  ;;  %v7798_v50 = vsel %vm7795_vm3, %v6718_v56, 0.0 }
 0x4f0   :  { %v6698_v47 = vpop.f32.mrb[19].mxu0  ;;  %v6719_v30 = vadd.f32 %v6710_v23, %v6696_v46 }
 0x4f1   :  { %v6720_v15 = vadd.f32 %v6714_v53, %v6698_v47 }
 0x4f2   :  { %v7799_v31 = vsel %vm7795_vm3, %v6719_v30, 0.0 }
 0x4f3   :  { %v7800_v43 = vsel %vm7795_vm3, %v6720_v15, 0.0 }
 0x564   :  { %v7774_v63 = vpop.f32.mrb[16].mxu1 }
 0x565   :  { %v7789_v7 = vadd.f32 %v7774_v63, %v6710_v23  ;;  %v7776_v42 = vpop.f32.mrb[17].mxu1 }
 0x566   :  { %v7790_v6 = vadd.f32 %v7776_v42, %v6714_v53 }
 0x567   :  { %v7801_v35 = vsel %vm7796_vm2, %v7789_v7, 0.0 }
 0x568   :  { %v7780_v38 = vpop.f32.mrb[18].mxu1  ;;  %v7802_v22 = vsel %vm7796_vm2, %v7790_v6, 0.0  ;;  %v7805_v26 = vadd.f32 %v7801_v35, %v7797_v10 }
 0x569   :  { %v7791_v11 = vadd.f32 %v7780_v38, %v6710_v23  ;;  %v7782_v3 = vpop.f32.mrb[19].mxu1  ;;  %v7806_v41 = vadd.f32 %v7802_v22, %v7798_v50 }
 0x56a   :  { %v7792_v28 = vadd.f32 %v7782_v3, %v6714_v53 }
 0x56b   :  { %v7803_v44 = vsel %vm7796_vm2, %v7791_v11, 0.0 }
 0x56c   :  { %v7807_v37 = vadd.f32 %v7803_v44, %v7799_v31  ;;  %v7804_v25 = vsel %vm7796_vm2, %v7792_v28, 0.0 }
 0x56d   :  { %v7808_v16 = vadd.f32 %v7804_v25, %v7800_v43  ;;  %v10162_v25 = vld [vmem:[%s19680_s7 + $0x188] sm:$0xff] }
 0x56e   :  { %v7809_v34 = vadd.f32 %v7807_v37, %v7805_v26  ;;  %v10161_v37 = vld [vmem:[%s19680_s7 + $0x180] sm:$0xff] }
 0x56f   :  { %v7810_v13 = vadd.f32 %v7808_v16, %v7806_v41  ;;  %v8174_v41 = vld [vmem:[%s19680_s7 + $0x80] sm:$0xff]  ;;  %v12584_v16 = vpack.c.bf16 %v10162_v25, %v10161_v37  ;;  %v10154_v37 = vld [vmem:[%s19680_s7 + $0x148] sm:$0xff] }
 0x570   :  { %v7811_v9 = vrot.slane %v7809_v34, 4 }
 0x571   :  { %v7817_v48 = vrot.slane %v7810_v13, 4  ;;  %12585 = vmatprep.subr.bf16.mxu0 %v12584_v16  ;;  %v8166_v16 = vld [vmem:[%s19680_s7 + $0x40] sm:$0xff] }
 0x572   :  { %v7812_v52 = vadd.f32 %v7811_v9, %v7809_v34  ;;  %v8175_v34 = vld [vmem:[%s19680_s7 + $0x88] sm:$0xff] }
 0x573   :  { %v7818_v1 = vadd.f32 %v7817_v48, %v7810_v13  ;;  %v10145_v13 = vld [vmem:[%s19680_s7 + $0x100] sm:$0xff]  ;;  %v10146_v9 = vld [vmem:[%s19680_s7 + $0x108] sm:$0xff]  ;;  %v12616_v48 = vpack.c.bf16 %v8175_v34, %v8174_v41 }
 0x574   :  { %v7813_v49 = vrot.slane %v7812_v52, 2  ;;  %v8167_v34 = vld [vmem:[%s19680_s7 + $0x48] sm:$0xff] }
 0x575   :  { %v7819_v58 = vrot.slane %v7818_v1, 2  ;;  %12617 = vmatprep.subr.bf16.mxu1 %v12616_v48  ;;  %v10172_v48 = vld [vmem:[%s19680_s7 + $0x1d8] sm:$0xff] }
 0x576   :  { %v7814_v39 = vadd.f32 %v7813_v49, %v7812_v52  ;;  %v12586_v52 = vpack.c.bf16 %v10146_v9, %v10145_v13  ;;  %v8159_v49 = vld [vmem:[%s19680_s7 + $0x8] sm:$0xff]  ;;  %v10171_v13 = vld [vmem:[%s19680_s7 + $0x1d0] sm:$0xff]  ;;  %v12634_v9 = vpack.c.bf16 %v8167_v34, %v8166_v16 }
 0x577   :  { %v7820_v54 = vadd.f32 %v7819_v58, %v7818_v1  ;;  %v8158_v1 = vld [vmem:[%s19680_s7] sm:$0xff]  ;;  %v19217_v16 = vld [vmem:[%s19680_s7 + $0x308] sm:$0xff]  ;;  %v19222_v34 = vld [vmem:[%s19680_s7 + $0x290] sm:$0xff] }
 0x578   :  { %v7815_v62 = vrot.slane %v7814_v39, 1  ;;  %v12618_v58 = vpack.c.bf16 %v8159_v49, %v8158_v1  ;;  %v8185_v1 = vld [vmem:[%s19680_s7 + $0xd8] sm:$0xff]  ;;  %v12604_v49 = vpack.c.bf16 %v10172_v48, %v10171_v13 }
 0x579   :  { %v7821_v4 = vrot.slane %v7820_v54, 1  ;;  %v19227_v13 = vld [vmem:[%s19680_s7 + $0x298] sm:$0xff] }
 0x57a   :  { %v7816_v19 = vadd.f32 %v7815_v62, %v7814_v39  ;;  %v10163_v39 = vld [vmem:[%s19680_s7 + $0x190] sm:$0xff]  ;;  %v19237_v48 = vld [vmem:[%s19680_s7 + $0x398] sm:$0xff] }
 0x57b   :  { %v7822_v40 = vadd.f32 %v7821_v4, %v7820_v54  ;;  %v10164_v54 = vld [vmem:[%s19680_s7 + $0x198] sm:$0xff]  ;;  %v8176_v62 = vld [vmem:[%s19680_s7 + $0x90] sm:$0xff] }
 0x57c   :  { %v12588_v4 = vpack.c.bf16 %v10164_v54, %v10163_v39  ;;  %v10155_v39 = vld [vmem:[%s19680_s7 + $0x150] sm:$0xff]  ;;  %v10156_v54 = vld [vmem:[%s19680_s7 + $0x158] sm:$0xff] }
 0x57d   :  { %7951 = vmatprep.mubr.f32.mxu0 %v7822_v40  ;;  %v8177_v40 = vld [vmem:[%s19680_s7 + $0x98] sm:$0xff] }
 0x57e   :  { %7952 = vmatmul.mubr.f32.vlgmr.msra.gmra.mrb[20].mxu0 %v7816_v19  ;;  %v10147_v19 = vld [vmem:[%s19680_s7 + $0x110] sm:$0xff] }
 0x57f   :  { %12587 = vmatpush3.bf16.msra.mxu0 %v12586_v52  ;;  %v8184_v52 = vld [vmem:[%s19680_s7 + $0xd0] sm:$0xff] }
 0x580   :  { %12589 = vmatprep.subr.bf16.mxu0 %v12588_v4  ;;  %v12606_v4 = vpack.c.bf16 %v10156_v54, %v10155_v39 }
 0x651   :  { %v7953_v46 = vpop.f32.mrb[20].mxu0 }
 0x652   :  { %v18949_v57 = vsub.f32 %v6717_v2, %v7953_v46  ;;  %v18951_v5 = vsub.f32 %v6719_v30, %v7953_v46  ;;  %v18953_v47 = vsub.f32 %v7789_v7, %v7953_v46  ;;  %v18955_v0 = vsub.f32 %v7791_v11, %v7953_v46  ;;  %v7955_v17 = vpop.f32.mrb[21].mxu0  ;;  %v10148_v46 = vld [vmem:[%s19680_s7 + $0x118] sm:$0xff] }
 0x653   :  { %v18957_v14 = vsub.f32 %v6718_v56, %v7955_v17  ;;  %v18959_v36 = vsub.f32 %v6720_v15, %v7955_v17  ;;  %v18961_v33 = vsub.f32 %v7790_v6, %v7955_v17  ;;  %v18963_v61 = vsub.f32 %v7792_v28, %v7955_v17 }
 0x654   :  { %v7962_v24 = vsel %vm7795_vm3, %v18949_v57, 0.0  ;;  %v7964_v51 = vsel %vm7795_vm3, %v18951_v5, 0.0  ;;  %v7970_v60 = vsel %vm7796_vm2, %v18953_v47, 0.0  ;;  %v7972_v55 = vsel %vm7796_vm2, %v18955_v0, 0.0 }
 0x655   :  { %v7974_v8 = vmul.f32 %v7962_v24, %v7962_v24  ;;  %v7976_v18 = vmul.f32 %v7964_v51, %v7964_v51  ;;  %v7978_v29 = vmul.f32 %v7970_v60, %v7970_v60  ;;  %v7980_v45 = vmul.f32 %v7972_v55, %v7972_v55  ;;  %v8160_v51 = vld [vmem:[%s19680_s7 + $0x10] sm:$0xff]  ;;  %v8161_v60 = vld [vmem:[%s19680_s7 + $0x18] sm:$0xff] }
 0x656   :  { %v7963_v59 = vsel %vm7795_vm3, %v18957_v14, 0.0  ;;  %v7965_v20 = vsel %vm7795_vm3, %v18959_v36, 0.0  ;;  %v7971_v27 = vsel %vm7796_vm2, %v18961_v33, 0.0  ;;  %v7973_v23 = vsel %vm7796_vm2, %v18963_v61, 0.0 }
 0x657   :  { %v7982_v53 = vadd.f32 %v7978_v29, %v7974_v8  ;;  %v7984_v63 = vadd.f32 %v7980_v45, %v7976_v18  ;;  %v7975_v7 = vmul.f32 %v7963_v59, %v7963_v59  ;;  %v7977_v42 = vmul.f32 %v7965_v20, %v7965_v20  ;;  %v10165_v8 = vld [vmem:[%s19680_s7 + $0x1a0] sm:$0xff]  ;;  %v10166_v18 = vld [vmem:[%s19680_s7 + $0x1a8] sm:$0xff] }
 0x658   :  { %v7979_v6 = vmul.f32 %v7971_v27, %v7971_v27  ;;  %v7981_v2 = vmul.f32 %v7973_v23, %v7973_v23  ;;  %v12620_v17 = vpack.c.bf16 %v8177_v40, %v8176_v62  ;;  %v12590_v24 = vpack.c.bf16 %v10148_v46, %v10147_v19  ;;  %v8178_v29 = vld [vmem:[%s19680_s7 + $0xa0] sm:$0xff]  ;;  %v8179_v59 = vld [vmem:[%s19680_s7 + $0xa8] sm:$0xff]  ;;  %v8168_v62 = vld [vmem:[%s19680_s7 + $0x50] sm:$0xff] }
 0x659   :  { %v7986_v56 = vadd.f32 %v7984_v63, %v7982_v53  ;;  %v12622_v55 = vpack.c.bf16 %v8161_v60, %v8160_v51  ;;  %v12592_v45 = vpack.c.bf16 %v10166_v18, %v10165_v8  ;;  %v10149_v20 = vld [vmem:[%s19680_s7 + $0x120] sm:$0xff]  ;;  %v10150_v27 = vld [vmem:[%s19680_s7 + $0x128] sm:$0xff]  ;;  %v12624_v23 = vpack.c.bf16 %v8179_v59, %v8178_v29  ;;  %v8169_v40 = vld [vmem:[%s19680_s7 + $0x58] sm:$0xff] }
 0x65a   :  { %v7983_v30 = vadd.f32 %v7979_v6, %v7975_v7  ;;  %v7985_v15 = vadd.f32 %v7981_v2, %v7977_v42  ;;  %12591 = vmatpush3.bf16.msra.mxu0 %v12590_v24  ;;  %v12594_v53 = vpack.c.bf16 %v10150_v27, %v10149_v20  ;;  %v8162_v63 = vld [vmem:[%s19680_s7 + $0x20] sm:$0xff]  ;;  %v8163_v7 = vld [vmem:[%s19680_s7 + $0x28] sm:$0xff]  ;;  %v10167_v6 = vld [vmem:[%s19680_s7 + $0x1b0] sm:$0xff] }
 0x65b   :  { %v7988_v38 = vrot.slane %v7986_v56, 4  ;;  %12593 = vmatprep.subr.bf16.mxu0 %v12592_v45  ;;  %v12626_v42 = vpack.c.bf16 %v8163_v7, %v8162_v63  ;;  %v10168_v2 = vld [vmem:[%s19680_s7 + $0x1b8] sm:$0xff]  ;;  %v10173_v19 = vld [vmem:[%s19680_s7 + $0x1e0] sm:$0xff]  ;;  %v10174_v46 = vld [vmem:[%s19680_s7 + $0x1e8] sm:$0xff] }
 0x65c   :  { %v7987_v35 = vadd.f32 %v7985_v15, %v7983_v30  ;;  %v12596_v30 = vpack.c.bf16 %v10168_v2, %v10167_v6  ;;  %v8181_v15 = vld [vmem:[%s19680_s7 + $0xb8] sm:$0xff]  ;;  %v12608_v24 = vpack.c.bf16 %v10174_v46, %v10173_v19  ;;  %v8186_v51 = vld [vmem:[%s19680_s7 + $0xe0] sm:$0xff]  ;;  %v8187_v60 = vld [vmem:[%s19680_s7 + $0xe8] sm:$0xff] }
 0x65d   :  { %v7989_v11 = vadd.f32 %v7988_v38, %v7986_v56  ;;  %v8180_v56 = vld [vmem:[%s19680_s7 + $0xb0] sm:$0xff]  ;;  %v12640_v8 = vpack.c.bf16 %v8187_v60, %v8186_v51  ;;  %v10158_v18 = vld [vmem:[%s19680_s7 + $0x168] sm:$0xff]  ;;  %v8170_v29 = vld [vmem:[%s19680_s7 + $0x60] sm:$0xff] }
 0x65e   :  { %v7994_v3 = vrot.slane %v7987_v35, 4  ;;  %12595 = vmatpush3.bf16.msra.mxu0 %v12594_v53  ;;  %v10151_v38 = vld [vmem:[%s19680_s7 + $0x130] sm:$0xff]  ;;  %v8171_v45 = vld [vmem:[%s19680_s7 + $0x68] sm:$0xff]  ;;  %v10176_v20 = vld [vmem:[%s19680_s7 + $0x1f8] sm:$0xff] }
 0x65f   :  { %v7990_v22 = vrot.slane %v7989_v11, 2  ;;  %12597 = vmatprep.subr.bf16.mxu0 %v12596_v30  ;;  %v10175_v59 = vld [vmem:[%s19680_s7 + $0x1f0] sm:$0xff]  ;;  %v8189_v53 = vld [vmem:[%s19680_s7 + $0xf8] sm:$0xff]  ;;  %v12642_v63 = vpack.c.bf16 %v8171_v45, %v8170_v29 }
 0x660   :  { %v7995_v28 = vadd.f32 %v7994_v3, %v7987_v35  ;;  %v10152_v35 = vld [vmem:[%s19680_s7 + $0x138] sm:$0xff]  ;;  %v8188_v27 = vld [vmem:[%s19680_s7 + $0xf0] sm:$0xff]  ;;  %v12612_v7 = vpack.c.bf16 %v10176_v20, %v10175_v59 }
 0x661   :  { %v7991_v10 = vadd.f32 %v7990_v22, %v7989_v11  ;;  %v12628_v11 = vpack.c.bf16 %v8181_v15, %v8180_v56  ;;  %v12598_v3 = vpack.c.bf16 %v10152_v35, %v10151_v38  ;;  %v8164_v22 = vld [vmem:[%s19680_s7 + $0x30] sm:$0xff]  ;;  %v10160_v6 = vld [vmem:[%s19680_s7 + $0x178] sm:$0xff]  ;;  %v12644_v2 = vpack.c.bf16 %v8189_v53, %v8188_v27  ;;  %v10193_v35 = vld [vmem:[%s19680_s7 + $0x280] sm:$0xff] }
 0x662   :  { %v7996_v50 = vrot.slane %v7995_v28, 2  ;;  %v8172_v56 = vld [vmem:[%s19680_s7 + $0x70] sm:$0xff]  ;;  %v8173_v30 = vld [vmem:[%s19680_s7 + $0x78] sm:$0xff] }
 0x663   :  { %v7992_v21 = vrot.slane %v7991_v10, 1  ;;  %12599 = vmatpush3.bf16.msra.mxu0 %v12598_v3  ;;  %v12646_v38 = vpack.c.bf16 %v8173_v30, %v8172_v56  ;;  %v10225_v3 = vld [vmem:[%s19680_s7 + $0x380] sm:$0xff]  ;;  %v10179_v30 = vld [vmem:[%s19680_s7 + $0x210] sm:$0xff] }
 0x664   :  { %v7997_v31 = vadd.f32 %v7996_v50, %v7995_v28  ;;  %v8165_v28 = vld [vmem:[%s19680_s7 + $0x38] sm:$0xff]  ;;  %v10169_v50 = vld [vmem:[%s19680_s7 + $0x1c0] sm:$0xff] }
 0x665   :  { %v7993_v26 = vadd.f32 %v7992_v21, %v7991_v10  ;;  %v12630_v10 = vpack.c.bf16 %v8165_v28, %v8164_v22  ;;  %v8182_v21 = vld [vmem:[%s19680_s7 + $0xc0] sm:$0xff]  ;;  %v10226_v28 = vld [vmem:[%s19680_s7 + $0x388] sm:$0xff] }
 0x666   :  { %v7998_v44 = vrot.slane %v7997_v31, 1 }
 0x668   :  { %v7999_v43 = vadd.f32 %v7998_v44, %v7997_v31  ;;  %v10170_v31 = vld [vmem:[%s19680_s7 + $0x1c8] sm:$0xff] }
 0x669   :  { %v12600_v44 = vpack.c.bf16 %v10170_v31, %v10169_v50 }
 0x66a   :  { %8064 = vmatprep.mubr.f32.mxu1 %v7999_v43  ;;  %v8183_v43 = vld [vmem:[%s19680_s7 + $0xc8] sm:$0xff] }
 0x66b   :  { %8065 = vmatmul.mubr.f32.vlgmr.msra.gmra.mrb[20].mxu1 %v7993_v26  ;;  %v10153_v26 = vld [vmem:[%s19680_s7 + $0x140] sm:$0xff]  ;;  %v12632_v25 = vpack.c.bf16 %v8183_v43, %v8182_v21  ;;  %12601 = vmatprep.subr.bf16.mxu0 %v12600_v44 }
 0x66c   :  { %12619 = vmatpush3.bf16.msra.mxu1 %v12618_v58  ;;  %v12602_v41 = vpack.c.bf16 %v10154_v37, %v10153_v26  ;;  %v12636_v58 = vpack.c.bf16 %v8185_v1, %v8184_v52  ;;  %v8077_v43 = vld [vmem:[%s19681_s5] sm:$0x3] }
 0x66d   :  { %12621 = vmatprep.subr.bf16.mxu1 %v12620_v17  ;;  %v12638_v17 = vpack.c.bf16 %v8169_v40, %v8168_v62  ;;  %v8093_v26 = vld [vmem:[%s19682_s6] sm:$0x3]  ;;  %v8086_v52 = vrot.slane %v8077_v43, %v20094_v32 }
 0x66e   :  { %12603 = vmatpush3.bf16.msra.mxu0 %v12602_v41  ;;  %v19202_v37 = vld [vmem:[%s19680_s7 + $0x200] sm:$0xff]  ;;  %v8102_v1 = vrot.slane %v8093_v26, %v20094_v32 }
 0x66f   :  { %12605 = vmatprep.subr.bf16.mxu0 %v12604_v49  ;;  %v19212_v41 = vld [vmem:[%s19680_s7 + $0x300] sm:$0xff]  ;;  %v8082_v49 = vrot.slane %v8077_v43, %v20093_v12 }
 0x670   :  { %12623 = vmatpush3.bf16.msra.mxu1 %v12622_v55  ;;  %v10157_v55 = vld [vmem:[%s19680_s7 + $0x160] sm:$0xff]  ;;  %v12682_v62 = vpack.c.bf16 %v19217_v16, %v19212_v41  ;;  %v10182_v41 = vld [vmem:[%s19680_s7 + $0x228] sm:$0xff] }
 0x671   :  { %12625 = vmatprep.subr.bf16.mxu1 %v12624_v23  ;;  %v12610_v23 = vpack.c.bf16 %v10158_v18, %v10157_v55  ;;  %v10213_v16 = vld [vmem:[%s19680_s7 + $0x320] sm:$0xff] }
 0x672   :  { %12607 = vmatpush3.bf16.msra.mxu0 %v12606_v4  ;;  %v12652_v4 = vpack.c.bf16 %v19227_v13, %v19222_v34  ;;  %v10231_v34 = vld [vmem:[%s19680_s7 + $0x3b0] sm:$0xff]  ;;  %v10232_v13 = vld [vmem:[%s19680_s7 + $0x3b8] sm:$0xff] }
 0x673   :  { %12609 = vmatprep.subr.bf16.mxu0 %v12608_v24 }
 0x674   :  { %12627 = vmatpush3.bf16.msra.mxu1 %v12626_v42  ;;  %v10159_v42 = vld [vmem:[%s19680_s7 + $0x170] sm:$0xff] }
 0x675   :  { %12629 = vmatprep.subr.bf16.mxu1 %v12628_v11  ;;  %v12614_v15 = vpack.c.bf16 %v10160_v6, %v10159_v42  ;;  %v10194_v11 = vld [vmem:[%s19680_s7 + $0x288] sm:$0xff] }
 0x676   :  { %12611 = vmatpush3.bf16.msra.mxu0 %v12610_v23  ;;  %v12648_v22 = vpack.c.bf16 %v10194_v11, %v10193_v35 }
 0x677   :  { %12613 = vmatprep.subr.bf16.mxu0 %v12612_v7 }
 0x678   :  { %12631 = vmatpush3.bf16.msra.mxu1 %v12630_v10  ;;  %v12680_v10 = vpack.c.bf16 %v10226_v28, %v10225_v3  ;;  %v10197_v28 = vld [vmem:[%s19680_s7 + $0x2a0] sm:$0xff] }
 0x679   :  { %12633 = vmatprep.subr.bf16.mxu1 %v12632_v25  ;;  %v19207_v25 = vld [vmem:[%s19680_s7 + $0x208] sm:$0xff] }
 0x67a   :  { %12615 = vmatpush3.bf16.msra.mxu0 %v12614_v15  ;;  %v12650_v54 = vpack.c.bf16 %v19207_v25, %v19202_v37  ;;  %v10180_v15 = vld [vmem:[%s19680_s7 + $0x218] sm:$0xff] }
 0x67b   :  { %12649 = vmatprep.subr.bf16.mxu0 %v12648_v22  ;;  %v10212_v22 = vld [vmem:[%s19680_s7 + $0x318] sm:$0xff] }
 0x67c   :  { %12635 = vmatpush3.bf16.msra.mxu1 %v12634_v9  ;;  %v19232_v9 = vld [vmem:[%s19680_s7 + $0x390] sm:$0xff] }
 0x67d   :  { %12637 = vmatprep.subr.bf16.mxu1 %v12636_v58  ;;  %v8098_v58 = vrot.slane %v8093_v26, %v20093_v12  ;;  %v12684_v40 = vpack.c.bf16 %v19237_v48, %v19232_v9  ;;  %v10183_v9 = vld [vmem:[%s19680_s7 + $0x230] sm:$0xff] }
 0x680   :  { %12639 = vmatpush3.bf16.msra.mxu1 %v12638_v17 }
 0x681   :  { %12641 = vmatprep.subr.bf16.mxu1 %v12640_v8 }
 0x684   :  { %12643 = vmatpush3.bf16.msra.mxu1 %v12642_v63 }
 0x685   :  { %12645 = vmatprep.subr.bf16.mxu1 %v12644_v2 }
 0x688   :  { %12647 = vmatpush3.bf16.msra.mxu1 %v12646_v38  ;;  %v10211_v38 = vld [vmem:[%s19680_s7 + $0x310] sm:$0xff] }
 0x689   :  { %12681 = vmatprep.subr.bf16.mxu1 %v12680_v10  ;;  %v10198_v10 = vld [vmem:[%s19680_s7 + $0x2a8] sm:$0xff] }
 0x68a   :  { %v12656_v25 = vpack.c.bf16 %v10198_v10, %v10197_v28  ;;  %v10205_v28 = vld [vmem:[%s19680_s7 + $0x2e0] sm:$0xff]  ;;  %v10206_v10 = vld [vmem:[%s19680_s7 + $0x2e8] sm:$0xff] }
 0x73e   :  { %v8066_v50 = vpop.f32.mrb[20].mxu1 }
 0x73f   :  { %v8067_v31 = vadd.f32 1e-05, %v8066_v50  ;;  %v8068_v21 = vpop.f32.mrb[21].mxu1 }
 0x740   :  { %v8069_v44 = vadd.f32 1e-05, %v8068_v21  ;;  %v10229_v21 = vld [vmem:[%s19680_s7 + $0x3a0] sm:$0xff] }
 0x741   :  { %13025 = vrsqrt.f32 %v8067_v31 }
 0x742   :  { %13027 = vrsqrt.f32 %v8069_v44  ;;  %v10230_v44 = vld [vmem:[%s19680_s7 + $0x3a8] sm:$0xff] }
 0x74b   :  { %v13026_v39 = vpop.eup %13025 }
 0x74c   :  { %v13028_v19 = vpop.eup %13027  ;;  %v8121_v32 = vmul.f32 %v13026_v39, %v18953_v47  ;;  %v8073_v46 = vmul.f32 %v13026_v39, %v18949_v57  ;;  %v8123_v12 = vmul.f32 %v13026_v39, %v18955_v0  ;;  %v8075_v17 = vmul.f32 %v13026_v39, %v18951_v5  ;;  %v8522_v39 = vld [vmem:[#allocation3 + $0x58] sm:$0x1] }
 0x74d   :  { %v8122_v24 = vmul.f32 %v13028_v19, %v18961_v33  ;;  %v8074_v51 = vmul.f32 %v13028_v19, %v18957_v14  ;;  %v8124_v60 = vmul.f32 %v13028_v19, %v18963_v61  ;;  %v8076_v55 = vmul.f32 %v13028_v19, %v18959_v36  ;;  %v10181_v19 = vld [vmem:[%s19680_s7 + $0x220] sm:$0xff] }
 0x74e   :  { %v8125_v8 = vmul.f32 %v8121_v32, %v8082_v49  ;;  %v8089_v18 = vmul.f32 %v8082_v49, %v8073_v46  ;;  %v8127_v29 = vmul.f32 %v8123_v12, %v8082_v49  ;;  %v8091_v45 = vmul.f32 %v8082_v49, %v8075_v17  ;;  %v10199_v32 = vld [vmem:[%s19680_s7 + $0x2b0] sm:$0xff]  ;;  %v10200_v46 = vld [vmem:[%s19680_s7 + $0x2b8] sm:$0xff] }
 0x74f   :  { %v8126_v59 = vmul.f32 %v8122_v24, %v8086_v52  ;;  %v8090_v47 = vmul.f32 %v8086_v52, %v8074_v51  ;;  %v8128_v20 = vmul.f32 %v8124_v60, %v8086_v52  ;;  %v8092_v57 = vmul.f32 %v8086_v52, %v8076_v55  ;;  %v10184_v17 = vld [vmem:[%s19680_s7 + $0x238] sm:$0xff]  ;;  %v10215_v24 = vld [vmem:[%s19680_s7 + $0x330] sm:$0xff] }
 0x750   :  { %v8129_v27 = vadd.f32 %v8125_v8, %v8098_v58  ;;  %v8105_v0 = vadd.f32 %v8098_v58, %v8089_v18  ;;  %v8131_v23 = vadd.f32 %v8127_v29, %v8098_v58  ;;  %v8107_v5 = vadd.f32 %v8098_v58, %v8091_v45  ;;  %v8380_v58 = vld [vmem:[#allocation3 + $0x18] sm:$0x1]  ;;  %v10201_v8 = vld [vmem:[%s19680_s7 + $0x2c0] sm:$0xff] }
 0x751   :  { %v8130_v53 = vadd.f32 %v8126_v59, %v8102_v1  ;;  %v8106_v33 = vadd.f32 %v8102_v1, %v8090_v47  ;;  %v8132_v63 = vadd.f32 %v8128_v20, %v8102_v1  ;;  %v8108_v14 = vadd.f32 %v8102_v1, %v8092_v57  ;;  %v10216_v51 = vld [vmem:[%s19680_s7 + $0x338] sm:$0xff]  ;;  %v10202_v47 = vld [vmem:[%s19680_s7 + $0x2c8] sm:$0xff]  ;;  %v10233_v20 = vld [vmem:[%s19680_s7 + $0x3c0] sm:$0xff] }
 0x752   :  { %vm8133_vm4 = vcmp.gt.f32.partialorder %v8129_v27, 0.0  ;;  %v8137_v61 = vmul.f32 0.2, %v8129_v27  ;;  %vm8109_vm5 = vcmp.gt.f32.partialorder %v8105_v0, 0.0  ;;  %v8113_v36 = vmul.f32 0.2, %v8105_v0 }
 0x753   :  { %vm8134_vm6 = vcmp.gt.f32.partialorder %v8130_v53, 0.0  ;;  %v8138_v7 = vmul.f32 0.2, %v8130_v53  ;;  %vm8110_vm7 = vcmp.gt.f32.partialorder %v8106_v33, 0.0  ;;  %v8114_v42 = vmul.f32 0.2, %v8106_v33 }
 0x754   :  { %v8141_v6 = vsel %vm8133_vm4, %v8129_v27, %v8137_v61  ;;  %v8117_v2 = vsel %vm8109_vm5, %v8105_v0, %v8113_v36  ;;  %vm8136_vm8 = vcmp.gt.f32.partialorder %v8132_v63, 0.0  ;;  %v8140_v56 = vmul.f32 0.2, %v8132_v63  ;;  %v10234_v57 = vld [vmem:[%s19680_s7 + $0x3c8] sm:$0xff]  ;;  %v10217_v61 = vld [vmem:[%s19680_s7 + $0x340] sm:$0xff] }
 0x755   :  { %v8142_v35 = vsel %vm8134_vm6, %v8130_v53, %v8138_v7  ;;  %v8118_v11 = vsel %vm8110_vm7, %v8106_v33, %v8114_v42  ;;  %8150 = vst [vmem:[#allocation3 + $0x40] sm:$0xff] %v8141_v6  ;;  %8145 = vst [vmem:[#allocation3] sm:$0xff] %v8117_v2  ;;  %vm8112_vm9 = vcmp.gt.f32.partialorder %v8108_v14, 0.0  ;;  %v8116_v3 = vmul.f32 0.2, %v8108_v14  ;;  %v10185_v53 = vld [vmem:[%s19680_s7 + $0x240] sm:$0xff] }
 0x756   :  { %8151 = vst [vmem:[#allocation3 + $0x48] sm:$0xff] %v8142_v35  ;;  %8291 = vmatprep.mubr.f32.mxu0 %v8142_v35  ;;  %8146 = vst [vmem:[#allocation3 + $0x8] sm:$0xff] %v8118_v11  ;;  %8366 = vmatprep.mubr.f32.mxu1 %v8118_v11  ;;  %v8144_v50 = vsel %vm8136_vm8, %v8132_v63, %v8140_v56  ;;  %vm8135_vm10 = vcmp.gt.f32.partialorder %v8131_v23, 0.0  ;;  %v8139_v31 = vmul.f32 0.2, %v8131_v23  ;;  %vm8111_vm11 = vcmp.gt.f32.partialorder %v8107_v5, 0.0 }
 0x757   :  { %8292 = vmatmul.mubr.f32.vlgmr.msra.gmra.mrb[22].mxu0 %v8141_v6  ;;  %8367 = vmatmul.mubr.f32.vlgmr.msra.gmra.mrb[22].mxu1 %v8117_v2  ;;  %8153 = vst [vmem:[#allocation3 + $0x68] sm:$0xff] %v8144_v50  ;;  %v8120_v43 = vsel %vm8112_vm9, %v8108_v14, %v8116_v3  ;;  %v8115_v26 = vmul.f32 0.2, %v8107_v5  ;;  %v12654_v1 = vpack.c.bf16 %v10180_v15, %v10179_v30  ;;  %v8397_v48 = vrot.slane %v8380_v58, 1  ;;  %v10186_v33 = vld [vmem:[%s19680_s7 + $0x248] sm:$0xff]  ;;  %v10203_v7 = vld [vmem:[%s19680_s7 + $0x2d0] sm:$0xff] }
 0x758   :  { %12651 = vmatpush3.bf16.msra.mxu0 %v12650_v54  ;;  %12683 = vmatpush3.bf16.msra.mxu1 %v12682_v62  ;;  %8148 = vst [vmem:[#allocation3 + $0x28] sm:$0xff] %v8120_v43  ;;  %v8143_v52 = vsel %vm8135_vm10, %v8131_v23, %v8139_v31  ;;  %v12686_v49 = vpack.c.bf16 %v10212_v22, %v10211_v38  ;;  %v10214_v62 = vld [vmem:[%s19680_s7 + $0x328] sm:$0xff]  ;;  %v10204_v42 = vld [vmem:[%s19680_s7 + $0x2d8] sm:$0xff]  ;;  %v10235_v6 = vld [vmem:[%s19680_s7 + $0x3d0] sm:$0xff] }
 0x759   :  { %8296 = vmatprep.mubr.f32.mxu0 %v8144_v50  ;;  %8371 = vmatprep.mubr.f32.mxu1 %v8120_v43  ;;  %8152 = vst [vmem:[#allocation3 + $0x60] sm:$0xff] %v8143_v52  ;;  %v8119_v37 = vsel %vm8111_vm11, %v8107_v5, %v8115_v26  ;;  %v12688_v54 = vpack.c.bf16 %v10230_v44, %v10229_v21  ;;  %v10218_v36 = vld [vmem:[%s19680_s7 + $0x348] sm:$0xff]  ;;  %v10236_v2 = vld [vmem:[%s19680_s7 + $0x3d8] sm:$0xff]  ;;  %v10187_v15 = vld [vmem:[%s19680_s7 + $0x250] sm:$0xff] }
 0x75a   :  { %12653 = vmatprep.subr.bf16.mxu0 %v12652_v4  ;;  %12685 = vmatprep.subr.bf16.mxu1 %v12684_v40  ;;  %8147 = vst [vmem:[#allocation3 + $0x20] sm:$0xff] %v8119_v37  ;;  %v8539_v4 = vrot.slane %v8522_v39, 1  ;;  %v12658_v40 = vpack.c.bf16 %v10182_v41, %v10181_v19  ;;  %v12690_v12 = vpack.c.bf16 %v10214_v62, %v10213_v16  ;;  %v10188_v38 = vld [vmem:[%s19680_s7 + $0x258] sm:$0xff]  ;;  %v10219_v3 = vld [vmem:[%s19680_s7 + $0x350] sm:$0xff]  ;;  %v10237_v50 = vld [vmem:[%s19680_s7 + $0x3e0] sm:$0xff] }
 0x75b   :  { %8297 = vmatmul.mubr.f32.gmra.mrb[24].mxu0 %v8143_v52  ;;  %8372 = vmatmul.mubr.f32.gmra.mrb[24].mxu1 %v8119_v37  ;;  %v12660_v45 = vpack.c.bf16 %v10200_v46, %v10199_v32  ;;  %v12692_v59 = vpack.c.bf16 %v10232_v13, %v10231_v34  ;;  %v12662_v27 = vpack.c.bf16 %v10184_v17, %v10183_v9  ;;  %v10220_v22 = vld [vmem:[%s19680_s7 + $0x358] sm:$0xff]  ;;  %v10238_v31 = vld [vmem:[%s19680_s7 + $0x3e8] sm:$0xff]  ;;  %v10189_v43 = vld [vmem:[%s19680_s7 + $0x260] sm:$0xff] }
 0x75c   :  { %12655 = vmatpush3.bf16.msra.mxu0 %v12654_v1  ;;  %12687 = vmatpush3.bf16.msra.mxu1 %v12686_v49  ;;  %v12694_v5 = vpack.c.bf16 %v10216_v51, %v10215_v24  ;;  %v12664_v63 = vpack.c.bf16 %v10202_v47, %v10201_v8  ;;  %v12696_v14 = vpack.c.bf16 %v10234_v57, %v10233_v20  ;;  %v10190_v26 = vld [vmem:[%s19680_s7 + $0x268] sm:$0xff]  ;;  %v10221_v49 = vld [vmem:[%s19680_s7 + $0x360] sm:$0xff]  ;;  %v10207_v39 = vld [vmem:[%s19680_s7 + $0x2f0] sm:$0xff] }
 0x75d   :  { %v8378_v60 = vld [vmem:[#allocation3 + $0x8] sm:$0xfe]  ;;  %12657 = vmatprep.subr.bf16.mxu0 %v12656_v25  ;;  %12689 = vmatprep.subr.bf16.mxu1 %v12688_v54  ;;  %v12666_v56 = vpack.c.bf16 %v10186_v33, %v10185_v53  ;;  %v12698_v30 = vpack.c.bf16 %v10218_v36, %v10217_v61  ;;  %v12668_v35 = vpack.c.bf16 %v10204_v42, %v10203_v7  ;;  %v10208_v19 = vld [vmem:[%s19680_s7 + $0x2f8] sm:$0xff]  ;;  %v10239_v37 = vld [vmem:[%s19680_s7 + $0x3f0] sm:$0xff] }
 0x75e   :  { %v8520_v55 = vld [vmem:[#allocation3 + $0x48] sm:$0xfe]  ;;  %v8396_v18 = vrot.slane %v8378_v60, 1  ;;  %v12700_v11 = vpack.c.bf16 %v10236_v2, %v10235_v6  ;;  %v12670_v21 = vpack.c.bf16 %v10188_v38, %v10187_v15  ;;  %v12702_v44 = vpack.c.bf16 %v10220_v22, %v10219_v3  ;;  %v10240_v25 = vld [vmem:[%s19680_s7 + $0x3f8] sm:$0xff]  ;;  %v19420_v54 = vld [vmem:[#allocation3 + $0x10] sm:$0x1] }
 0x75f   :  { %v8538_v29 = vrot.slane %v8520_v55, 1  ;;  %v12672_v52 = vpack.c.bf16 %v10206_v10, %v10205_v28  ;;  %v12704_v1 = vpack.c.bf16 %v10238_v31, %v10237_v50  ;;  %v10222_v58 = vld [vmem:[%s19680_s7 + $0x368] sm:$0xff]  ;;  %v19422_v41 = vld [vmem:[#allocation3 + $0x50] sm:$0x1]  ;;  %v12674_v16 = vpack.c.bf16 %v10190_v26, %v10189_v43  ;;  %v10192_v46 = vld [vmem:[%s19680_s7 + $0x278] sm:$0xff] }
 0x760   :  { %v8398_v0 = vsel %vm6034_vm1, %v8396_v18, %v8397_v48  ;;  %12659 = vmatpush3.bf16.msra.mxu0 %v12658_v40  ;;  %12691 = vmatpush3.bf16.msra.mxu1 %v12690_v12  ;;  %v12706_v62 = vpack.c.bf16 %v10222_v58, %v10221_v49  ;;  %v10191_v32 = vld [vmem:[%s19680_s7 + $0x270] sm:$0xff]  ;;  %v19430_v34 = vld [vmem:[#allocation3 + $0x38] sm:$0x1]  ;;  %v12676_v9 = vpack.c.bf16 %v10208_v19, %v10207_v39  ;;  %v10257_v12 = vld [vmem:[%s19680_s7 + $0x480] sm:$0xff]  ;;  %v8394_v8 = vrot.slane %v19420_v54, 1 }
 0x761   :  { %v8540_v23 = vsel %vm6034_vm1, %v8538_v29, %v8539_v4  ;;  %8506 = vmatprep.mubr.f32.mxu0 %v8398_v0  ;;  %12661 = vmatprep.subr.bf16.mxu0 %v12660_v45  ;;  %v19432_v13 = vld [vmem:[#allocation3 + $0x78] sm:$0x1]  ;;  %v12708_v48 = vpack.c.bf16 %v10240_v25, %v10239_v37  ;;  %v10223_v4 = vld [vmem:[%s19680_s7 + $0x370] sm:$0xff]  ;;  %v10258_v24 = vld [vmem:[%s19680_s7 + $0x488] sm:$0xff]  ;;  %v12678_v47 = vpack.c.bf16 %v10192_v46, %v10191_v32  ;;  %v8536_v57 = vrot.slane %v19422_v41, 1 }
 0x762   :  { %8648 = vmatprep.mubr.f32.mxu1 %v8540_v23  ;;  %12693 = vmatprep.subr.bf16.mxu1 %v12692_v59  ;;  %v10224_v40 = vld [vmem:[%s19680_s7 + $0x378] sm:$0xff]  ;;  %v19443_v17 = vld [vmem:[#allocation3 + $0x30] sm:$0x1]  ;;  %v10289_v51 = vld [vmem:[%s19680_s7 + $0x580] sm:$0xff]  ;;  %v12712_v53 = vpack.c.bf16 %v10258_v24, %v10257_v12 }
 0x763   :  { %v10290_v60 = vld [vmem:[%s19680_s7 + $0x588] sm:$0xff]  ;;  %v8377_v55 = vld [vmem:[#allocation3] sm:$0xfe]  ;;  %v19460_v45 = vld [vmem:[#allocation3 + $0x70] sm:$0x1]  ;;  %v12710_v20 = vpack.c.bf16 %v10224_v40, %v10223_v4  ;;  %v8400_v2 = vrot.slane %v19443_v17, 1 }
 0x764   :  { %12663 = vmatpush3.bf16.msra.mxu0 %v12662_v27  ;;  %12695 = vmatpush3.bf16.msra.mxu1 %v12694_v5  ;;  %v8519_v18 = vld [vmem:[#allocation3 + $0x40] sm:$0xfe]  ;;  %v19462_v59 = vld [vmem:[#allocation3 + $0x18] sm:$0x3]  ;;  %v8382_v27 = vld [vmem:[#allocation3 + $0x28] sm:$0xfe]  ;;  %v12744_v33 = vpack.c.bf16 %v10290_v60, %v10289_v51 }
 0x765   :  { %12665 = vmatprep.subr.bf16.mxu0 %v12664_v63  ;;  %12697 = vmatprep.subr.bf16.mxu1 %v12696_v14  ;;  %v19458_v29 = vld [vmem:[%s19680_s7 + $0x400] sm:$0xff]  ;;  %v8524_v0 = vld [vmem:[#allocation3 + $0x68] sm:$0xfe]  ;;  %v19468_v5 = vld [vmem:[#allocation3 + $0x58] sm:$0x3]  ;;  %v8403_v63 = vrot.slane %v19430_v34, 1 }
 0x766   :  { %v10242_v23 = vld [vmem:[%s19680_s7 + $0x408] sm:$0xff]  ;;  %v8545_v14 = vrot.slane %v19432_v13, 1  ;;  %v10273_v61 = vld [vmem:[%s19680_s7 + $0x500] sm:$0xff]  ;;  %v10259_v7 = vld [vmem:[%s19680_s7 + $0x490] sm:$0xff]  ;;  %v8393_v42 = vrot.slane %v8377_v55, 1  ;;  %v8535_v6 = vrot.slane %v8519_v18, 1 }
 0x767   :  { %v10274_v36 = vld [vmem:[%s19680_s7 + $0x508] sm:$0xff]  ;;  %v10292_v15 = vld [vmem:[%s19680_s7 + $0x598] sm:$0xff]  ;;  %v8402_v38 = vrot.slane %v8382_v27, 1  ;;  %v8523_v3 = vld [vmem:[#allocation3 + $0x60] sm:$0xfe]  ;;  %v12714_v22 = vpack.c.bf16 %v10242_v23, %v19458_v29  ;;  %v8542_v28 = vrot.slane %v19460_v45, 1 }
 0x768   :  { %12667 = vmatpush3.bf16.msra.mxu0 %v12666_v56  ;;  %12699 = vmatpush3.bf16.msra.mxu1 %v12698_v30  ;;  %v10260_v56 = vld [vmem:[%s19680_s7 + $0x498] sm:$0xff]  ;;  %v10291_v30 = vld [vmem:[%s19680_s7 + $0x590] sm:$0xff]  ;;  %v8662_v10 = vld [vmem:[#allocation3 + $0x8] sm:$0xfc]  ;;  %v8682_v50 = vrot.slane %v19462_v59, 2  ;;  %v8824_v49 = vrot.slane %v19468_v5, 2  ;;  %v8395_v58 = vsel %vm6034_vm1, %v8393_v42, %v8394_v8  ;;  %v8537_v39 = vsel %vm6034_vm1, %v8535_v6, %v8536_v57 }
 0x769   :  { %12669 = vmatprep.subr.bf16.mxu0 %v12668_v35  ;;  %12701 = vmatprep.subr.bf16.mxu1 %v12700_v11  ;;  %v8544_v35 = vrot.slane %v8524_v0, 1  ;;  %v8381_v11 = vld [vmem:[#allocation3 + $0x20] sm:$0xfe]  ;;  %v8805_v31 = vld [vmem:[#allocation3 + $0x48] sm:$0xfc]  ;;  %v12748_v43 = vpack.c.bf16 %v10292_v15, %v10291_v30  ;;  %v10243_v26 = vld [vmem:[%s19680_s7 + $0x410] sm:$0xff] }
 0x76a   :  { %v8399_v19 = vrot.slane %v8381_v11, 1  ;;  %v8541_v37 = vrot.slane %v8523_v3, 1  ;;  %v10276_v25 = vld [vmem:[%s19680_s7 + $0x518] sm:$0xff]  ;;  %v10261_v54 = vld [vmem:[%s19680_s7 + $0x4a0] sm:$0xff]  ;;  %v10262_v41 = vld [vmem:[%s19680_s7 + $0x4a8] sm:$0xff]  ;;  %v8681_v32 = vrot.slane %v8662_v10, 2 }
 0x76b   :  { %v8823_v46 = vrot.slane %v8805_v31, 2  ;;  %v10293_v34 = vld [vmem:[%s19680_s7 + $0x5a0] sm:$0xff]  ;;  %v10294_v13 = vld [vmem:[%s19680_s7 + $0x5a8] sm:$0xff]  ;;  %v12720_v4 = vpack.c.bf16 %v10262_v41, %v10261_v54  ;;  %v10263_v8 = vld [vmem:[%s19680_s7 + $0x4b0] sm:$0xff] }
 0x76c   :  { %12671 = vmatpush3.bf16.msra.mxu0 %v12670_v21  ;;  %12703 = vmatpush3.bf16.msra.mxu1 %v12702_v44  ;;  %v12746_v21 = vpack.c.bf16 %v10274_v36, %v10273_v61  ;;  %v12716_v44 = vpack.c.bf16 %v10260_v56, %v10259_v7  ;;  %v10245_v40 = vld [vmem:[%s19680_s7 + $0x420] sm:$0xff]  ;;  %v10246_v12 = vld [vmem:[%s19680_s7 + $0x428] sm:$0xff]  ;;  %v8401_v17 = vsel %vm6034_vm1, %v8399_v19, %v8400_v2  ;;  %v10264_v45 = vld [vmem:[%s19680_s7 + $0x4b8] sm:$0xff] }
 0x76d   :  { %12673 = vmatprep.subr.bf16.mxu0 %v12672_v52  ;;  %12705 = vmatprep.subr.bf16.mxu1 %v12704_v1  ;;  %v10244_v52 = vld [vmem:[%s19680_s7 + $0x418] sm:$0xff]  ;;  %v10275_v1 = vld [vmem:[%s19680_s7 + $0x510] sm:$0xff]  ;;  %v8543_v24 = vsel %vm6034_vm1, %v8541_v37, %v8542_v28  ;;  %v12752_v51 = vpack.c.bf16 %v10294_v13, %v10293_v34  ;;  %v10277_v60 = vld [vmem:[%s19680_s7 + $0x520] sm:$0xff]  ;;  %v8683_v18 = vsel %vm8677_vm12, %v8681_v32, %v8682_v50 }
 0x76e   :  { %v10278_v55 = vld [vmem:[%s19680_s7 + $0x528] sm:$0xff]  ;;  %v8825_v29 = vsel %vm8677_vm12, %v8823_v46, %v8824_v49  ;;  %v10295_v59 = vld [vmem:[%s19680_s7 + $0x5b0] sm:$0xff]  ;;  %v10248_v0 = vld [vmem:[%s19680_s7 + $0x438] sm:$0xff]  ;;  %v12724_v23 = vpack.c.bf16 %v10264_v45, %v10263_v8 }
 0x76f   :  { %v12754_v57 = vpack.c.bf16 %v10278_v55, %v10277_v60  ;;  %v10247_v27 = vld [vmem:[%s19680_s7 + $0x430] sm:$0xff]  ;;  %v10297_v61 = vld [vmem:[%s19680_s7 + $0x5c0] sm:$0xff]  ;;  %v10298_v36 = vld [vmem:[%s19680_s7 + $0x5c8] sm:$0xff] }
 0x770   :  { %12675 = vmatpush3.bf16.msra.mxu0 %v12674_v16  ;;  %12707 = vmatpush3.bf16.msra.mxu1 %v12706_v62  ;;  %v8404_v16 = vsel %vm6034_vm1, %v8402_v38, %v8403_v63  ;;  %v8546_v62 = vsel %vm6034_vm1, %v8544_v35, %v8545_v14  ;;  %v10265_v63 = vld [vmem:[%s19680_s7 + $0x4c0] sm:$0xff]  ;;  %v10266_v14 = vld [vmem:[%s19680_s7 + $0x4c8] sm:$0xff]  ;;  %v12726_v7 = vpack.c.bf16 %v10248_v0, %v10247_v27  ;;  %v10267_v35 = vld [vmem:[%s19680_s7 + $0x4d0] sm:$0xff] }
 0x771   :  { %12677 = vmatprep.subr.bf16.mxu0 %v12676_v9  ;;  %12709 = vmatprep.subr.bf16.mxu1 %v12708_v48  ;;  %v12718_v9 = vpack.c.bf16 %v10244_v52, %v10243_v26  ;;  %v12750_v48 = vpack.c.bf16 %v10276_v25, %v10275_v1  ;;  %v10249_v6 = vld [vmem:[%s19680_s7 + $0x440] sm:$0xff]  ;;  %v10250_v2 = vld [vmem:[%s19680_s7 + $0x448] sm:$0xff]  ;;  %v12728_v56 = vpack.c.bf16 %v10266_v14, %v10265_v63  ;;  %v10268_v11 = vld [vmem:[%s19680_s7 + $0x4d8] sm:$0xff] }
 0x772   :  { %v12760_v30 = vpack.c.bf16 %v10298_v36, %v10297_v61  ;;  %v10281_v15 = vld [vmem:[%s19680_s7 + $0x540] sm:$0xff]  ;;  %v10282_v38 = vld [vmem:[%s19680_s7 + $0x548] sm:$0xff]  ;;  %v10299_v3 = vld [vmem:[%s19680_s7 + $0x5d0] sm:$0xff]  ;;  %v12730_v28 = vpack.c.bf16 %v10250_v2, %v10249_v6 }
 0x773   :  { %v12762_v10 = vpack.c.bf16 %v10282_v38, %v10281_v15  ;;  %v10251_v50 = vld [vmem:[%s19680_s7 + $0x450] sm:$0xff]  ;;  %v10252_v31 = vld [vmem:[%s19680_s7 + $0x458] sm:$0xff]  ;;  %v10269_v52 = vld [vmem:[%s19680_s7 + $0x4e0] sm:$0xff] }
 0x774   :  { %12679 = vmatpush3.bf16.msra.mxu0 %v12678_v47  ;;  %12711 = vmatpush3.bf16.msra.mxu1 %v12710_v20  ;;  %v10296_v47 = vld [vmem:[%s19680_s7 + $0x5b8] sm:$0xff]  ;;  %v12722_v20 = vpack.c.bf16 %v10246_v12, %v10245_v40  ;;  %v10270_v1 = vld [vmem:[%s19680_s7 + $0x4e8] sm:$0xff]  ;;  %v10301_v49 = vld [vmem:[%s19680_s7 + $0x5e0] sm:$0xff] }
 0x775   :  { %12713 = vmatprep.subr.bf16.mxu0 %v12712_v53  ;;  %12745 = vmatprep.subr.bf16.mxu1 %v12744_v33  ;;  %v12756_v5 = vpack.c.bf16 %v10296_v47, %v10295_v59  ;;  %v10279_v53 = vld [vmem:[%s19680_s7 + $0x530] sm:$0xff]  ;;  %v10280_v33 = vld [vmem:[%s19680_s7 + $0x538] sm:$0xff]  ;;  %v10253_v37 = vld [vmem:[%s19680_s7 + $0x460] sm:$0xff]  ;;  %v12736_v54 = vpack.c.bf16 %v10270_v1, %v10269_v52 }
 0x776   :  { %v12758_v42 = vpack.c.bf16 %v10280_v33, %v10279_v53  ;;  %v10284_v26 = vld [vmem:[%s19680_s7 + $0x558] sm:$0xff]  ;;  %v10254_v25 = vld [vmem:[%s19680_s7 + $0x468] sm:$0xff]  ;;  %v10271_v32 = vld [vmem:[%s19680_s7 + $0x4f0] sm:$0xff] }
 0x777   :  { %8507 = vmatmul.mubr.f32.vlgmr.msra.gmra.mrb[26].mxu0 %v8395_v58  ;;  %8649 = vmatmul.mubr.f32.vlgmr.msra.gmra.mrb[26].mxu1 %v8537_v39  ;;  %v10302_v58 = vld [vmem:[%s19680_s7 + $0x5e8] sm:$0xff]  ;;  %v12734_v39 = vpack.c.bf16 %v10252_v31, %v10251_v50  ;;  %v10272_v46 = vld [vmem:[%s19680_s7 + $0x4f8] sm:$0xff]  ;;  %v10303_v34 = vld [vmem:[%s19680_s7 + $0x5f0] sm:$0xff] }
 0x778   :  { %8511 = vmatprep.mubr.f32.mxu0 %v8404_v16  ;;  %8653 = vmatprep.mubr.f32.mxu1 %v8546_v62  ;;  %v12768_v41 = vpack.c.bf16 %v10302_v58, %v10301_v49  ;;  %v10285_v16 = vld [vmem:[%s19680_s7 + $0x560] sm:$0xff]  ;;  %v10286_v62 = vld [vmem:[%s19680_s7 + $0x568] sm:$0xff]  ;;  %v10304_v13 = vld [vmem:[%s19680_s7 + $0x5f8] sm:$0xff]  ;;  %v12740_v40 = vpack.c.bf16 %v10272_v46, %v10271_v32 }
 0x779   :  { %12715 = vmatpush3.bf16.msra.mxu0 %v12714_v22  ;;  %12747 = vmatpush3.bf16.msra.mxu1 %v12746_v21  ;;  %v10300_v22 = vld [vmem:[%s19680_s7 + $0x5d8] sm:$0xff]  ;;  %v12732_v21 = vpack.c.bf16 %v10268_v11, %v10267_v35  ;;  %v12772_v12 = vpack.c.bf16 %v10304_v13, %v10303_v34  ;;  %v8663_v60 = vld [vmem:[#allocation3 + $0x10] sm:$0x3] }
 0x77a   :  { %12717 = vmatprep.subr.bf16.mxu0 %v12716_v44  ;;  %12749 = vmatprep.subr.bf16.mxu1 %v12748_v43  ;;  %v12764_v44 = vpack.c.bf16 %v10300_v22, %v10299_v3  ;;  %v10283_v43 = vld [vmem:[%s19680_s7 + $0x550] sm:$0xff]  ;;  %v8668_v8 = vld [vmem:[#allocation3 + $0x38] sm:$0x3]  ;;  %v8679_v27 = vrot.slane %v8663_v60, 2 }
 0x77b   :  { %8512 = vmatmul.mubr.f32.gmra.mrb[28].mxu0 %v8401_v17  ;;  %8654 = vmatmul.mubr.f32.gmra.mrb[28].mxu1 %v8543_v24  ;;  %v12766_v19 = vpack.c.bf16 %v10284_v26, %v10283_v43  ;;  %v10256_v17 = vld [vmem:[%s19680_s7 + $0x478] sm:$0xff]  ;;  %v10287_v24 = vld [vmem:[%s19680_s7 + $0x570] sm:$0xff]  ;;  %v8688_v33 = vrot.slane %v8668_v8, 2 }
 0x77c   :  { %8791 = vmatprep.mubr.f32.mxu0 %v8683_v18  ;;  %8933 = vmatprep.mubr.f32.mxu1 %v8825_v29  ;;  %v8806_v55 = vld [vmem:[#allocation3 + $0x50] sm:$0x3]  ;;  %v8661_v18 = vld [vmem:[#allocation3] sm:$0xfc]  ;;  %v8811_v45 = vld [vmem:[#allocation3 + $0x78] sm:$0x3] }
 0x77d   :  { %12719 = vmatpush3.bf16.msra.mxu0 %v12718_v9  ;;  %12751 = vmatpush3.bf16.msra.mxu1 %v12750_v48  ;;  %v12738_v9 = vpack.c.bf16 %v10254_v25, %v10253_v37  ;;  %v12770_v48 = vpack.c.bf16 %v10286_v62, %v10285_v16  ;;  %v8804_v29 = vld [vmem:[#allocation3 + $0x40] sm:$0xfc]  ;;  %v8821_v0 = vrot.slane %v8806_v55, 2  ;;  %v8830_v63 = vrot.slane %v8811_v45, 2  ;;  %v8810_v14 = vld [vmem:[#allocation3 + $0x70] sm:$0x3] }
 0x77e   :  { %12721 = vmatprep.subr.bf16.mxu0 %v12720_v4  ;;  %12753 = vmatprep.subr.bf16.mxu1 %v12752_v51  ;;  %v10255_v4 = vld [vmem:[%s19680_s7 + $0x470] sm:$0xff]  ;;  %v10288_v51 = vld [vmem:[%s19680_s7 + $0x578] sm:$0xff]  ;;  %v8820_v53 = vrot.slane %v8804_v29, 2  ;;  %v8827_v2 = vrot.slane %v8810_v14, 2 }
 0x77f   :  { %v12742_v59 = vpack.c.bf16 %v10256_v17, %v10255_v4  ;;  %v12774_v47 = vpack.c.bf16 %v10288_v51, %v10287_v24 }
 0x781   :  { %12723 = vmatpush3.bf16.msra.mxu0 %v12722_v20  ;;  %12755 = vmatpush3.bf16.msra.mxu1 %v12754_v57  ;;  %v8666_v20 = vld [vmem:[#allocation3 + $0x28] sm:$0xfc] }
 0x782   :  { %12725 = vmatprep.subr.bf16.mxu0 %v12724_v23  ;;  %12757 = vmatprep.subr.bf16.mxu1 %v12756_v5  ;;  %v8809_v57 = vld [vmem:[#allocation3 + $0x68] sm:$0xfc]  ;;  %v8667_v23 = vld [vmem:[#allocation3 + $0x30] sm:$0x3]  ;;  %v8678_v5 = vrot.slane %v8661_v18, 2  ;;  %v8687_v61 = vrot.slane %v8666_v20, 2 }
 0x783   :  { %v8829_v36 = vrot.slane %v8809_v57, 2  ;;  %v8685_v6 = vrot.slane %v8667_v23, 2 }
 0x784   :  { %v8689_v35 = vsel %vm8677_vm12, %v8687_v61, %v8688_v33 }
 0x785   :  { %12727 = vmatpush3.bf16.msra.mxu0 %v12726_v7  ;;  %12759 = vmatpush3.bf16.msra.mxu1 %v12758_v42  ;;  %v8665_v7 = vld [vmem:[#allocation3 + $0x20] sm:$0xfc]  ;;  %v8831_v11 = vsel %vm8677_vm12, %v8829_v36, %v8830_v63 }
 0x786   :  { %12729 = vmatprep.subr.bf16.mxu0 %v12728_v56  ;;  %12761 = vmatprep.subr.bf16.mxu1 %v12760_v30  ;;  %v8808_v42 = vld [vmem:[#allocation3 + $0x60] sm:$0xfc]  ;;  %v8680_v56 = vsel %vm8677_vm12, %v8678_v5, %v8679_v27  ;;  %v8822_v30 = vsel %vm8677_vm12, %v8820_v53, %v8821_v0  ;;  %v8684_v15 = vrot.slane %v8665_v7, 2 }
 0x787   :  { %v8826_v38 = vrot.slane %v8808_v42, 2 }
 0x788   :  { %v8686_v3 = vsel %vm8677_vm12, %v8684_v15, %v8685_v6 }
 0x789   :  { %12731 = vmatpush3.bf16.msra.mxu0 %v12730_v28  ;;  %12763 = vmatpush3.bf16.msra.mxu1 %v12762_v10  ;;  %v8828_v22 = vsel %vm8677_vm12, %v8826_v38, %v8827_v2 }
 0x78a   :  { %12733 = vmatprep.subr.bf16.mxu0 %v12732_v21  ;;  %12765 = vmatprep.subr.bf16.mxu1 %v12764_v44 }
 0x78d   :  { %12735 = vmatpush3.bf16.msra.mxu0 %v12734_v39  ;;  %12767 = vmatpush3.bf16.msra.mxu1 %v12766_v19 }
 0x78e   :  { %12737 = vmatprep.subr.bf16.mxu0 %v12736_v54  ;;  %12769 = vmatprep.subr.bf16.mxu1 %v12768_v41 }
 0x791   :  { %12739 = vmatpush3.bf16.msra.mxu0 %v12738_v9  ;;  %12771 = vmatpush3.bf16.msra.mxu1 %v12770_v48 }
 0x792   :  { %12741 = vmatprep.subr.bf16.mxu0 %v12740_v40  ;;  %12773 = vmatprep.subr.bf16.mxu1 %v12772_v12 }
 0x795   :  { %12743 = vmatpush3.bf16.msra.mxu0 %v12742_v59  ;;  %12775 = vmatpush3.bf16.msra.mxu1 %v12774_v47  ;;  %v10305_v47 = vld [vmem:[%s19683_s8] ss:$0 sm:$0xff] }
 0x798   :  { %8792 = vmatmul.mubr.f32.vlgmr.msra.gmra.mrb[30].mxu0 %v8680_v56  ;;  %8934 = vmatmul.mubr.f32.vlgmr.msra.gmra.mrb[30].mxu1 %v8822_v30 }
 0x799   :  { %8796 = vmatprep.mubr.f32.mxu0 %v8689_v35  ;;  %8938 = vmatprep.mubr.f32.mxu1 %v8831_v11 }
 0x79c   :  { %8797 = vmatmul.mubr.f32.gmra.mrb[32].mxu0 %v8686_v3  ;;  %8939 = vmatmul.mubr.f32.gmra.mrb[32].mxu1 %v8828_v22 }
 0x82a   :  { %v10340_v28 = vpop.f32.mrb[22].mxu0  ;;  %v10378_v10 = vpop.f32.mrb[22].mxu1 }
 0x82b   :  { %v10341_v50 = vpop.f32.mrb[23].mxu0  ;;  %v10379_v31 = vpop.f32.mrb[23].mxu1 }
 0x82c   :  { %v10342_v21 = vadd.f32 %v10341_v50, %v10340_v28  ;;  %v10380_v44 = vadd.f32 %v10379_v31, %v10378_v10 }
 0x82e   :  { %v8369_v43 = vadd.f32 %v10380_v44, %v10342_v21  ;;  %v10343_v26 = vpop.f32.mrb[24].mxu0  ;;  %v10381_v52 = vpop.f32.mrb[24].mxu1 }
 0x82f   :  { %v10344_v1 = vpop.f32.mrb[25].mxu0  ;;  %v10382_v49 = vpop.f32.mrb[25].mxu1 }
 0x830   :  { %v10345_v58 = vadd.f32 %v10344_v1, %v10343_v26  ;;  %v10383_v39 = vadd.f32 %v10382_v49, %v10381_v52 }
 0x832   :  { %v8374_v19 = vadd.f32 %v10383_v39, %v10345_v58 }
 0x84a   :  { %v10416_v37 = vpop.f32.mrb[26].mxu0  ;;  %v10454_v25 = vpop.f32.mrb[26].mxu1 }
 0x84b   :  { %v10417_v54 = vpop.f32.mrb[27].mxu0  ;;  %v10455_v41 = vpop.f32.mrb[27].mxu1 }
 0x84c   :  { %v10418_v16 = vadd.f32 %v10417_v54, %v10416_v37  ;;  %v10456_v62 = vadd.f32 %v10455_v41, %v10454_v25 }
 0x84e   :  { %v8517_v32 = vadd.f32 %v10418_v16, %v8369_v43  ;;  %v10419_v46 = vpop.f32.mrb[28].mxu0  ;;  %v10457_v34 = vpop.f32.mrb[28].mxu1 }
 0x84f   :  { %v10420_v13 = vpop.f32.mrb[29].mxu0  ;;  %v10458_v9 = vpop.f32.mrb[29].mxu1 }
 0x850   :  { %v8659_v48 = vadd.f32 %v10456_v62, %v8517_v32  ;;  %v10421_v4 = vadd.f32 %v10420_v13, %v10419_v46  ;;  %v10459_v40 = vadd.f32 %v10458_v9, %v10457_v34 }
 0x852   :  { %v8518_v12 = vadd.f32 %v10421_v4, %v8374_v19 }
 0x854   :  { %v8660_v17 = vadd.f32 %v10459_v40, %v8518_v12 }
 0x86b   :  { %v10492_v24 = vpop.f32.mrb[30].mxu0  ;;  %v10530_v51 = vpop.f32.mrb[30].mxu1 }
 0x86c   :  { %v10493_v60 = vpop.f32.mrb[31].mxu0  ;;  %v10531_v55 = vpop.f32.mrb[31].mxu1 }
 0x86d   :  { %v10494_v8 = vadd.f32 %v10493_v60, %v10492_v24  ;;  %v10532_v18 = vadd.f32 %v10531_v55, %v10530_v51 }
 0x86f   :  { %v8802_v29 = vadd.f32 %v10494_v8, %v8659_v48  ;;  %v10495_v45 = vpop.f32.mrb[32].mxu0  ;;  %v10533_v59 = vpop.f32.mrb[32].mxu1 }
 0x870   :  { %v10496_v20 = vpop.f32.mrb[33].mxu0  ;;  %v10534_v57 = vpop.f32.mrb[33].mxu1 }
 0x871   :  { %v8944_v27 = vadd.f32 %v10532_v18, %v8802_v29  ;;  %v10497_v0 = vadd.f32 %v10496_v20, %v10495_v45  ;;  %v10535_v23 = vadd.f32 %v10534_v57, %v10533_v59 }
 0x873   :  { %v8953_v5 = vadd.f32 %v10305_v47, %v8944_v27  ;;  %v8803_v53 = vadd.f32 %v10497_v0, %v8660_v17 }
 0x875   :  { %v10306_v33 = vmul.f32 -1.442695, %v8953_v5  ;;  %v8945_v63 = vadd.f32 %v10535_v23, %v8803_v53 }
 0x877   :  { %13029 = vpow2.f32 %v10306_v33  ;;  %v8954_v14 = vadd.f32 %v10305_v47, %v8945_v63 }
 0x879   :  { %v10307_v61 = vmul.f32 -1.442695, %v8954_v14 }
 0x87b   :  { %13031 = vpow2.f32 %v10307_v61 }
 0x881   :  { %v13030_v36 = vpop.eup %13029 }
 0x882   :  { %v8961_v7 = vadd.f32 1.0, %v13030_v36 }
 0x884   :  { %13033 = vrcp.f32 %v8961_v7 }
 0x885   :  { %v13032_v42 = vpop.eup %13031 }
 0x886   :  { %v8962_v6 = vadd.f32 1.0, %v13032_v42 }
 0x888   :  { %13035 = vrcp.f32 %v8962_v6 }
 0x88e   :  { %v13034_v2 = vpop.eup %13033 }
 0x88f   :  { %8967 = vst [vmem:[%s19684_s10] sm:$0xff] %v13034_v2 }
 0x892   :  { %v13036_v56 = vpop.eup %13035 }
 0x893   :  { %8968 = vst [vmem:[%s19684_s10 + $0x8] sm:$0xff] %v13036_v56 }

</bundles_post_ra>
